<compile_context>
chip_gen: v7x
topology: tpu7x:2x2x1
jax: 0.10.0
libtpu: 0.0.40
codegen_flags: <defaults>
</compile_context>

<pallas_src>
import functools

import jax
import jax.numpy as jnp
from jax.experimental import pallas as pl
from jax.experimental.pallas import tpu as pltpu


# ----------------------------- Pallas kernel: one LSTM layer's recurrence -----------------------------

def _lstm_layer_kernel(xg_ref, whh_ref, h0_ref, c0_ref,
                       hseq_ref, h_ref, c_ref,
                       *, steps, hid, seq_len, x_const):
    """Grid = (batch_tile ["parallel"], time_block ["arbitrary"]).

    xg_ref:   [steps, BT, 4*hid] precomputed x @ w_ih + b   (or [1, BT, 4*hid] if x_const)
    whh_ref:  [hid, 4*hid]       recurrent weight, VMEM-resident (constant block index)
    h0_ref, c0_ref: [BT, hid]    initial state for this batch tile
    hseq_ref: [steps, BT, hid]   per-step hidden output (fed to the next layer)
    h_ref, c_ref: [BT, hid]      carried state; revisited output blocks (accumulator pattern)
    Gate packing order in the 4*hid axis is (i, f, o, g).
    """
    tb = pl.program_id(1)

    @pl.when(tb == 0)
    def _init():
        h_ref[...] = h0_ref[...]
        c_ref[...] = c0_ref[...]

    def step(k, carry):
        h = h_ref[...]
        c = c_ref[...]
        xg = xg_ref[0] if x_const else xg_ref[k]
        # Only the h-path matmul lives inside the recurrence (layer-major design).
        gates = xg + jnp.dot(h, whh_ref[...], preferred_element_type=jnp.float32)
        sig = jax.nn.sigmoid(gates[:, : 3 * hid])      # one EUP stream for i,f,o
        i_g = sig[:, 0 * hid: 1 * hid]
        f_g = sig[:, 1 * hid: 2 * hid]
        o_g = sig[:, 2 * hid: 3 * hid]
        g_g = jnp.tanh(gates[:, 3 * hid: 4 * hid])     # one tanh for g
        c_new = f_g * c + i_g * g_g
        h_new = o_g * jnp.tanh(c_new)

        def commit():
            hseq_ref[k] = h_new
            h_ref[...] = h_new
            c_ref[...] = c_new

        if seq_len % steps == 0:          # static: every step of every block is valid
            commit()
        else:                              # mask padded timesteps of the last block
            pl.when(tb * steps + k < seq_len)(commit)
        return carry

    jax.lax.fori_loop(0, steps, step, 0, unroll=True)


def lstm_layer_recurrence(xg, w_hh, h0, c0, *, seq_len, steps_per_block,
                          batch_tile, x_const):
    """Run one LSTM layer over time.

    xg:   [t_pad, BP, 4*HP]  (or [1, BP, 4*HP] if x_const) precomputed x @ w_ih + b
    w_hh: [HP, 4*HP]
    h0/c0:[BP, HP]
    Returns (hseq [t_pad, BP, HP], h_final [BP, HP], c_final [BP, HP]).
    """
    BP, HP = h0.shape
    GP = 4 * HP
    nb = BP // batch_tile
    nt = pl.cdiv(seq_len, steps_per_block)
    t_pad = nt * steps_per_block

    kernel = functools.partial(_lstm_layer_kernel, steps=steps_per_block,
                               hid=HP, seq_len=seq_len, x_const=x_const)

    if x_const:
        xg_spec = pl.BlockSpec((1, batch_tile, GP), lambda bi, tb: (0, bi, 0))
    else:
        xg_spec = pl.BlockSpec((steps_per_block, batch_tile, GP),
                               lambda bi, tb: (tb, bi, 0))

    return pl.pallas_call(
        kernel,
        out_shape=(jax.ShapeDtypeStruct((t_pad, BP, HP), jnp.float32),
                   jax.ShapeDtypeStruct((BP, HP), jnp.float32),
                   jax.ShapeDtypeStruct((BP, HP), jnp.float32)),
        grid=(nb, nt),
        in_specs=[
            xg_spec,                                                    # x-gates
            pl.BlockSpec((HP, GP), lambda bi, tb: (0, 0)),              # w_hh (resident)
            pl.BlockSpec((batch_tile, HP), lambda bi, tb: (bi, 0)),     # h0
            pl.BlockSpec((batch_tile, HP), lambda bi, tb: (bi, 0)),     # c0
        ],
        out_specs=(
            pl.BlockSpec((steps_per_block, batch_tile, HP), lambda bi, tb: (tb, bi, 0)),
            pl.BlockSpec((batch_tile, HP), lambda bi, tb: (bi, 0)),     # h state (accum)
            pl.BlockSpec((batch_tile, HP), lambda bi, tb: (bi, 0)),     # c state (accum)
        ),
        compiler_params=pltpu.CompilerParams(
            dimension_semantics=("parallel", "arbitrary"),
            vmem_limit_bytes=32 * 1024 * 1024),
    )(xg, w_hh, h0, c0)


# ----------------------------- Param packing / padding (plain JAX glue) -----------------------------

def _round_up(x, m):
    return ((x + m - 1) // m) * m


def _pad_axis(x, axis, n):
    pads = [(0, 0)] * x.ndim
    pads[axis] = (0, n - x.shape[axis])
    return jnp.pad(x, pads)


def _pack_gates(arr, H, HP):
    """PyTorch gate order (i,f,g,o) on the last axis -> kernel order (i,f,o,g),
    each gate zero-padded from H to HP (padded hidden lanes then stay exactly 0)."""
    i, f, g, o = (arr[..., k * H:(k + 1) * H] for k in range(4))

    def pad(x):
        widths = [(0, 0)] * (x.ndim - 1) + [(0, HP - H)]
        return jnp.pad(x, widths)

    return jnp.concatenate([pad(i), pad(f), pad(o), pad(g)], axis=-1)


def _prep_layer(layer, H, HP):
    w_ih = _pack_gates(layer["w_ih"], H, HP)                      # [in_dim, 4HP]
    w_hh = _pad_axis(_pack_gates(layer["w_hh"], H, HP), 0, HP)    # [HP,  4HP]
    b = _pack_gates(layer["b"], H, HP)                            # [1,   4HP]
    return w_ih, w_hh, b


def init_params(key, input_dim, output_dim, emb_dim, hid_dim, n_layers):
    keys = jax.random.split(key, 64)
    ki = iter(range(64))

    def w(shape, scale=0.1):
        return scale * jax.random.normal(keys[next(ki)], shape, dtype=jnp.float32)

    def lstm_layers(in_dim):
        layers = []
        for l in range(n_layers):
            d_in = in_dim if l == 0 else hid_dim
            layers.append(dict(
                w_ih=w((d_in, 4 * hid_dim)),
                w_hh=w((hid_dim, 4 * hid_dim)),
                b=w((1, 4 * hid_dim)),   # b_ih + b_hh folded together
            ))
        return layers

    return dict(
        enc_emb=w((input_dim, emb_dim)),
        enc_lstm=lstm_layers(emb_dim),
        dec_emb=w((output_dim, emb_dim)),
        dec_lstm=lstm_layers(emb_dim),
        fc_w=w((hid_dim, output_dim)),
        fc_b=w((1, output_dim)),
    )


# ----------------------------- Forward pass -----------------------------

def seq2seq_forward(params, src, trg, *, emb_dim, hid_dim, n_layers, output_dim,
                    steps_per_block=8):
    """src/trg: [B, T] int32 -> outputs [T, B, vocab] (outputs[0] is zeros)."""
    del emb_dim  # x-path matmuls contract over the real embedding width; no padding to HP.
    B, S = src.shape
    _, T = trg.shape
    H = hid_dim
    HP = _round_up(H, 128)          # hidden -> 128 lanes
    BP = _round_up(B, 8)            # batch  -> 8 sublanes
    # Split the padded batch into 2 tiles when large enough so the leading
    # "parallel" grid axis can use v7x's second TensorCore (no-op on v5e/v6e).
    BT = BP // 2 if (BP >= 16 and BP % 16 == 0) else BP

    # ---------------- Encoder ----------------
    enc_x = jnp.transpose(jnp.take(params["enc_emb"], src, axis=0), (1, 0, 2))  # [S,B,E]
    nt_e = pl.cdiv(S, steps_per_block)
    t_pad_e = nt_e * steps_per_block

    zeros_state = jnp.zeros((BP, HP), jnp.float32)
    enc_h, enc_c = [], []
    h_prev_seq = None
    for l in range(n_layers):
        w_ih, w_hh, b = _prep_layer(params["enc_lstm"][l], H, HP)
        if l == 0:
            # Fat layer-major x-path matmul over the whole sequence, bias folded in.
            xg = jnp.einsum("sbe,eg->sbg", enc_x, w_ih) + b                  # [S,B,4HP]
            xg = jnp.pad(xg, ((0, t_pad_e - S), (0, BP - B), (0, 0)))
        else:
            xg = jnp.einsum("tbh,hg->tbg", h_prev_seq[..., :H], w_ih) + b    # [t_pad,BP,4HP]
        h_prev_seq, h_n, c_n = lstm_layer_recurrence(
            xg, w_hh, zeros_state, zeros_state, seq_len=S,
            steps_per_block=steps_per_block, batch_tile=BT, x_const=False)
        enc_h.append(h_n)
        enc_c.append(c_n)

    # ---------------- Decoder ----------------
    # outputs[0] stays zero; the decoder input is the first target token and (per the
    # upstream `intput` typo) never changes, so layer-0 x-gates are one constant row.
    n_steps = T - 1
    if n_steps > 0:
        dec_x0 = jnp.take(params["dec_emb"], trg[:, 0], axis=0)              # [B,E]
        h_prev_seq = None
        for l in range(n_layers):
            w_ih, w_hh, b = _prep_layer(params["dec_lstm"][l], H, HP)
            if l == 0:
                xg = jnp.pad(dec_x0 @ w_ih + b, ((0, BP - B), (0, 0)))[None]  # [1,BP,4HP]
                x_const = True
            else:
                xg = jnp.einsum("tbh,hg->tbg", h_prev_seq[..., :H], w_ih) + b
                x_const = False
            h_prev_seq, _, _ = lstm_layer_recurrence(
                xg, w_hh, enc_h[l], enc_c[l], seq_len=n_steps,
                steps_per_block=steps_per_block, batch_tile=BT, x_const=x_const)
        # FC projection: one fat matmul over the whole decoded hidden sequence
        # (XLA tiles the vocab axis; no [HP, VP] weight ever resides in VMEM).
        logits = jnp.einsum("tbh,hv->tbv", h_prev_seq[:n_steps, :B, :H],
                            params["fc_w"]) + params["fc_b"]
    else:
        logits = jnp.zeros((0, B, output_dim), jnp.float32)

    return jnp.concatenate(
        [jnp.zeros((1, B, output_dim), jnp.float32), logits.astype(jnp.float32)],
        axis=0)


# ----------------------------- Demo -----------------------------

if __name__ == "__main__":
    batch = 2
    seq_len = 8
    input_dim = 32     # source vocab
    output_dim = 32    # target vocab
    emb_dim = 16
    hid_dim = 32
    n_layers = 2

    key = jax.random.PRNGKey(0)
    k_params, k_src, k_trg = jax.random.split(key, 3)

    params = init_params(k_params, input_dim, output_dim, emb_dim, hid_dim, n_layers)
    src = jax.random.randint(k_src, (batch, seq_len), 0, input_dim, dtype=jnp.int32)
    trg = jax.random.randint(k_trg, (batch, seq_len), 0, output_dim, dtype=jnp.int32)

    forward = jax.jit(functools.partial(
        seq2seq_forward, emb_dim=emb_dim, hid_dim=hid_dim,
        n_layers=n_layers, output_dim=output_dim))

    outputs = forward(params, src, trg)
    outputs = jax.block_until_ready(outputs)

    assert outputs.shape == (seq_len, batch, output_dim)
    assert bool(jnp.all(outputs[0] == 0.0))
    assert bool(jnp.all(jnp.isfinite(outputs)))
    print("KERNEL_OK")
</pallas_src>

<mosaic_0001>
module attributes {stable_mosaic.version = 11 : i64} {
  func.func @_lstm_layer_kernel(%arg0: i32, %arg1: i32, %arg2: memref<8x8x512xf32, #tpu.memory_space<vmem>>, %arg3: memref<128x512xf32, #tpu.memory_space<vmem>>, %arg4: memref<8x128xf32, #tpu.memory_space<vmem>>, %arg5: memref<8x128xf32, #tpu.memory_space<vmem>>, %arg6: memref<8x8x128xf32, #tpu.memory_space<vmem>>, %arg7: memref<8x128xf32, #tpu.memory_space<vmem>>, %arg8: memref<8x128xf32, #tpu.memory_space<vmem>>) attributes {dimension_semantics = [#tpu.dimension_semantics<parallel>, #tpu.dimension_semantics<arbitrary>], iteration_bounds = array<i64: 1, 1>, scalar_prefetch = 0 : i64, scratch_operands = 0 : i64, tpu.core_type = #tpu.core_type<tc>, window_params = [{transform_indices = @transform_0, window_bounds = array<i64: 8, 8, 512>}, {pipeline_mode = #tpu.pipeline_mode<synchronous>, transform_indices = @transform_1, window_bounds = array<i64: 128, 512>}, {transform_indices = @transform_2, window_bounds = array<i64: 8, 128>}, {transform_indices = @transform_3, window_bounds = array<i64: 8, 128>}, {transform_indices = @transform_4, window_bounds = array<i64: 8, 8, 128>}, {transform_indices = @transform_5, window_bounds = array<i64: 8, 128>}, {transform_indices = @transform_6, window_bounds = array<i64: 8, 128>}]} {
    %c0_i32 = arith.constant 0 : i32
    %0 = arith.cmpi eq, %arg1, %c0_i32 : i32
    %1 = arith.extui %0 : i1 to i32
    %c0_i32_0 = arith.constant 0 : i32
    %2 = arith.cmpi ne, %1, %c0_i32_0 : i32
    scf.if %2 {
      %c0_128 = arith.constant 0 : index
      %c0_129 = arith.constant 0 : index
      %243 = vector.load %arg4[%c0_128, %c0_129] : memref<8x128xf32, #tpu.memory_space<vmem>>, vector<8x128xf32>
      %c0_130 = arith.constant 0 : index
      %c0_131 = arith.constant 0 : index
      %244 = vector.load %arg7[%c0_130, %c0_131] : memref<8x128xf32, #tpu.memory_space<vmem>>, vector<8x128xf32>
      tpu.vector_store %arg7[%c0_130, %c0_131], %243 {strides = array<i32>} : memref<8x128xf32, #tpu.memory_space<vmem>>, vector<8x128xf32>,
      %c0_132 = arith.constant 0 : index
      %c0_133 = arith.constant 0 : index
      %245 = vector.load %arg5[%c0_132, %c0_133] : memref<8x128xf32, #tpu.memory_space<vmem>>, vector<8x128xf32>
      %c0_134 = arith.constant 0 : index
      %c0_135 = arith.constant 0 : index
      %246 = vector.load %arg8[%c0_134, %c0_135] : memref<8x128xf32, #tpu.memory_space<vmem>>, vector<8x128xf32>
      tpu.vector_store %arg8[%c0_134, %c0_135], %245 {strides = array<i32>} : memref<8x128xf32, #tpu.memory_space<vmem>>, vector<8x128xf32>,
    } else {
    }
    %c0_i32_1 = arith.constant 0 : i32
    %c0 = arith.constant 0 : index
    %c0_2 = arith.constant 0 : index
    %3 = vector.load %arg7[%c0, %c0_2] : memref<8x128xf32, #tpu.memory_space<vmem>>, vector<8x128xf32>
    %c0_3 = arith.constant 0 : index
    %c0_4 = arith.constant 0 : index
    %4 = vector.load %arg8[%c0_3, %c0_4] : memref<8x128xf32, #tpu.memory_space<vmem>>, vector<8x128xf32>
    %5 = arith.index_cast %c0_i32_1 : i32 to index
    %c0_5 = arith.constant 0 : index
    %c0_6 = arith.constant 0 : index
    %6 = vector.load %arg2[%5, %c0_5, %c0_6] : memref<8x8x512xf32, #tpu.memory_space<vmem>>, vector<1x8x512xf32>
    %7 = vector.shape_cast %6 : vector<1x8x512xf32> to vector<8x512xf32>
    %c0_7 = arith.constant 0 : index
    %c0_8 = arith.constant 0 : index
    %8 = vector.load %arg3[%c0_7, %c0_8] : memref<128x512xf32, #tpu.memory_space<vmem>>, vector<128x512xf32>
    %cst = arith.constant dense<0.000000e+00> : vector<8x512xf32>
    %9 = tpu.matmul %3, %8, %cst {dimension_numbers = #tpu.dot_dimension_numbers<[1], [0], [0], [1], [0, 0, 1, 1], [], []>} : vector<8x128xf32>, vector<128x512xf32>, vector<8x512xf32> -> vector<8x512xf32>
    %10 = arith.addf %7, %9 : vector<8x512xf32>
    %11 = vector.extract_strided_slice %10 {offsets = [0, 0], sizes = [8, 384], strides = [1, 1]} : vector<8x512xf32> to vector<8x384xf32>
    %12 = arith.negf %11 : vector<8x384xf32>
    %13 = math.exp %12 : vector<8x384xf32>
    %cst_9 = arith.constant 1.000000e+00 : f32
    %14 = vector.broadcast %cst_9 : f32 to vector<8x384xf32>
    %15 = arith.addf %14, %13 : vector<8x384xf32>
    %16 = arith.divf %14, %15 : vector<8x384xf32>
    %17 = vector.extract_strided_slice %16 {offsets = [0, 0], sizes = [8, 128], strides = [1, 1]} : vector<8x384xf32> to vector<8x128xf32>
    %18 = vector.extract_strided_slice %16 {offsets = [0, 128], sizes = [8, 128], strides = [1, 1]} : vector<8x384xf32> to vector<8x128xf32>
    %19 = vector.extract_strided_slice %16 {offsets = [0, 256], sizes = [8, 128], strides = [1, 1]} : vector<8x384xf32> to vector<8x128xf32>
    %20 = vector.extract_strided_slice %10 {offsets = [0, 384], sizes = [8, 128], strides = [1, 1]} : vector<8x512xf32> to vector<8x128xf32>
    %21 = math.tanh %20 : vector<8x128xf32>
    %22 = arith.mulf %18, %4 : vector<8x128xf32>
    %23 = arith.mulf %17, %21 : vector<8x128xf32>
    %24 = arith.addf %22, %23 : vector<8x128xf32>
    %25 = math.tanh %24 : vector<8x128xf32>
    %26 = arith.mulf %19, %25 : vector<8x128xf32>
    %27 = arith.index_cast %c0_i32_1 : i32 to index
    %c0_10 = arith.constant 0 : index
    %c0_11 = arith.constant 0 : index
    %28 = vector.load %arg6[%27, %c0_10, %c0_11] : memref<8x8x128xf32, #tpu.memory_space<vmem>>, vector<1x8x128xf32>
    %29 = vector.shape_cast %28 : vector<1x8x128xf32> to vector<8x128xf32>
    %30 = vector.shape_cast %26 : vector<8x128xf32> to vector<1x8x128xf32>
    tpu.vector_store %arg6[%27, %c0_10, %c0_11], %30 {strides = array<i32>} : memref<8x8x128xf32, #tpu.memory_space<vmem>>, vector<1x8x128xf32>,
    %c0_12 = arith.constant 0 : index
    %c0_13 = arith.constant 0 : index
    %31 = vector.load %arg7[%c0_12, %c0_13] : memref<8x128xf32, #tpu.memory_space<vmem>>, vector<8x128xf32>
    tpu.vector_store %arg7[%c0_12, %c0_13], %26 {strides = array<i32>} : memref<8x128xf32, #tpu.memory_space<vmem>>, vector<8x128xf32>,
    %c0_14 = arith.constant 0 : index
    %c0_15 = arith.constant 0 : index
    %32 = vector.load %arg8[%c0_14, %c0_15] : memref<8x128xf32, #tpu.memory_space<vmem>>, vector<8x128xf32>
    tpu.vector_store %arg8[%c0_14, %c0_15], %24 {strides = array<i32>} : memref<8x128xf32, #tpu.memory_space<vmem>>, vector<8x128xf32>,
    %c1_i32 = arith.constant 1 : i32
    %c0_16 = arith.constant 0 : index
    %c0_17 = arith.constant 0 : index
    %33 = vector.load %arg7[%c0_16, %c0_17] : memref<8x128xf32, #tpu.memory_space<vmem>>, vector<8x128xf32>
    %c0_18 = arith.constant 0 : index
    %c0_19 = arith.constant 0 : index
    %34 = vector.load %arg8[%c0_18, %c0_19] : memref<8x128xf32, #tpu.memory_space<vmem>>, vector<8x128xf32>
    %35 = arith.index_cast %c1_i32 : i32 to index
    %c0_20 = arith.constant 0 : index
    %c0_21 = arith.constant 0 : index
    %36 = vector.load %arg2[%35, %c0_20, %c0_21] : memref<8x8x512xf32, #tpu.memory_space<vmem>>, vector<1x8x512xf32>
    %37 = vector.shape_cast %36 : vector<1x8x512xf32> to vector<8x512xf32>
    %c0_22 = arith.constant 0 : index
    %c0_23 = arith.constant 0 : index
    %38 = vector.load %arg3[%c0_22, %c0_23] : memref<128x512xf32, #tpu.memory_space<vmem>>, vector<128x512xf32>
    %cst_24 = arith.constant dense<0.000000e+00> : vector<8x512xf32>
    %39 = tpu.matmul %33, %38, %cst_24 {dimension_numbers = #tpu.dot_dimension_numbers<[1], [0], [0], [1], [0, 0, 1, 1], [], []>} : vector<8x128xf32>, vector<128x512xf32>, vector<8x512xf32> -> vector<8x512xf32>
    %40 = arith.addf %37, %39 : vector<8x512xf32>
    %41 = vector.extract_strided_slice %40 {offsets = [0, 0], sizes = [8, 384], strides = [1, 1]} : vector<8x512xf32> to vector<8x384xf32>
    %42 = arith.negf %41 : vector<8x384xf32>
    %43 = math.exp %42 : vector<8x384xf32>
    %cst_25 = arith.constant 1.000000e+00 : f32
    %44 = vector.broadcast %cst_25 : f32 to vector<8x384xf32>
    %45 = arith.addf %44, %43 : vector<8x384xf32>
    %46 = arith.divf %44, %45 : vector<8x384xf32>
    %47 = vector.extract_strided_slice %46 {offsets = [0, 0], sizes = [8, 128], strides = [1, 1]} : vector<8x384xf32> to vector<8x128xf32>
    %48 = vector.extract_strided_slice %46 {offsets = [0, 128], sizes = [8, 128], strides = [1, 1]} : vector<8x384xf32> to vector<8x128xf32>
    %49 = vector.extract_strided_slice %46 {offsets = [0, 256], sizes = [8, 128], strides = [1, 1]} : vector<8x384xf32> to vector<8x128xf32>
    %50 = vector.extract_strided_slice %40 {offsets = [0, 384], sizes = [8, 128], strides = [1, 1]} : vector<8x512xf32> to vector<8x128xf32>
    %51 = math.tanh %50 : vector<8x128xf32>
    %52 = arith.mulf %48, %34 : vector<8x128xf32>
    %53 = arith.mulf %47, %51 : vector<8x128xf32>
    %54 = arith.addf %52, %53 : vector<8x128xf32>
    %55 = math.tanh %54 : vector<8x128xf32>
    %56 = arith.mulf %49, %55 : vector<8x128xf32>
    %57 = arith.index_cast %c1_i32 : i32 to index
    %c0_26 = arith.constant 0 : index
    %c0_27 = arith.constant 0 : index
    %58 = vector.load %arg6[%57, %c0_26, %c0_27] : memref<8x8x128xf32, #tpu.memory_space<vmem>>, vector<1x8x128xf32>
    %59 = vector.shape_cast %58 : vector<1x8x128xf32> to vector<8x128xf32>
    %60 = vector.shape_cast %56 : vector<8x128xf32> to vector<1x8x128xf32>
    tpu.vector_store %arg6[%57, %c0_26, %c0_27], %60 {strides = array<i32>} : memref<8x8x128xf32, #tpu.memory_space<vmem>>, vector<1x8x128xf32>,
    %c0_28 = arith.constant 0 : index
    %c0_29 = arith.constant 0 : index
    %61 = vector.load %arg7[%c0_28, %c0_29] : memref<8x128xf32, #tpu.memory_space<vmem>>, vector<8x128xf32>
    tpu.vector_store %arg7[%c0_28, %c0_29], %56 {strides = array<i32>} : memref<8x128xf32, #tpu.memory_space<vmem>>, vector<8x128xf32>,
    %c0_30 = arith.constant 0 : index
    %c0_31 = arith.constant 0 : index
    %62 = vector.load %arg8[%c0_30, %c0_31] : memref<8x128xf32, #tpu.memory_space<vmem>>, vector<8x128xf32>
    tpu.vector_store %arg8[%c0_30, %c0_31], %54 {strides = array<i32>} : memref<8x128xf32, #tpu.memory_space<vmem>>, vector<8x128xf32>,
    %c2_i32 = arith.constant 2 : i32
    %c0_32 = arith.constant 0 : index
    %c0_33 = arith.constant 0 : index
    %63 = vector.load %arg7[%c0_32, %c0_33] : memref<8x128xf32, #tpu.memory_space<vmem>>, vector<8x128xf32>
    %c0_34 = arith.constant 0 : index
    %c0_35 = arith.constant 0 : index
    %64 = vector.load %arg8[%c0_34, %c0_35] : memref<8x128xf32, #tpu.memory_space<vmem>>, vector<8x128xf32>
    %65 = arith.index_cast %c2_i32 : i32 to index
    %c0_36 = arith.constant 0 : index
    %c0_37 = arith.constant 0 : index
    %66 = vector.load %arg2[%65, %c0_36, %c0_37] : memref<8x8x512xf32, #tpu.memory_space<vmem>>, vector<1x8x512xf32>
    %67 = vector.shape_cast %66 : vector<1x8x512xf32> to vector<8x512xf32>
    %c0_38 = arith.constant 0 : index
    %c0_39 = arith.constant 0 : index
    %68 = vector.load %arg3[%c0_38, %c0_39] : memref<128x512xf32, #tpu.memory_space<vmem>>, vector<128x512xf32>
    %cst_40 = arith.constant dense<0.000000e+00> : vector<8x512xf32>
    %69 = tpu.matmul %63, %68, %cst_40 {dimension_numbers = #tpu.dot_dimension_numbers<[1], [0], [0], [1], [0, 0, 1, 1], [], []>} : vector<8x128xf32>, vector<128x512xf32>, vector<8x512xf32> -> vector<8x512xf32>
    %70 = arith.addf %67, %69 : vector<8x512xf32>
    %71 = vector.extract_strided_slice %70 {offsets = [0, 0], sizes = [8, 384], strides = [1, 1]} : vector<8x512xf32> to vector<8x384xf32>
    %72 = arith.negf %71 : vector<8x384xf32>
    %73 = math.exp %72 : vector<8x384xf32>
    %cst_41 = arith.constant 1.000000e+00 : f32
    %74 = vector.broadcast %cst_41 : f32 to vector<8x384xf32>
    %75 = arith.addf %74, %73 : vector<8x384xf32>
    %76 = arith.divf %74, %75 : vector<8x384xf32>
    %77 = vector.extract_strided_slice %76 {offsets = [0, 0], sizes = [8, 128], strides = [1, 1]} : vector<8x384xf32> to vector<8x128xf32>
    %78 = vector.extract_strided_slice %76 {offsets = [0, 128], sizes = [8, 128], strides = [1, 1]} : vector<8x384xf32> to vector<8x128xf32>
    %79 = vector.extract_strided_slice %76 {offsets = [0, 256], sizes = [8, 128], strides = [1, 1]} : vector<8x384xf32> to vector<8x128xf32>
    %80 = vector.extract_strided_slice %70 {offsets = [0, 384], sizes = [8, 128], strides = [1, 1]} : vector<8x512xf32> to vector<8x128xf32>
    %81 = math.tanh %80 : vector<8x128xf32>
    %82 = arith.mulf %78, %64 : vector<8x128xf32>
    %83 = arith.mulf %77, %81 : vector<8x128xf32>
    %84 = arith.addf %82, %83 : vector<8x128xf32>
    %85 = math.tanh %84 : vector<8x128xf32>
    %86 = arith.mulf %79, %85 : vector<8x128xf32>
    %87 = arith.index_cast %c2_i32 : i32 to index
    %c0_42 = arith.constant 0 : index
    %c0_43 = arith.constant 0 : index
    %88 = vector.load %arg6[%87, %c0_42, %c0_43] : memref<8x8x128xf32, #tpu.memory_space<vmem>>, vector<1x8x128xf32>
    %89 = vector.shape_cast %88 : vector<1x8x128xf32> to vector<8x128xf32>
    %90 = vector.shape_cast %86 : vector<8x128xf32> to vector<1x8x128xf32>
    tpu.vector_store %arg6[%87, %c0_42, %c0_43], %90 {strides = array<i32>} : memref<8x8x128xf32, #tpu.memory_space<vmem>>, vector<1x8x128xf32>,
    %c0_44 = arith.constant 0 : index
    %c0_45 = arith.constant 0 : index
    %91 = vector.load %arg7[%c0_44, %c0_45] : memref<8x128xf32, #tpu.memory_space<vmem>>, vector<8x128xf32>
    tpu.vector_store %arg7[%c0_44, %c0_45], %86 {strides = array<i32>} : memref<8x128xf32, #tpu.memory_space<vmem>>, vector<8x128xf32>,
    %c0_46 = arith.constant 0 : index
    %c0_47 = arith.constant 0 : index
    %92 = vector.load %arg8[%c0_46, %c0_47] : memref<8x128xf32, #tpu.memory_space<vmem>>, vector<8x128xf32>
    tpu.vector_store %arg8[%c0_46, %c0_47], %84 {strides = array<i32>} : memref<8x128xf32, #tpu.memory_space<vmem>>, vector<8x128xf32>,
    %c3_i32 = arith.constant 3 : i32
    %c0_48 = arith.constant 0 : index
    %c0_49 = arith.constant 0 : index
    %93 = vector.load %arg7[%c0_48, %c0_49] : memref<8x128xf32, #tpu.memory_space<vmem>>, vector<8x128xf32>
    %c0_50 = arith.constant 0 : index
    %c0_51 = arith.constant 0 : index
    %94 = vector.load %arg8[%c0_50, %c0_51] : memref<8x128xf32, #tpu.memory_space<vmem>>, vector<8x128xf32>
    %95 = arith.index_cast %c3_i32 : i32 to index
    %c0_52 = arith.constant 0 : index
    %c0_53 = arith.constant 0 : index
    %96 = vector.load %arg2[%95, %c0_52, %c0_53] : memref<8x8x512xf32, #tpu.memory_space<vmem>>, vector<1x8x512xf32>
    %97 = vector.shape_cast %96 : vector<1x8x512xf32> to vector<8x512xf32>
    %c0_54 = arith.constant 0 : index
    %c0_55 = arith.constant 0 : index
    %98 = vector.load %arg3[%c0_54, %c0_55] : memref<128x512xf32, #tpu.memory_space<vmem>>, vector<128x512xf32>
    %cst_56 = arith.constant dense<0.000000e+00> : vector<8x512xf32>
    %99 = tpu.matmul %93, %98, %cst_56 {dimension_numbers = #tpu.dot_dimension_numbers<[1], [0], [0], [1], [0, 0, 1, 1], [], []>} : vector<8x128xf32>, vector<128x512xf32>, vector<8x512xf32> -> vector<8x512xf32>
    %100 = arith.addf %97, %99 : vector<8x512xf32>
    %101 = vector.extract_strided_slice %100 {offsets = [0, 0], sizes = [8, 384], strides = [1, 1]} : vector<8x512xf32> to vector<8x384xf32>
    %102 = arith.negf %101 : vector<8x384xf32>
    %103 = math.exp %102 : vector<8x384xf32>
    %cst_57 = arith.constant 1.000000e+00 : f32
    %104 = vector.broadcast %cst_57 : f32 to vector<8x384xf32>
    %105 = arith.addf %104, %103 : vector<8x384xf32>
    %106 = arith.divf %104, %105 : vector<8x384xf32>
    %107 = vector.extract_strided_slice %106 {offsets = [0, 0], sizes = [8, 128], strides = [1, 1]} : vector<8x384xf32> to vector<8x128xf32>
    %108 = vector.extract_strided_slice %106 {offsets = [0, 128], sizes = [8, 128], strides = [1, 1]} : vector<8x384xf32> to vector<8x128xf32>
    %109 = vector.extract_strided_slice %106 {offsets = [0, 256], sizes = [8, 128], strides = [1, 1]} : vector<8x384xf32> to vector<8x128xf32>
    %110 = vector.extract_strided_slice %100 {offsets = [0, 384], sizes = [8, 128], strides = [1, 1]} : vector<8x512xf32> to vector<8x128xf32>
    %111 = math.tanh %110 : vector<8x128xf32>
    %112 = arith.mulf %108, %94 : vector<8x128xf32>
    %113 = arith.mulf %107, %111 : vector<8x128xf32>
    %114 = arith.addf %112, %113 : vector<8x128xf32>
    %115 = math.tanh %114 : vector<8x128xf32>
    %116 = arith.mulf %109, %115 : vector<8x128xf32>
    %117 = arith.index_cast %c3_i32 : i32 to index
    %c0_58 = arith.constant 0 : index
    %c0_59 = arith.constant 0 : index
    %118 = vector.load %arg6[%117, %c0_58, %c0_59] : memref<8x8x128xf32, #tpu.memory_space<vmem>>, vector<1x8x128xf32>
    %119 = vector.shape_cast %118 : vector<1x8x128xf32> to vector<8x128xf32>
    %120 = vector.shape_cast %116 : vector<8x128xf32> to vector<1x8x128xf32>
    tpu.vector_store %arg6[%117, %c0_58, %c0_59], %120 {strides = array<i32>} : memref<8x8x128xf32, #tpu.memory_space<vmem>>, vector<1x8x128xf32>,
    %c0_60 = arith.constant 0 : index
    %c0_61 = arith.constant 0 : index
    %121 = vector.load %arg7[%c0_60, %c0_61] : memref<8x128xf32, #tpu.memory_space<vmem>>, vector<8x128xf32>
    tpu.vector_store %arg7[%c0_60, %c0_61], %116 {strides = array<i32>} : memref<8x128xf32, #tpu.memory_space<vmem>>, vector<8x128xf32>,
    %c0_62 = arith.constant 0 : index
    %c0_63 = arith.constant 0 : index
    %122 = vector.load %arg8[%c0_62, %c0_63] : memref<8x128xf32, #tpu.memory_space<vmem>>, vector<8x128xf32>
    tpu.vector_store %arg8[%c0_62, %c0_63], %114 {strides = array<i32>} : memref<8x128xf32, #tpu.memory_space<vmem>>, vector<8x128xf32>,
    %c4_i32 = arith.constant 4 : i32
    %c0_64 = arith.constant 0 : index
    %c0_65 = arith.constant 0 : index
    %123 = vector.load %arg7[%c0_64, %c0_65] : memref<8x128xf32, #tpu.memory_space<vmem>>, vector<8x128xf32>
    %c0_66 = arith.constant 0 : index
    %c0_67 = arith.constant 0 : index
    %124 = vector.load %arg8[%c0_66, %c0_67] : memref<8x128xf32, #tpu.memory_space<vmem>>, vector<8x128xf32>
    %125 = arith.index_cast %c4_i32 : i32 to index
    %c0_68 = arith.constant 0 : index
    %c0_69 = arith.constant 0 : index
    %126 = vector.load %arg2[%125, %c0_68, %c0_69] : memref<8x8x512xf32, #tpu.memory_space<vmem>>, vector<1x8x512xf32>
    %127 = vector.shape_cast %126 : vector<1x8x512xf32> to vector<8x512xf32>
    %c0_70 = arith.constant 0 : index
    %c0_71 = arith.constant 0 : index
    %128 = vector.load %arg3[%c0_70, %c0_71] : memref<128x512xf32, #tpu.memory_space<vmem>>, vector<128x512xf32>
    %cst_72 = arith.constant dense<0.000000e+00> : vector<8x512xf32>
    %129 = tpu.matmul %123, %128, %cst_72 {dimension_numbers = #tpu.dot_dimension_numbers<[1], [0], [0], [1], [0, 0, 1, 1], [], []>} : vector<8x128xf32>, vector<128x512xf32>, vector<8x512xf32> -> vector<8x512xf32>
    %130 = arith.addf %127, %129 : vector<8x512xf32>
    %131 = vector.extract_strided_slice %130 {offsets = [0, 0], sizes = [8, 384], strides = [1, 1]} : vector<8x512xf32> to vector<8x384xf32>
    %132 = arith.negf %131 : vector<8x384xf32>
    %133 = math.exp %132 : vector<8x384xf32>
    %cst_73 = arith.constant 1.000000e+00 : f32
    %134 = vector.broadcast %cst_73 : f32 to vector<8x384xf32>
    %135 = arith.addf %134, %133 : vector<8x384xf32>
    %136 = arith.divf %134, %135 : vector<8x384xf32>
    %137 = vector.extract_strided_slice %136 {offsets = [0, 0], sizes = [8, 128], strides = [1, 1]} : vector<8x384xf32> to vector<8x128xf32>
    %138 = vector.extract_strided_slice %136 {offsets = [0, 128], sizes = [8, 128], strides = [1, 1]} : vector<8x384xf32> to vector<8x128xf32>
    %139 = vector.extract_strided_slice %136 {offsets = [0, 256], sizes = [8, 128], strides = [1, 1]} : vector<8x384xf32> to vector<8x128xf32>
    %140 = vector.extract_strided_slice %130 {offsets = [0, 384], sizes = [8, 128], strides = [1, 1]} : vector<8x512xf32> to vector<8x128xf32>
    %141 = math.tanh %140 : vector<8x128xf32>
    %142 = arith.mulf %138, %124 : vector<8x128xf32>
    %143 = arith.mulf %137, %141 : vector<8x128xf32>
    %144 = arith.addf %142, %143 : vector<8x128xf32>
    %145 = math.tanh %144 : vector<8x128xf32>
    %146 = arith.mulf %139, %145 : vector<8x128xf32>
    %147 = arith.index_cast %c4_i32 : i32 to index
    %c0_74 = arith.constant 0 : index
    %c0_75 = arith.constant 0 : index
    %148 = vector.load %arg6[%147, %c0_74, %c0_75] : memref<8x8x128xf32, #tpu.memory_space<vmem>>, vector<1x8x128xf32>
    %149 = vector.shape_cast %148 : vector<1x8x128xf32> to vector<8x128xf32>
    %150 = vector.shape_cast %146 : vector<8x128xf32> to vector<1x8x128xf32>
    tpu.vector_store %arg6[%147, %c0_74, %c0_75], %150 {strides = array<i32>} : memref<8x8x128xf32, #tpu.memory_space<vmem>>, vector<1x8x128xf32>,
    %c0_76 = arith.constant 0 : index
    %c0_77 = arith.constant 0 : index
    %151 = vector.load %arg7[%c0_76, %c0_77] : memref<8x128xf32, #tpu.memory_space<vmem>>, vector<8x128xf32>
    tpu.vector_store %arg7[%c0_76, %c0_77], %146 {strides = array<i32>} : memref<8x128xf32, #tpu.memory_space<vmem>>, vector<8x128xf32>,
    %c0_78 = arith.constant 0 : index
    %c0_79 = arith.constant 0 : index
    %152 = vector.load %arg8[%c0_78, %c0_79] : memref<8x128xf32, #tpu.memory_space<vmem>>, vector<8x128xf32>
    tpu.vector_store %arg8[%c0_78, %c0_79], %144 {strides = array<i32>} : memref<8x128xf32, #tpu.memory_space<vmem>>, vector<8x128xf32>,
    %c5_i32 = arith.constant 5 : i32
    %c0_80 = arith.constant 0 : index
    %c0_81 = arith.constant 0 : index
    %153 = vector.load %arg7[%c0_80, %c0_81] : memref<8x128xf32, #tpu.memory_space<vmem>>, vector<8x128xf32>
    %c0_82 = arith.constant 0 : index
    %c0_83 = arith.constant 0 : index
    %154 = vector.load %arg8[%c0_82, %c0_83] : memref<8x128xf32, #tpu.memory_space<vmem>>, vector<8x128xf32>
    %155 = arith.index_cast %c5_i32 : i32 to index
    %c0_84 = arith.constant 0 : index
    %c0_85 = arith.constant 0 : index
    %156 = vector.load %arg2[%155, %c0_84, %c0_85] : memref<8x8x512xf32, #tpu.memory_space<vmem>>, vector<1x8x512xf32>
    %157 = vector.shape_cast %156 : vector<1x8x512xf32> to vector<8x512xf32>
    %c0_86 = arith.constant 0 : index
    %c0_87 = arith.constant 0 : index
    %158 = vector.load %arg3[%c0_86, %c0_87] : memref<128x512xf32, #tpu.memory_space<vmem>>, vector<128x512xf32>
    %cst_88 = arith.constant dense<0.000000e+00> : vector<8x512xf32>
    %159 = tpu.matmul %153, %158, %cst_88 {dimension_numbers = #tpu.dot_dimension_numbers<[1], [0], [0], [1], [0, 0, 1, 1], [], []>} : vector<8x128xf32>, vector<128x512xf32>, vector<8x512xf32> -> vector<8x512xf32>
    %160 = arith.addf %157, %159 : vector<8x512xf32>
    %161 = vector.extract_strided_slice %160 {offsets = [0, 0], sizes = [8, 384], strides = [1, 1]} : vector<8x512xf32> to vector<8x384xf32>
    %162 = arith.negf %161 : vector<8x384xf32>
    %163 = math.exp %162 : vector<8x384xf32>
    %cst_89 = arith.constant 1.000000e+00 : f32
    %164 = vector.broadcast %cst_89 : f32 to vector<8x384xf32>
    %165 = arith.addf %164, %163 : vector<8x384xf32>
    %166 = arith.divf %164, %165 : vector<8x384xf32>
    %167 = vector.extract_strided_slice %166 {offsets = [0, 0], sizes = [8, 128], strides = [1, 1]} : vector<8x384xf32> to vector<8x128xf32>
    %168 = vector.extract_strided_slice %166 {offsets = [0, 128], sizes = [8, 128], strides = [1, 1]} : vector<8x384xf32> to vector<8x128xf32>
    %169 = vector.extract_strided_slice %166 {offsets = [0, 256], sizes = [8, 128], strides = [1, 1]} : vector<8x384xf32> to vector<8x128xf32>
    %170 = vector.extract_strided_slice %160 {offsets = [0, 384], sizes = [8, 128], strides = [1, 1]} : vector<8x512xf32> to vector<8x128xf32>
    %171 = math.tanh %170 : vector<8x128xf32>
    %172 = arith.mulf %168, %154 : vector<8x128xf32>
    %173 = arith.mulf %167, %171 : vector<8x128xf32>
    %174 = arith.addf %172, %173 : vector<8x128xf32>
    %175 = math.tanh %174 : vector<8x128xf32>
    %176 = arith.mulf %169, %175 : vector<8x128xf32>
    %177 = arith.index_cast %c5_i32 : i32 to index
    %c0_90 = arith.constant 0 : index
    %c0_91 = arith.constant 0 : index
    %178 = vector.load %arg6[%177, %c0_90, %c0_91] : memref<8x8x128xf32, #tpu.memory_space<vmem>>, vector<1x8x128xf32>
    %179 = vector.shape_cast %178 : vector<1x8x128xf32> to vector<8x128xf32>
    %180 = vector.shape_cast %176 : vector<8x128xf32> to vector<1x8x128xf32>
    tpu.vector_store %arg6[%177, %c0_90, %c0_91], %180 {strides = array<i32>} : memref<8x8x128xf32, #tpu.memory_space<vmem>>, vector<1x8x128xf32>,
    %c0_92 = arith.constant 0 : index
    %c0_93 = arith.constant 0 : index
    %181 = vector.load %arg7[%c0_92, %c0_93] : memref<8x128xf32, #tpu.memory_space<vmem>>, vector<8x128xf32>
    tpu.vector_store %arg7[%c0_92, %c0_93], %176 {strides = array<i32>} : memref<8x128xf32, #tpu.memory_space<vmem>>, vector<8x128xf32>,
    %c0_94 = arith.constant 0 : index
    %c0_95 = arith.constant 0 : index
    %182 = vector.load %arg8[%c0_94, %c0_95] : memref<8x128xf32, #tpu.memory_space<vmem>>, vector<8x128xf32>
    tpu.vector_store %arg8[%c0_94, %c0_95], %174 {strides = array<i32>} : memref<8x128xf32, #tpu.memory_space<vmem>>, vector<8x128xf32>,
    %c6_i32 = arith.constant 6 : i32
    %c0_96 = arith.constant 0 : index
    %c0_97 = arith.constant 0 : index
    %183 = vector.load %arg7[%c0_96, %c0_97] : memref<8x128xf32, #tpu.memory_space<vmem>>, vector<8x128xf32>
    %c0_98 = arith.constant 0 : index
    %c0_99 = arith.constant 0 : index
    %184 = vector.load %arg8[%c0_98, %c0_99] : memref<8x128xf32, #tpu.memory_space<vmem>>, vector<8x128xf32>
    %185 = arith.index_cast %c6_i32 : i32 to index
    %c0_100 = arith.constant 0 : index
    %c0_101 = arith.constant 0 : index
    %186 = vector.load %arg2[%185, %c0_100, %c0_101] : memref<8x8x512xf32, #tpu.memory_space<vmem>>, vector<1x8x512xf32>
    %187 = vector.shape_cast %186 : vector<1x8x512xf32> to vector<8x512xf32>
    %c0_102 = arith.constant 0 : index
    %c0_103 = arith.constant 0 : index
    %188 = vector.load %arg3[%c0_102, %c0_103] : memref<128x512xf32, #tpu.memory_space<vmem>>, vector<128x512xf32>
    %cst_104 = arith.constant dense<0.000000e+00> : vector<8x512xf32>
    %189 = tpu.matmul %183, %188, %cst_104 {dimension_numbers = #tpu.dot_dimension_numbers<[1], [0], [0], [1], [0, 0, 1, 1], [], []>} : vector<8x128xf32>, vector<128x512xf32>, vector<8x512xf32> -> vector<8x512xf32>
    %190 = arith.addf %187, %189 : vector<8x512xf32>
    %191 = vector.extract_strided_slice %190 {offsets = [0, 0], sizes = [8, 384], strides = [1, 1]} : vector<8x512xf32> to vector<8x384xf32>
    %192 = arith.negf %191 : vector<8x384xf32>
    %193 = math.exp %192 : vector<8x384xf32>
    %cst_105 = arith.constant 1.000000e+00 : f32
    %194 = vector.broadcast %cst_105 : f32 to vector<8x384xf32>
    %195 = arith.addf %194, %193 : vector<8x384xf32>
    %196 = arith.divf %194, %195 : vector<8x384xf32>
    %197 = vector.extract_strided_slice %196 {offsets = [0, 0], sizes = [8, 128], strides = [1, 1]} : vector<8x384xf32> to vector<8x128xf32>
    %198 = vector.extract_strided_slice %196 {offsets = [0, 128], sizes = [8, 128], strides = [1, 1]} : vector<8x384xf32> to vector<8x128xf32>
    %199 = vector.extract_strided_slice %196 {offsets = [0, 256], sizes = [8, 128], strides = [1, 1]} : vector<8x384xf32> to vector<8x128xf32>
    %200 = vector.extract_strided_slice %190 {offsets = [0, 384], sizes = [8, 128], strides = [1, 1]} : vector<8x512xf32> to vector<8x128xf32>
    %201 = math.tanh %200 : vector<8x128xf32>
    %202 = arith.mulf %198, %184 : vector<8x128xf32>
    %203 = arith.mulf %197, %201 : vector<8x128xf32>
    %204 = arith.addf %202, %203 : vector<8x128xf32>
    %205 = math.tanh %204 : vector<8x128xf32>
    %206 = arith.mulf %199, %205 : vector<8x128xf32>
    %207 = arith.index_cast %c6_i32 : i32 to index
    %c0_106 = arith.constant 0 : index
    %c0_107 = arith.constant 0 : index
    %208 = vector.load %arg6[%207, %c0_106, %c0_107] : memref<8x8x128xf32, #tpu.memory_space<vmem>>, vector<1x8x128xf32>
    %209 = vector.shape_cast %208 : vector<1x8x128xf32> to vector<8x128xf32>
    %210 = vector.shape_cast %206 : vector<8x128xf32> to vector<1x8x128xf32>
    tpu.vector_store %arg6[%207, %c0_106, %c0_107], %210 {strides = array<i32>} : memref<8x8x128xf32, #tpu.memory_space<vmem>>, vector<1x8x128xf32>,
    %c0_108 = arith.constant 0 : index
    %c0_109 = arith.constant 0 : index
    %211 = vector.load %arg7[%c0_108, %c0_109] : memref<8x128xf32, #tpu.memory_space<vmem>>, vector<8x128xf32>
    tpu.vector_store %arg7[%c0_108, %c0_109], %206 {strides = array<i32>} : memref<8x128xf32, #tpu.memory_space<vmem>>, vector<8x128xf32>,
    %c0_110 = arith.constant 0 : index
    %c0_111 = arith.constant 0 : index
    %212 = vector.load %arg8[%c0_110, %c0_111] : memref<8x128xf32, #tpu.memory_space<vmem>>, vector<8x128xf32>
    tpu.vector_store %arg8[%c0_110, %c0_111], %204 {strides = array<i32>} : memref<8x128xf32, #tpu.memory_space<vmem>>, vector<8x128xf32>,
    %c7_i32 = arith.constant 7 : i32
    %c0_112 = arith.constant 0 : index
    %c0_113 = arith.constant 0 : index
    %213 = vector.load %arg7[%c0_112, %c0_113] : memref<8x128xf32, #tpu.memory_space<vmem>>, vector<8x128xf32>
    %c0_114 = arith.constant 0 : index
    %c0_115 = arith.constant 0 : index
    %214 = vector.load %arg8[%c0_114, %c0_115] : memref<8x128xf32, #tpu.memory_space<vmem>>, vector<8x128xf32>
    %215 = arith.index_cast %c7_i32 : i32 to index
    %c0_116 = arith.constant 0 : index
    %c0_117 = arith.constant 0 : index
    %216 = vector.load %arg2[%215, %c0_116, %c0_117] : memref<8x8x512xf32, #tpu.memory_space<vmem>>, vector<1x8x512xf32>
    %217 = vector.shape_cast %216 : vector<1x8x512xf32> to vector<8x512xf32>
    %c0_118 = arith.constant 0 : index
    %c0_119 = arith.constant 0 : index
    %218 = vector.load %arg3[%c0_118, %c0_119] : memref<128x512xf32, #tpu.memory_space<vmem>>, vector<128x512xf32>
    %cst_120 = arith.constant dense<0.000000e+00> : vector<8x512xf32>
    %219 = tpu.matmul %213, %218, %cst_120 {dimension_numbers = #tpu.dot_dimension_numbers<[1], [0], [0], [1], [0, 0, 1, 1], [], []>} : vector<8x128xf32>, vector<128x512xf32>, vector<8x512xf32> -> vector<8x512xf32>
    %220 = arith.addf %217, %219 : vector<8x512xf32>
    %221 = vector.extract_strided_slice %220 {offsets = [0, 0], sizes = [8, 384], strides = [1, 1]} : vector<8x512xf32> to vector<8x384xf32>
    %222 = arith.negf %221 : vector<8x384xf32>
    %223 = math.exp %222 : vector<8x384xf32>
    %cst_121 = arith.constant 1.000000e+00 : f32
    %224 = vector.broadcast %cst_121 : f32 to vector<8x384xf32>
    %225 = arith.addf %224, %223 : vector<8x384xf32>
    %226 = arith.divf %224, %225 : vector<8x384xf32>
    %227 = vector.extract_strided_slice %226 {offsets = [0, 0], sizes = [8, 128], strides = [1, 1]} : vector<8x384xf32> to vector<8x128xf32>
    %228 = vector.extract_strided_slice %226 {offsets = [0, 128], sizes = [8, 128], strides = [1, 1]} : vector<8x384xf32> to vector<8x128xf32>
    %229 = vector.extract_strided_slice %226 {offsets = [0, 256], sizes = [8, 128], strides = [1, 1]} : vector<8x384xf32> to vector<8x128xf32>
    %230 = vector.extract_strided_slice %220 {offsets = [0, 384], sizes = [8, 128], strides = [1, 1]} : vector<8x512xf32> to vector<8x128xf32>
    %231 = math.tanh %230 : vector<8x128xf32>
    %232 = arith.mulf %228, %214 : vector<8x128xf32>
    %233 = arith.mulf %227, %231 : vector<8x128xf32>
    %234 = arith.addf %232, %233 : vector<8x128xf32>
    %235 = math.tanh %234 : vector<8x128xf32>
    %236 = arith.mulf %229, %235 : vector<8x128xf32>
    %237 = arith.index_cast %c7_i32 : i32 to index
    %c0_122 = arith.constant 0 : index
    %c0_123 = arith.constant 0 : index
    %238 = vector.load %arg6[%237, %c0_122, %c0_123] : memref<8x8x128xf32, #tpu.memory_space<vmem>>, vector<1x8x128xf32>
    %239 = vector.shape_cast %238 : vector<1x8x128xf32> to vector<8x128xf32>
    %240 = vector.shape_cast %236 : vector<8x128xf32> to vector<1x8x128xf32>
    tpu.vector_store %arg6[%237, %c0_122, %c0_123], %240 {strides = array<i32>} : memref<8x8x128xf32, #tpu.memory_space<vmem>>, vector<1x8x128xf32>,
    %c0_124 = arith.constant 0 : index
    %c0_125 = arith.constant 0 : index
    %241 = vector.load %arg7[%c0_124, %c0_125] : memref<8x128xf32, #tpu.memory_space<vmem>>, vector<8x128xf32>
    tpu.vector_store %arg7[%c0_124, %c0_125], %236 {strides = array<i32>} : memref<8x128xf32, #tpu.memory_space<vmem>>, vector<8x128xf32>,
    %c0_126 = arith.constant 0 : index
    %c0_127 = arith.constant 0 : index
    %242 = vector.load %arg8[%c0_126, %c0_127] : memref<8x128xf32, #tpu.memory_space<vmem>>, vector<8x128xf32>
    tpu.vector_store %arg8[%c0_126, %c0_127], %234 {strides = array<i32>} : memref<8x128xf32, #tpu.memory_space<vmem>>, vector<8x128xf32>,
    %c8_i32 = arith.constant 8 : i32
    return
  }
  func.func @transform_0(%arg0: i32, %arg1: i32) -> (i32, i32, i32) {
    %c0_i32 = arith.constant 0 : i32
    %c0_i32_0 = arith.constant 0 : i32
    return %arg1, %arg0, %c0_i32 : i32, i32, i32
  }
  func.func @transform_1(%arg0: i32, %arg1: i32) -> (i32, i32) {
    %c0_i32 = arith.constant 0 : i32
    %c0_i32_0 = arith.constant 0 : i32
    %c0_i32_1 = arith.constant 0 : i32
    return %c0_i32, %c0_i32_0 : i32, i32
  }
  func.func @transform_2(%arg0: i32, %arg1: i32) -> (i32, i32) {
    %c0_i32 = arith.constant 0 : i32
    %c0_i32_0 = arith.constant 0 : i32
    return %arg0, %c0_i32 : i32, i32
  }
  func.func @transform_3(%arg0: i32, %arg1: i32) -> (i32, i32) {
    %c0_i32 = arith.constant 0 : i32
    %c0_i32_0 = arith.constant 0 : i32
    return %arg0, %c0_i32 : i32, i32
  }
  func.func @transform_4(%arg0: i32, %arg1: i32) -> (i32, i32, i32) {
    %c0_i32 = arith.constant 0 : i32
    %c0_i32_0 = arith.constant 0 : i32
    return %arg1, %arg0, %c0_i32 : i32, i32, i32
  }
  func.func @transform_5(%arg0: i32, %arg1: i32) -> (i32, i32) {
    %c0_i32 = arith.constant 0 : i32
    %c0_i32_0 = arith.constant 0 : i32
    return %arg0, %c0_i32 : i32, i32
  }
  func.func @transform_6(%arg0: i32, %arg1: i32) -> (i32, i32) {
    %c0_i32 = arith.constant 0 : i32
    %c0_i32_0 = arith.constant 0 : i32
    return %arg0, %c0_i32 : i32, i32
  }
}

module attributes {stable_mosaic.version = 11 : i64} {
  func.func @_lstm_layer_kernel(%arg0: i32, %arg1: i32, %arg2: memref<1x8x512xf32, #tpu.memory_space<vmem>>, %arg3: memref<128x512xf32, #tpu.memory_space<vmem>>, %arg4: memref<8x128xf32, #tpu.memory_space<vmem>>, %arg5: memref<8x128xf32, #tpu.memory_space<vmem>>, %arg6: memref<8x8x128xf32, #tpu.memory_space<vmem>>, %arg7: memref<8x128xf32, #tpu.memory_space<vmem>>, %arg8: memref<8x128xf32, #tpu.memory_space<vmem>>) attributes {dimension_semantics = [#tpu.dimension_semantics<parallel>, #tpu.dimension_semantics<arbitrary>], iteration_bounds = array<i64: 1, 1>, scalar_prefetch = 0 : i64, scratch_operands = 0 : i64, tpu.core_type = #tpu.core_type<tc>, window_params = [{transform_indices = @transform_0, window_bounds = array<i64: 1, 8, 512>}, {pipeline_mode = #tpu.pipeline_mode<synchronous>, transform_indices = @transform_1, window_bounds = array<i64: 128, 512>}, {transform_indices = @transform_2, window_bounds = array<i64: 8, 128>}, {transform_indices = @transform_3, window_bounds = array<i64: 8, 128>}, {transform_indices = @transform_4, window_bounds = array<i64: 8, 8, 128>}, {transform_indices = @transform_5, window_bounds = array<i64: 8, 128>}, {transform_indices = @transform_6, window_bounds = array<i64: 8, 128>}]} {
    %c0_i32 = arith.constant 0 : i32
    %0 = arith.cmpi eq, %arg1, %c0_i32 : i32
    %1 = arith.extui %0 : i1 to i32
    %c0_i32_0 = arith.constant 0 : i32
    %2 = arith.cmpi ne, %1, %c0_i32_0 : i32
    scf.if %2 {
      %c0_112 = arith.constant 0 : index
      %c0_113 = arith.constant 0 : index
      %227 = vector.load %arg4[%c0_112, %c0_113] : memref<8x128xf32, #tpu.memory_space<vmem>>, vector<8x128xf32>
      %c0_114 = arith.constant 0 : index
      %c0_115 = arith.constant 0 : index
      %228 = vector.load %arg7[%c0_114, %c0_115] : memref<8x128xf32, #tpu.memory_space<vmem>>, vector<8x128xf32>
      tpu.vector_store %arg7[%c0_114, %c0_115], %227 {strides = array<i32>} : memref<8x128xf32, #tpu.memory_space<vmem>>, vector<8x128xf32>,
      %c0_116 = arith.constant 0 : index
      %c0_117 = arith.constant 0 : index
      %229 = vector.load %arg5[%c0_116, %c0_117] : memref<8x128xf32, #tpu.memory_space<vmem>>, vector<8x128xf32>
      %c0_118 = arith.constant 0 : index
      %c0_119 = arith.constant 0 : index
      %230 = vector.load %arg8[%c0_118, %c0_119] : memref<8x128xf32, #tpu.memory_space<vmem>>, vector<8x128xf32>
      tpu.vector_store %arg8[%c0_118, %c0_119], %229 {strides = array<i32>} : memref<8x128xf32, #tpu.memory_space<vmem>>, vector<8x128xf32>,
    } else {
    }
    %c0_i32_1 = arith.constant 0 : i32
    %c0 = arith.constant 0 : index
    %c0_2 = arith.constant 0 : index
    %3 = vector.load %arg7[%c0, %c0_2] : memref<8x128xf32, #tpu.memory_space<vmem>>, vector<8x128xf32>
    %c0_3 = arith.constant 0 : index
    %c0_4 = arith.constant 0 : index
    %4 = vector.load %arg8[%c0_3, %c0_4] : memref<8x128xf32, #tpu.memory_space<vmem>>, vector<8x128xf32>
    %c0_5 = arith.constant 0 : index
    %c0_6 = arith.constant 0 : index
    %c0_7 = arith.constant 0 : index
    %5 = vector.load %arg2[%c0_5, %c0_6, %c0_7] : memref<1x8x512xf32, #tpu.memory_space<vmem>>, vector<1x8x512xf32>
    %6 = vector.shape_cast %5 : vector<1x8x512xf32> to vector<8x512xf32>
    %c0_8 = arith.constant 0 : index
    %c0_9 = arith.constant 0 : index
    %7 = vector.load %arg3[%c0_8, %c0_9] : memref<128x512xf32, #tpu.memory_space<vmem>>, vector<128x512xf32>
    %cst = arith.constant dense<0.000000e+00> : vector<8x512xf32>
    %8 = tpu.matmul %3, %7, %cst {dimension_numbers = #tpu.dot_dimension_numbers<[1], [0], [0], [1], [0, 0, 1, 1], [], []>} : vector<8x128xf32>, vector<128x512xf32>, vector<8x512xf32> -> vector<8x512xf32>
    %9 = arith.addf %6, %8 : vector<8x512xf32>
    %10 = vector.extract_strided_slice %9 {offsets = [0, 0], sizes = [8, 384], strides = [1, 1]} : vector<8x512xf32> to vector<8x384xf32>
    %11 = arith.negf %10 : vector<8x384xf32>
    %12 = math.exp %11 : vector<8x384xf32>
    %cst_10 = arith.constant 1.000000e+00 : f32
    %13 = vector.broadcast %cst_10 : f32 to vector<8x384xf32>
    %14 = arith.addf %13, %12 : vector<8x384xf32>
    %15 = arith.divf %13, %14 : vector<8x384xf32>
    %16 = vector.extract_strided_slice %15 {offsets = [0, 0], sizes = [8, 128], strides = [1, 1]} : vector<8x384xf32> to vector<8x128xf32>
    %17 = vector.extract_strided_slice %15 {offsets = [0, 128], sizes = [8, 128], strides = [1, 1]} : vector<8x384xf32> to vector<8x128xf32>
    %18 = vector.extract_strided_slice %15 {offsets = [0, 256], sizes = [8, 128], strides = [1, 1]} : vector<8x384xf32> to vector<8x128xf32>
    %19 = vector.extract_strided_slice %9 {offsets = [0, 384], sizes = [8, 128], strides = [1, 1]} : vector<8x512xf32> to vector<8x128xf32>
    %20 = math.tanh %19 : vector<8x128xf32>
    %21 = arith.mulf %17, %4 : vector<8x128xf32>
    %22 = arith.mulf %16, %20 : vector<8x128xf32>
    %23 = arith.addf %21, %22 : vector<8x128xf32>
    %24 = math.tanh %23 : vector<8x128xf32>
    %25 = arith.mulf %18, %24 : vector<8x128xf32>
    %c8_i32 = arith.constant 8 : i32
    %26 = arith.muli %arg1, %c8_i32 : i32
    %27 = arith.addi %26, %c0_i32_1 : i32
    %c7_i32 = arith.constant 7 : i32
    %28 = arith.cmpi slt, %27, %c7_i32 : i32
    %29 = arith.extui %28 : i1 to i32
    %c0_i32_11 = arith.constant 0 : i32
    %30 = arith.cmpi ne, %29, %c0_i32_11 : i32
    scf.if %30 {
      %227 = arith.index_cast %c0_i32_1 : i32 to index
      %c0_112 = arith.constant 0 : index
      %c0_113 = arith.constant 0 : index
      %228 = vector.load %arg6[%227, %c0_112, %c0_113] : memref<8x8x128xf32, #tpu.memory_space<vmem>>, vector<1x8x128xf32>
      %229 = vector.shape_cast %228 : vector<1x8x128xf32> to vector<8x128xf32>
      %230 = vector.shape_cast %25 : vector<8x128xf32> to vector<1x8x128xf32>
      tpu.vector_store %arg6[%227, %c0_112, %c0_113], %230 {strides = array<i32>} : memref<8x8x128xf32, #tpu.memory_space<vmem>>, vector<1x8x128xf32>,
      %c0_114 = arith.constant 0 : index
      %c0_115 = arith.constant 0 : index
      %231 = vector.load %arg7[%c0_114, %c0_115] : memref<8x128xf32, #tpu.memory_space<vmem>>, vector<8x128xf32>
      tpu.vector_store %arg7[%c0_114, %c0_115], %25 {strides = array<i32>} : memref<8x128xf32, #tpu.memory_space<vmem>>, vector<8x128xf32>,
      %c0_116 = arith.constant 0 : index
      %c0_117 = arith.constant 0 : index
      %232 = vector.load %arg8[%c0_116, %c0_117] : memref<8x128xf32, #tpu.memory_space<vmem>>, vector<8x128xf32>
      tpu.vector_store %arg8[%c0_116, %c0_117], %23 {strides = array<i32>} : memref<8x128xf32, #tpu.memory_space<vmem>>, vector<8x128xf32>,
    } else {
    }
    %c1_i32 = arith.constant 1 : i32
    %c0_12 = arith.constant 0 : index
    %c0_13 = arith.constant 0 : index
    %31 = vector.load %arg7[%c0_12, %c0_13] : memref<8x128xf32, #tpu.memory_space<vmem>>, vector<8x128xf32>
    %c0_14 = arith.constant 0 : index
    %c0_15 = arith.constant 0 : index
    %32 = vector.load %arg8[%c0_14, %c0_15] : memref<8x128xf32, #tpu.memory_space<vmem>>, vector<8x128xf32>
    %c0_16 = arith.constant 0 : index
    %c0_17 = arith.constant 0 : index
    %c0_18 = arith.constant 0 : index
    %33 = vector.load %arg2[%c0_16, %c0_17, %c0_18] : memref<1x8x512xf32, #tpu.memory_space<vmem>>, vector<1x8x512xf32>
    %34 = vector.shape_cast %33 : vector<1x8x512xf32> to vector<8x512xf32>
    %c0_19 = arith.constant 0 : index
    %c0_20 = arith.constant 0 : index
    %35 = vector.load %arg3[%c0_19, %c0_20] : memref<128x512xf32, #tpu.memory_space<vmem>>, vector<128x512xf32>
    %cst_21 = arith.constant dense<0.000000e+00> : vector<8x512xf32>
    %36 = tpu.matmul %31, %35, %cst_21 {dimension_numbers = #tpu.dot_dimension_numbers<[1], [0], [0], [1], [0, 0, 1, 1], [], []>} : vector<8x128xf32>, vector<128x512xf32>, vector<8x512xf32> -> vector<8x512xf32>
    %37 = arith.addf %34, %36 : vector<8x512xf32>
    %38 = vector.extract_strided_slice %37 {offsets = [0, 0], sizes = [8, 384], strides = [1, 1]} : vector<8x512xf32> to vector<8x384xf32>
    %39 = arith.negf %38 : vector<8x384xf32>
    %40 = math.exp %39 : vector<8x384xf32>
    %cst_22 = arith.constant 1.000000e+00 : f32
    %41 = vector.broadcast %cst_22 : f32 to vector<8x384xf32>
    %42 = arith.addf %41, %40 : vector<8x384xf32>
    %43 = arith.divf %41, %42 : vector<8x384xf32>
    %44 = vector.extract_strided_slice %43 {offsets = [0, 0], sizes = [8, 128], strides = [1, 1]} : vector<8x384xf32> to vector<8x128xf32>
    %45 = vector.extract_strided_slice %43 {offsets = [0, 128], sizes = [8, 128], strides = [1, 1]} : vector<8x384xf32> to vector<8x128xf32>
    %46 = vector.extract_strided_slice %43 {offsets = [0, 256], sizes = [8, 128], strides = [1, 1]} : vector<8x384xf32> to vector<8x128xf32>
    %47 = vector.extract_strided_slice %37 {offsets = [0, 384], sizes = [8, 128], strides = [1, 1]} : vector<8x512xf32> to vector<8x128xf32>
    %48 = math.tanh %47 : vector<8x128xf32>
    %49 = arith.mulf %45, %32 : vector<8x128xf32>
    %50 = arith.mulf %44, %48 : vector<8x128xf32>
    %51 = arith.addf %49, %50 : vector<8x128xf32>
    %52 = math.tanh %51 : vector<8x128xf32>
    %53 = arith.mulf %46, %52 : vector<8x128xf32>
    %c8_i32_23 = arith.constant 8 : i32
    %54 = arith.muli %arg1, %c8_i32_23 : i32
    %55 = arith.addi %54, %c1_i32 : i32
    %c7_i32_24 = arith.constant 7 : i32
    %56 = arith.cmpi slt, %55, %c7_i32_24 : i32
    %57 = arith.extui %56 : i1 to i32
    %c0_i32_25 = arith.constant 0 : i32
    %58 = arith.cmpi ne, %57, %c0_i32_25 : i32
    scf.if %58 {
      %227 = arith.index_cast %c1_i32 : i32 to index
      %c0_112 = arith.constant 0 : index
      %c0_113 = arith.constant 0 : index
      %228 = vector.load %arg6[%227, %c0_112, %c0_113] : memref<8x8x128xf32, #tpu.memory_space<vmem>>, vector<1x8x128xf32>
      %229 = vector.shape_cast %228 : vector<1x8x128xf32> to vector<8x128xf32>
      %230 = vector.shape_cast %53 : vector<8x128xf32> to vector<1x8x128xf32>
      tpu.vector_store %arg6[%227, %c0_112, %c0_113], %230 {strides = array<i32>} : memref<8x8x128xf32, #tpu.memory_space<vmem>>, vector<1x8x128xf32>,
      %c0_114 = arith.constant 0 : index
      %c0_115 = arith.constant 0 : index
      %231 = vector.load %arg7[%c0_114, %c0_115] : memref<8x128xf32, #tpu.memory_space<vmem>>, vector<8x128xf32>
      tpu.vector_store %arg7[%c0_114, %c0_115], %53 {strides = array<i32>} : memref<8x128xf32, #tpu.memory_space<vmem>>, vector<8x128xf32>,
      %c0_116 = arith.constant 0 : index
      %c0_117 = arith.constant 0 : index
      %232 = vector.load %arg8[%c0_116, %c0_117] : memref<8x128xf32, #tpu.memory_space<vmem>>, vector<8x128xf32>
      tpu.vector_store %arg8[%c0_116, %c0_117], %51 {strides = array<i32>} : memref<8x128xf32, #tpu.memory_space<vmem>>, vector<8x128xf32>,
    } else {
    }
    %c2_i32 = arith.constant 2 : i32
    %c0_26 = arith.constant 0 : index
    %c0_27 = arith.constant 0 : index
    %59 = vector.load %arg7[%c0_26, %c0_27] : memref<8x128xf32, #tpu.memory_space<vmem>>, vector<8x128xf32>
    %c0_28 = arith.constant 0 : index
    %c0_29 = arith.constant 0 : index
    %60 = vector.load %arg8[%c0_28, %c0_29] : memref<8x128xf32, #tpu.memory_space<vmem>>, vector<8x128xf32>
    %c0_30 = arith.constant 0 : index
    %c0_31 = arith.constant 0 : index
    %c0_32 = arith.constant 0 : index
    %61 = vector.load %arg2[%c0_30, %c0_31, %c0_32] : memref<1x8x512xf32, #tpu.memory_space<vmem>>, vector<1x8x512xf32>
    %62 = vector.shape_cast %61 : vector<1x8x512xf32> to vector<8x512xf32>
    %c0_33 = arith.constant 0 : index
    %c0_34 = arith.constant 0 : index
    %63 = vector.load %arg3[%c0_33, %c0_34] : memref<128x512xf32, #tpu.memory_space<vmem>>, vector<128x512xf32>
    %cst_35 = arith.constant dense<0.000000e+00> : vector<8x512xf32>
    %64 = tpu.matmul %59, %63, %cst_35 {dimension_numbers = #tpu.dot_dimension_numbers<[1], [0], [0], [1], [0, 0, 1, 1], [], []>} : vector<8x128xf32>, vector<128x512xf32>, vector<8x512xf32> -> vector<8x512xf32>
    %65 = arith.addf %62, %64 : vector<8x512xf32>
    %66 = vector.extract_strided_slice %65 {offsets = [0, 0], sizes = [8, 384], strides = [1, 1]} : vector<8x512xf32> to vector<8x384xf32>
    %67 = arith.negf %66 : vector<8x384xf32>
    %68 = math.exp %67 : vector<8x384xf32>
    %cst_36 = arith.constant 1.000000e+00 : f32
    %69 = vector.broadcast %cst_36 : f32 to vector<8x384xf32>
    %70 = arith.addf %69, %68 : vector<8x384xf32>
    %71 = arith.divf %69, %70 : vector<8x384xf32>
    %72 = vector.extract_strided_slice %71 {offsets = [0, 0], sizes = [8, 128], strides = [1, 1]} : vector<8x384xf32> to vector<8x128xf32>
    %73 = vector.extract_strided_slice %71 {offsets = [0, 128], sizes = [8, 128], strides = [1, 1]} : vector<8x384xf32> to vector<8x128xf32>
    %74 = vector.extract_strided_slice %71 {offsets = [0, 256], sizes = [8, 128], strides = [1, 1]} : vector<8x384xf32> to vector<8x128xf32>
    %75 = vector.extract_strided_slice %65 {offsets = [0, 384], sizes = [8, 128], strides = [1, 1]} : vector<8x512xf32> to vector<8x128xf32>
    %76 = math.tanh %75 : vector<8x128xf32>
    %77 = arith.mulf %73, %60 : vector<8x128xf32>
    %78 = arith.mulf %72, %76 : vector<8x128xf32>
    %79 = arith.addf %77, %78 : vector<8x128xf32>
    %80 = math.tanh %79 : vector<8x128xf32>
    %81 = arith.mulf %74, %80 : vector<8x128xf32>
    %c8_i32_37 = arith.constant 8 : i32
    %82 = arith.muli %arg1, %c8_i32_37 : i32
    %83 = arith.addi %82, %c2_i32 : i32
    %c7_i32_38 = arith.constant 7 : i32
    %84 = arith.cmpi slt, %83, %c7_i32_38 : i32
    %85 = arith.extui %84 : i1 to i32
    %c0_i32_39 = arith.constant 0 : i32
    %86 = arith.cmpi ne, %85, %c0_i32_39 : i32
    scf.if %86 {
      %227 = arith.index_cast %c2_i32 : i32 to index
      %c0_112 = arith.constant 0 : index
      %c0_113 = arith.constant 0 : index
      %228 = vector.load %arg6[%227, %c0_112, %c0_113] : memref<8x8x128xf32, #tpu.memory_space<vmem>>, vector<1x8x128xf32>
      %229 = vector.shape_cast %228 : vector<1x8x128xf32> to vector<8x128xf32>
      %230 = vector.shape_cast %81 : vector<8x128xf32> to vector<1x8x128xf32>
      tpu.vector_store %arg6[%227, %c0_112, %c0_113], %230 {strides = array<i32>} : memref<8x8x128xf32, #tpu.memory_space<vmem>>, vector<1x8x128xf32>,
      %c0_114 = arith.constant 0 : index
      %c0_115 = arith.constant 0 : index
      %231 = vector.load %arg7[%c0_114, %c0_115] : memref<8x128xf32, #tpu.memory_space<vmem>>, vector<8x128xf32>
      tpu.vector_store %arg7[%c0_114, %c0_115], %81 {strides = array<i32>} : memref<8x128xf32, #tpu.memory_space<vmem>>, vector<8x128xf32>,
      %c0_116 = arith.constant 0 : index
      %c0_117 = arith.constant 0 : index
      %232 = vector.load %arg8[%c0_116, %c0_117] : memref<8x128xf32, #tpu.memory_space<vmem>>, vector<8x128xf32>
      tpu.vector_store %arg8[%c0_116, %c0_117], %79 {strides = array<i32>} : memref<8x128xf32, #tpu.memory_space<vmem>>, vector<8x128xf32>,
    } else {
    }
    %c3_i32 = arith.constant 3 : i32
    %c0_40 = arith.constant 0 : index
    %c0_41 = arith.constant 0 : index
    %87 = vector.load %arg7[%c0_40, %c0_41] : memref<8x128xf32, #tpu.memory_space<vmem>>, vector<8x128xf32>
    %c0_42 = arith.constant 0 : index
    %c0_43 = arith.constant 0 : index
    %88 = vector.load %arg8[%c0_42, %c0_43] : memref<8x128xf32, #tpu.memory_space<vmem>>, vector<8x128xf32>
    %c0_44 = arith.constant 0 : index
    %c0_45 = arith.constant 0 : index
    %c0_46 = arith.constant 0 : index
    %89 = vector.load %arg2[%c0_44, %c0_45, %c0_46] : memref<1x8x512xf32, #tpu.memory_space<vmem>>, vector<1x8x512xf32>
    %90 = vector.shape_cast %89 : vector<1x8x512xf32> to vector<8x512xf32>
    %c0_47 = arith.constant 0 : index
    %c0_48 = arith.constant 0 : index
    %91 = vector.load %arg3[%c0_47, %c0_48] : memref<128x512xf32, #tpu.memory_space<vmem>>, vector<128x512xf32>
    %cst_49 = arith.constant dense<0.000000e+00> : vector<8x512xf32>
    %92 = tpu.matmul %87, %91, %cst_49 {dimension_numbers = #tpu.dot_dimension_numbers<[1], [0], [0], [1], [0, 0, 1, 1], [], []>} : vector<8x128xf32>, vector<128x512xf32>, vector<8x512xf32> -> vector<8x512xf32>
    %93 = arith.addf %90, %92 : vector<8x512xf32>
    %94 = vector.extract_strided_slice %93 {offsets = [0, 0], sizes = [8, 384], strides = [1, 1]} : vector<8x512xf32> to vector<8x384xf32>
    %95 = arith.negf %94 : vector<8x384xf32>
    %96 = math.exp %95 : vector<8x384xf32>
    %cst_50 = arith.constant 1.000000e+00 : f32
    %97 = vector.broadcast %cst_50 : f32 to vector<8x384xf32>
    %98 = arith.addf %97, %96 : vector<8x384xf32>
    %99 = arith.divf %97, %98 : vector<8x384xf32>
    %100 = vector.extract_strided_slice %99 {offsets = [0, 0], sizes = [8, 128], strides = [1, 1]} : vector<8x384xf32> to vector<8x128xf32>
    %101 = vector.extract_strided_slice %99 {offsets = [0, 128], sizes = [8, 128], strides = [1, 1]} : vector<8x384xf32> to vector<8x128xf32>
    %102 = vector.extract_strided_slice %99 {offsets = [0, 256], sizes = [8, 128], strides = [1, 1]} : vector<8x384xf32> to vector<8x128xf32>
    %103 = vector.extract_strided_slice %93 {offsets = [0, 384], sizes = [8, 128], strides = [1, 1]} : vector<8x512xf32> to vector<8x128xf32>
    %104 = math.tanh %103 : vector<8x128xf32>
    %105 = arith.mulf %101, %88 : vector<8x128xf32>
    %106 = arith.mulf %100, %104 : vector<8x128xf32>
    %107 = arith.addf %105, %106 : vector<8x128xf32>
    %108 = math.tanh %107 : vector<8x128xf32>
    %109 = arith.mulf %102, %108 : vector<8x128xf32>
    %c8_i32_51 = arith.constant 8 : i32
    %110 = arith.muli %arg1, %c8_i32_51 : i32
    %111 = arith.addi %110, %c3_i32 : i32
    %c7_i32_52 = arith.constant 7 : i32
    %112 = arith.cmpi slt, %111, %c7_i32_52 : i32
    %113 = arith.extui %112 : i1 to i32
    %c0_i32_53 = arith.constant 0 : i32
    %114 = arith.cmpi ne, %113, %c0_i32_53 : i32
    scf.if %114 {
      %227 = arith.index_cast %c3_i32 : i32 to index
      %c0_112 = arith.constant 0 : index
      %c0_113 = arith.constant 0 : index
      %228 = vector.load %arg6[%227, %c0_112, %c0_113] : memref<8x8x128xf32, #tpu.memory_space<vmem>>, vector<1x8x128xf32>
      %229 = vector.shape_cast %228 : vector<1x8x128xf32> to vector<8x128xf32>
      %230 = vector.shape_cast %109 : vector<8x128xf32> to vector<1x8x128xf32>
      tpu.vector_store %arg6[%227, %c0_112, %c0_113], %230 {strides = array<i32>} : memref<8x8x128xf32, #tpu.memory_space<vmem>>, vector<1x8x128xf32>,
      %c0_114 = arith.constant 0 : index
      %c0_115 = arith.constant 0 : index
      %231 = vector.load %arg7[%c0_114, %c0_115] : memref<8x128xf32, #tpu.memory_space<vmem>>, vector<8x128xf32>
      tpu.vector_store %arg7[%c0_114, %c0_115], %109 {strides = array<i32>} : memref<8x128xf32, #tpu.memory_space<vmem>>, vector<8x128xf32>,
      %c0_116 = arith.constant 0 : index
      %c0_117 = arith.constant 0 : index
      %232 = vector.load %arg8[%c0_116, %c0_117] : memref<8x128xf32, #tpu.memory_space<vmem>>, vector<8x128xf32>
      tpu.vector_store %arg8[%c0_116, %c0_117], %107 {strides = array<i32>} : memref<8x128xf32, #tpu.memory_space<vmem>>, vector<8x128xf32>,
    } else {
    }
    %c4_i32 = arith.constant 4 : i32
    %c0_54 = arith.constant 0 : index
    %c0_55 = arith.constant 0 : index
    %115 = vector.load %arg7[%c0_54, %c0_55] : memref<8x128xf32, #tpu.memory_space<vmem>>, vector<8x128xf32>
    %c0_56 = arith.constant 0 : index
    %c0_57 = arith.constant 0 : index
    %116 = vector.load %arg8[%c0_56, %c0_57] : memref<8x128xf32, #tpu.memory_space<vmem>>, vector<8x128xf32>
    %c0_58 = arith.constant 0 : index
    %c0_59 = arith.constant 0 : index
    %c0_60 = arith.constant 0 : index
    %117 = vector.load %arg2[%c0_58, %c0_59, %c0_60] : memref<1x8x512xf32, #tpu.memory_space<vmem>>, vector<1x8x512xf32>
    %118 = vector.shape_cast %117 : vector<1x8x512xf32> to vector<8x512xf32>
    %c0_61 = arith.constant 0 : index
    %c0_62 = arith.constant 0 : index
    %119 = vector.load %arg3[%c0_61, %c0_62] : memref<128x512xf32, #tpu.memory_space<vmem>>, vector<128x512xf32>
    %cst_63 = arith.constant dense<0.000000e+00> : vector<8x512xf32>
    %120 = tpu.matmul %115, %119, %cst_63 {dimension_numbers = #tpu.dot_dimension_numbers<[1], [0], [0], [1], [0, 0, 1, 1], [], []>} : vector<8x128xf32>, vector<128x512xf32>, vector<8x512xf32> -> vector<8x512xf32>
    %121 = arith.addf %118, %120 : vector<8x512xf32>
    %122 = vector.extract_strided_slice %121 {offsets = [0, 0], sizes = [8, 384], strides = [1, 1]} : vector<8x512xf32> to vector<8x384xf32>
    %123 = arith.negf %122 : vector<8x384xf32>
    %124 = math.exp %123 : vector<8x384xf32>
    %cst_64 = arith.constant 1.000000e+00 : f32
    %125 = vector.broadcast %cst_64 : f32 to vector<8x384xf32>
    %126 = arith.addf %125, %124 : vector<8x384xf32>
    %127 = arith.divf %125, %126 : vector<8x384xf32>
    %128 = vector.extract_strided_slice %127 {offsets = [0, 0], sizes = [8, 128], strides = [1, 1]} : vector<8x384xf32> to vector<8x128xf32>
    %129 = vector.extract_strided_slice %127 {offsets = [0, 128], sizes = [8, 128], strides = [1, 1]} : vector<8x384xf32> to vector<8x128xf32>
    %130 = vector.extract_strided_slice %127 {offsets = [0, 256], sizes = [8, 128], strides = [1, 1]} : vector<8x384xf32> to vector<8x128xf32>
    %131 = vector.extract_strided_slice %121 {offsets = [0, 384], sizes = [8, 128], strides = [1, 1]} : vector<8x512xf32> to vector<8x128xf32>
    %132 = math.tanh %131 : vector<8x128xf32>
    %133 = arith.mulf %129, %116 : vector<8x128xf32>
    %134 = arith.mulf %128, %132 : vector<8x128xf32>
    %135 = arith.addf %133, %134 : vector<8x128xf32>
    %136 = math.tanh %135 : vector<8x128xf32>
    %137 = arith.mulf %130, %136 : vector<8x128xf32>
    %c8_i32_65 = arith.constant 8 : i32
    %138 = arith.muli %arg1, %c8_i32_65 : i32
    %139 = arith.addi %138, %c4_i32 : i32
    %c7_i32_66 = arith.constant 7 : i32
    %140 = arith.cmpi slt, %139, %c7_i32_66 : i32
    %141 = arith.extui %140 : i1 to i32
    %c0_i32_67 = arith.constant 0 : i32
    %142 = arith.cmpi ne, %141, %c0_i32_67 : i32
    scf.if %142 {
      %227 = arith.index_cast %c4_i32 : i32 to index
      %c0_112 = arith.constant 0 : index
      %c0_113 = arith.constant 0 : index
      %228 = vector.load %arg6[%227, %c0_112, %c0_113] : memref<8x8x128xf32, #tpu.memory_space<vmem>>, vector<1x8x128xf32>
      %229 = vector.shape_cast %228 : vector<1x8x128xf32> to vector<8x128xf32>
      %230 = vector.shape_cast %137 : vector<8x128xf32> to vector<1x8x128xf32>
      tpu.vector_store %arg6[%227, %c0_112, %c0_113], %230 {strides = array<i32>} : memref<8x8x128xf32, #tpu.memory_space<vmem>>, vector<1x8x128xf32>,
      %c0_114 = arith.constant 0 : index
      %c0_115 = arith.constant 0 : index
      %231 = vector.load %arg7[%c0_114, %c0_115] : memref<8x128xf32, #tpu.memory_space<vmem>>, vector<8x128xf32>
      tpu.vector_store %arg7[%c0_114, %c0_115], %137 {strides = array<i32>} : memref<8x128xf32, #tpu.memory_space<vmem>>, vector<8x128xf32>,
      %c0_116 = arith.constant 0 : index
      %c0_117 = arith.constant 0 : index
      %232 = vector.load %arg8[%c0_116, %c0_117] : memref<8x128xf32, #tpu.memory_space<vmem>>, vector<8x128xf32>
      tpu.vector_store %arg8[%c0_116, %c0_117], %135 {strides = array<i32>} : memref<8x128xf32, #tpu.memory_space<vmem>>, vector<8x128xf32>,
    } else {
    }
    %c5_i32 = arith.constant 5 : i32
    %c0_68 = arith.constant 0 : index
    %c0_69 = arith.constant 0 : index
    %143 = vector.load %arg7[%c0_68, %c0_69] : memref<8x128xf32, #tpu.memory_space<vmem>>, vector<8x128xf32>
    %c0_70 = arith.constant 0 : index
    %c0_71 = arith.constant 0 : index
    %144 = vector.load %arg8[%c0_70, %c0_71] : memref<8x128xf32, #tpu.memory_space<vmem>>, vector<8x128xf32>
    %c0_72 = arith.constant 0 : index
    %c0_73 = arith.constant 0 : index
    %c0_74 = arith.constant 0 : index
    %145 = vector.load %arg2[%c0_72, %c0_73, %c0_74] : memref<1x8x512xf32, #tpu.memory_space<vmem>>, vector<1x8x512xf32>
    %146 = vector.shape_cast %145 : vector<1x8x512xf32> to vector<8x512xf32>
    %c0_75 = arith.constant 0 : index
    %c0_76 = arith.constant 0 : index
    %147 = vector.load %arg3[%c0_75, %c0_76] : memref<128x512xf32, #tpu.memory_space<vmem>>, vector<128x512xf32>
    %cst_77 = arith.constant dense<0.000000e+00> : vector<8x512xf32>
    %148 = tpu.matmul %143, %147, %cst_77 {dimension_numbers = #tpu.dot_dimension_numbers<[1], [0], [0], [1], [0, 0, 1, 1], [], []>} : vector<8x128xf32>, vector<128x512xf32>, vector<8x512xf32> -> vector<8x512xf32>
    %149 = arith.addf %146, %148 : vector<8x512xf32>
    %150 = vector.extract_strided_slice %149 {offsets = [0, 0], sizes = [8, 384], strides = [1, 1]} : vector<8x512xf32> to vector<8x384xf32>
    %151 = arith.negf %150 : vector<8x384xf32>
    %152 = math.exp %151 : vector<8x384xf32>
    %cst_78 = arith.constant 1.000000e+00 : f32
    %153 = vector.broadcast %cst_78 : f32 to vector<8x384xf32>
    %154 = arith.addf %153, %152 : vector<8x384xf32>
    %155 = arith.divf %153, %154 : vector<8x384xf32>
    %156 = vector.extract_strided_slice %155 {offsets = [0, 0], sizes = [8, 128], strides = [1, 1]} : vector<8x384xf32> to vector<8x128xf32>
    %157 = vector.extract_strided_slice %155 {offsets = [0, 128], sizes = [8, 128], strides = [1, 1]} : vector<8x384xf32> to vector<8x128xf32>
    %158 = vector.extract_strided_slice %155 {offsets = [0, 256], sizes = [8, 128], strides = [1, 1]} : vector<8x384xf32> to vector<8x128xf32>
    %159 = vector.extract_strided_slice %149 {offsets = [0, 384], sizes = [8, 128], strides = [1, 1]} : vector<8x512xf32> to vector<8x128xf32>
    %160 = math.tanh %159 : vector<8x128xf32>
    %161 = arith.mulf %157, %144 : vector<8x128xf32>
    %162 = arith.mulf %156, %160 : vector<8x128xf32>
    %163 = arith.addf %161, %162 : vector<8x128xf32>
    %164 = math.tanh %163 : vector<8x128xf32>
    %165 = arith.mulf %158, %164 : vector<8x128xf32>
    %c8_i32_79 = arith.constant 8 : i32
    %166 = arith.muli %arg1, %c8_i32_79 : i32
    %167 = arith.addi %166, %c5_i32 : i32
    %c7_i32_80 = arith.constant 7 : i32
    %168 = arith.cmpi slt, %167, %c7_i32_80 : i32
    %169 = arith.extui %168 : i1 to i32
    %c0_i32_81 = arith.constant 0 : i32
    %170 = arith.cmpi ne, %169, %c0_i32_81 : i32
    scf.if %170 {
      %227 = arith.index_cast %c5_i32 : i32 to index
      %c0_112 = arith.constant 0 : index
      %c0_113 = arith.constant 0 : index
      %228 = vector.load %arg6[%227, %c0_112, %c0_113] : memref<8x8x128xf32, #tpu.memory_space<vmem>>, vector<1x8x128xf32>
      %229 = vector.shape_cast %228 : vector<1x8x128xf32> to vector<8x128xf32>
      %230 = vector.shape_cast %165 : vector<8x128xf32> to vector<1x8x128xf32>
      tpu.vector_store %arg6[%227, %c0_112, %c0_113], %230 {strides = array<i32>} : memref<8x8x128xf32, #tpu.memory_space<vmem>>, vector<1x8x128xf32>,
      %c0_114 = arith.constant 0 : index
      %c0_115 = arith.constant 0 : index
      %231 = vector.load %arg7[%c0_114, %c0_115] : memref<8x128xf32, #tpu.memory_space<vmem>>, vector<8x128xf32>
      tpu.vector_store %arg7[%c0_114, %c0_115], %165 {strides = array<i32>} : memref<8x128xf32, #tpu.memory_space<vmem>>, vector<8x128xf32>,
      %c0_116 = arith.constant 0 : index
      %c0_117 = arith.constant 0 : index
      %232 = vector.load %arg8[%c0_116, %c0_117] : memref<8x128xf32, #tpu.memory_space<vmem>>, vector<8x128xf32>
      tpu.vector_store %arg8[%c0_116, %c0_117], %163 {strides = array<i32>} : memref<8x128xf32, #tpu.memory_space<vmem>>, vector<8x128xf32>,
    } else {
    }
    %c6_i32 = arith.constant 6 : i32
    %c0_82 = arith.constant 0 : index
    %c0_83 = arith.constant 0 : index
    %171 = vector.load %arg7[%c0_82, %c0_83] : memref<8x128xf32, #tpu.memory_space<vmem>>, vector<8x128xf32>
    %c0_84 = arith.constant 0 : index
    %c0_85 = arith.constant 0 : index
    %172 = vector.load %arg8[%c0_84, %c0_85] : memref<8x128xf32, #tpu.memory_space<vmem>>, vector<8x128xf32>
    %c0_86 = arith.constant 0 : index
    %c0_87 = arith.constant 0 : index
    %c0_88 = arith.constant 0 : index
    %173 = vector.load %arg2[%c0_86, %c0_87, %c0_88] : memref<1x8x512xf32, #tpu.memory_space<vmem>>, vector<1x8x512xf32>
    %174 = vector.shape_cast %173 : vector<1x8x512xf32> to vector<8x512xf32>
    %c0_89 = arith.constant 0 : index
    %c0_90 = arith.constant 0 : index
    %175 = vector.load %arg3[%c0_89, %c0_90] : memref<128x512xf32, #tpu.memory_space<vmem>>, vector<128x512xf32>
    %cst_91 = arith.constant dense<0.000000e+00> : vector<8x512xf32>
    %176 = tpu.matmul %171, %175, %cst_91 {dimension_numbers = #tpu.dot_dimension_numbers<[1], [0], [0], [1], [0, 0, 1, 1], [], []>} : vector<8x128xf32>, vector<128x512xf32>, vector<8x512xf32> -> vector<8x512xf32>
    %177 = arith.addf %174, %176 : vector<8x512xf32>
    %178 = vector.extract_strided_slice %177 {offsets = [0, 0], sizes = [8, 384], strides = [1, 1]} : vector<8x512xf32> to vector<8x384xf32>
    %179 = arith.negf %178 : vector<8x384xf32>
    %180 = math.exp %179 : vector<8x384xf32>
    %cst_92 = arith.constant 1.000000e+00 : f32
    %181 = vector.broadcast %cst_92 : f32 to vector<8x384xf32>
    %182 = arith.addf %181, %180 : vector<8x384xf32>
    %183 = arith.divf %181, %182 : vector<8x384xf32>
    %184 = vector.extract_strided_slice %183 {offsets = [0, 0], sizes = [8, 128], strides = [1, 1]} : vector<8x384xf32> to vector<8x128xf32>
    %185 = vector.extract_strided_slice %183 {offsets = [0, 128], sizes = [8, 128], strides = [1, 1]} : vector<8x384xf32> to vector<8x128xf32>
    %186 = vector.extract_strided_slice %183 {offsets = [0, 256], sizes = [8, 128], strides = [1, 1]} : vector<8x384xf32> to vector<8x128xf32>
    %187 = vector.extract_strided_slice %177 {offsets = [0, 384], sizes = [8, 128], strides = [1, 1]} : vector<8x512xf32> to vector<8x128xf32>
    %188 = math.tanh %187 : vector<8x128xf32>
    %189 = arith.mulf %185, %172 : vector<8x128xf32>
    %190 = arith.mulf %184, %188 : vector<8x128xf32>
    %191 = arith.addf %189, %190 : vector<8x128xf32>
    %192 = math.tanh %191 : vector<8x128xf32>
    %193 = arith.mulf %186, %192 : vector<8x128xf32>
    %c8_i32_93 = arith.constant 8 : i32
    %194 = arith.muli %arg1, %c8_i32_93 : i32
    %195 = arith.addi %194, %c6_i32 : i32
    %c7_i32_94 = arith.constant 7 : i32
    %196 = arith.cmpi slt, %195, %c7_i32_94 : i32
    %197 = arith.extui %196 : i1 to i32
    %c0_i32_95 = arith.constant 0 : i32
    %198 = arith.cmpi ne, %197, %c0_i32_95 : i32
    scf.if %198 {
      %227 = arith.index_cast %c6_i32 : i32 to index
      %c0_112 = arith.constant 0 : index
      %c0_113 = arith.constant 0 : index
      %228 = vector.load %arg6[%227, %c0_112, %c0_113] : memref<8x8x128xf32, #tpu.memory_space<vmem>>, vector<1x8x128xf32>
      %229 = vector.shape_cast %228 : vector<1x8x128xf32> to vector<8x128xf32>
      %230 = vector.shape_cast %193 : vector<8x128xf32> to vector<1x8x128xf32>
      tpu.vector_store %arg6[%227, %c0_112, %c0_113], %230 {strides = array<i32>} : memref<8x8x128xf32, #tpu.memory_space<vmem>>, vector<1x8x128xf32>,
      %c0_114 = arith.constant 0 : index
      %c0_115 = arith.constant 0 : index
      %231 = vector.load %arg7[%c0_114, %c0_115] : memref<8x128xf32, #tpu.memory_space<vmem>>, vector<8x128xf32>
      tpu.vector_store %arg7[%c0_114, %c0_115], %193 {strides = array<i32>} : memref<8x128xf32, #tpu.memory_space<vmem>>, vector<8x128xf32>,
      %c0_116 = arith.constant 0 : index
      %c0_117 = arith.constant 0 : index
      %232 = vector.load %arg8[%c0_116, %c0_117] : memref<8x128xf32, #tpu.memory_space<vmem>>, vector<8x128xf32>
      tpu.vector_store %arg8[%c0_116, %c0_117], %191 {strides = array<i32>} : memref<8x128xf32, #tpu.memory_space<vmem>>, vector<8x128xf32>,
    } else {
    }
    %c7_i32_96 = arith.constant 7 : i32
    %c0_97 = arith.constant 0 : index
    %c0_98 = arith.constant 0 : index
    %199 = vector.load %arg7[%c0_97, %c0_98] : memref<8x128xf32, #tpu.memory_space<vmem>>, vector<8x128xf32>
    %c0_99 = arith.constant 0 : index
    %c0_100 = arith.constant 0 : index
    %200 = vector.load %arg8[%c0_99, %c0_100] : memref<8x128xf32, #tpu.memory_space<vmem>>, vector<8x128xf32>
    %c0_101 = arith.constant 0 : index
    %c0_102 = arith.constant 0 : index
    %c0_103 = arith.constant 0 : index
    %201 = vector.load %arg2[%c0_101, %c0_102, %c0_103] : memref<1x8x512xf32, #tpu.memory_space<vmem>>, vector<1x8x512xf32>
    %202 = vector.shape_cast %201 : vector<1x8x512xf32> to vector<8x512xf32>
    %c0_104 = arith.constant 0 : index
    %c0_105 = arith.constant 0 : index
    %203 = vector.load %arg3[%c0_104, %c0_105] : memref<128x512xf32, #tpu.memory_space<vmem>>, vector<128x512xf32>
    %cst_106 = arith.constant dense<0.000000e+00> : vector<8x512xf32>
    %204 = tpu.matmul %199, %203, %cst_106 {dimension_numbers = #tpu.dot_dimension_numbers<[1], [0], [0], [1], [0, 0, 1, 1], [], []>} : vector<8x128xf32>, vector<128x512xf32>, vector<8x512xf32> -> vector<8x512xf32>
    %205 = arith.addf %202, %204 : vector<8x512xf32>
    %206 = vector.extract_strided_slice %205 {offsets = [0, 0], sizes = [8, 384], strides = [1, 1]} : vector<8x512xf32> to vector<8x384xf32>
    %207 = arith.negf %206 : vector<8x384xf32>
    %208 = math.exp %207 : vector<8x384xf32>
    %cst_107 = arith.constant 1.000000e+00 : f32
    %209 = vector.broadcast %cst_107 : f32 to vector<8x384xf32>
    %210 = arith.addf %209, %208 : vector<8x384xf32>
    %211 = arith.divf %209, %210 : vector<8x384xf32>
    %212 = vector.extract_strided_slice %211 {offsets = [0, 0], sizes = [8, 128], strides = [1, 1]} : vector<8x384xf32> to vector<8x128xf32>
    %213 = vector.extract_strided_slice %211 {offsets = [0, 128], sizes = [8, 128], strides = [1, 1]} : vector<8x384xf32> to vector<8x128xf32>
    %214 = vector.extract_strided_slice %211 {offsets = [0, 256], sizes = [8, 128], strides = [1, 1]} : vector<8x384xf32> to vector<8x128xf32>
    %215 = vector.extract_strided_slice %205 {offsets = [0, 384], sizes = [8, 128], strides = [1, 1]} : vector<8x512xf32> to vector<8x128xf32>
    %216 = math.tanh %215 : vector<8x128xf32>
    %217 = arith.mulf %213, %200 : vector<8x128xf32>
    %218 = arith.mulf %212, %216 : vector<8x128xf32>
    %219 = arith.addf %217, %218 : vector<8x128xf32>
    %220 = math.tanh %219 : vector<8x128xf32>
    %221 = arith.mulf %214, %220 : vector<8x128xf32>
    %c8_i32_108 = arith.constant 8 : i32
    %222 = arith.muli %arg1, %c8_i32_108 : i32
    %223 = arith.addi %222, %c7_i32_96 : i32
    %c7_i32_109 = arith.constant 7 : i32
    %224 = arith.cmpi slt, %223, %c7_i32_109 : i32
    %225 = arith.extui %224 : i1 to i32
    %c0_i32_110 = arith.constant 0 : i32
    %226 = arith.cmpi ne, %225, %c0_i32_110 : i32
    scf.if %226 {
      %227 = arith.index_cast %c7_i32_96 : i32 to index
      %c0_112 = arith.constant 0 : index
      %c0_113 = arith.constant 0 : index
      %228 = vector.load %arg6[%227, %c0_112, %c0_113] : memref<8x8x128xf32, #tpu.memory_space<vmem>>, vector<1x8x128xf32>
      %229 = vector.shape_cast %228 : vector<1x8x128xf32> to vector<8x128xf32>
      %230 = vector.shape_cast %221 : vector<8x128xf32> to vector<1x8x128xf32>
      tpu.vector_store %arg6[%227, %c0_112, %c0_113], %230 {strides = array<i32>} : memref<8x8x128xf32, #tpu.memory_space<vmem>>, vector<1x8x128xf32>,
      %c0_114 = arith.constant 0 : index
      %c0_115 = arith.constant 0 : index
      %231 = vector.load %arg7[%c0_114, %c0_115] : memref<8x128xf32, #tpu.memory_space<vmem>>, vector<8x128xf32>
      tpu.vector_store %arg7[%c0_114, %c0_115], %221 {strides = array<i32>} : memref<8x128xf32, #tpu.memory_space<vmem>>, vector<8x128xf32>,
      %c0_116 = arith.constant 0 : index
      %c0_117 = arith.constant 0 : index
      %232 = vector.load %arg8[%c0_116, %c0_117] : memref<8x128xf32, #tpu.memory_space<vmem>>, vector<8x128xf32>
      tpu.vector_store %arg8[%c0_116, %c0_117], %219 {strides = array<i32>} : memref<8x128xf32, #tpu.memory_space<vmem>>, vector<8x128xf32>,
    } else {
    }
    %c8_i32_111 = arith.constant 8 : i32
    return
  }
  func.func @transform_0(%arg0: i32, %arg1: i32) -> (i32, i32, i32) {
    %c0_i32 = arith.constant 0 : i32
    %c0_i32_0 = arith.constant 0 : i32
    %c0_i32_1 = arith.constant 0 : i32
    return %c0_i32, %arg0, %c0_i32_0 : i32, i32, i32
  }
  func.func @transform_1(%arg0: i32, %arg1: i32) -> (i32, i32) {
    %c0_i32 = arith.constant 0 : i32
    %c0_i32_0 = arith.constant 0 : i32
    %c0_i32_1 = arith.constant 0 : i32
    return %c0_i32, %c0_i32_0 : i32, i32
  }
  func.func @transform_2(%arg0: i32, %arg1: i32) -> (i32, i32) {
    %c0_i32 = arith.constant 0 : i32
    %c0_i32_0 = arith.constant 0 : i32
    return %arg0, %c0_i32 : i32, i32
  }
  func.func @transform_3(%arg0: i32, %arg1: i32) -> (i32, i32) {
    %c0_i32 = arith.constant 0 : i32
    %c0_i32_0 = arith.constant 0 : i32
    return %arg0, %c0_i32 : i32, i32
  }
  func.func @transform_4(%arg0: i32, %arg1: i32) -> (i32, i32, i32) {
    %c0_i32 = arith.constant 0 : i32
    %c0_i32_0 = arith.constant 0 : i32
    return %arg1, %arg0, %c0_i32 : i32, i32, i32
  }
  func.func @transform_5(%arg0: i32, %arg1: i32) -> (i32, i32) {
    %c0_i32 = arith.constant 0 : i32
    %c0_i32_0 = arith.constant 0 : i32
    return %arg0, %c0_i32 : i32, i32
  }
  func.func @transform_6(%arg0: i32, %arg1: i32) -> (i32, i32) {
    %c0_i32 = arith.constant 0 : i32
    %c0_i32_0 = arith.constant 0 : i32
    return %arg0, %c0_i32 : i32, i32
  }
}

module attributes {stable_mosaic.version = 11 : i64} {
  func.func @_lstm_layer_kernel(%arg0: i32, %arg1: i32, %arg2: memref<8x8x512xf32, #tpu.memory_space<vmem>>, %arg3: memref<128x512xf32, #tpu.memory_space<vmem>>, %arg4: memref<8x128xf32, #tpu.memory_space<vmem>>, %arg5: memref<8x128xf32, #tpu.memory_space<vmem>>, %arg6: memref<8x8x128xf32, #tpu.memory_space<vmem>>, %arg7: memref<8x128xf32, #tpu.memory_space<vmem>>, %arg8: memref<8x128xf32, #tpu.memory_space<vmem>>) attributes {dimension_semantics = [#tpu.dimension_semantics<parallel>, #tpu.dimension_semantics<arbitrary>], iteration_bounds = array<i64: 1, 1>, scalar_prefetch = 0 : i64, scratch_operands = 0 : i64, tpu.core_type = #tpu.core_type<tc>, window_params = [{transform_indices = @transform_0, window_bounds = array<i64: 8, 8, 512>}, {pipeline_mode = #tpu.pipeline_mode<synchronous>, transform_indices = @transform_1, window_bounds = array<i64: 128, 512>}, {transform_indices = @transform_2, window_bounds = array<i64: 8, 128>}, {transform_indices = @transform_3, window_bounds = array<i64: 8, 128>}, {transform_indices = @transform_4, window_bounds = array<i64: 8, 8, 128>}, {transform_indices = @transform_5, window_bounds = array<i64: 8, 128>}, {transform_indices = @transform_6, window_bounds = array<i64: 8, 128>}]} {
    %c0_i32 = arith.constant 0 : i32
    %0 = arith.cmpi eq, %arg1, %c0_i32 : i32
    %1 = arith.extui %0 : i1 to i32
    %c0_i32_0 = arith.constant 0 : i32
    %2 = arith.cmpi ne, %1, %c0_i32_0 : i32
    scf.if %2 {
      %c0_128 = arith.constant 0 : index
      %c0_129 = arith.constant 0 : index
      %243 = vector.load %arg4[%c0_128, %c0_129] : memref<8x128xf32, #tpu.memory_space<vmem>>, vector<8x128xf32>
      %c0_130 = arith.constant 0 : index
      %c0_131 = arith.constant 0 : index
      %244 = vector.load %arg7[%c0_130, %c0_131] : memref<8x128xf32, #tpu.memory_space<vmem>>, vector<8x128xf32>
      tpu.vector_store %arg7[%c0_130, %c0_131], %243 {strides = array<i32>} : memref<8x128xf32, #tpu.memory_space<vmem>>, vector<8x128xf32>,
      %c0_132 = arith.constant 0 : index
      %c0_133 = arith.constant 0 : index
      %245 = vector.load %arg5[%c0_132, %c0_133] : memref<8x128xf32, #tpu.memory_space<vmem>>, vector<8x128xf32>
      %c0_134 = arith.constant 0 : index
      %c0_135 = arith.constant 0 : index
      %246 = vector.load %arg8[%c0_134, %c0_135] : memref<8x128xf32, #tpu.memory_space<vmem>>, vector<8x128xf32>
      tpu.vector_store %arg8[%c0_134, %c0_135], %245 {strides = array<i32>} : memref<8x128xf32, #tpu.memory_space<vmem>>, vector<8x128xf32>,
    } else {
    }
    %c0_i32_1 = arith.constant 0 : i32
    %c0 = arith.constant 0 : index
    %c0_2 = arith.constant 0 : index
    %3 = vector.load %arg7[%c0, %c0_2] : memref<8x128xf32, #tpu.memory_space<vmem>>, vector<8x128xf32>
    %c0_3 = arith.constant 0 : index
    %c0_4 = arith.constant 0 : index
    %4 = vector.load %arg8[%c0_3, %c0_4] : memref<8x128xf32, #tpu.memory_space<vmem>>, vector<8x128xf32>
    %5 = arith.index_cast %c0_i32_1 : i32 to index
    %c0_5 = arith.constant 0 : index
    %c0_6 = arith.constant 0 : index
    %6 = vector.load %arg2[%5, %c0_5, %c0_6] : memref<8x8x512xf32, #tpu.memory_space<vmem>>, vector<1x8x512xf32>
    %7 = vector.shape_cast %6 : vector<1x8x512xf32> to vector<8x512xf32>
    %c0_7 = arith.constant 0 : index
    %c0_8 = arith.constant 0 : index
    %8 = vector.load %arg3[%c0_7, %c0_8] : memref<128x512xf32, #tpu.memory_space<vmem>>, vector<128x512xf32>
    %cst = arith.constant dense<0.000000e+00> : vector<8x512xf32>
    %9 = tpu.matmul %3, %8, %cst {dimension_numbers = #tpu.dot_dimension_numbers<[1], [0], [0], [1], [0, 0, 1, 1], [], []>} : vector<8x128xf32>, vector<128x512xf32>, vector<8x512xf32> -> vector<8x512xf32>
    %10 = arith.addf %7, %9 : vector<8x512xf32>
    %11 = vector.extract_strided_slice %10 {offsets = [0, 0], sizes = [8, 384], strides = [1, 1]} : vector<8x512xf32> to vector<8x384xf32>
    %12 = arith.negf %11 : vector<8x384xf32>
    %13 = math.exp %12 : vector<8x384xf32>
    %cst_9 = arith.constant 1.000000e+00 : f32
    %14 = vector.broadcast %cst_9 : f32 to vector<8x384xf32>
    %15 = arith.addf %14, %13 : vector<8x384xf32>
    %16 = arith.divf %14, %15 : vector<8x384xf32>
    %17 = vector.extract_strided_slice %16 {offsets = [0, 0], sizes = [8, 128], strides = [1, 1]} : vector<8x384xf32> to vector<8x128xf32>
    %18 = vector.extract_strided_slice %16 {offsets = [0, 128], sizes = [8, 128], strides = [1, 1]} : vector<8x384xf32> to vector<8x128xf32>
    %19 = vector.extract_strided_slice %16 {offsets = [0, 256], sizes = [8, 128], strides = [1, 1]} : vector<8x384xf32> to vector<8x128xf32>
    %20 = vector.extract_strided_slice %10 {offsets = [0, 384], sizes = [8, 128], strides = [1, 1]} : vector<8x512xf32> to vector<8x128xf32>
    %21 = math.tanh %20 : vector<8x128xf32>
    %22 = arith.mulf %18, %4 : vector<8x128xf32>
    %23 = arith.mulf %17, %21 : vector<8x128xf32>
    %24 = arith.addf %22, %23 : vector<8x128xf32>
    %25 = math.tanh %24 : vector<8x128xf32>
    %26 = arith.mulf %19, %25 : vector<8x128xf32>
    %27 = arith.index_cast %c0_i32_1 : i32 to index
    %c0_10 = arith.constant 0 : index
    %c0_11 = arith.constant 0 : index
    %28 = vector.load %arg6[%27, %c0_10, %c0_11] : memref<8x8x128xf32, #tpu.memory_space<vmem>>, vector<1x8x128xf32>
    %29 = vector.shape_cast %28 : vector<1x8x128xf32> to vector<8x128xf32>
    %30 = vector.shape_cast %26 : vector<8x128xf32> to vector<1x8x128xf32>
    tpu.vector_store %arg6[%27, %c0_10, %c0_11], %30 {strides = array<i32>} : memref<8x8x128xf32, #tpu.memory_space<vmem>>, vector<1x8x128xf32>,
    %c0_12 = arith.constant 0 : index
    %c0_13 = arith.constant 0 : index
    %31 = vector.load %arg7[%c0_12, %c0_13] : memref<8x128xf32, #tpu.memory_space<vmem>>, vector<8x128xf32>
    tpu.vector_store %arg7[%c0_12, %c0_13], %26 {strides = array<i32>} : memref<8x128xf32, #tpu.memory_space<vmem>>, vector<8x128xf32>,
    %c0_14 = arith.constant 0 : index
    %c0_15 = arith.constant 0 : index
    %32 = vector.load %arg8[%c0_14, %c0_15] : memref<8x128xf32, #tpu.memory_space<vmem>>, vector<8x128xf32>
    tpu.vector_store %arg8[%c0_14, %c0_15], %24 {strides = array<i32>} : memref<8x128xf32, #tpu.memory_space<vmem>>, vector<8x128xf32>,
    %c1_i32 = arith.constant 1 : i32
    %c0_16 = arith.constant 0 : index
    %c0_17 = arith.constant 0 : index
    %33 = vector.load %arg7[%c0_16, %c0_17] : memref<8x128xf32, #tpu.memory_space<vmem>>, vector<8x128xf32>
    %c0_18 = arith.constant 0 : index
    %c0_19 = arith.constant 0 : index
    %34 = vector.load %arg8[%c0_18, %c0_19] : memref<8x128xf32, #tpu.memory_space<vmem>>, vector<8x128xf32>
    %35 = arith.index_cast %c1_i32 : i32 to index
    %c0_20 = arith.constant 0 : index
    %c0_21 = arith.constant 0 : index
    %36 = vector.load %arg2[%35, %c0_20, %c0_21] : memref<8x8x512xf32, #tpu.memory_space<vmem>>, vector<1x8x512xf32>
    %37 = vector.shape_cast %36 : vector<1x8x512xf32> to vector<8x512xf32>
    %c0_22 = arith.constant 0 : index
    %c0_23 = arith.constant 0 : index
    %38 = vector.load %arg3[%c0_22, %c0_23] : memref<128x512xf32, #tpu.memory_space<vmem>>, vector<128x512xf32>
    %cst_24 = arith.constant dense<0.000000e+00> : vector<8x512xf32>
    %39 = tpu.matmul %33, %38, %cst_24 {dimension_numbers = #tpu.dot_dimension_numbers<[1], [0], [0], [1], [0, 0, 1, 1], [], []>} : vector<8x128xf32>, vector<128x512xf32>, vector<8x512xf32> -> vector<8x512xf32>
    %40 = arith.addf %37, %39 : vector<8x512xf32>
    %41 = vector.extract_strided_slice %40 {offsets = [0, 0], sizes = [8, 384], strides = [1, 1]} : vector<8x512xf32> to vector<8x384xf32>
    %42 = arith.negf %41 : vector<8x384xf32>
    %43 = math.exp %42 : vector<8x384xf32>
    %cst_25 = arith.constant 1.000000e+00 : f32
    %44 = vector.broadcast %cst_25 : f32 to vector<8x384xf32>
    %45 = arith.addf %44, %43 : vector<8x384xf32>
    %46 = arith.divf %44, %45 : vector<8x384xf32>
    %47 = vector.extract_strided_slice %46 {offsets = [0, 0], sizes = [8, 128], strides = [1, 1]} : vector<8x384xf32> to vector<8x128xf32>
    %48 = vector.extract_strided_slice %46 {offsets = [0, 128], sizes = [8, 128], strides = [1, 1]} : vector<8x384xf32> to vector<8x128xf32>
    %49 = vector.extract_strided_slice %46 {offsets = [0, 256], sizes = [8, 128], strides = [1, 1]} : vector<8x384xf32> to vector<8x128xf32>
    %50 = vector.extract_strided_slice %40 {offsets = [0, 384], sizes = [8, 128], strides = [1, 1]} : vector<8x512xf32> to vector<8x128xf32>
    %51 = math.tanh %50 : vector<8x128xf32>
    %52 = arith.mulf %48, %34 : vector<8x128xf32>
    %53 = arith.mulf %47, %51 : vector<8x128xf32>
    %54 = arith.addf %52, %53 : vector<8x128xf32>
    %55 = math.tanh %54 : vector<8x128xf32>
    %56 = arith.mulf %49, %55 : vector<8x128xf32>
    %57 = arith.index_cast %c1_i32 : i32 to index
    %c0_26 = arith.constant 0 : index
    %c0_27 = arith.constant 0 : index
    %58 = vector.load %arg6[%57, %c0_26, %c0_27] : memref<8x8x128xf32, #tpu.memory_space<vmem>>, vector<1x8x128xf32>
    %59 = vector.shape_cast %58 : vector<1x8x128xf32> to vector<8x128xf32>
    %60 = vector.shape_cast %56 : vector<8x128xf32> to vector<1x8x128xf32>
    tpu.vector_store %arg6[%57, %c0_26, %c0_27], %60 {strides = array<i32>} : memref<8x8x128xf32, #tpu.memory_space<vmem>>, vector<1x8x128xf32>,
    %c0_28 = arith.constant 0 : index
    %c0_29 = arith.constant 0 : index
    %61 = vector.load %arg7[%c0_28, %c0_29] : memref<8x128xf32, #tpu.memory_space<vmem>>, vector<8x128xf32>
    tpu.vector_store %arg7[%c0_28, %c0_29], %56 {strides = array<i32>} : memref<8x128xf32, #tpu.memory_space<vmem>>, vector<8x128xf32>,
    %c0_30 = arith.constant 0 : index
    %c0_31 = arith.constant 0 : index
    %62 = vector.load %arg8[%c0_30, %c0_31] : memref<8x128xf32, #tpu.memory_space<vmem>>, vector<8x128xf32>
    tpu.vector_store %arg8[%c0_30, %c0_31], %54 {strides = array<i32>} : memref<8x128xf32, #tpu.memory_space<vmem>>, vector<8x128xf32>,
    %c2_i32 = arith.constant 2 : i32
    %c0_32 = arith.constant 0 : index
    %c0_33 = arith.constant 0 : index
    %63 = vector.load %arg7[%c0_32, %c0_33] : memref<8x128xf32, #tpu.memory_space<vmem>>, vector<8x128xf32>
    %c0_34 = arith.constant 0 : index
    %c0_35 = arith.constant 0 : index
    %64 = vector.load %arg8[%c0_34, %c0_35] : memref<8x128xf32, #tpu.memory_space<vmem>>, vector<8x128xf32>
    %65 = arith.index_cast %c2_i32 : i32 to index
    %c0_36 = arith.constant 0 : index
    %c0_37 = arith.constant 0 : index
    %66 = vector.load %arg2[%65, %c0_36, %c0_37] : memref<8x8x512xf32, #tpu.memory_space<vmem>>, vector<1x8x512xf32>
    %67 = vector.shape_cast %66 : vector<1x8x512xf32> to vector<8x512xf32>
    %c0_38 = arith.constant 0 : index
    %c0_39 = arith.constant 0 : index
    %68 = vector.load %arg3[%c0_38, %c0_39] : memref<128x512xf32, #tpu.memory_space<vmem>>, vector<128x512xf32>
    %cst_40 = arith.constant dense<0.000000e+00> : vector<8x512xf32>
    %69 = tpu.matmul %63, %68, %cst_40 {dimension_numbers = #tpu.dot_dimension_numbers<[1], [0], [0], [1], [0, 0, 1, 1], [], []>} : vector<8x128xf32>, vector<128x512xf32>, vector<8x512xf32> -> vector<8x512xf32>
    %70 = arith.addf %67, %69 : vector<8x512xf32>
    %71 = vector.extract_strided_slice %70 {offsets = [0, 0], sizes = [8, 384], strides = [1, 1]} : vector<8x512xf32> to vector<8x384xf32>
    %72 = arith.negf %71 : vector<8x384xf32>
    %73 = math.exp %72 : vector<8x384xf32>
    %cst_41 = arith.constant 1.000000e+00 : f32
    %74 = vector.broadcast %cst_41 : f32 to vector<8x384xf32>
    %75 = arith.addf %74, %73 : vector<8x384xf32>
    %76 = arith.divf %74, %75 : vector<8x384xf32>
    %77 = vector.extract_strided_slice %76 {offsets = [0, 0], sizes = [8, 128], strides = [1, 1]} : vector<8x384xf32> to vector<8x128xf32>
    %78 = vector.extract_strided_slice %76 {offsets = [0, 128], sizes = [8, 128], strides = [1, 1]} : vector<8x384xf32> to vector<8x128xf32>
    %79 = vector.extract_strided_slice %76 {offsets = [0, 256], sizes = [8, 128], strides = [1, 1]} : vector<8x384xf32> to vector<8x128xf32>
    %80 = vector.extract_strided_slice %70 {offsets = [0, 384], sizes = [8, 128], strides = [1, 1]} : vector<8x512xf32> to vector<8x128xf32>
    %81 = math.tanh %80 : vector<8x128xf32>
    %82 = arith.mulf %78, %64 : vector<8x128xf32>
    %83 = arith.mulf %77, %81 : vector<8x128xf32>
    %84 = arith.addf %82, %83 : vector<8x128xf32>
    %85 = math.tanh %84 : vector<8x128xf32>
    %86 = arith.mulf %79, %85 : vector<8x128xf32>
    %87 = arith.index_cast %c2_i32 : i32 to index
    %c0_42 = arith.constant 0 : index
    %c0_43 = arith.constant 0 : index
    %88 = vector.load %arg6[%87, %c0_42, %c0_43] : memref<8x8x128xf32, #tpu.memory_space<vmem>>, vector<1x8x128xf32>
    %89 = vector.shape_cast %88 : vector<1x8x128xf32> to vector<8x128xf32>
    %90 = vector.shape_cast %86 : vector<8x128xf32> to vector<1x8x128xf32>
    tpu.vector_store %arg6[%87, %c0_42, %c0_43], %90 {strides = array<i32>} : memref<8x8x128xf32, #tpu.memory_space<vmem>>, vector<1x8x128xf32>,
    %c0_44 = arith.constant 0 : index
    %c0_45 = arith.constant 0 : index
    %91 = vector.load %arg7[%c0_44, %c0_45] : memref<8x128xf32, #tpu.memory_space<vmem>>, vector<8x128xf32>
    tpu.vector_store %arg7[%c0_44, %c0_45], %86 {strides = array<i32>} : memref<8x128xf32, #tpu.memory_space<vmem>>, vector<8x128xf32>,
    %c0_46 = arith.constant 0 : index
    %c0_47 = arith.constant 0 : index
    %92 = vector.load %arg8[%c0_46, %c0_47] : memref<8x128xf32, #tpu.memory_space<vmem>>, vector<8x128xf32>
    tpu.vector_store %arg8[%c0_46, %c0_47], %84 {strides = array<i32>} : memref<8x128xf32, #tpu.memory_space<vmem>>, vector<8x128xf32>,
    %c3_i32 = arith.constant 3 : i32
    %c0_48 = arith.constant 0 : index
    %c0_49 = arith.constant 0 : index
    %93 = vector.load %arg7[%c0_48, %c0_49] : memref<8x128xf32, #tpu.memory_space<vmem>>, vector<8x128xf32>
    %c0_50 = arith.constant 0 : index
    %c0_51 = arith.constant 0 : index
    %94 = vector.load %arg8[%c0_50, %c0_51] : memref<8x128xf32, #tpu.memory_space<vmem>>, vector<8x128xf32>
    %95 = arith.index_cast %c3_i32 : i32 to index
    %c0_52 = arith.constant 0 : index
    %c0_53 = arith.constant 0 : index
    %96 = vector.load %arg2[%95, %c0_52, %c0_53] : memref<8x8x512xf32, #tpu.memory_space<vmem>>, vector<1x8x512xf32>
    %97 = vector.shape_cast %96 : vector<1x8x512xf32> to vector<8x512xf32>
    %c0_54 = arith.constant 0 : index
    %c0_55 = arith.constant 0 : index
    %98 = vector.load %arg3[%c0_54, %c0_55] : memref<128x512xf32, #tpu.memory_space<vmem>>, vector<128x512xf32>
    %cst_56 = arith.constant dense<0.000000e+00> : vector<8x512xf32>
    %99 = tpu.matmul %93, %98, %cst_56 {dimension_numbers = #tpu.dot_dimension_numbers<[1], [0], [0], [1], [0, 0, 1, 1], [], []>} : vector<8x128xf32>, vector<128x512xf32>, vector<8x512xf32> -> vector<8x512xf32>
    %100 = arith.addf %97, %99 : vector<8x512xf32>
    %101 = vector.extract_strided_slice %100 {offsets = [0, 0], sizes = [8, 384], strides = [1, 1]} : vector<8x512xf32> to vector<8x384xf32>
    %102 = arith.negf %101 : vector<8x384xf32>
    %103 = math.exp %102 : vector<8x384xf32>
    %cst_57 = arith.constant 1.000000e+00 : f32
    %104 = vector.broadcast %cst_57 : f32 to vector<8x384xf32>
    %105 = arith.addf %104, %103 : vector<8x384xf32>
    %106 = arith.divf %104, %105 : vector<8x384xf32>
    %107 = vector.extract_strided_slice %106 {offsets = [0, 0], sizes = [8, 128], strides = [1, 1]} : vector<8x384xf32> to vector<8x128xf32>
    %108 = vector.extract_strided_slice %106 {offsets = [0, 128], sizes = [8, 128], strides = [1, 1]} : vector<8x384xf32> to vector<8x128xf32>
    %109 = vector.extract_strided_slice %106 {offsets = [0, 256], sizes = [8, 128], strides = [1, 1]} : vector<8x384xf32> to vector<8x128xf32>
    %110 = vector.extract_strided_slice %100 {offsets = [0, 384], sizes = [8, 128], strides = [1, 1]} : vector<8x512xf32> to vector<8x128xf32>
    %111 = math.tanh %110 : vector<8x128xf32>
    %112 = arith.mulf %108, %94 : vector<8x128xf32>
    %113 = arith.mulf %107, %111 : vector<8x128xf32>
    %114 = arith.addf %112, %113 : vector<8x128xf32>
    %115 = math.tanh %114 : vector<8x128xf32>
    %116 = arith.mulf %109, %115 : vector<8x128xf32>
    %117 = arith.index_cast %c3_i32 : i32 to index
    %c0_58 = arith.constant 0 : index
    %c0_59 = arith.constant 0 : index
    %118 = vector.load %arg6[%117, %c0_58, %c0_59] : memref<8x8x128xf32, #tpu.memory_space<vmem>>, vector<1x8x128xf32>
    %119 = vector.shape_cast %118 : vector<1x8x128xf32> to vector<8x128xf32>
    %120 = vector.shape_cast %116 : vector<8x128xf32> to vector<1x8x128xf32>
    tpu.vector_store %arg6[%117, %c0_58, %c0_59], %120 {strides = array<i32>} : memref<8x8x128xf32, #tpu.memory_space<vmem>>, vector<1x8x128xf32>,
    %c0_60 = arith.constant 0 : index
    %c0_61 = arith.constant 0 : index
    %121 = vector.load %arg7[%c0_60, %c0_61] : memref<8x128xf32, #tpu.memory_space<vmem>>, vector<8x128xf32>
    tpu.vector_store %arg7[%c0_60, %c0_61], %116 {strides = array<i32>} : memref<8x128xf32, #tpu.memory_space<vmem>>, vector<8x128xf32>,
    %c0_62 = arith.constant 0 : index
    %c0_63 = arith.constant 0 : index
    %122 = vector.load %arg8[%c0_62, %c0_63] : memref<8x128xf32, #tpu.memory_space<vmem>>, vector<8x128xf32>
    tpu.vector_store %arg8[%c0_62, %c0_63], %114 {strides = array<i32>} : memref<8x128xf32, #tpu.memory_space<vmem>>, vector<8x128xf32>,
    %c4_i32 = arith.constant 4 : i32
    %c0_64 = arith.constant 0 : index
    %c0_65 = arith.constant 0 : index
    %123 = vector.load %arg7[%c0_64, %c0_65] : memref<8x128xf32, #tpu.memory_space<vmem>>, vector<8x128xf32>
    %c0_66 = arith.constant 0 : index
    %c0_67 = arith.constant 0 : index
    %124 = vector.load %arg8[%c0_66, %c0_67] : memref<8x128xf32, #tpu.memory_space<vmem>>, vector<8x128xf32>
    %125 = arith.index_cast %c4_i32 : i32 to index
    %c0_68 = arith.constant 0 : index
    %c0_69 = arith.constant 0 : index
    %126 = vector.load %arg2[%125, %c0_68, %c0_69] : memref<8x8x512xf32, #tpu.memory_space<vmem>>, vector<1x8x512xf32>
    %127 = vector.shape_cast %126 : vector<1x8x512xf32> to vector<8x512xf32>
    %c0_70 = arith.constant 0 : index
    %c0_71 = arith.constant 0 : index
    %128 = vector.load %arg3[%c0_70, %c0_71] : memref<128x512xf32, #tpu.memory_space<vmem>>, vector<128x512xf32>
    %cst_72 = arith.constant dense<0.000000e+00> : vector<8x512xf32>
    %129 = tpu.matmul %123, %128, %cst_72 {dimension_numbers = #tpu.dot_dimension_numbers<[1], [0], [0], [1], [0, 0, 1, 1], [], []>} : vector<8x128xf32>, vector<128x512xf32>, vector<8x512xf32> -> vector<8x512xf32>
    %130 = arith.addf %127, %129 : vector<8x512xf32>
    %131 = vector.extract_strided_slice %130 {offsets = [0, 0], sizes = [8, 384], strides = [1, 1]} : vector<8x512xf32> to vector<8x384xf32>
    %132 = arith.negf %131 : vector<8x384xf32>
    %133 = math.exp %132 : vector<8x384xf32>
    %cst_73 = arith.constant 1.000000e+00 : f32
    %134 = vector.broadcast %cst_73 : f32 to vector<8x384xf32>
    %135 = arith.addf %134, %133 : vector<8x384xf32>
    %136 = arith.divf %134, %135 : vector<8x384xf32>
    %137 = vector.extract_strided_slice %136 {offsets = [0, 0], sizes = [8, 128], strides = [1, 1]} : vector<8x384xf32> to vector<8x128xf32>
    %138 = vector.extract_strided_slice %136 {offsets = [0, 128], sizes = [8, 128], strides = [1, 1]} : vector<8x384xf32> to vector<8x128xf32>
    %139 = vector.extract_strided_slice %136 {offsets = [0, 256], sizes = [8, 128], strides = [1, 1]} : vector<8x384xf32> to vector<8x128xf32>
    %140 = vector.extract_strided_slice %130 {offsets = [0, 384], sizes = [8, 128], strides = [1, 1]} : vector<8x512xf32> to vector<8x128xf32>
    %141 = math.tanh %140 : vector<8x128xf32>
    %142 = arith.mulf %138, %124 : vector<8x128xf32>
    %143 = arith.mulf %137, %141 : vector<8x128xf32>
    %144 = arith.addf %142, %143 : vector<8x128xf32>
    %145 = math.tanh %144 : vector<8x128xf32>
    %146 = arith.mulf %139, %145 : vector<8x128xf32>
    %147 = arith.index_cast %c4_i32 : i32 to index
    %c0_74 = arith.constant 0 : index
    %c0_75 = arith.constant 0 : index
    %148 = vector.load %arg6[%147, %c0_74, %c0_75] : memref<8x8x128xf32, #tpu.memory_space<vmem>>, vector<1x8x128xf32>
    %149 = vector.shape_cast %148 : vector<1x8x128xf32> to vector<8x128xf32>
    %150 = vector.shape_cast %146 : vector<8x128xf32> to vector<1x8x128xf32>
    tpu.vector_store %arg6[%147, %c0_74, %c0_75], %150 {strides = array<i32>} : memref<8x8x128xf32, #tpu.memory_space<vmem>>, vector<1x8x128xf32>,
    %c0_76 = arith.constant 0 : index
    %c0_77 = arith.constant 0 : index
    %151 = vector.load %arg7[%c0_76, %c0_77] : memref<8x128xf32, #tpu.memory_space<vmem>>, vector<8x128xf32>
    tpu.vector_store %arg7[%c0_76, %c0_77], %146 {strides = array<i32>} : memref<8x128xf32, #tpu.memory_space<vmem>>, vector<8x128xf32>,
    %c0_78 = arith.constant 0 : index
    %c0_79 = arith.constant 0 : index
    %152 = vector.load %arg8[%c0_78, %c0_79] : memref<8x128xf32, #tpu.memory_space<vmem>>, vector<8x128xf32>
    tpu.vector_store %arg8[%c0_78, %c0_79], %144 {strides = array<i32>} : memref<8x128xf32, #tpu.memory_space<vmem>>, vector<8x128xf32>,
    %c5_i32 = arith.constant 5 : i32
    %c0_80 = arith.constant 0 : index
    %c0_81 = arith.constant 0 : index
    %153 = vector.load %arg7[%c0_80, %c0_81] : memref<8x128xf32, #tpu.memory_space<vmem>>, vector<8x128xf32>
    %c0_82 = arith.constant 0 : index
    %c0_83 = arith.constant 0 : index
    %154 = vector.load %arg8[%c0_82, %c0_83] : memref<8x128xf32, #tpu.memory_space<vmem>>, vector<8x128xf32>
    %155 = arith.index_cast %c5_i32 : i32 to index
    %c0_84 = arith.constant 0 : index
    %c0_85 = arith.constant 0 : index
    %156 = vector.load %arg2[%155, %c0_84, %c0_85] : memref<8x8x512xf32, #tpu.memory_space<vmem>>, vector<1x8x512xf32>
    %157 = vector.shape_cast %156 : vector<1x8x512xf32> to vector<8x512xf32>
    %c0_86 = arith.constant 0 : index
    %c0_87 = arith.constant 0 : index
    %158 = vector.load %arg3[%c0_86, %c0_87] : memref<128x512xf32, #tpu.memory_space<vmem>>, vector<128x512xf32>
    %cst_88 = arith.constant dense<0.000000e+00> : vector<8x512xf32>
    %159 = tpu.matmul %153, %158, %cst_88 {dimension_numbers = #tpu.dot_dimension_numbers<[1], [0], [0], [1], [0, 0, 1, 1], [], []>} : vector<8x128xf32>, vector<128x512xf32>, vector<8x512xf32> -> vector<8x512xf32>
    %160 = arith.addf %157, %159 : vector<8x512xf32>
    %161 = vector.extract_strided_slice %160 {offsets = [0, 0], sizes = [8, 384], strides = [1, 1]} : vector<8x512xf32> to vector<8x384xf32>
    %162 = arith.negf %161 : vector<8x384xf32>
    %163 = math.exp %162 : vector<8x384xf32>
    %cst_89 = arith.constant 1.000000e+00 : f32
    %164 = vector.broadcast %cst_89 : f32 to vector<8x384xf32>
    %165 = arith.addf %164, %163 : vector<8x384xf32>
    %166 = arith.divf %164, %165 : vector<8x384xf32>
    %167 = vector.extract_strided_slice %166 {offsets = [0, 0], sizes = [8, 128], strides = [1, 1]} : vector<8x384xf32> to vector<8x128xf32>
    %168 = vector.extract_strided_slice %166 {offsets = [0, 128], sizes = [8, 128], strides = [1, 1]} : vector<8x384xf32> to vector<8x128xf32>
    %169 = vector.extract_strided_slice %166 {offsets = [0, 256], sizes = [8, 128], strides = [1, 1]} : vector<8x384xf32> to vector<8x128xf32>
    %170 = vector.extract_strided_slice %160 {offsets = [0, 384], sizes = [8, 128], strides = [1, 1]} : vector<8x512xf32> to vector<8x128xf32>
    %171 = math.tanh %170 : vector<8x128xf32>
    %172 = arith.mulf %168, %154 : vector<8x128xf32>
    %173 = arith.mulf %167, %171 : vector<8x128xf32>
    %174 = arith.addf %172, %173 : vector<8x128xf32>
    %175 = math.tanh %174 : vector<8x128xf32>
    %176 = arith.mulf %169, %175 : vector<8x128xf32>
    %177 = arith.index_cast %c5_i32 : i32 to index
    %c0_90 = arith.constant 0 : index
    %c0_91 = arith.constant 0 : index
    %178 = vector.load %arg6[%177, %c0_90, %c0_91] : memref<8x8x128xf32, #tpu.memory_space<vmem>>, vector<1x8x128xf32>
    %179 = vector.shape_cast %178 : vector<1x8x128xf32> to vector<8x128xf32>
    %180 = vector.shape_cast %176 : vector<8x128xf32> to vector<1x8x128xf32>
    tpu.vector_store %arg6[%177, %c0_90, %c0_91], %180 {strides = array<i32>} : memref<8x8x128xf32, #tpu.memory_space<vmem>>, vector<1x8x128xf32>,
    %c0_92 = arith.constant 0 : index
    %c0_93 = arith.constant 0 : index
    %181 = vector.load %arg7[%c0_92, %c0_93] : memref<8x128xf32, #tpu.memory_space<vmem>>, vector<8x128xf32>
    tpu.vector_store %arg7[%c0_92, %c0_93], %176 {strides = array<i32>} : memref<8x128xf32, #tpu.memory_space<vmem>>, vector<8x128xf32>,
    %c0_94 = arith.constant 0 : index
    %c0_95 = arith.constant 0 : index
    %182 = vector.load %arg8[%c0_94, %c0_95] : memref<8x128xf32, #tpu.memory_space<vmem>>, vector<8x128xf32>
    tpu.vector_store %arg8[%c0_94, %c0_95], %174 {strides = array<i32>} : memref<8x128xf32, #tpu.memory_space<vmem>>, vector<8x128xf32>,
    %c6_i32 = arith.constant 6 : i32
    %c0_96 = arith.constant 0 : index
    %c0_97 = arith.constant 0 : index
    %183 = vector.load %arg7[%c0_96, %c0_97] : memref<8x128xf32, #tpu.memory_space<vmem>>, vector<8x128xf32>
    %c0_98 = arith.constant 0 : index
    %c0_99 = arith.constant 0 : index
    %184 = vector.load %arg8[%c0_98, %c0_99] : memref<8x128xf32, #tpu.memory_space<vmem>>, vector<8x128xf32>
    %185 = arith.index_cast %c6_i32 : i32 to index
    %c0_100 = arith.constant 0 : index
    %c0_101 = arith.constant 0 : index
    %186 = vector.load %arg2[%185, %c0_100, %c0_101] : memref<8x8x512xf32, #tpu.memory_space<vmem>>, vector<1x8x512xf32>
    %187 = vector.shape_cast %186 : vector<1x8x512xf32> to vector<8x512xf32>
    %c0_102 = arith.constant 0 : index
    %c0_103 = arith.constant 0 : index
    %188 = vector.load %arg3[%c0_102, %c0_103] : memref<128x512xf32, #tpu.memory_space<vmem>>, vector<128x512xf32>
    %cst_104 = arith.constant dense<0.000000e+00> : vector<8x512xf32>
    %189 = tpu.matmul %183, %188, %cst_104 {dimension_numbers = #tpu.dot_dimension_numbers<[1], [0], [0], [1], [0, 0, 1, 1], [], []>} : vector<8x128xf32>, vector<128x512xf32>, vector<8x512xf32> -> vector<8x512xf32>
    %190 = arith.addf %187, %189 : vector<8x512xf32>
    %191 = vector.extract_strided_slice %190 {offsets = [0, 0], sizes = [8, 384], strides = [1, 1]} : vector<8x512xf32> to vector<8x384xf32>
    %192 = arith.negf %191 : vector<8x384xf32>
    %193 = math.exp %192 : vector<8x384xf32>
    %cst_105 = arith.constant 1.000000e+00 : f32
    %194 = vector.broadcast %cst_105 : f32 to vector<8x384xf32>
    %195 = arith.addf %194, %193 : vector<8x384xf32>
    %196 = arith.divf %194, %195 : vector<8x384xf32>
    %197 = vector.extract_strided_slice %196 {offsets = [0, 0], sizes = [8, 128], strides = [1, 1]} : vector<8x384xf32> to vector<8x128xf32>
    %198 = vector.extract_strided_slice %196 {offsets = [0, 128], sizes = [8, 128], strides = [1, 1]} : vector<8x384xf32> to vector<8x128xf32>
    %199 = vector.extract_strided_slice %196 {offsets = [0, 256], sizes = [8, 128], strides = [1, 1]} : vector<8x384xf32> to vector<8x128xf32>
    %200 = vector.extract_strided_slice %190 {offsets = [0, 384], sizes = [8, 128], strides = [1, 1]} : vector<8x512xf32> to vector<8x128xf32>
    %201 = math.tanh %200 : vector<8x128xf32>
    %202 = arith.mulf %198, %184 : vector<8x128xf32>
    %203 = arith.mulf %197, %201 : vector<8x128xf32>
    %204 = arith.addf %202, %203 : vector<8x128xf32>
    %205 = math.tanh %204 : vector<8x128xf32>
    %206 = arith.mulf %199, %205 : vector<8x128xf32>
    %207 = arith.index_cast %c6_i32 : i32 to index
    %c0_106 = arith.constant 0 : index
    %c0_107 = arith.constant 0 : index
    %208 = vector.load %arg6[%207, %c0_106, %c0_107] : memref<8x8x128xf32, #tpu.memory_space<vmem>>, vector<1x8x128xf32>
    %209 = vector.shape_cast %208 : vector<1x8x128xf32> to vector<8x128xf32>
    %210 = vector.shape_cast %206 : vector<8x128xf32> to vector<1x8x128xf32>
    tpu.vector_store %arg6[%207, %c0_106, %c0_107], %210 {strides = array<i32>} : memref<8x8x128xf32, #tpu.memory_space<vmem>>, vector<1x8x128xf32>,
    %c0_108 = arith.constant 0 : index
    %c0_109 = arith.constant 0 : index
    %211 = vector.load %arg7[%c0_108, %c0_109] : memref<8x128xf32, #tpu.memory_space<vmem>>, vector<8x128xf32>
    tpu.vector_store %arg7[%c0_108, %c0_109], %206 {strides = array<i32>} : memref<8x128xf32, #tpu.memory_space<vmem>>, vector<8x128xf32>,
    %c0_110 = arith.constant 0 : index
    %c0_111 = arith.constant 0 : index
    %212 = vector.load %arg8[%c0_110, %c0_111] : memref<8x128xf32, #tpu.memory_space<vmem>>, vector<8x128xf32>
    tpu.vector_store %arg8[%c0_110, %c0_111], %204 {strides = array<i32>} : memref<8x128xf32, #tpu.memory_space<vmem>>, vector<8x128xf32>,
    %c7_i32 = arith.constant 7 : i32
    %c0_112 = arith.constant 0 : index
    %c0_113 = arith.constant 0 : index
    %213 = vector.load %arg7[%c0_112, %c0_113] : memref<8x128xf32, #tpu.memory_space<vmem>>, vector<8x128xf32>
    %c0_114 = arith.constant 0 : index
    %c0_115 = arith.constant 0 : index
    %214 = vector.load %arg8[%c0_114, %c0_115] : memref<8x128xf32, #tpu.memory_space<vmem>>, vector<8x128xf32>
    %215 = arith.index_cast %c7_i32 : i32 to index
    %c0_116 = arith.constant 0 : index
    %c0_117 = arith.constant 0 : index
    %216 = vector.load %arg2[%215, %c0_116, %c0_117] : memref<8x8x512xf32, #tpu.memory_space<vmem>>, vector<1x8x512xf32>
    %217 = vector.shape_cast %216 : vector<1x8x512xf32> to vector<8x512xf32>
    %c0_118 = arith.constant 0 : index
    %c0_119 = arith.constant 0 : index
    %218 = vector.load %arg3[%c0_118, %c0_119] : memref<128x512xf32, #tpu.memory_space<vmem>>, vector<128x512xf32>
    %cst_120 = arith.constant dense<0.000000e+00> : vector<8x512xf32>
    %219 = tpu.matmul %213, %218, %cst_120 {dimension_numbers = #tpu.dot_dimension_numbers<[1], [0], [0], [1], [0, 0, 1, 1], [], []>} : vector<8x128xf32>, vector<128x512xf32>, vector<8x512xf32> -> vector<8x512xf32>
    %220 = arith.addf %217, %219 : vector<8x512xf32>
    %221 = vector.extract_strided_slice %220 {offsets = [0, 0], sizes = [8, 384], strides = [1, 1]} : vector<8x512xf32> to vector<8x384xf32>
    %222 = arith.negf %221 : vector<8x384xf32>
    %223 = math.exp %222 : vector<8x384xf32>
    %cst_121 = arith.constant 1.000000e+00 : f32
    %224 = vector.broadcast %cst_121 : f32 to vector<8x384xf32>
    %225 = arith.addf %224, %223 : vector<8x384xf32>
    %226 = arith.divf %224, %225 : vector<8x384xf32>
    %227 = vector.extract_strided_slice %226 {offsets = [0, 0], sizes = [8, 128], strides = [1, 1]} : vector<8x384xf32> to vector<8x128xf32>
    %228 = vector.extract_strided_slice %226 {offsets = [0, 128], sizes = [8, 128], strides = [1, 1]} : vector<8x384xf32> to vector<8x128xf32>
    %229 = vector.extract_strided_slice %226 {offsets = [0, 256], sizes = [8, 128], strides = [1, 1]} : vector<8x384xf32> to vector<8x128xf32>
    %230 = vector.extract_strided_slice %220 {offsets = [0, 384], sizes = [8, 128], strides = [1, 1]} : vector<8x512xf32> to vector<8x128xf32>
    %231 = math.tanh %230 : vector<8x128xf32>
    %232 = arith.mulf %228, %214 : vector<8x128xf32>
    %233 = arith.mulf %227, %231 : vector<8x128xf32>
    %234 = arith.addf %232, %233 : vector<8x128xf32>
    %235 = math.tanh %234 : vector<8x128xf32>
    %236 = arith.mulf %229, %235 : vector<8x128xf32>
    %237 = arith.index_cast %c7_i32 : i32 to index
    %c0_122 = arith.constant 0 : index
    %c0_123 = arith.constant 0 : index
    %238 = vector.load %arg6[%237, %c0_122, %c0_123] : memref<8x8x128xf32, #tpu.memory_space<vmem>>, vector<1x8x128xf32>
    %239 = vector.shape_cast %238 : vector<1x8x128xf32> to vector<8x128xf32>
    %240 = vector.shape_cast %236 : vector<8x128xf32> to vector<1x8x128xf32>
    tpu.vector_store %arg6[%237, %c0_122, %c0_123], %240 {strides = array<i32>} : memref<8x8x128xf32, #tpu.memory_space<vmem>>, vector<1x8x128xf32>,
    %c0_124 = arith.constant 0 : index
    %c0_125 = arith.constant 0 : index
    %241 = vector.load %arg7[%c0_124, %c0_125] : memref<8x128xf32, #tpu.memory_space<vmem>>, vector<8x128xf32>
    tpu.vector_store %arg7[%c0_124, %c0_125], %236 {strides = array<i32>} : memref<8x128xf32, #tpu.memory_space<vmem>>, vector<8x128xf32>,
    %c0_126 = arith.constant 0 : index
    %c0_127 = arith.constant 0 : index
    %242 = vector.load %arg8[%c0_126, %c0_127] : memref<8x128xf32, #tpu.memory_space<vmem>>, vector<8x128xf32>
    tpu.vector_store %arg8[%c0_126, %c0_127], %234 {strides = array<i32>} : memref<8x128xf32, #tpu.memory_space<vmem>>, vector<8x128xf32>,
    %c8_i32 = arith.constant 8 : i32
    return
  }
  func.func @transform_0(%arg0: i32, %arg1: i32) -> (i32, i32, i32) {
    %c0_i32 = arith.constant 0 : i32
    %c0_i32_0 = arith.constant 0 : i32
    return %arg1, %arg0, %c0_i32 : i32, i32, i32
  }
  func.func @transform_1(%arg0: i32, %arg1: i32) -> (i32, i32) {
    %c0_i32 = arith.constant 0 : i32
    %c0_i32_0 = arith.constant 0 : i32
    %c0_i32_1 = arith.constant 0 : i32
    return %c0_i32, %c0_i32_0 : i32, i32
  }
  func.func @transform_2(%arg0: i32, %arg1: i32) -> (i32, i32) {
    %c0_i32 = arith.constant 0 : i32
    %c0_i32_0 = arith.constant 0 : i32
    return %arg0, %c0_i32 : i32, i32
  }
  func.func @transform_3(%arg0: i32, %arg1: i32) -> (i32, i32) {
    %c0_i32 = arith.constant 0 : i32
    %c0_i32_0 = arith.constant 0 : i32
    return %arg0, %c0_i32 : i32, i32
  }
  func.func @transform_4(%arg0: i32, %arg1: i32) -> (i32, i32, i32) {
    %c0_i32 = arith.constant 0 : i32
    %c0_i32_0 = arith.constant 0 : i32
    return %arg1, %arg0, %c0_i32 : i32, i32, i32
  }
  func.func @transform_5(%arg0: i32, %arg1: i32) -> (i32, i32) {
    %c0_i32 = arith.constant 0 : i32
    %c0_i32_0 = arith.constant 0 : i32
    return %arg0, %c0_i32 : i32, i32
  }
  func.func @transform_6(%arg0: i32, %arg1: i32) -> (i32, i32) {
    %c0_i32 = arith.constant 0 : i32
    %c0_i32_0 = arith.constant 0 : i32
    return %arg0, %c0_i32 : i32, i32
  }
}

module attributes {stable_mosaic.version = 11 : i64} {
  func.func @_lstm_layer_kernel(%arg0: i32, %arg1: i32, %arg2: memref<8x8x512xf32, #tpu.memory_space<vmem>>, %arg3: memref<128x512xf32, #tpu.memory_space<vmem>>, %arg4: memref<8x128xf32, #tpu.memory_space<vmem>>, %arg5: memref<8x128xf32, #tpu.memory_space<vmem>>, %arg6: memref<8x8x128xf32, #tpu.memory_space<vmem>>, %arg7: memref<8x128xf32, #tpu.memory_space<vmem>>, %arg8: memref<8x128xf32, #tpu.memory_space<vmem>>) attributes {dimension_semantics = [#tpu.dimension_semantics<parallel>, #tpu.dimension_semantics<arbitrary>], iteration_bounds = array<i64: 1, 1>, scalar_prefetch = 0 : i64, scratch_operands = 0 : i64, tpu.core_type = #tpu.core_type<tc>, window_params = [{transform_indices = @transform_0, window_bounds = array<i64: 8, 8, 512>}, {pipeline_mode = #tpu.pipeline_mode<synchronous>, transform_indices = @transform_1, window_bounds = array<i64: 128, 512>}, {transform_indices = @transform_2, window_bounds = array<i64: 8, 128>}, {transform_indices = @transform_3, window_bounds = array<i64: 8, 128>}, {transform_indices = @transform_4, window_bounds = array<i64: 8, 8, 128>}, {transform_indices = @transform_5, window_bounds = array<i64: 8, 128>}, {transform_indices = @transform_6, window_bounds = array<i64: 8, 128>}]} {
    %c0_i32 = arith.constant 0 : i32
    %0 = arith.cmpi eq, %arg1, %c0_i32 : i32
    %1 = arith.extui %0 : i1 to i32
    %c0_i32_0 = arith.constant 0 : i32
    %2 = arith.cmpi ne, %1, %c0_i32_0 : i32
    scf.if %2 {
      %c0_104 = arith.constant 0 : index
      %c0_105 = arith.constant 0 : index
      %235 = vector.load %arg4[%c0_104, %c0_105] : memref<8x128xf32, #tpu.memory_space<vmem>>, vector<8x128xf32>
      %c0_106 = arith.constant 0 : index
      %c0_107 = arith.constant 0 : index
      %236 = vector.load %arg7[%c0_106, %c0_107] : memref<8x128xf32, #tpu.memory_space<vmem>>, vector<8x128xf32>
      tpu.vector_store %arg7[%c0_106, %c0_107], %235 {strides = array<i32>} : memref<8x128xf32, #tpu.memory_space<vmem>>, vector<8x128xf32>,
      %c0_108 = arith.constant 0 : index
      %c0_109 = arith.constant 0 : index
      %237 = vector.load %arg5[%c0_108, %c0_109] : memref<8x128xf32, #tpu.memory_space<vmem>>, vector<8x128xf32>
      %c0_110 = arith.constant 0 : index
      %c0_111 = arith.constant 0 : index
      %238 = vector.load %arg8[%c0_110, %c0_111] : memref<8x128xf32, #tpu.memory_space<vmem>>, vector<8x128xf32>
      tpu.vector_store %arg8[%c0_110, %c0_111], %237 {strides = array<i32>} : memref<8x128xf32, #tpu.memory_space<vmem>>, vector<8x128xf32>,
    } else {
    }
    %c0_i32_1 = arith.constant 0 : i32
    %c0 = arith.constant 0 : index
    %c0_2 = arith.constant 0 : index
    %3 = vector.load %arg7[%c0, %c0_2] : memref<8x128xf32, #tpu.memory_space<vmem>>, vector<8x128xf32>
    %c0_3 = arith.constant 0 : index
    %c0_4 = arith.constant 0 : index
    %4 = vector.load %arg8[%c0_3, %c0_4] : memref<8x128xf32, #tpu.memory_space<vmem>>, vector<8x128xf32>
    %5 = arith.index_cast %c0_i32_1 : i32 to index
    %c0_5 = arith.constant 0 : index
    %c0_6 = arith.constant 0 : index
    %6 = vector.load %arg2[%5, %c0_5, %c0_6] : memref<8x8x512xf32, #tpu.memory_space<vmem>>, vector<1x8x512xf32>
    %7 = vector.shape_cast %6 : vector<1x8x512xf32> to vector<8x512xf32>
    %c0_7 = arith.constant 0 : index
    %c0_8 = arith.constant 0 : index
    %8 = vector.load %arg3[%c0_7, %c0_8] : memref<128x512xf32, #tpu.memory_space<vmem>>, vector<128x512xf32>
    %cst = arith.constant dense<0.000000e+00> : vector<8x512xf32>
    %9 = tpu.matmul %3, %8, %cst {dimension_numbers = #tpu.dot_dimension_numbers<[1], [0], [0], [1], [0, 0, 1, 1], [], []>} : vector<8x128xf32>, vector<128x512xf32>, vector<8x512xf32> -> vector<8x512xf32>
    %10 = arith.addf %7, %9 : vector<8x512xf32>
    %11 = vector.extract_strided_slice %10 {offsets = [0, 0], sizes = [8, 384], strides = [1, 1]} : vector<8x512xf32> to vector<8x384xf32>
    %12 = arith.negf %11 : vector<8x384xf32>
    %13 = math.exp %12 : vector<8x384xf32>
    %cst_9 = arith.constant 1.000000e+00 : f32
    %14 = vector.broadcast %cst_9 : f32 to vector<8x384xf32>
    %15 = arith.addf %14, %13 : vector<8x384xf32>
    %16 = arith.divf %14, %15 : vector<8x384xf32>
    %17 = vector.extract_strided_slice %16 {offsets = [0, 0], sizes = [8, 128], strides = [1, 1]} : vector<8x384xf32> to vector<8x128xf32>
    %18 = vector.extract_strided_slice %16 {offsets = [0, 128], sizes = [8, 128], strides = [1, 1]} : vector<8x384xf32> to vector<8x128xf32>
    %19 = vector.extract_strided_slice %16 {offsets = [0, 256], sizes = [8, 128], strides = [1, 1]} : vector<8x384xf32> to vector<8x128xf32>
    %20 = vector.extract_strided_slice %10 {offsets = [0, 384], sizes = [8, 128], strides = [1, 1]} : vector<8x512xf32> to vector<8x128xf32>
    %21 = math.tanh %20 : vector<8x128xf32>
    %22 = arith.mulf %18, %4 : vector<8x128xf32>
    %23 = arith.mulf %17, %21 : vector<8x128xf32>
    %24 = arith.addf %22, %23 : vector<8x128xf32>
    %25 = math.tanh %24 : vector<8x128xf32>
    %26 = arith.mulf %19, %25 : vector<8x128xf32>
    %c8_i32 = arith.constant 8 : i32
    %27 = arith.muli %arg1, %c8_i32 : i32
    %28 = arith.addi %27, %c0_i32_1 : i32
    %c7_i32 = arith.constant 7 : i32
    %29 = arith.cmpi slt, %28, %c7_i32 : i32
    %30 = arith.extui %29 : i1 to i32
    %c0_i32_10 = arith.constant 0 : i32
    %31 = arith.cmpi ne, %30, %c0_i32_10 : i32
    scf.if %31 {
      %235 = arith.index_cast %c0_i32_1 : i32 to index
      %c0_104 = arith.constant 0 : index
      %c0_105 = arith.constant 0 : index
      %236 = vector.load %arg6[%235, %c0_104, %c0_105] : memref<8x8x128xf32, #tpu.memory_space<vmem>>, vector<1x8x128xf32>
      %237 = vector.shape_cast %236 : vector<1x8x128xf32> to vector<8x128xf32>
      %238 = vector.shape_cast %26 : vector<8x128xf32> to vector<1x8x128xf32>
      tpu.vector_store %arg6[%235, %c0_104, %c0_105], %238 {strides = array<i32>} : memref<8x8x128xf32, #tpu.memory_space<vmem>>, vector<1x8x128xf32>,
      %c0_106 = arith.constant 0 : index
      %c0_107 = arith.constant 0 : index
      %239 = vector.load %arg7[%c0_106, %c0_107] : memref<8x128xf32, #tpu.memory_space<vmem>>, vector<8x128xf32>
      tpu.vector_store %arg7[%c0_106, %c0_107], %26 {strides = array<i32>} : memref<8x128xf32, #tpu.memory_space<vmem>>, vector<8x128xf32>,
      %c0_108 = arith.constant 0 : index
      %c0_109 = arith.constant 0 : index
      %240 = vector.load %arg8[%c0_108, %c0_109] : memref<8x128xf32, #tpu.memory_space<vmem>>, vector<8x128xf32>
      tpu.vector_store %arg8[%c0_108, %c0_109], %24 {strides = array<i32>} : memref<8x128xf32, #tpu.memory_space<vmem>>, vector<8x128xf32>,
    } else {
    }
    %c1_i32 = arith.constant 1 : i32
    %c0_11 = arith.constant 0 : index
    %c0_12 = arith.constant 0 : index
    %32 = vector.load %arg7[%c0_11, %c0_12] : memref<8x128xf32, #tpu.memory_space<vmem>>, vector<8x128xf32>
    %c0_13 = arith.constant 0 : index
    %c0_14 = arith.constant 0 : index
    %33 = vector.load %arg8[%c0_13, %c0_14] : memref<8x128xf32, #tpu.memory_space<vmem>>, vector<8x128xf32>
    %34 = arith.index_cast %c1_i32 : i32 to index
    %c0_15 = arith.constant 0 : index
    %c0_16 = arith.constant 0 : index
    %35 = vector.load %arg2[%34, %c0_15, %c0_16] : memref<8x8x512xf32, #tpu.memory_space<vmem>>, vector<1x8x512xf32>
    %36 = vector.shape_cast %35 : vector<1x8x512xf32> to vector<8x512xf32>
    %c0_17 = arith.constant 0 : index
    %c0_18 = arith.constant 0 : index
    %37 = vector.load %arg3[%c0_17, %c0_18] : memref<128x512xf32, #tpu.memory_space<vmem>>, vector<128x512xf32>
    %cst_19 = arith.constant dense<0.000000e+00> : vector<8x512xf32>
    %38 = tpu.matmul %32, %37, %cst_19 {dimension_numbers = #tpu.dot_dimension_numbers<[1], [0], [0], [1], [0, 0, 1, 1], [], []>} : vector<8x128xf32>, vector<128x512xf32>, vector<8x512xf32> -> vector<8x512xf32>
    %39 = arith.addf %36, %38 : vector<8x512xf32>
    %40 = vector.extract_strided_slice %39 {offsets = [0, 0], sizes = [8, 384], strides = [1, 1]} : vector<8x512xf32> to vector<8x384xf32>
    %41 = arith.negf %40 : vector<8x384xf32>
    %42 = math.exp %41 : vector<8x384xf32>
    %cst_20 = arith.constant 1.000000e+00 : f32
    %43 = vector.broadcast %cst_20 : f32 to vector<8x384xf32>
    %44 = arith.addf %43, %42 : vector<8x384xf32>
    %45 = arith.divf %43, %44 : vector<8x384xf32>
    %46 = vector.extract_strided_slice %45 {offsets = [0, 0], sizes = [8, 128], strides = [1, 1]} : vector<8x384xf32> to vector<8x128xf32>
    %47 = vector.extract_strided_slice %45 {offsets = [0, 128], sizes = [8, 128], strides = [1, 1]} : vector<8x384xf32> to vector<8x128xf32>
    %48 = vector.extract_strided_slice %45 {offsets = [0, 256], sizes = [8, 128], strides = [1, 1]} : vector<8x384xf32> to vector<8x128xf32>
    %49 = vector.extract_strided_slice %39 {offsets = [0, 384], sizes = [8, 128], strides = [1, 1]} : vector<8x512xf32> to vector<8x128xf32>
    %50 = math.tanh %49 : vector<8x128xf32>
    %51 = arith.mulf %47, %33 : vector<8x128xf32>
    %52 = arith.mulf %46, %50 : vector<8x128xf32>
    %53 = arith.addf %51, %52 : vector<8x128xf32>
    %54 = math.tanh %53 : vector<8x128xf32>
    %55 = arith.mulf %48, %54 : vector<8x128xf32>
    %c8_i32_21 = arith.constant 8 : i32
    %56 = arith.muli %arg1, %c8_i32_21 : i32
    %57 = arith.addi %56, %c1_i32 : i32
    %c7_i32_22 = arith.constant 7 : i32
    %58 = arith.cmpi slt, %57, %c7_i32_22 : i32
    %59 = arith.extui %58 : i1 to i32
    %c0_i32_23 = arith.constant 0 : i32
    %60 = arith.cmpi ne, %59, %c0_i32_23 : i32
    scf.if %60 {
      %235 = arith.index_cast %c1_i32 : i32 to index
      %c0_104 = arith.constant 0 : index
      %c0_105 = arith.constant 0 : index
      %236 = vector.load %arg6[%235, %c0_104, %c0_105] : memref<8x8x128xf32, #tpu.memory_space<vmem>>, vector<1x8x128xf32>
      %237 = vector.shape_cast %236 : vector<1x8x128xf32> to vector<8x128xf32>
      %238 = vector.shape_cast %55 : vector<8x128xf32> to vector<1x8x128xf32>
      tpu.vector_store %arg6[%235, %c0_104, %c0_105], %238 {strides = array<i32>} : memref<8x8x128xf32, #tpu.memory_space<vmem>>, vector<1x8x128xf32>,
      %c0_106 = arith.constant 0 : index
      %c0_107 = arith.constant 0 : index
      %239 = vector.load %arg7[%c0_106, %c0_107] : memref<8x128xf32, #tpu.memory_space<vmem>>, vector<8x128xf32>
      tpu.vector_store %arg7[%c0_106, %c0_107], %55 {strides = array<i32>} : memref<8x128xf32, #tpu.memory_space<vmem>>, vector<8x128xf32>,
      %c0_108 = arith.constant 0 : index
      %c0_109 = arith.constant 0 : index
      %240 = vector.load %arg8[%c0_108, %c0_109] : memref<8x128xf32, #tpu.memory_space<vmem>>, vector<8x128xf32>
      tpu.vector_store %arg8[%c0_108, %c0_109], %53 {strides = array<i32>} : memref<8x128xf32, #tpu.memory_space<vmem>>, vector<8x128xf32>,
    } else {
    }
    %c2_i32 = arith.constant 2 : i32
    %c0_24 = arith.constant 0 : index
    %c0_25 = arith.constant 0 : index
    %61 = vector.load %arg7[%c0_24, %c0_25] : memref<8x128xf32, #tpu.memory_space<vmem>>, vector<8x128xf32>
    %c0_26 = arith.constant 0 : index
    %c0_27 = arith.constant 0 : index
    %62 = vector.load %arg8[%c0_26, %c0_27] : memref<8x128xf32, #tpu.memory_space<vmem>>, vector<8x128xf32>
    %63 = arith.index_cast %c2_i32 : i32 to index
    %c0_28 = arith.constant 0 : index
    %c0_29 = arith.constant 0 : index
    %64 = vector.load %arg2[%63, %c0_28, %c0_29] : memref<8x8x512xf32, #tpu.memory_space<vmem>>, vector<1x8x512xf32>
    %65 = vector.shape_cast %64 : vector<1x8x512xf32> to vector<8x512xf32>
    %c0_30 = arith.constant 0 : index
    %c0_31 = arith.constant 0 : index
    %66 = vector.load %arg3[%c0_30, %c0_31] : memref<128x512xf32, #tpu.memory_space<vmem>>, vector<128x512xf32>
    %cst_32 = arith.constant dense<0.000000e+00> : vector<8x512xf32>
    %67 = tpu.matmul %61, %66, %cst_32 {dimension_numbers = #tpu.dot_dimension_numbers<[1], [0], [0], [1], [0, 0, 1, 1], [], []>} : vector<8x128xf32>, vector<128x512xf32>, vector<8x512xf32> -> vector<8x512xf32>
    %68 = arith.addf %65, %67 : vector<8x512xf32>
    %69 = vector.extract_strided_slice %68 {offsets = [0, 0], sizes = [8, 384], strides = [1, 1]} : vector<8x512xf32> to vector<8x384xf32>
    %70 = arith.negf %69 : vector<8x384xf32>
    %71 = math.exp %70 : vector<8x384xf32>
    %cst_33 = arith.constant 1.000000e+00 : f32
    %72 = vector.broadcast %cst_33 : f32 to vector<8x384xf32>
    %73 = arith.addf %72, %71 : vector<8x384xf32>
    %74 = arith.divf %72, %73 : vector<8x384xf32>
    %75 = vector.extract_strided_slice %74 {offsets = [0, 0], sizes = [8, 128], strides = [1, 1]} : vector<8x384xf32> to vector<8x128xf32>
    %76 = vector.extract_strided_slice %74 {offsets = [0, 128], sizes = [8, 128], strides = [1, 1]} : vector<8x384xf32> to vector<8x128xf32>
    %77 = vector.extract_strided_slice %74 {offsets = [0, 256], sizes = [8, 128], strides = [1, 1]} : vector<8x384xf32> to vector<8x128xf32>
    %78 = vector.extract_strided_slice %68 {offsets = [0, 384], sizes = [8, 128], strides = [1, 1]} : vector<8x512xf32> to vector<8x128xf32>
    %79 = math.tanh %78 : vector<8x128xf32>
    %80 = arith.mulf %76, %62 : vector<8x128xf32>
    %81 = arith.mulf %75, %79 : vector<8x128xf32>
    %82 = arith.addf %80, %81 : vector<8x128xf32>
    %83 = math.tanh %82 : vector<8x128xf32>
    %84 = arith.mulf %77, %83 : vector<8x128xf32>
    %c8_i32_34 = arith.constant 8 : i32
    %85 = arith.muli %arg1, %c8_i32_34 : i32
    %86 = arith.addi %85, %c2_i32 : i32
    %c7_i32_35 = arith.constant 7 : i32
    %87 = arith.cmpi slt, %86, %c7_i32_35 : i32
    %88 = arith.extui %87 : i1 to i32
    %c0_i32_36 = arith.constant 0 : i32
    %89 = arith.cmpi ne, %88, %c0_i32_36 : i32
    scf.if %89 {
      %235 = arith.index_cast %c2_i32 : i32 to index
      %c0_104 = arith.constant 0 : index
      %c0_105 = arith.constant 0 : index
      %236 = vector.load %arg6[%235, %c0_104, %c0_105] : memref<8x8x128xf32, #tpu.memory_space<vmem>>, vector<1x8x128xf32>
      %237 = vector.shape_cast %236 : vector<1x8x128xf32> to vector<8x128xf32>
      %238 = vector.shape_cast %84 : vector<8x128xf32> to vector<1x8x128xf32>
      tpu.vector_store %arg6[%235, %c0_104, %c0_105], %238 {strides = array<i32>} : memref<8x8x128xf32, #tpu.memory_space<vmem>>, vector<1x8x128xf32>,
      %c0_106 = arith.constant 0 : index
      %c0_107 = arith.constant 0 : index
      %239 = vector.load %arg7[%c0_106, %c0_107] : memref<8x128xf32, #tpu.memory_space<vmem>>, vector<8x128xf32>
      tpu.vector_store %arg7[%c0_106, %c0_107], %84 {strides = array<i32>} : memref<8x128xf32, #tpu.memory_space<vmem>>, vector<8x128xf32>,
      %c0_108 = arith.constant 0 : index
      %c0_109 = arith.constant 0 : index
      %240 = vector.load %arg8[%c0_108, %c0_109] : memref<8x128xf32, #tpu.memory_space<vmem>>, vector<8x128xf32>
      tpu.vector_store %arg8[%c0_108, %c0_109], %82 {strides = array<i32>} : memref<8x128xf32, #tpu.memory_space<vmem>>, vector<8x128xf32>,
    } else {
    }
    %c3_i32 = arith.constant 3 : i32
    %c0_37 = arith.constant 0 : index
    %c0_38 = arith.constant 0 : index
    %90 = vector.load %arg7[%c0_37, %c0_38] : memref<8x128xf32, #tpu.memory_space<vmem>>, vector<8x128xf32>
    %c0_39 = arith.constant 0 : index
    %c0_40 = arith.constant 0 : index
    %91 = vector.load %arg8[%c0_39, %c0_40] : memref<8x128xf32, #tpu.memory_space<vmem>>, vector<8x128xf32>
    %92 = arith.index_cast %c3_i32 : i32 to index
    %c0_41 = arith.constant 0 : index
    %c0_42 = arith.constant 0 : index
    %93 = vector.load %arg2[%92, %c0_41, %c0_42] : memref<8x8x512xf32, #tpu.memory_space<vmem>>, vector<1x8x512xf32>
    %94 = vector.shape_cast %93 : vector<1x8x512xf32> to vector<8x512xf32>
    %c0_43 = arith.constant 0 : index
    %c0_44 = arith.constant 0 : index
    %95 = vector.load %arg3[%c0_43, %c0_44] : memref<128x512xf32, #tpu.memory_space<vmem>>, vector<128x512xf32>
    %cst_45 = arith.constant dense<0.000000e+00> : vector<8x512xf32>
    %96 = tpu.matmul %90, %95, %cst_45 {dimension_numbers = #tpu.dot_dimension_numbers<[1], [0], [0], [1], [0, 0, 1, 1], [], []>} : vector<8x128xf32>, vector<128x512xf32>, vector<8x512xf32> -> vector<8x512xf32>
    %97 = arith.addf %94, %96 : vector<8x512xf32>
    %98 = vector.extract_strided_slice %97 {offsets = [0, 0], sizes = [8, 384], strides = [1, 1]} : vector<8x512xf32> to vector<8x384xf32>
    %99 = arith.negf %98 : vector<8x384xf32>
    %100 = math.exp %99 : vector<8x384xf32>
    %cst_46 = arith.constant 1.000000e+00 : f32
    %101 = vector.broadcast %cst_46 : f32 to vector<8x384xf32>
    %102 = arith.addf %101, %100 : vector<8x384xf32>
    %103 = arith.divf %101, %102 : vector<8x384xf32>
    %104 = vector.extract_strided_slice %103 {offsets = [0, 0], sizes = [8, 128], strides = [1, 1]} : vector<8x384xf32> to vector<8x128xf32>
    %105 = vector.extract_strided_slice %103 {offsets = [0, 128], sizes = [8, 128], strides = [1, 1]} : vector<8x384xf32> to vector<8x128xf32>
    %106 = vector.extract_strided_slice %103 {offsets = [0, 256], sizes = [8, 128], strides = [1, 1]} : vector<8x384xf32> to vector<8x128xf32>
    %107 = vector.extract_strided_slice %97 {offsets = [0, 384], sizes = [8, 128], strides = [1, 1]} : vector<8x512xf32> to vector<8x128xf32>
    %108 = math.tanh %107 : vector<8x128xf32>
    %109 = arith.mulf %105, %91 : vector<8x128xf32>
    %110 = arith.mulf %104, %108 : vector<8x128xf32>
    %111 = arith.addf %109, %110 : vector<8x128xf32>
    %112 = math.tanh %111 : vector<8x128xf32>
    %113 = arith.mulf %106, %112 : vector<8x128xf32>
    %c8_i32_47 = arith.constant 8 : i32
    %114 = arith.muli %arg1, %c8_i32_47 : i32
    %115 = arith.addi %114, %c3_i32 : i32
    %c7_i32_48 = arith.constant 7 : i32
    %116 = arith.cmpi slt, %115, %c7_i32_48 : i32
    %117 = arith.extui %116 : i1 to i32
    %c0_i32_49 = arith.constant 0 : i32
    %118 = arith.cmpi ne, %117, %c0_i32_49 : i32
    scf.if %118 {
      %235 = arith.index_cast %c3_i32 : i32 to index
      %c0_104 = arith.constant 0 : index
      %c0_105 = arith.constant 0 : index
      %236 = vector.load %arg6[%235, %c0_104, %c0_105] : memref<8x8x128xf32, #tpu.memory_space<vmem>>, vector<1x8x128xf32>
      %237 = vector.shape_cast %236 : vector<1x8x128xf32> to vector<8x128xf32>
      %238 = vector.shape_cast %113 : vector<8x128xf32> to vector<1x8x128xf32>
      tpu.vector_store %arg6[%235, %c0_104, %c0_105], %238 {strides = array<i32>} : memref<8x8x128xf32, #tpu.memory_space<vmem>>, vector<1x8x128xf32>,
      %c0_106 = arith.constant 0 : index
      %c0_107 = arith.constant 0 : index
      %239 = vector.load %arg7[%c0_106, %c0_107] : memref<8x128xf32, #tpu.memory_space<vmem>>, vector<8x128xf32>
      tpu.vector_store %arg7[%c0_106, %c0_107], %113 {strides = array<i32>} : memref<8x128xf32, #tpu.memory_space<vmem>>, vector<8x128xf32>,
      %c0_108 = arith.constant 0 : index
      %c0_109 = arith.constant 0 : index
      %240 = vector.load %arg8[%c0_108, %c0_109] : memref<8x128xf32, #tpu.memory_space<vmem>>, vector<8x128xf32>
      tpu.vector_store %arg8[%c0_108, %c0_109], %111 {strides = array<i32>} : memref<8x128xf32, #tpu.memory_space<vmem>>, vector<8x128xf32>,
    } else {
    }
    %c4_i32 = arith.constant 4 : i32
    %c0_50 = arith.constant 0 : index
    %c0_51 = arith.constant 0 : index
    %119 = vector.load %arg7[%c0_50, %c0_51] : memref<8x128xf32, #tpu.memory_space<vmem>>, vector<8x128xf32>
    %c0_52 = arith.constant 0 : index
    %c0_53 = arith.constant 0 : index
    %120 = vector.load %arg8[%c0_52, %c0_53] : memref<8x128xf32, #tpu.memory_space<vmem>>, vector<8x128xf32>
    %121 = arith.index_cast %c4_i32 : i32 to index
    %c0_54 = arith.constant 0 : index
    %c0_55 = arith.constant 0 : index
    %122 = vector.load %arg2[%121, %c0_54, %c0_55] : memref<8x8x512xf32, #tpu.memory_space<vmem>>, vector<1x8x512xf32>
    %123 = vector.shape_cast %122 : vector<1x8x512xf32> to vector<8x512xf32>
    %c0_56 = arith.constant 0 : index
    %c0_57 = arith.constant 0 : index
    %124 = vector.load %arg3[%c0_56, %c0_57] : memref<128x512xf32, #tpu.memory_space<vmem>>, vector<128x512xf32>
    %cst_58 = arith.constant dense<0.000000e+00> : vector<8x512xf32>
    %125 = tpu.matmul %119, %124, %cst_58 {dimension_numbers = #tpu.dot_dimension_numbers<[1], [0], [0], [1], [0, 0, 1, 1], [], []>} : vector<8x128xf32>, vector<128x512xf32>, vector<8x512xf32> -> vector<8x512xf32>
    %126 = arith.addf %123, %125 : vector<8x512xf32>
    %127 = vector.extract_strided_slice %126 {offsets = [0, 0], sizes = [8, 384], strides = [1, 1]} : vector<8x512xf32> to vector<8x384xf32>
    %128 = arith.negf %127 : vector<8x384xf32>
    %129 = math.exp %128 : vector<8x384xf32>
    %cst_59 = arith.constant 1.000000e+00 : f32
    %130 = vector.broadcast %cst_59 : f32 to vector<8x384xf32>
    %131 = arith.addf %130, %129 : vector<8x384xf32>
    %132 = arith.divf %130, %131 : vector<8x384xf32>
    %133 = vector.extract_strided_slice %132 {offsets = [0, 0], sizes = [8, 128], strides = [1, 1]} : vector<8x384xf32> to vector<8x128xf32>
    %134 = vector.extract_strided_slice %132 {offsets = [0, 128], sizes = [8, 128], strides = [1, 1]} : vector<8x384xf32> to vector<8x128xf32>
    %135 = vector.extract_strided_slice %132 {offsets = [0, 256], sizes = [8, 128], strides = [1, 1]} : vector<8x384xf32> to vector<8x128xf32>
    %136 = vector.extract_strided_slice %126 {offsets = [0, 384], sizes = [8, 128], strides = [1, 1]} : vector<8x512xf32> to vector<8x128xf32>
    %137 = math.tanh %136 : vector<8x128xf32>
    %138 = arith.mulf %134, %120 : vector<8x128xf32>
    %139 = arith.mulf %133, %137 : vector<8x128xf32>
    %140 = arith.addf %138, %139 : vector<8x128xf32>
    %141 = math.tanh %140 : vector<8x128xf32>
    %142 = arith.mulf %135, %141 : vector<8x128xf32>
    %c8_i32_60 = arith.constant 8 : i32
    %143 = arith.muli %arg1, %c8_i32_60 : i32
    %144 = arith.addi %143, %c4_i32 : i32
    %c7_i32_61 = arith.constant 7 : i32
    %145 = arith.cmpi slt, %144, %c7_i32_61 : i32
    %146 = arith.extui %145 : i1 to i32
    %c0_i32_62 = arith.constant 0 : i32
    %147 = arith.cmpi ne, %146, %c0_i32_62 : i32
    scf.if %147 {
      %235 = arith.index_cast %c4_i32 : i32 to index
      %c0_104 = arith.constant 0 : index
      %c0_105 = arith.constant 0 : index
      %236 = vector.load %arg6[%235, %c0_104, %c0_105] : memref<8x8x128xf32, #tpu.memory_space<vmem>>, vector<1x8x128xf32>
      %237 = vector.shape_cast %236 : vector<1x8x128xf32> to vector<8x128xf32>
      %238 = vector.shape_cast %142 : vector<8x128xf32> to vector<1x8x128xf32>
      tpu.vector_store %arg6[%235, %c0_104, %c0_105], %238 {strides = array<i32>} : memref<8x8x128xf32, #tpu.memory_space<vmem>>, vector<1x8x128xf32>,
      %c0_106 = arith.constant 0 : index
      %c0_107 = arith.constant 0 : index
      %239 = vector.load %arg7[%c0_106, %c0_107] : memref<8x128xf32, #tpu.memory_space<vmem>>, vector<8x128xf32>
      tpu.vector_store %arg7[%c0_106, %c0_107], %142 {strides = array<i32>} : memref<8x128xf32, #tpu.memory_space<vmem>>, vector<8x128xf32>,
      %c0_108 = arith.constant 0 : index
      %c0_109 = arith.constant 0 : index
      %240 = vector.load %arg8[%c0_108, %c0_109] : memref<8x128xf32, #tpu.memory_space<vmem>>, vector<8x128xf32>
      tpu.vector_store %arg8[%c0_108, %c0_109], %140 {strides = array<i32>} : memref<8x128xf32, #tpu.memory_space<vmem>>, vector<8x128xf32>,
    } else {
    }
    %c5_i32 = arith.constant 5 : i32
    %c0_63 = arith.constant 0 : index
    %c0_64 = arith.constant 0 : index
    %148 = vector.load %arg7[%c0_63, %c0_64] : memref<8x128xf32, #tpu.memory_space<vmem>>, vector<8x128xf32>
    %c0_65 = arith.constant 0 : index
    %c0_66 = arith.constant 0 : index
    %149 = vector.load %arg8[%c0_65, %c0_66] : memref<8x128xf32, #tpu.memory_space<vmem>>, vector<8x128xf32>
    %150 = arith.index_cast %c5_i32 : i32 to index
    %c0_67 = arith.constant 0 : index
    %c0_68 = arith.constant 0 : index
    %151 = vector.load %arg2[%150, %c0_67, %c0_68] : memref<8x8x512xf32, #tpu.memory_space<vmem>>, vector<1x8x512xf32>
    %152 = vector.shape_cast %151 : vector<1x8x512xf32> to vector<8x512xf32>
    %c0_69 = arith.constant 0 : index
    %c0_70 = arith.constant 0 : index
    %153 = vector.load %arg3[%c0_69, %c0_70] : memref<128x512xf32, #tpu.memory_space<vmem>>, vector<128x512xf32>
    %cst_71 = arith.constant dense<0.000000e+00> : vector<8x512xf32>
    %154 = tpu.matmul %148, %153, %cst_71 {dimension_numbers = #tpu.dot_dimension_numbers<[1], [0], [0], [1], [0, 0, 1, 1], [], []>} : vector<8x128xf32>, vector<128x512xf32>, vector<8x512xf32> -> vector<8x512xf32>
    %155 = arith.addf %152, %154 : vector<8x512xf32>
    %156 = vector.extract_strided_slice %155 {offsets = [0, 0], sizes = [8, 384], strides = [1, 1]} : vector<8x512xf32> to vector<8x384xf32>
    %157 = arith.negf %156 : vector<8x384xf32>
    %158 = math.exp %157 : vector<8x384xf32>
    %cst_72 = arith.constant 1.000000e+00 : f32
    %159 = vector.broadcast %cst_72 : f32 to vector<8x384xf32>
    %160 = arith.addf %159, %158 : vector<8x384xf32>
    %161 = arith.divf %159, %160 : vector<8x384xf32>
    %162 = vector.extract_strided_slice %161 {offsets = [0, 0], sizes = [8, 128], strides = [1, 1]} : vector<8x384xf32> to vector<8x128xf32>
    %163 = vector.extract_strided_slice %161 {offsets = [0, 128], sizes = [8, 128], strides = [1, 1]} : vector<8x384xf32> to vector<8x128xf32>
    %164 = vector.extract_strided_slice %161 {offsets = [0, 256], sizes = [8, 128], strides = [1, 1]} : vector<8x384xf32> to vector<8x128xf32>
    %165 = vector.extract_strided_slice %155 {offsets = [0, 384], sizes = [8, 128], strides = [1, 1]} : vector<8x512xf32> to vector<8x128xf32>
    %166 = math.tanh %165 : vector<8x128xf32>
    %167 = arith.mulf %163, %149 : vector<8x128xf32>
    %168 = arith.mulf %162, %166 : vector<8x128xf32>
    %169 = arith.addf %167, %168 : vector<8x128xf32>
    %170 = math.tanh %169 : vector<8x128xf32>
    %171 = arith.mulf %164, %170 : vector<8x128xf32>
    %c8_i32_73 = arith.constant 8 : i32
    %172 = arith.muli %arg1, %c8_i32_73 : i32
    %173 = arith.addi %172, %c5_i32 : i32
    %c7_i32_74 = arith.constant 7 : i32
    %174 = arith.cmpi slt, %173, %c7_i32_74 : i32
    %175 = arith.extui %174 : i1 to i32
    %c0_i32_75 = arith.constant 0 : i32
    %176 = arith.cmpi ne, %175, %c0_i32_75 : i32
    scf.if %176 {
      %235 = arith.index_cast %c5_i32 : i32 to index
      %c0_104 = arith.constant 0 : index
      %c0_105 = arith.constant 0 : index
      %236 = vector.load %arg6[%235, %c0_104, %c0_105] : memref<8x8x128xf32, #tpu.memory_space<vmem>>, vector<1x8x128xf32>
      %237 = vector.shape_cast %236 : vector<1x8x128xf32> to vector<8x128xf32>
      %238 = vector.shape_cast %171 : vector<8x128xf32> to vector<1x8x128xf32>
      tpu.vector_store %arg6[%235, %c0_104, %c0_105], %238 {strides = array<i32>} : memref<8x8x128xf32, #tpu.memory_space<vmem>>, vector<1x8x128xf32>,
      %c0_106 = arith.constant 0 : index
      %c0_107 = arith.constant 0 : index
      %239 = vector.load %arg7[%c0_106, %c0_107] : memref<8x128xf32, #tpu.memory_space<vmem>>, vector<8x128xf32>
      tpu.vector_store %arg7[%c0_106, %c0_107], %171 {strides = array<i32>} : memref<8x128xf32, #tpu.memory_space<vmem>>, vector<8x128xf32>,
      %c0_108 = arith.constant 0 : index
      %c0_109 = arith.constant 0 : index
      %240 = vector.load %arg8[%c0_108, %c0_109] : memref<8x128xf32, #tpu.memory_space<vmem>>, vector<8x128xf32>
      tpu.vector_store %arg8[%c0_108, %c0_109], %169 {strides = array<i32>} : memref<8x128xf32, #tpu.memory_space<vmem>>, vector<8x128xf32>,
    } else {
    }
    %c6_i32 = arith.constant 6 : i32
    %c0_76 = arith.constant 0 : index
    %c0_77 = arith.constant 0 : index
    %177 = vector.load %arg7[%c0_76, %c0_77] : memref<8x128xf32, #tpu.memory_space<vmem>>, vector<8x128xf32>
    %c0_78 = arith.constant 0 : index
    %c0_79 = arith.constant 0 : index
    %178 = vector.load %arg8[%c0_78, %c0_79] : memref<8x128xf32, #tpu.memory_space<vmem>>, vector<8x128xf32>
    %179 = arith.index_cast %c6_i32 : i32 to index
    %c0_80 = arith.constant 0 : index
    %c0_81 = arith.constant 0 : index
    %180 = vector.load %arg2[%179, %c0_80, %c0_81] : memref<8x8x512xf32, #tpu.memory_space<vmem>>, vector<1x8x512xf32>
    %181 = vector.shape_cast %180 : vector<1x8x512xf32> to vector<8x512xf32>
    %c0_82 = arith.constant 0 : index
    %c0_83 = arith.constant 0 : index
    %182 = vector.load %arg3[%c0_82, %c0_83] : memref<128x512xf32, #tpu.memory_space<vmem>>, vector<128x512xf32>
    %cst_84 = arith.constant dense<0.000000e+00> : vector<8x512xf32>
    %183 = tpu.matmul %177, %182, %cst_84 {dimension_numbers = #tpu.dot_dimension_numbers<[1], [0], [0], [1], [0, 0, 1, 1], [], []>} : vector<8x128xf32>, vector<128x512xf32>, vector<8x512xf32> -> vector<8x512xf32>
    %184 = arith.addf %181, %183 : vector<8x512xf32>
    %185 = vector.extract_strided_slice %184 {offsets = [0, 0], sizes = [8, 384], strides = [1, 1]} : vector<8x512xf32> to vector<8x384xf32>
    %186 = arith.negf %185 : vector<8x384xf32>
    %187 = math.exp %186 : vector<8x384xf32>
    %cst_85 = arith.constant 1.000000e+00 : f32
    %188 = vector.broadcast %cst_85 : f32 to vector<8x384xf32>
    %189 = arith.addf %188, %187 : vector<8x384xf32>
    %190 = arith.divf %188, %189 : vector<8x384xf32>
    %191 = vector.extract_strided_slice %190 {offsets = [0, 0], sizes = [8, 128], strides = [1, 1]} : vector<8x384xf32> to vector<8x128xf32>
    %192 = vector.extract_strided_slice %190 {offsets = [0, 128], sizes = [8, 128], strides = [1, 1]} : vector<8x384xf32> to vector<8x128xf32>
    %193 = vector.extract_strided_slice %190 {offsets = [0, 256], sizes = [8, 128], strides = [1, 1]} : vector<8x384xf32> to vector<8x128xf32>
    %194 = vector.extract_strided_slice %184 {offsets = [0, 384], sizes = [8, 128], strides = [1, 1]} : vector<8x512xf32> to vector<8x128xf32>
    %195 = math.tanh %194 : vector<8x128xf32>
    %196 = arith.mulf %192, %178 : vector<8x128xf32>
    %197 = arith.mulf %191, %195 : vector<8x128xf32>
    %198 = arith.addf %196, %197 : vector<8x128xf32>
    %199 = math.tanh %198 : vector<8x128xf32>
    %200 = arith.mulf %193, %199 : vector<8x128xf32>
    %c8_i32_86 = arith.constant 8 : i32
    %201 = arith.muli %arg1, %c8_i32_86 : i32
    %202 = arith.addi %201, %c6_i32 : i32
    %c7_i32_87 = arith.constant 7 : i32
    %203 = arith.cmpi slt, %202, %c7_i32_87 : i32
    %204 = arith.extui %203 : i1 to i32
    %c0_i32_88 = arith.constant 0 : i32
    %205 = arith.cmpi ne, %204, %c0_i32_88 : i32
    scf.if %205 {
      %235 = arith.index_cast %c6_i32 : i32 to index
      %c0_104 = arith.constant 0 : index
      %c0_105 = arith.constant 0 : index
      %236 = vector.load %arg6[%235, %c0_104, %c0_105] : memref<8x8x128xf32, #tpu.memory_space<vmem>>, vector<1x8x128xf32>
      %237 = vector.shape_cast %236 : vector<1x8x128xf32> to vector<8x128xf32>
      %238 = vector.shape_cast %200 : vector<8x128xf32> to vector<1x8x128xf32>
      tpu.vector_store %arg6[%235, %c0_104, %c0_105], %238 {strides = array<i32>} : memref<8x8x128xf32, #tpu.memory_space<vmem>>, vector<1x8x128xf32>,
      %c0_106 = arith.constant 0 : index
      %c0_107 = arith.constant 0 : index
      %239 = vector.load %arg7[%c0_106, %c0_107] : memref<8x128xf32, #tpu.memory_space<vmem>>, vector<8x128xf32>
      tpu.vector_store %arg7[%c0_106, %c0_107], %200 {strides = array<i32>} : memref<8x128xf32, #tpu.memory_space<vmem>>, vector<8x128xf32>,
      %c0_108 = arith.constant 0 : index
      %c0_109 = arith.constant 0 : index
      %240 = vector.load %arg8[%c0_108, %c0_109] : memref<8x128xf32, #tpu.memory_space<vmem>>, vector<8x128xf32>
      tpu.vector_store %arg8[%c0_108, %c0_109], %198 {strides = array<i32>} : memref<8x128xf32, #tpu.memory_space<vmem>>, vector<8x128xf32>,
    } else {
    }
    %c7_i32_89 = arith.constant 7 : i32
    %c0_90 = arith.constant 0 : index
    %c0_91 = arith.constant 0 : index
    %206 = vector.load %arg7[%c0_90, %c0_91] : memref<8x128xf32, #tpu.memory_space<vmem>>, vector<8x128xf32>
    %c0_92 = arith.constant 0 : index
    %c0_93 = arith.constant 0 : index
    %207 = vector.load %arg8[%c0_92, %c0_93] : memref<8x128xf32, #tpu.memory_space<vmem>>, vector<8x128xf32>
    %208 = arith.index_cast %c7_i32_89 : i32 to index
    %c0_94 = arith.constant 0 : index
    %c0_95 = arith.constant 0 : index
    %209 = vector.load %arg2[%208, %c0_94, %c0_95] : memref<8x8x512xf32, #tpu.memory_space<vmem>>, vector<1x8x512xf32>
    %210 = vector.shape_cast %209 : vector<1x8x512xf32> to vector<8x512xf32>
    %c0_96 = arith.constant 0 : index
    %c0_97 = arith.constant 0 : index
    %211 = vector.load %arg3[%c0_96, %c0_97] : memref<128x512xf32, #tpu.memory_space<vmem>>, vector<128x512xf32>
    %cst_98 = arith.constant dense<0.000000e+00> : vector<8x512xf32>
    %212 = tpu.matmul %206, %211, %cst_98 {dimension_numbers = #tpu.dot_dimension_numbers<[1], [0], [0], [1], [0, 0, 1, 1], [], []>} : vector<8x128xf32>, vector<128x512xf32>, vector<8x512xf32> -> vector<8x512xf32>
    %213 = arith.addf %210, %212 : vector<8x512xf32>
    %214 = vector.extract_strided_slice %213 {offsets = [0, 0], sizes = [8, 384], strides = [1, 1]} : vector<8x512xf32> to vector<8x384xf32>
    %215 = arith.negf %214 : vector<8x384xf32>
    %216 = math.exp %215 : vector<8x384xf32>
    %cst_99 = arith.constant 1.000000e+00 : f32
    %217 = vector.broadcast %cst_99 : f32 to vector<8x384xf32>
    %218 = arith.addf %217, %216 : vector<8x384xf32>
    %219 = arith.divf %217, %218 : vector<8x384xf32>
    %220 = vector.extract_strided_slice %219 {offsets = [0, 0], sizes = [8, 128], strides = [1, 1]} : vector<8x384xf32> to vector<8x128xf32>
    %221 = vector.extract_strided_slice %219 {offsets = [0, 128], sizes = [8, 128], strides = [1, 1]} : vector<8x384xf32> to vector<8x128xf32>
    %222 = vector.extract_strided_slice %219 {offsets = [0, 256], sizes = [8, 128], strides = [1, 1]} : vector<8x384xf32> to vector<8x128xf32>
    %223 = vector.extract_strided_slice %213 {offsets = [0, 384], sizes = [8, 128], strides = [1, 1]} : vector<8x512xf32> to vector<8x128xf32>
    %224 = math.tanh %223 : vector<8x128xf32>
    %225 = arith.mulf %221, %207 : vector<8x128xf32>
    %226 = arith.mulf %220, %224 : vector<8x128xf32>
    %227 = arith.addf %225, %226 : vector<8x128xf32>
    %228 = math.tanh %227 : vector<8x128xf32>
    %229 = arith.mulf %222, %228 : vector<8x128xf32>
    %c8_i32_100 = arith.constant 8 : i32
    %230 = arith.muli %arg1, %c8_i32_100 : i32
    %231 = arith.addi %230, %c7_i32_89 : i32
    %c7_i32_101 = arith.constant 7 : i32
    %232 = arith.cmpi slt, %231, %c7_i32_101 : i32
    %233 = arith.extui %232 : i1 to i32
    %c0_i32_102 = arith.constant 0 : i32
    %234 = arith.cmpi ne, %233, %c0_i32_102 : i32
    scf.if %234 {
      %235 = arith.index_cast %c7_i32_89 : i32 to index
      %c0_104 = arith.constant 0 : index
      %c0_105 = arith.constant 0 : index
      %236 = vector.load %arg6[%235, %c0_104, %c0_105] : memref<8x8x128xf32, #tpu.memory_space<vmem>>, vector<1x8x128xf32>
      %237 = vector.shape_cast %236 : vector<1x8x128xf32> to vector<8x128xf32>
      %238 = vector.shape_cast %229 : vector<8x128xf32> to vector<1x8x128xf32>
      tpu.vector_store %arg6[%235, %c0_104, %c0_105], %238 {strides = array<i32>} : memref<8x8x128xf32, #tpu.memory_space<vmem>>, vector<1x8x128xf32>,
      %c0_106 = arith.constant 0 : index
      %c0_107 = arith.constant 0 : index
      %239 = vector.load %arg7[%c0_106, %c0_107] : memref<8x128xf32, #tpu.memory_space<vmem>>, vector<8x128xf32>
      tpu.vector_store %arg7[%c0_106, %c0_107], %229 {strides = array<i32>} : memref<8x128xf32, #tpu.memory_space<vmem>>, vector<8x128xf32>,
      %c0_108 = arith.constant 0 : index
      %c0_109 = arith.constant 0 : index
      %240 = vector.load %arg8[%c0_108, %c0_109] : memref<8x128xf32, #tpu.memory_space<vmem>>, vector<8x128xf32>
      tpu.vector_store %arg8[%c0_108, %c0_109], %227 {strides = array<i32>} : memref<8x128xf32, #tpu.memory_space<vmem>>, vector<8x128xf32>,
    } else {
    }
    %c8_i32_103 = arith.constant 8 : i32
    return
  }
  func.func @transform_0(%arg0: i32, %arg1: i32) -> (i32, i32, i32) {
    %c0_i32 = arith.constant 0 : i32
    %c0_i32_0 = arith.constant 0 : i32
    return %arg1, %arg0, %c0_i32 : i32, i32, i32
  }
  func.func @transform_1(%arg0: i32, %arg1: i32) -> (i32, i32) {
    %c0_i32 = arith.constant 0 : i32
    %c0_i32_0 = arith.constant 0 : i32
    %c0_i32_1 = arith.constant 0 : i32
    return %c0_i32, %c0_i32_0 : i32, i32
  }
  func.func @transform_2(%arg0: i32, %arg1: i32) -> (i32, i32) {
    %c0_i32 = arith.constant 0 : i32
    %c0_i32_0 = arith.constant 0 : i32
    return %arg0, %c0_i32 : i32, i32
  }
  func.func @transform_3(%arg0: i32, %arg1: i32) -> (i32, i32) {
    %c0_i32 = arith.constant 0 : i32
    %c0_i32_0 = arith.constant 0 : i32
    return %arg0, %c0_i32 : i32, i32
  }
  func.func @transform_4(%arg0: i32, %arg1: i32) -> (i32, i32, i32) {
    %c0_i32 = arith.constant 0 : i32
    %c0_i32_0 = arith.constant 0 : i32
    return %arg1, %arg0, %c0_i32 : i32, i32, i32
  }
  func.func @transform_5(%arg0: i32, %arg1: i32) -> (i32, i32) {
    %c0_i32 = arith.constant 0 : i32
    %c0_i32_0 = arith.constant 0 : i32
    return %arg0, %c0_i32 : i32, i32
  }
  func.func @transform_6(%arg0: i32, %arg1: i32) -> (i32, i32) {
    %c0_i32 = arith.constant 0 : i32
    %c0_i32_0 = arith.constant 0 : i32
    return %arg0, %c0_i32 : i32, i32
  }
}

</mosaic_0001>

<bundles_post_ra>
// kernel: seq2seq_forward.5
= control target key start
LH: loop header
LB: loop body
LE: loop exit
PB: predicated region body
PF: predicated region fallthrough
CT: control target
= control target key end

     0   :  { %v2731_v7 = vmov 0.0   ;;  %s3768_s0 = inlined_call_operand.vmem [shape: f32[8,8,512], index: 0, kind: input, shape index: {}]   ;;  %s3769_s1 = inlined_call_operand.vmem [shape: f32[128,512], index: 1, kind: input, shape index: {}]   ;;  %s3770_s2 = inlined_call_operand.vmem [shape: f32[8,128], index: 2, kind: input, shape index: {}, may-alias: {2,3}]   ;;  %s3771_s3 = inlined_call_operand.vmem [shape: f32[8,128], index: 3, kind: input, shape index: {}, may-alias: {2,3}]   ;;  %s3772_s4 = inlined_call_operand.hbm [shape: f32[8,8,128], index: 4, kind: output, shape index: {0}]   ;;  %s3773_s5 = inlined_call_operand.vmem [shape: f32[8,128], index: 5, kind: output, shape index: {1}]   ;;  %s3774_s6 = inlined_call_operand.vmem [shape: f32[8,128], index: 6, kind: output, shape index: {2}]  }
   0x1   :  { %v36_v0 = vld [vmem:[%s3769_s1 + $0x8] sm:$0xff]  ;;  %v35_v2 = vld [vmem:[%s3769_s1] sm:$0xff]  ;;  %163 = vmatprep.mubr.f32.mxu0 %v2731_v7  ;;  %234 = vmatprep.mubr.f32.mxu1 %v2731_v7  ;;  %v38_v19 = vld [vmem:[%s3769_s1 + $0x18] sm:$0xff] }
   0x2   :  { %v40_v1 = vld [vmem:[%s3769_s1 + $0x28] sm:$0xff]  ;;  %v39_v4 = vld [vmem:[%s3769_s1 + $0x20] sm:$0xff]  ;;  %v42_v20 = vld [vmem:[%s3769_s1 + $0x38] sm:$0xff] }
   0x3   :  { %v2779_v3 = vpack.c.bf16 %v40_v1, %v36_v0  ;;  %v44_v5 = vld [vmem:[%s3769_s1 + $0x48] sm:$0xff]  ;;  %v2792_v8 = vpack.c.bf16 %v39_v4, %v35_v2  ;;  %v43_v10 = vld [vmem:[%s3769_s1 + $0x40] sm:$0xff]  ;;  %v2833_v22 = vpack.c.bf16 %v42_v20, %v38_v19  ;;  %v37_v23 = vld [vmem:[%s3769_s1 + $0x10] sm:$0xff] }
   0x4   :  { %v48_v6 = vld [vmem:[%s3769_s1 + $0x68] sm:$0xff]  ;;  %v47_v11 = vld [vmem:[%s3769_s1 + $0x60] sm:$0xff]  ;;  %v41_v24 = vld [vmem:[%s3769_s1 + $0x30] sm:$0xff] }
   0x5   :  { %v2794_v9 = vpack.c.bf16 %v48_v6, %v44_v5  ;;  %v52_v12 = vld [vmem:[%s3769_s1 + $0x88] sm:$0xff]  ;;  %2064 = vmatprep.subr.bf16.mxu0 %v2779_v3  ;;  %v2810_v14 = vpack.c.bf16 %v47_v11, %v43_v10  ;;  %v51_v15 = vld [vmem:[%s3769_s1 + $0x80] sm:$0xff]  ;;  %v2841_v25 = vpack.c.bf16 %v41_v24, %v37_v23  ;;  %2096 = vmatprep.subr.bf16.mxu1 %v2833_v22  ;;  %v46_v27 = vld [vmem:[%s3769_s1 + $0x58] sm:$0xff] }
   0x6   :  { %v56_v13 = vld [vmem:[%s3769_s1 + $0xa8] sm:$0xff]  ;;  %2066 = vmatpush1.bf16.msra.mxu0 %v2792_v8  ;;  %v55_v16 = vld [vmem:[%s3769_s1 + $0xa0] sm:$0xff]  ;;  %v50_v28 = vld [vmem:[%s3769_s1 + $0x78] sm:$0xff] }
   0x7   :  { %2068 = vmatprep.subr.bf16.mxu0 %v2794_v9  ;;  %v2819_v17 = vpack.c.bf16 %v56_v13, %v52_v12  ;;  %v60_v18 = vld [vmem:[%s3769_s1 + $0xc8] sm:$0xff]  ;;  %v2844_v26 = vpack.c.bf16 %v55_v16, %v51_v15  ;;  %v45_v29 = vld [vmem:[%s3769_s1 + $0x50] sm:$0xff]  ;;  %v59_v31 = vld [vmem:[%s3769_s1 + $0xc0] sm:$0xff]  ;;  %2098 = vmatpush1.bf16.msra.mxu1 %v2841_v25  ;;  %v2866_v33 = vpack.c.bf16 %v50_v28, %v46_v27 }
   0x8   :  { %v64_v21 = vld [vmem:[%s3769_s1 + $0xe8] sm:$0xff]  ;;  %v63_v32 = vld [vmem:[%s3769_s1 + $0xe0] sm:$0xff]  ;;  %v49_v34 = vld [vmem:[%s3769_s1 + $0x70] sm:$0xff] }
   0x9   :  { %v2857_v30 = vpack.c.bf16 %v64_v21, %v60_v18  ;;  %v68_v35 = vld [vmem:[%s3769_s1 + $0x108] sm:$0xff]  ;;  %v2877_v37 = vpack.c.bf16 %v49_v34, %v45_v29  ;;  %v54_v38 = vld [vmem:[%s3769_s1 + $0x98] sm:$0xff]  ;;  %2100 = vmatprep.subr.bf16.mxu1 %v2866_v33  ;;  %v53_v40 = vld [vmem:[%s3769_s1 + $0x90] sm:$0xff]  ;;  %v2893_v42 = vpack.c.bf16 %v63_v32, %v59_v31 }
   0xa   :  { %2070 = vmatpush1.bf16.msra.mxu0 %v2810_v14  ;;  %v72_v36 = vld [vmem:[%s3769_s1 + $0x128] sm:$0xff]  ;;  %v58_v39 = vld [vmem:[%s3769_s1 + $0xb8] sm:$0xff]  ;;  %v57_v41 = vld [vmem:[%s3769_s1 + $0xb0] sm:$0xff] }
   0xb   :  { %2072 = vmatprep.subr.bf16.mxu0 %v2819_v17  ;;  %v67_v43 = vld [vmem:[%s3769_s1 + $0x100] sm:$0xff]  ;;  %v2901_v45 = vpack.c.bf16 %v58_v39, %v54_v38  ;;  %v2904_v46 = vpack.c.bf16 %v72_v36, %v68_v35  ;;  %2102 = vmatpush1.bf16.msra.mxu1 %v2877_v37  ;;  %v76_v47 = vld [vmem:[%s3769_s1 + $0x148] sm:$0xff]  ;;  %v2910_v48 = vpack.c.bf16 %v57_v41, %v53_v40  ;;  %v62_v49 = vld [vmem:[%s3769_s1 + $0xd8] sm:$0xff] }
   0xc   :  { %v71_v44 = vld [vmem:[%s3769_s1 + $0x120] sm:$0xff]  ;;  %v66_v50 = vld [vmem:[%s3769_s1 + $0xf8] sm:$0xff]  ;;  %v80_v51 = vld [vmem:[%s3769_s1 + $0x168] sm:$0xff] }
   0xd   :  { %2104 = vmatprep.subr.bf16.mxu1 %v2901_v45  ;;  %v2922_v52 = vpack.c.bf16 %v66_v50, %v62_v49  ;;  %v61_v53 = vld [vmem:[%s3769_s1 + $0xd0] sm:$0xff]  ;;  %v2931_v55 = vpack.c.bf16 %v71_v44, %v67_v43  ;;  %v70_v56 = vld [vmem:[%s3769_s1 + $0x118] sm:$0xff]  ;;  %v2940_v58 = vpack.c.bf16 %v80_v51, %v76_v47  ;;  %v75_v59 = vld [vmem:[%s3769_s1 + $0x140] sm:$0xff] }
   0xe   :  { %2074 = vmatpush1.bf16.msra.mxu0 %v2844_v26  ;;  %v65_v54 = vld [vmem:[%s3769_s1 + $0xf0] sm:$0xff]  ;;  %v74_v57 = vld [vmem:[%s3769_s1 + $0x138] sm:$0xff]  ;;  %v79_v60 = vld [vmem:[%s3769_s1 + $0x160] sm:$0xff] }
   0xf   :  { %2076 = vmatprep.subr.bf16.mxu0 %v2857_v30  ;;  %2106 = vmatpush1.bf16.msra.mxu1 %v2910_v48  ;;  %v84_v61 = vld [vmem:[%s3769_s1 + $0x188] sm:$0xff]  ;;  %v2952_v62 = vpack.c.bf16 %v65_v54, %v61_v53  ;;  %v2958_v0 = vpack.c.bf16 %v74_v57, %v70_v56  ;;  %v69_v1 = vld [vmem:[%s3769_s1 + $0x110] sm:$0xff]  ;;  %v78_v4 = vld [vmem:[%s3769_s1 + $0x158] sm:$0xff]  ;;  %v2973_v6 = vpack.c.bf16 %v79_v60, %v75_v59 }
  0x10   :  { %v88_v63 = vld [vmem:[%s3769_s1 + $0x1a8] sm:$0xff]  ;;  %2108 = vmatprep.subr.bf16.mxu1 %v2922_v52  ;;  %v73_v2 = vld [vmem:[%s3769_s1 + $0x130] sm:$0xff]  ;;  %v82_v5 = vld [vmem:[%s3769_s1 + $0x178] sm:$0xff] }
  0x11   :  { %v83_v10 = vld [vmem:[%s3769_s1 + $0x180] sm:$0xff]  ;;  %v2979_v11 = vpack.c.bf16 %v88_v63, %v84_v61  ;;  %v92_v13 = vld [vmem:[%s3769_s1 + $0x1c8] sm:$0xff]  ;;  %v2991_v16 = vpack.c.bf16 %v73_v2, %v69_v1  ;;  %v2994_v18 = vpack.c.bf16 %v82_v5, %v78_v4  ;;  %v77_v19 = vld [vmem:[%s3769_s1 + $0x150] sm:$0xff] }
  0x12   :  { %2078 = vmatpush1.bf16.msra.mxu0 %v2893_v42  ;;  %v87_v12 = vld [vmem:[%s3769_s1 + $0x1a0] sm:$0xff]  ;;  %v96_v15 = vld [vmem:[%s3769_s1 + $0x1e8] sm:$0xff]  ;;  %v81_v20 = vld [vmem:[%s3769_s1 + $0x170] sm:$0xff] }
  0x13   :  { %2080 = vmatprep.subr.bf16.mxu0 %v2904_v46  ;;  %2110 = vmatpush1.bf16.msra.mxu1 %v2952_v62 }
  0x14   :  { %2112 = vmatprep.subr.bf16.mxu1 %v2958_v0 }
  0x16   :  { %2082 = vmatpush1.bf16.msra.mxu0 %v2931_v55 }
  0x17   :  { %2084 = vmatprep.subr.bf16.mxu0 %v2940_v58 }
  0x18   :  { %12 = vsyncpa [#allocation3], 0  ;;  %v86_v21 = vld [vmem:[%s3769_s1 + $0x198] sm:$0xff]  ;;  %v3009_v24 = vpack.c.bf16 %v87_v12, %v83_v10  ;;  %v3012_v27 = vpack.c.bf16 %v96_v15, %v92_v13  ;;  %v91_v28 = vld [vmem:[%s3769_s1 + $0x1c0] sm:$0xff]  ;;  %2114 = vmatpush1.bf16.msra.mxu1 %v2991_v16  ;;  %v3021_v31 = vpack.c.bf16 %v81_v20, %v77_v19  ;;  %s2732_s21 = smov [#allocation2]  }
  0x19   :  { %v90_v23 = vld [vmem:[%s3769_s1 + $0x1b8] sm:$0xff]  ;;  %v95_v29 = vld [vmem:[%s3769_s1 + $0x1e0] sm:$0xff]  ;;  %2116 = vmatprep.subr.bf16.mxu1 %v2994_v18  ;;  %v85_v34 = vld [vmem:[%s3769_s1 + $0x190] sm:$0xff]  ;;  %s1992_s22 = sshll.u32 %s2732_s21, 4  ;;  %s1993_s22 = int_to_ptr.vmem [resolvable:$true] %s1992_s22 }
  0x1a   :  { %2086 = vmatpush1.bf16.msra.mxu0 %v2973_v6  ;;  %v3024_v32 = vpack.c.bf16 %v90_v23, %v86_v21  ;;  %v89_v35 = vld [vmem:[%s3769_s1 + $0x1b0] sm:$0xff]  ;;  %v94_v36 = vld [vmem:[%s3769_s1 + $0x1d8] sm:$0xff]  ;;  %v3039_v39 = vpack.c.bf16 %v95_v29, %v91_v28  ;;  %v25_v47 = vld [vmem:[%s3770_s2] sm:$0xff]  ;;  %s2707_s25 = scalar_lea.vmem %s1993_s22, 1024  ;;  %p2712_p1 = scmp.lt.s32.totalorder %s1993_s22, %s1993_s22 }
  0x1b   :  { %2088 = vmatprep.subr.bf16.mxu0 %v2979_v11  ;;  %v98_v38 = vld [vmem:[%s3769_s1 + $0x1f8] sm:$0xff]  ;;  %v3043_v40 = vpack.c.bf16 %v89_v35, %v85_v34  ;;  %v93_v43 = vld [vmem:[%s3769_s1 + $0x1d0] sm:$0xff]  ;;  %v31_v50 = vld [vmem:[%s3768_s0] sm:$0xff]  ;;  %p2708_p0 = scmp.ne.s32.totalorder %s1993_s22, %s2707_s25  ;;  %p2713_p2 = scmp.lt.s32.totalorder %s2707_s25, %s2707_s25 }
  0x1c   :  { %2118 = vmatpush1.bf16.msra.mxu1 %v3021_v31  ;;  %v3046_v41 = vpack.c.bf16 %v98_v38, %v94_v36  ;;  %v97_v44 = vld [vmem:[%s3769_s1 + $0x1f0] sm:$0xff]  ;;  %v32_v51 = vld [vmem:[%s3768_s0 + $0x8] sm:$0xff]  ;;  %v34_v4 = vld [vmem:[%s3768_s0 + $0x18] sm:$0xff] }
  0x1d   :  { %2120 = vmatprep.subr.bf16.mxu1 %v3024_v32  ;;  %v3059_v49 = vpack.c.bf16 %v97_v44, %v93_v43  ;;  %v33_v61 = vld [vmem:[%s3768_s0 + $0x10] sm:$0xff]  ;;  %v27_v23 = vld [vmem:[%s3771_s3] sm:$0xff]  ;;  %p2714_p3 = por %p2713_p2, %p2712_p1 }
  0x1e   :  { %2090 = vmatpush1.bf16.msra.mxu0 %v3009_v24 }
  0x1f   :  { %2092 = vmatprep.subr.bf16.mxu0 %v3012_v27  ;;  %p2715_p4 = pnand %p2714_p3, %p2708_p0 }
  0x20   :  { %2122 = vmatpush1.bf16.msra.mxu1 %v3043_v40 }
  0x21   :  { %2124 = vmatprep.subr.bf16.mxu1 %v3046_v41 }
  0x22   :  { %2094 = vmatpush1.bf16.msra.mxu0 %v3039_v39 }
  0x23   :  { %2128 = vmatprep.subr.bf16.mxu0 %v2779_v3 }
  0x24   :  { %2126 = vmatpush1.bf16.msra.mxu1 %v3059_v49 }
  0x25   :  { %164 = vmatmul.mubr.f32.vlgmr.msra.gmra.mrb[0].mxu0 %v25_v47  ;;  %2160 = vmatprep.subr.bf16.mxu1 %v2833_v22 }
  0x26   :  { %2130 = vmatpush1.bf16.msra.mxu0 %v2792_v8  ;;  %407 = vmatprep.mubr.f32.mxu0 %v2731_v7 }
  0x27   :  { %2132 = vmatprep.subr.bf16.mxu0 %v2794_v9  ;;  %235 = vmatmul.mubr.f32.vlgmr.msra.gmra.mrb[0].mxu1 %v25_v47 }
  0x28   :  { %2162 = vmatpush1.bf16.msra.mxu1 %v2841_v25  ;;  %478 = vmatprep.mubr.f32.mxu1 %v2731_v7 }
  0x29   :  { %2164 = vmatprep.subr.bf16.mxu1 %v2866_v33 }
  0x2a   :  { %2134 = vmatpush1.bf16.msra.mxu0 %v2810_v14 }
  0x2b   :  { %2136 = vmatprep.subr.bf16.mxu0 %v2819_v17 }
  0x2c   :  { %2166 = vmatpush1.bf16.msra.mxu1 %v2877_v37 }
  0x2d   :  { %2168 = vmatprep.subr.bf16.mxu1 %v2901_v45 }
  0x2e   :  { %2138 = vmatpush1.bf16.msra.mxu0 %v2844_v26 }
  0x2f   :  { %2140 = vmatprep.subr.bf16.mxu0 %v2857_v30 }
  0x30   :  { %2170 = vmatpush1.bf16.msra.mxu1 %v2910_v48 }
  0x31   :  { %2172 = vmatprep.subr.bf16.mxu1 %v2922_v52 }
  0x32   :  { %2142 = vmatpush1.bf16.msra.mxu0 %v2893_v42 }
  0x33   :  { %2144 = vmatprep.subr.bf16.mxu0 %v2904_v46 }
  0x34   :  { %2174 = vmatpush1.bf16.msra.mxu1 %v2952_v62 }
  0x35   :  { %2176 = vmatprep.subr.bf16.mxu1 %v2958_v0 }
  0x36   :  { %2146 = vmatpush1.bf16.msra.mxu0 %v2931_v55 }
  0x37   :  { %2148 = vmatprep.subr.bf16.mxu0 %v2940_v58 }
  0x38   :  { %2178 = vmatpush1.bf16.msra.mxu1 %v2991_v16 }
  0x39   :  { %2180 = vmatprep.subr.bf16.mxu1 %v2994_v18 }
  0x3a   :  { %2150 = vmatpush1.bf16.msra.mxu0 %v2973_v6 }
  0x3b   :  { %2152 = vmatprep.subr.bf16.mxu0 %v2979_v11 }
  0x3c   :  { %2182 = vmatpush1.bf16.msra.mxu1 %v3021_v31 }
  0x3d   :  { %2184 = vmatprep.subr.bf16.mxu1 %v3024_v32 }
  0x3e   :  { %2154 = vmatpush1.bf16.msra.mxu0 %v3009_v24 }
  0x3f   :  { %2156 = vmatprep.subr.bf16.mxu0 %v3012_v27 }
  0x40   :  { %2186 = vmatpush1.bf16.msra.mxu1 %v3043_v40 }
  0x41   :  { %2188 = vmatprep.subr.bf16.mxu1 %v3046_v41 }
  0x42   :  { %2158 = vmatpush1.bf16.msra.mxu0 %v3039_v39 }
  0x43   :  { %2192 = vmatprep.subr.bf16.mxu0 %v2779_v3 }
  0x44   :  { %2190 = vmatpush1.bf16.msra.mxu1 %v3059_v49 }
  0x45   :  { %2224 = vmatprep.subr.bf16.mxu1 %v2833_v22 }
  0xf8   :  { %v165_v53 = vpop.f32.mrb[0].mxu0 }
  0xf9   :  { %v241_v54 = vadd.f32 %v165_v53, %v31_v50  ;;  %v167_v56 = vpop.f32.mrb[1].mxu0 }
  0xfa   :  { %v242_v57 = vadd.f32 %v167_v56, %v32_v51  ;;  %v236_v63 = vpop.f32.mrb[0].mxu1 }
  0xfb   :  { %v2011_v59 = vmul.f32 -1.442695, %v241_v54  ;;  %v238_v1 = vpop.f32.mrb[1].mxu1  ;;  %v243_v2 = vadd.f32 %v236_v63, %v33_v61 }
  0xfc   :  { %v2012_v60 = vmul.f32 -1.442695, %v242_v57  ;;  %v244_v10 = vadd.f32 %v238_v1, %v34_v4 }
  0xfd   :  { %2579 = vpow2.f32 %v2011_v59  ;;  %v2013_v5 = vmul.f32 -1.442695, %v243_v2 }
  0xfe   :  { %2581 = vpow2.f32 %v2012_v60 }
  0xff   :  { %2583 = vpow2.f32 %v2013_v5 }
 0x100   :  { %2585 = vtanh.f32 %v244_v10  ;;  %v797_v10 = vld [vmem:[%s3769_s1 + $0xe0] sm:$0xff] }
 0x107   :  { %v2580_v12 = vpop.eup %2579 }
 0x108   :  { %v2582_v13 = vpop.eup %2581  ;;  %v254_v15 = vadd.f32 1.0, %v2580_v12 }
 0x109   :  { %v255_v19 = vadd.f32 1.0, %v2582_v13  ;;  %v2584_v20 = vpop.eup %2583  ;;  %v802_v13 = vld [vmem:[%s3769_s1 + $0x108] sm:$0xff] }
 0x10a   :  { %2587 = vrcp.f32 %v254_v15  ;;  %v2586_v21 = vpop.eup %2585  ;;  %v256_v29 = vadd.f32 1.0, %v2584_v20  ;;  %v806_v15 = vld [vmem:[%s3769_s1 + $0x128] sm:$0xff]  ;;  %v801_v20 = vld [vmem:[%s3769_s1 + $0x100] sm:$0xff] }
 0x10b   :  { %2589 = vrcp.f32 %v255_v19  ;;  %v3245_v19 = vpack.c.bf16 %v806_v15, %v802_v13  ;;  %v1021_v15 = vld [vmem:[%s3769_s1 + $0x38] sm:$0xff] }
 0x10c   :  { %2591 = vrcp.f32 %v256_v29  ;;  %v814_v29 = vld [vmem:[%s3769_s1 + $0x168] sm:$0xff] }
 0x114   :  { %v2588_v28 = vpop.eup %2587 }
 0x115   :  { %v2590_v34 = vpop.eup %2589  ;;  %v265_v35 = vmul.f32 %v2588_v28, %v2586_v21  ;;  %v805_v21 = vld [vmem:[%s3769_s1 + $0x120] sm:$0xff]  ;;  %v810_v28 = vld [vmem:[%s3769_s1 + $0x148] sm:$0xff] }
 0x116   :  { %v264_v36 = vmul.f32 %v2590_v34, %v27_v23  ;;  %v2592_v43 = vpop.eup %2591  ;;  %v3253_v23 = vpack.c.bf16 %v805_v21, %v801_v20  ;;  %v3263_v34 = vpack.c.bf16 %v814_v29, %v810_v28  ;;  %v1014_v20 = vld [vmem:[%s3769_s1] sm:$0xff] }
 0x117   :  { %v1018_v21 = vld [vmem:[%s3769_s1 + $0x20] sm:$0xff] }
 0x118   :  { %v3114_v38 = vadd.f32 %v265_v35, %v264_v36  ;;  %v809_v35 = vld [vmem:[%s3769_s1 + $0x140] sm:$0xff]  ;;  %v3351_v29 = vpack.c.bf16 %v1018_v21, %v1014_v20  ;;  %v1076_v20 = vld [vmem:[%s3769_s1 + $0x1f0] sm:$0xff] }
 0x119   :  { %v813_v36 = vld [vmem:[%s3769_s1 + $0x160] sm:$0xff] }
 0x11a   :  { %2593 = vtanh.f32 %v3114_v38 }
 0x124   :  { %v2594_v44 = vpop.eup %2593 }
 0x125   :  { %v268_v47 = vmul.f32 %v2594_v44, %v2592_v43  ;;  %v818_v43 = vld [vmem:[%s3769_s1 + $0x188] sm:$0xff] }
 0x126   :  { %v822_v44 = vld [vmem:[%s3769_s1 + $0x1a8] sm:$0xff] }
 0x127   :  { %269 = vst [vmem:[#allocation2] sm:$0xff] %v268_v47  ;;  %408 = vmatmul.mubr.f32.vlgmr.msra.gmra.mrb[2].mxu0 %v268_v47  ;;  %479 = vmatmul.mubr.f32.vlgmr.msra.gmra.mrb[2].mxu1 %v268_v47  ;;  %v3281_v47 = vpack.c.bf16 %v822_v44, %v818_v43  ;;  %v1025_v44 = vld [vmem:[%s3769_s1 + $0x58] sm:$0xff] }
 0x128   :  { %2194 = vmatpush1.bf16.msra.mxu0 %v2792_v8  ;;  %2226 = vmatpush1.bf16.msra.mxu1 %v2841_v25 }
 0x129   :  { %2196 = vmatprep.subr.bf16.mxu0 %v2794_v9  ;;  %2228 = vmatprep.subr.bf16.mxu1 %v2866_v33  ;;  %v2014_v9 = vld [vmem:[%s3768_s0 + $0x20] sm:$0xff] }
 0x12a   :  { %652 = vmatprep.mubr.f32.mxu0 %v2731_v7  ;;  %723 = vmatprep.mubr.f32.mxu1 %v2731_v7 }
 0x12c   :  { %2198 = vmatpush1.bf16.msra.mxu0 %v2810_v14  ;;  %2230 = vmatpush1.bf16.msra.mxu1 %v2877_v37  ;;  %v2015_v14 = vld [vmem:[%s3768_s0 + $0x28] sm:$0xff] }
 0x12d   :  { %2200 = vmatprep.subr.bf16.mxu0 %v2819_v17  ;;  %2232 = vmatprep.subr.bf16.mxu1 %v2901_v45 }
 0x130   :  { %2202 = vmatpush1.bf16.msra.mxu0 %v2844_v26  ;;  %2234 = vmatpush1.bf16.msra.mxu1 %v2910_v48 }
 0x131   :  { %2204 = vmatprep.subr.bf16.mxu0 %v2857_v30  ;;  %2236 = vmatprep.subr.bf16.mxu1 %v2922_v52 }
 0x134   :  { %2206 = vmatpush1.bf16.msra.mxu0 %v2893_v42  ;;  %2238 = vmatpush1.bf16.msra.mxu1 %v2952_v62 }
 0x135   :  { %2208 = vmatprep.subr.bf16.mxu0 %v2904_v46  ;;  %2240 = vmatprep.subr.bf16.mxu1 %v2958_v0 }
 0x138   :  { %2210 = vmatpush1.bf16.msra.mxu0 %v2931_v55  ;;  %2242 = vmatpush1.bf16.msra.mxu1 %v2991_v16 }
 0x139   :  { %2212 = vmatprep.subr.bf16.mxu0 %v2940_v58  ;;  %2244 = vmatprep.subr.bf16.mxu1 %v2994_v18 }
 0x13c   :  { %2214 = vmatpush1.bf16.msra.mxu0 %v2973_v6  ;;  %2246 = vmatpush1.bf16.msra.mxu1 %v3021_v31 }
 0x13d   :  { %2216 = vmatprep.subr.bf16.mxu0 %v2979_v11  ;;  %2248 = vmatprep.subr.bf16.mxu1 %v3024_v32  ;;  %v2017_v11 = vld [vmem:[%s3768_s0 + $0x38] sm:$0xff] }
 0x140   :  { %2218 = vmatpush1.bf16.msra.mxu0 %v3009_v24  ;;  %2250 = vmatpush1.bf16.msra.mxu1 %v3043_v40 }
 0x141   :  { %2220 = vmatprep.subr.bf16.mxu0 %v3012_v27  ;;  %2252 = vmatprep.subr.bf16.mxu1 %v3046_v41 }
 0x144   :  { %2222 = vmatpush1.bf16.msra.mxu0 %v3039_v39  ;;  %2254 = vmatpush1.bf16.msra.mxu1 %v3059_v49 }
 0x145   :  { %2256 = vmatprep.subr.bf16.mxu0 %v2779_v3  ;;  %2288 = vmatprep.subr.bf16.mxu1 %v2833_v22  ;;  %v2016_v3 = vld [vmem:[%s3768_s0 + $0x30] sm:$0xff] }
 0x1fa   :  { %v409_v17 = vpop.f32.mrb[2].mxu0  ;;  %v480_v26 = vpop.f32.mrb[2].mxu1 }
 0x1fb   :  { %v485_v30 = vadd.f32 %v2014_v9, %v409_v17  ;;  %v411_v42 = vpop.f32.mrb[3].mxu0  ;;  %v482_v46 = vpop.f32.mrb[3].mxu1  ;;  %v487_v22 = vadd.f32 %v2016_v3, %v480_v26  ;;  %v817_v9 = vld [vmem:[%s3769_s1 + $0x180] sm:$0xff]  ;;  %v826_v26 = vld [vmem:[%s3769_s1 + $0x1c8] sm:$0xff] }
 0x1fc   :  { %v486_v55 = vadd.f32 %v2015_v14, %v411_v42  ;;  %v488_v24 = vadd.f32 %v2017_v11, %v482_v46  ;;  %v821_v14 = vld [vmem:[%s3769_s1 + $0x1a0] sm:$0xff]  ;;  %v2022_v3 = vld [vmem:[%s3768_s0 + $0x48] sm:$0xff] }
 0x1fd   :  { %v2018_v58 = vmul.f32 -1.442695, %v485_v30  ;;  %v2020_v27 = vmul.f32 -1.442695, %v487_v22  ;;  %v3289_v17 = vpack.c.bf16 %v821_v14, %v817_v9  ;;  %v830_v30 = vld [vmem:[%s3769_s1 + $0x1e8] sm:$0xff]  ;;  %v825_v46 = vld [vmem:[%s3769_s1 + $0x1c0] sm:$0xff] }
 0x1fe   :  { %v2019_v6 = vmul.f32 -1.442695, %v486_v55  ;;  %v3299_v42 = vpack.c.bf16 %v830_v30, %v826_v26  ;;  %v829_v55 = vld [vmem:[%s3769_s1 + $0x1e0] sm:$0xff]  ;;  %v1029_v9 = vld [vmem:[%s3769_s1 + $0x78] sm:$0xff]  ;;  %v1024_v26 = vld [vmem:[%s3769_s1 + $0x50] sm:$0xff] }
 0x1ff   :  { %2595 = vpow2.f32 %v2018_v58  ;;  %v3307_v58 = vpack.c.bf16 %v829_v55, %v825_v46  ;;  %v3372_v14 = vpack.c.bf16 %v1029_v9, %v1025_v44  ;;  %v1028_v30 = vld [vmem:[%s3769_s1 + $0x70] sm:$0xff]  ;;  %v1033_v55 = vld [vmem:[%s3769_s1 + $0x98] sm:$0xff] }
 0x200   :  { %2597 = vpow2.f32 %v2019_v6  ;;  %v2021_v6 = vld [vmem:[%s3768_s0 + $0x40] sm:$0xff]  ;;  %v3380_v46 = vpack.c.bf16 %v1028_v30, %v1024_v26 }
 0x201   :  { %2599 = vtanh.f32 %v488_v24 }
 0x202   :  { %2601 = vpow2.f32 %v2020_v27 }
 0x209   :  { %v2596_v39 = vpop.eup %2595 }
 0x20a   :  { %v498_v50 = vadd.f32 1.0, %v2596_v39  ;;  %v2598_v51 = vpop.eup %2597 }
 0x20b   :  { %v499_v53 = vadd.f32 1.0, %v2598_v51  ;;  %v2600_v54 = vpop.eup %2599 }
 0x20c   :  { %2603 = vrcp.f32 %v498_v50  ;;  %v2602_v56 = vpop.eup %2601 }
 0x20d   :  { %2605 = vrcp.f32 %v499_v53  ;;  %v500_v61 = vadd.f32 1.0, %v2602_v56 }
 0x20f   :  { %2607 = vrcp.f32 %v500_v61 }
 0x216   :  { %v2604_v57 = vpop.eup %2603 }
 0x217   :  { %v509_v59 = vmul.f32 %v2604_v57, %v2600_v54  ;;  %v2606_v60 = vpop.eup %2605  ;;  %v2023_v54 = vld [vmem:[%s3768_s0 + $0x50] sm:$0xff]  ;;  %v2024_v57 = vld [vmem:[%s3768_s0 + $0x58] sm:$0xff] }
 0x218   :  { %v508_v63 = vmul.f32 %v2606_v60, %v3114_v38  ;;  %v3271_v38 = vpack.c.bf16 %v813_v36, %v809_v35  ;;  %v1016_v35 = vld [vmem:[%s3769_s1 + $0x10] sm:$0xff] }
 0x219   :  { %v2608_v2 = vpop.eup %2607  ;;  %v1020_v36 = vld [vmem:[%s3769_s1 + $0x30] sm:$0xff] }
 0x21a   :  { %v3164_v1 = vadd.f32 %v509_v59, %v508_v63  ;;  %v3360_v43 = vpack.c.bf16 %v1020_v36, %v1016_v35  ;;  %v2028_v35 = vld [vmem:[%s3768_s0 + $0x60] sm:$0xff]  ;;  %v2029_v36 = vld [vmem:[%s3768_s0 + $0x68] sm:$0xff] }
 0x21c   :  { %2609 = vtanh.f32 %v3164_v1 }
 0x226   :  { %v2610_v4 = vpop.eup %2609 }
 0x227   :  { %v512_v5 = vmul.f32 %v2610_v4, %v2608_v2 }
 0x229   :  { %514 = vst [vmem:[#allocation2 + $0x8] sm:$0xff] %v512_v5  ;;  %653 = vmatmul.mubr.f32.vlgmr.msra.gmra.mrb[4].mxu0 %v512_v5  ;;  %724 = vmatmul.mubr.f32.vlgmr.msra.gmra.mrb[4].mxu1 %v512_v5 }
 0x22a   :  { %2258 = vmatpush1.bf16.msra.mxu0 %v2792_v8  ;;  %2290 = vmatpush1.bf16.msra.mxu1 %v2841_v25  ;;  %v778_v8 = vld [vmem:[%s3769_s1 + $0x48] sm:$0xff] }
 0x22b   :  { %2292 = vmatprep.subr.bf16.mxu1 %v2866_v33  ;;  %897 = vmatprep.mubr.f32.mxu0 %v2731_v7  ;;  %v782_v25 = vld [vmem:[%s3769_s1 + $0x68] sm:$0xff] }
 0x22c   :  { %968 = vmatprep.mubr.f32.mxu1 %v2731_v7  ;;  %v3191_v33 = vpack.c.bf16 %v782_v25, %v778_v8 }
 0x22e   :  { %2294 = vmatpush1.bf16.msra.mxu1 %v2877_v37  ;;  %v777_v37 = vld [vmem:[%s3769_s1 + $0x40] sm:$0xff]  ;;  %2260 = vmatprep.subr.bf16.mxu0 %v3191_v33 }
 0x22f   :  { %2296 = vmatprep.subr.bf16.mxu1 %v2901_v45  ;;  %v781_v45 = vld [vmem:[%s3769_s1 + $0x60] sm:$0xff] }
 0x232   :  { %2298 = vmatpush1.bf16.msra.mxu1 %v2910_v48  ;;  %v3199_v48 = vpack.c.bf16 %v781_v45, %v777_v37 }
 0x233   :  { %2300 = vmatprep.subr.bf16.mxu1 %v2922_v52  ;;  %v786_v52 = vld [vmem:[%s3769_s1 + $0x88] sm:$0xff] }
 0x234   :  { %2262 = vmatpush1.bf16.msra.mxu0 %v3199_v48 }
 0x236   :  { %2302 = vmatpush1.bf16.msra.mxu1 %v2952_v62  ;;  %v790_v62 = vld [vmem:[%s3769_s1 + $0xa8] sm:$0xff] }
 0x237   :  { %2304 = vmatprep.subr.bf16.mxu1 %v2958_v0  ;;  %v3209_v0 = vpack.c.bf16 %v790_v62, %v786_v52 }
 0x239   :  { %2264 = vmatprep.subr.bf16.mxu0 %v3209_v0 }
 0x23a   :  { %2306 = vmatpush1.bf16.msra.mxu1 %v2991_v16  ;;  %v785_v16 = vld [vmem:[%s3769_s1 + $0x80] sm:$0xff] }
 0x23b   :  { %2308 = vmatprep.subr.bf16.mxu1 %v2994_v18  ;;  %v789_v18 = vld [vmem:[%s3769_s1 + $0xa0] sm:$0xff] }
 0x23e   :  { %2310 = vmatpush1.bf16.msra.mxu1 %v3021_v31  ;;  %v3217_v31 = vpack.c.bf16 %v789_v18, %v785_v16 }
 0x23f   :  { %2312 = vmatprep.subr.bf16.mxu1 %v3024_v32  ;;  %v794_v32 = vld [vmem:[%s3769_s1 + $0xc8] sm:$0xff] }
 0x240   :  { %2266 = vmatpush1.bf16.msra.mxu0 %v3217_v31 }
 0x242   :  { %2314 = vmatpush1.bf16.msra.mxu1 %v3043_v40  ;;  %v798_v40 = vld [vmem:[%s3769_s1 + $0xe8] sm:$0xff] }
 0x243   :  { %2316 = vmatprep.subr.bf16.mxu1 %v3046_v41  ;;  %v3227_v41 = vpack.c.bf16 %v798_v40, %v794_v32 }
 0x245   :  { %2268 = vmatprep.subr.bf16.mxu0 %v3227_v41 }
 0x246   :  { %2318 = vmatpush1.bf16.msra.mxu1 %v3059_v49  ;;  %v793_v49 = vld [vmem:[%s3769_s1 + $0xc0] sm:$0xff] }
 0x247   :  { %v3235_v12 = vpack.c.bf16 %v797_v10, %v793_v49  ;;  %v1015_v49 = vld [vmem:[%s3769_s1 + $0x8] sm:$0xff]  ;;  %v1017_v10 = vld [vmem:[%s3769_s1 + $0x18] sm:$0xff] }
 0x248   :  { %v3349_v28 = vpack.c.bf16 %v1021_v15, %v1017_v10  ;;  %v1072_v15 = vld [vmem:[%s3769_s1 + $0x1d0] sm:$0xff] }
 0x249   :  { %2270 = vmatpush1.bf16.msra.mxu0 %v3235_v12  ;;  %v3500_v21 = vpack.c.bf16 %v1076_v20, %v1072_v15 }
 0x24a   :  { %2272 = vmatprep.subr.bf16.mxu0 %v3245_v19  ;;  %2352 = vmatprep.subr.bf16.mxu1 %v3349_v28 }
 0x24d   :  { %2274 = vmatpush1.bf16.msra.mxu0 %v3253_v23 }
 0x24e   :  { %2276 = vmatprep.subr.bf16.mxu0 %v3263_v34 }
 0x251   :  { %2278 = vmatpush1.bf16.msra.mxu0 %v3271_v38 }
 0x252   :  { %2280 = vmatprep.subr.bf16.mxu0 %v3281_v47 }
 0x255   :  { %2282 = vmatpush1.bf16.msra.mxu0 %v3289_v17 }
 0x256   :  { %2284 = vmatprep.subr.bf16.mxu0 %v3299_v42 }
 0x259   :  { %2286 = vmatpush1.bf16.msra.mxu0 %v3307_v58 }
 0x2fc   :  { %v654_v22 = vpop.f32.mrb[4].mxu0  ;;  %v725_v11 = vpop.f32.mrb[4].mxu1 }
 0x2fd   :  { %v730_v24 = vadd.f32 %v2021_v6, %v654_v22  ;;  %v656_v27 = vpop.f32.mrb[5].mxu0  ;;  %v727_v39 = vpop.f32.mrb[5].mxu1  ;;  %v732_v56 = vadd.f32 %v2023_v54, %v725_v11  ;;  %v1037_v6 = vld [vmem:[%s3769_s1 + $0xb8] sm:$0xff]  ;;  %v1032_v22 = vld [vmem:[%s3769_s1 + $0x90] sm:$0xff] }
 0x2fe   :  { %v731_v50 = vadd.f32 %v2022_v3, %v656_v27  ;;  %v733_v59 = vadd.f32 %v2024_v57, %v727_v39  ;;  %v3392_v3 = vpack.c.bf16 %v1037_v6, %v1033_v55  ;;  %v1036_v11 = vld [vmem:[%s3769_s1 + $0xb0] sm:$0xff]  ;;  %v1041_v27 = vld [vmem:[%s3769_s1 + $0xd8] sm:$0xff] }
 0x2ff   :  { %v2025_v51 = vmul.f32 -1.442695, %v730_v24  ;;  %v2027_v60 = vmul.f32 -1.442695, %v732_v56  ;;  %v3400_v24 = vpack.c.bf16 %v1036_v11, %v1032_v22  ;;  %v1045_v39 = vld [vmem:[%s3769_s1 + $0xf8] sm:$0xff] }
 0x300   :  { %v2026_v53 = vmul.f32 -1.442695, %v731_v50  ;;  %v3412_v50 = vpack.c.bf16 %v1045_v39, %v1041_v27  ;;  %v1049_v56 = vld [vmem:[%s3769_s1 + $0x118] sm:$0xff]  ;;  %v2030_v27 = vld [vmem:[%s3768_s0 + $0x70] sm:$0xff] }
 0x301   :  { %2611 = vpow2.f32 %v2025_v51  ;;  %v1040_v51 = vld [vmem:[%s3769_s1 + $0xd0] sm:$0xff]  ;;  %v1053_v57 = vld [vmem:[%s3769_s1 + $0x138] sm:$0xff] }
 0x302   :  { %2613 = vpow2.f32 %v2026_v53  ;;  %v1044_v53 = vld [vmem:[%s3769_s1 + $0xf0] sm:$0xff] }
 0x303   :  { %2615 = vtanh.f32 %v733_v59  ;;  %v3420_v54 = vpack.c.bf16 %v1044_v53, %v1040_v51  ;;  %v3432_v59 = vpack.c.bf16 %v1053_v57, %v1049_v56  ;;  %v2031_v51 = vld [vmem:[%s3768_s0 + $0x78] sm:$0xff] }
 0x304   :  { %2617 = vpow2.f32 %v2027_v60  ;;  %v1048_v60 = vld [vmem:[%s3769_s1 + $0x110] sm:$0xff] }
 0x30b   :  { %v2612_v61 = vpop.eup %2611 }
 0x30c   :  { %v743_v63 = vadd.f32 1.0, %v2612_v61  ;;  %v2614_v2 = vpop.eup %2613  ;;  %v1052_v61 = vld [vmem:[%s3769_s1 + $0x130] sm:$0xff] }
 0x30d   :  { %v744_v4 = vadd.f32 1.0, %v2614_v2  ;;  %v2616_v5 = vpop.eup %2615  ;;  %v1057_v2 = vld [vmem:[%s3769_s1 + $0x158] sm:$0xff] }
 0x30e   :  { %2619 = vrcp.f32 %v743_v63  ;;  %v2618_v8 = vpop.eup %2617  ;;  %v3440_v63 = vpack.c.bf16 %v1052_v61, %v1048_v60 }
 0x30f   :  { %2621 = vrcp.f32 %v744_v4  ;;  %v745_v52 = vadd.f32 1.0, %v2618_v8  ;;  %v1061_v4 = vld [vmem:[%s3769_s1 + $0x178] sm:$0xff]  ;;  %v1056_v8 = vld [vmem:[%s3769_s1 + $0x150] sm:$0xff] }
 0x311   :  { %2623 = vrcp.f32 %v745_v52  ;;  %v1069_v52 = vld [vmem:[%s3769_s1 + $0x1b8] sm:$0xff] }
 0x318   :  { %v2620_v25 = vpop.eup %2619 }
 0x319   :  { %v754_v37 = vmul.f32 %v2620_v25, %v2616_v5  ;;  %v2622_v45 = vpop.eup %2621  ;;  %v3452_v5 = vpack.c.bf16 %v1061_v4, %v1057_v2  ;;  %v1060_v25 = vld [vmem:[%s3769_s1 + $0x170] sm:$0xff] }
 0x31a   :  { %v753_v62 = vmul.f32 %v2622_v45, %v3164_v1  ;;  %v1019_v1 = vld [vmem:[%s3769_s1 + $0x28] sm:$0xff]  ;;  %v1065_v45 = vld [vmem:[%s3769_s1 + $0x198] sm:$0xff] }
 0x31b   :  { %v2624_v18 = vpop.eup %2623  ;;  %v3338_v13 = vpack.c.bf16 %v1019_v1, %v1015_v49  ;;  %v1073_v49 = vld [vmem:[%s3769_s1 + $0x1d8] sm:$0xff] }
 0x31c   :  { %v3324_v16 = vadd.f32 %v754_v37, %v753_v62  ;;  %v3460_v37 = vpack.c.bf16 %v1060_v25, %v1056_v8  ;;  %v3472_v62 = vpack.c.bf16 %v1069_v52, %v1065_v45  ;;  %v1077_v1 = vld [vmem:[%s3769_s1 + $0x1f8] sm:$0xff] }
 0x31d   :  { %2320 = vmatprep.subr.bf16.mxu0 %v3338_v13  ;;  %v3492_v10 = vpack.c.bf16 %v1077_v1, %v1073_v49 }
 0x31e   :  { %2625 = vtanh.f32 %v3324_v16 }
 0x328   :  { %v2626_v32 = vpop.eup %2625 }
 0x329   :  { %v757_v40 = vmul.f32 %v2626_v32, %v2624_v18  ;;  %v1064_v18 = vld [vmem:[%s3769_s1 + $0x190] sm:$0xff] }
 0x32a   :  { %v1068_v32 = vld [vmem:[%s3769_s1 + $0x1b0] sm:$0xff] }
 0x32b   :  { %759 = vst [vmem:[#allocation2 + $0x10] sm:$0xff] %v757_v40  ;;  %898 = vmatmul.mubr.f32.vlgmr.msra.gmra.mrb[6].mxu0 %v757_v40  ;;  %969 = vmatmul.mubr.f32.vlgmr.msra.gmra.mrb[6].mxu1 %v757_v40  ;;  %v3480_v40 = vpack.c.bf16 %v1068_v32, %v1064_v18 }
 0x32c   :  { %1142 = vmatprep.mubr.f32.mxu0 %v2731_v7  ;;  %1213 = vmatprep.mubr.f32.mxu1 %v2731_v7 }
 0x32d   :  { %2322 = vmatpush1.bf16.msra.mxu0 %v3351_v29  ;;  %2354 = vmatpush1.bf16.msra.mxu1 %v3360_v43 }
 0x32e   :  { %2324 = vmatprep.subr.bf16.mxu0 %v3191_v33  ;;  %2356 = vmatprep.subr.bf16.mxu1 %v3372_v14 }
 0x331   :  { %2326 = vmatpush1.bf16.msra.mxu0 %v3199_v48  ;;  %2358 = vmatpush1.bf16.msra.mxu1 %v3380_v46 }
 0x332   :  { %2328 = vmatprep.subr.bf16.mxu0 %v3209_v0  ;;  %2360 = vmatprep.subr.bf16.mxu1 %v3392_v3 }
 0x335   :  { %2330 = vmatpush1.bf16.msra.mxu0 %v3217_v31  ;;  %2362 = vmatpush1.bf16.msra.mxu1 %v3400_v24 }
 0x336   :  { %2332 = vmatprep.subr.bf16.mxu0 %v3227_v41  ;;  %2364 = vmatprep.subr.bf16.mxu1 %v3412_v50 }
 0x339   :  { %2334 = vmatpush1.bf16.msra.mxu0 %v3235_v12  ;;  %2366 = vmatpush1.bf16.msra.mxu1 %v3420_v54 }
 0x33a   :  { %2336 = vmatprep.subr.bf16.mxu0 %v3245_v19  ;;  %2368 = vmatprep.subr.bf16.mxu1 %v3432_v59 }
 0x33d   :  { %2338 = vmatpush1.bf16.msra.mxu0 %v3253_v23  ;;  %2370 = vmatpush1.bf16.msra.mxu1 %v3440_v63 }
 0x33e   :  { %2340 = vmatprep.subr.bf16.mxu0 %v3263_v34  ;;  %2372 = vmatprep.subr.bf16.mxu1 %v3452_v5 }
 0x341   :  { %2342 = vmatpush1.bf16.msra.mxu0 %v3271_v38  ;;  %2374 = vmatpush1.bf16.msra.mxu1 %v3460_v37 }
 0x342   :  { %2344 = vmatprep.subr.bf16.mxu0 %v3281_v47  ;;  %2376 = vmatprep.subr.bf16.mxu1 %v3472_v62 }
 0x345   :  { %2346 = vmatpush1.bf16.msra.mxu0 %v3289_v17  ;;  %2378 = vmatpush1.bf16.msra.mxu1 %v3480_v40 }
 0x346   :  { %2348 = vmatprep.subr.bf16.mxu0 %v3299_v42  ;;  %2380 = vmatprep.subr.bf16.mxu1 %v3492_v10 }
 0x349   :  { %2350 = vmatpush1.bf16.msra.mxu0 %v3307_v58  ;;  %2382 = vmatpush1.bf16.msra.mxu1 %v3500_v21 }
 0x34a   :  { %2384 = vmatprep.subr.bf16.mxu0 %v3338_v13  ;;  %2416 = vmatprep.subr.bf16.mxu1 %v3349_v28 }
 0x3fe   :  { %v899_v44 = vpop.f32.mrb[6].mxu0  ;;  %v970_v9 = vpop.f32.mrb[6].mxu1 }
 0x3ff   :  { %v975_v26 = vadd.f32 %v2028_v35, %v899_v44  ;;  %v901_v30 = vpop.f32.mrb[7].mxu0  ;;  %v972_v55 = vpop.f32.mrb[7].mxu1  ;;  %v977_v39 = vadd.f32 %v2030_v27, %v970_v9  ;;  %v2036_v35 = vld [vmem:[%s3768_s0 + $0x88] sm:$0xff] }
 0x400   :  { %v976_v6 = vadd.f32 %v2029_v36, %v901_v30  ;;  %v978_v53 = vadd.f32 %v2031_v51, %v972_v55 }
 0x401   :  { %v2032_v22 = vmul.f32 -1.442695, %v975_v26  ;;  %v2034_v56 = vmul.f32 -1.442695, %v977_v39  ;;  %v2038_v39 = vld [vmem:[%s3768_s0 + $0x98] sm:$0xff] }
 0x402   :  { %v2033_v11 = vmul.f32 -1.442695, %v976_v6 }
 0x403   :  { %2627 = vpow2.f32 %v2032_v22 }
 0x404   :  { %2629 = vpow2.f32 %v2033_v11  ;;  %v2037_v11 = vld [vmem:[%s3768_s0 + $0x90] sm:$0xff] }
 0x405   :  { %2631 = vtanh.f32 %v978_v53 }
 0x406   :  { %2633 = vpow2.f32 %v2034_v56 }
 0x40d   :  { %v2628_v57 = vpop.eup %2627 }
 0x40e   :  { %v988_v60 = vadd.f32 1.0, %v2628_v57  ;;  %v2630_v61 = vpop.eup %2629 }
 0x40f   :  { %v989_v2 = vadd.f32 1.0, %v2630_v61  ;;  %v2632_v4 = vpop.eup %2631 }
 0x410   :  { %2635 = vrcp.f32 %v988_v60  ;;  %v2634_v8 = vpop.eup %2633 }
 0x411   :  { %2637 = vrcp.f32 %v989_v2  ;;  %v990_v18 = vadd.f32 1.0, %v2634_v8 }
 0x413   :  { %2639 = vrcp.f32 %v990_v18 }
 0x41a   :  { %v2636_v25 = vpop.eup %2635 }
 0x41b   :  { %v999_v45 = vmul.f32 %v2636_v25, %v2632_v4  ;;  %v2638_v52 = vpop.eup %2637 }
 0x41c   :  { %v998_v32 = vmul.f32 %v2638_v52, %v3324_v16  ;;  %v2035_v16 = vld [vmem:[%s3768_s0 + $0x80] sm:$0xff] }
 0x41d   :  { %v2640_v1 = vpop.eup %2639 }
 0x41e   :  { %v3520_v49 = vadd.f32 %v999_v45, %v998_v32 }
 0x420   :  { %2641 = vtanh.f32 %v3520_v49 }
 0x42a   :  { %v2642_v15 = vpop.eup %2641 }
 0x42b   :  { %v1002_v20 = vmul.f32 %v2642_v15, %v2640_v1 }
 0x42d   :  { %1004 = vst [vmem:[#allocation2 + $0x18] sm:$0xff] %v1002_v20  ;;  %1143 = vmatmul.mubr.f32.vlgmr.msra.gmra.mrb[8].mxu0 %v1002_v20  ;;  %1214 = vmatmul.mubr.f32.vlgmr.msra.gmra.mrb[8].mxu1 %v1002_v20 }
 0x42e   :  { %2386 = vmatpush1.bf16.msra.mxu0 %v3351_v29  ;;  %2418 = vmatpush1.bf16.msra.mxu1 %v3360_v43 }
 0x42f   :  { %2388 = vmatprep.subr.bf16.mxu0 %v3191_v33  ;;  %2420 = vmatprep.subr.bf16.mxu1 %v3372_v14 }
 0x430   :  { %1387 = vmatprep.mubr.f32.mxu0 %v2731_v7  ;;  %1458 = vmatprep.mubr.f32.mxu1 %v2731_v7 }
 0x432   :  { %2390 = vmatpush1.bf16.msra.mxu0 %v3199_v48  ;;  %2422 = vmatpush1.bf16.msra.mxu1 %v3380_v46 }
 0x433   :  { %2392 = vmatprep.subr.bf16.mxu0 %v3209_v0  ;;  %2424 = vmatprep.subr.bf16.mxu1 %v3392_v3 }
 0x436   :  { %2394 = vmatpush1.bf16.msra.mxu0 %v3217_v31  ;;  %2426 = vmatpush1.bf16.msra.mxu1 %v3400_v24 }
 0x437   :  { %2396 = vmatprep.subr.bf16.mxu0 %v3227_v41  ;;  %2428 = vmatprep.subr.bf16.mxu1 %v3412_v50 }
 0x43a   :  { %2398 = vmatpush1.bf16.msra.mxu0 %v3235_v12  ;;  %2430 = vmatpush1.bf16.msra.mxu1 %v3420_v54 }
 0x43b   :  { %2400 = vmatprep.subr.bf16.mxu0 %v3245_v19  ;;  %2432 = vmatprep.subr.bf16.mxu1 %v3432_v59 }
 0x43e   :  { %2402 = vmatpush1.bf16.msra.mxu0 %v3253_v23  ;;  %2434 = vmatpush1.bf16.msra.mxu1 %v3440_v63 }
 0x43f   :  { %2404 = vmatprep.subr.bf16.mxu0 %v3263_v34  ;;  %2436 = vmatprep.subr.bf16.mxu1 %v3452_v5 }
 0x442   :  { %2406 = vmatpush1.bf16.msra.mxu0 %v3271_v38  ;;  %2438 = vmatpush1.bf16.msra.mxu1 %v3460_v37 }
 0x443   :  { %2408 = vmatprep.subr.bf16.mxu0 %v3281_v47  ;;  %2440 = vmatprep.subr.bf16.mxu1 %v3472_v62 }
 0x446   :  { %2410 = vmatpush1.bf16.msra.mxu0 %v3289_v17  ;;  %2442 = vmatpush1.bf16.msra.mxu1 %v3480_v40 }
 0x447   :  { %2412 = vmatprep.subr.bf16.mxu0 %v3299_v42  ;;  %2444 = vmatprep.subr.bf16.mxu1 %v3492_v10 }
 0x44a   :  { %2414 = vmatpush1.bf16.msra.mxu0 %v3307_v58  ;;  %2446 = vmatpush1.bf16.msra.mxu1 %v3500_v21 }
 0x44b   :  { %2448 = vmatprep.subr.bf16.mxu0 %v3338_v13  ;;  %2480 = vmatprep.subr.bf16.mxu1 %v3349_v28 }
 0x500   :  { %v1144_v36 = vpop.f32.mrb[8].mxu0  ;;  %v1215_v44 = vpop.f32.mrb[8].mxu1 }
 0x501   :  { %v1220_v9 = vadd.f32 %v2035_v16, %v1144_v36  ;;  %v1146_v26 = vpop.f32.mrb[9].mxu0  ;;  %v1217_v30 = vpop.f32.mrb[9].mxu1  ;;  %v1222_v27 = vadd.f32 %v2037_v11, %v1215_v44 }
 0x502   :  { %v1221_v55 = vadd.f32 %v2036_v35, %v1146_v26  ;;  %v1223_v51 = vadd.f32 %v2038_v39, %v1217_v30 }
 0x503   :  { %v2039_v6 = vmul.f32 -1.442695, %v1220_v9  ;;  %v2041_v53 = vmul.f32 -1.442695, %v1222_v27 }
 0x504   :  { %v2040_v22 = vmul.f32 -1.442695, %v1221_v55 }
 0x505   :  { %2643 = vpow2.f32 %v2039_v6 }
 0x506   :  { %2645 = vpow2.f32 %v2040_v22 }
 0x507   :  { %2647 = vtanh.f32 %v1223_v51 }
 0x508   :  { %2649 = vpow2.f32 %v2041_v53  ;;  %v1782_v53 = vld [vmem:[%s3769_s1 + $0x108] sm:$0xff] }
 0x50f   :  { %v2644_v56 = vpop.eup %2643 }
 0x510   :  { %v1233_v57 = vadd.f32 1.0, %v2644_v56  ;;  %v2646_v60 = vpop.eup %2645  ;;  %v1786_v56 = vld [vmem:[%s3769_s1 + $0x128] sm:$0xff] }
 0x511   :  { %v1234_v61 = vadd.f32 1.0, %v2646_v60  ;;  %v2648_v2 = vpop.eup %2647  ;;  %v1781_v60 = vld [vmem:[%s3769_s1 + $0x100] sm:$0xff] }
 0x512   :  { %2651 = vrcp.f32 %v1233_v57  ;;  %v2650_v4 = vpop.eup %2649  ;;  %v2527_v57 = vpack.c.bf16 %v1786_v56, %v1782_v53  ;;  %v2058_v53 = vld [vmem:[%s3768_s0 + $0xf0] sm:$0xff] }
 0x513   :  { %2653 = vrcp.f32 %v1234_v61  ;;  %v1235_v52 = vadd.f32 1.0, %v2650_v4  ;;  %v1785_v61 = vld [vmem:[%s3769_s1 + $0x120] sm:$0xff]  ;;  %v1790_v4 = vld [vmem:[%s3769_s1 + $0x148] sm:$0xff] }
 0x515   :  { %2655 = vrcp.f32 %v1235_v52  ;;  %v1793_v52 = vld [vmem:[%s3769_s1 + $0x160] sm:$0xff] }
 0x51c   :  { %v2652_v8 = vpop.eup %2651 }
 0x51d   :  { %v1244_v25 = vmul.f32 %v2652_v8, %v2648_v2  ;;  %v2654_v45 = vpop.eup %2653  ;;  %v2529_v2 = vpack.c.bf16 %v1785_v61, %v1781_v60  ;;  %v1794_v8 = vld [vmem:[%s3769_s1 + $0x168] sm:$0xff] }
 0x51e   :  { %v1243_v18 = vmul.f32 %v2654_v45, %v3520_v49  ;;  %v1789_v45 = vld [vmem:[%s3769_s1 + $0x140] sm:$0xff] }
 0x51f   :  { %v2656_v1 = vpop.eup %2655 }
 0x520   :  { %v3570_v32 = vadd.f32 %v1244_v25, %v1243_v18  ;;  %v2531_v25 = vpack.c.bf16 %v1794_v8, %v1790_v4  ;;  %v2533_v18 = vpack.c.bf16 %v1793_v52, %v1789_v45 }
 0x522   :  { %2657 = vtanh.f32 %v3570_v32 }
 0x52c   :  { %v2658_v15 = vpop.eup %2657 }
 0x52d   :  { %v1247_v20 = vmul.f32 %v2658_v15, %v2656_v1  ;;  %v1802_v1 = vld [vmem:[%s3769_s1 + $0x1a8] sm:$0xff] }
 0x52f   :  { %1249 = vst [vmem:[#allocation2 + $0x20] sm:$0xff] %v1247_v20  ;;  %1388 = vmatmul.mubr.f32.vlgmr.msra.gmra.mrb[10].mxu0 %v1247_v20  ;;  %1459 = vmatmul.mubr.f32.vlgmr.msra.gmra.mrb[10].mxu1 %v1247_v20  ;;  %v1797_v20 = vld [vmem:[%s3769_s1 + $0x180] sm:$0xff] }
 0x530   :  { %2450 = vmatpush1.bf16.msra.mxu0 %v3351_v29  ;;  %2482 = vmatpush1.bf16.msra.mxu1 %v3360_v43 }
 0x531   :  { %2452 = vmatprep.subr.bf16.mxu0 %v3191_v33  ;;  %2484 = vmatprep.subr.bf16.mxu1 %v3372_v14  ;;  %v2042_v33 = vld [vmem:[%s3768_s0 + $0xa0] sm:$0xff] }
 0x532   :  { %1632 = vmatprep.mubr.f32.mxu0 %v2731_v7  ;;  %1703 = vmatprep.mubr.f32.mxu1 %v2731_v7 }
 0x534   :  { %2454 = vmatpush1.bf16.msra.mxu0 %v3199_v48  ;;  %2486 = vmatpush1.bf16.msra.mxu1 %v3380_v46  ;;  %v2043_v48 = vld [vmem:[%s3768_s0 + $0xa8] sm:$0xff] }
 0x535   :  { %2456 = vmatprep.subr.bf16.mxu0 %v3209_v0  ;;  %2488 = vmatprep.subr.bf16.mxu1 %v3392_v3 }
 0x538   :  { %2458 = vmatpush1.bf16.msra.mxu0 %v3217_v31  ;;  %2490 = vmatpush1.bf16.msra.mxu1 %v3400_v24 }
 0x539   :  { %2460 = vmatprep.subr.bf16.mxu0 %v3227_v41  ;;  %2492 = vmatprep.subr.bf16.mxu1 %v3412_v50 }
 0x53c   :  { %2462 = vmatpush1.bf16.msra.mxu0 %v3235_v12  ;;  %2494 = vmatpush1.bf16.msra.mxu1 %v3420_v54 }
 0x53d   :  { %2464 = vmatprep.subr.bf16.mxu0 %v3245_v19  ;;  %2496 = vmatprep.subr.bf16.mxu1 %v3432_v59 }
 0x540   :  { %2466 = vmatpush1.bf16.msra.mxu0 %v3253_v23  ;;  %2498 = vmatpush1.bf16.msra.mxu1 %v3440_v63 }
 0x541   :  { %2468 = vmatprep.subr.bf16.mxu0 %v3263_v34  ;;  %2500 = vmatprep.subr.bf16.mxu1 %v3452_v5 }
 0x544   :  { %2470 = vmatpush1.bf16.msra.mxu0 %v3271_v38  ;;  %2502 = vmatpush1.bf16.msra.mxu1 %v3460_v37 }
 0x545   :  { %2472 = vmatprep.subr.bf16.mxu0 %v3281_v47  ;;  %2504 = vmatprep.subr.bf16.mxu1 %v3472_v62  ;;  %v2044_v47 = vld [vmem:[%s3768_s0 + $0xb0] sm:$0xff] }
 0x548   :  { %2474 = vmatpush1.bf16.msra.mxu0 %v3289_v17  ;;  %2506 = vmatpush1.bf16.msra.mxu1 %v3480_v40 }
 0x549   :  { %2476 = vmatprep.subr.bf16.mxu0 %v3299_v42  ;;  %2508 = vmatprep.subr.bf16.mxu1 %v3492_v10  ;;  %v2045_v42 = vld [vmem:[%s3768_s0 + $0xb8] sm:$0xff] }
 0x54c   :  { %2478 = vmatpush1.bf16.msra.mxu0 %v3307_v58  ;;  %2510 = vmatpush1.bf16.msra.mxu1 %v3500_v21 }
 0x54d   :  { %2512 = vmatprep.subr.bf16.mxu0 %v3338_v13  ;;  %2544 = vmatprep.subr.bf16.mxu1 %v3349_v28 }
 0x602   :  { %v1389_v0 = vpop.f32.mrb[10].mxu0  ;;  %v1460_v31 = vpop.f32.mrb[10].mxu1 }
 0x603   :  { %v1465_v41 = vadd.f32 %v2042_v33, %v1389_v0  ;;  %v1391_v12 = vpop.f32.mrb[11].mxu0  ;;  %v1462_v19 = vpop.f32.mrb[11].mxu1  ;;  %v1467_v17 = vadd.f32 %v2044_v47, %v1460_v31  ;;  %v1801_v33 = vld [vmem:[%s3769_s1 + $0x1a0] sm:$0xff]  ;;  %v1806_v0 = vld [vmem:[%s3769_s1 + $0x1c8] sm:$0xff] }
 0x604   :  { %v1466_v23 = vadd.f32 %v2043_v48, %v1391_v12  ;;  %v1468_v58 = vadd.f32 %v2045_v42, %v1462_v19  ;;  %v2537_v48 = vpack.c.bf16 %v1801_v33, %v1797_v20  ;;  %v1810_v31 = vld [vmem:[%s3769_s1 + $0x1e8] sm:$0xff]  ;;  %v1805_v12 = vld [vmem:[%s3769_s1 + $0x1c0] sm:$0xff] }
 0x605   :  { %v2046_v34 = vmul.f32 -1.442695, %v1465_v41  ;;  %v2048_v13 = vmul.f32 -1.442695, %v1467_v17  ;;  %v2539_v41 = vpack.c.bf16 %v1810_v31, %v1806_v0  ;;  %v1809_v19 = vld [vmem:[%s3769_s1 + $0x1e0] sm:$0xff] }
 0x606   :  { %v2047_v38 = vmul.f32 -1.442695, %v1466_v23  ;;  %v2541_v23 = vpack.c.bf16 %v1809_v19, %v1805_v12 }
 0x607   :  { %2659 = vpow2.f32 %v2046_v34  ;;  %v2049_v34 = vld [vmem:[%s3768_s0 + $0xc0] sm:$0xff] }
 0x608   :  { %2661 = vpow2.f32 %v2047_v38  ;;  %v2050_v38 = vld [vmem:[%s3768_s0 + $0xc8] sm:$0xff] }
 0x609   :  { %2663 = vtanh.f32 %v1468_v58 }
 0x60a   :  { %2665 = vpow2.f32 %v2048_v13 }
 0x611   :  { %v2660_v28 = vpop.eup %2659 }
 0x612   :  { %v1478_v49 = vadd.f32 1.0, %v2660_v28  ;;  %v2662_v16 = vpop.eup %2661 }
 0x613   :  { %v1479_v35 = vadd.f32 1.0, %v2662_v16  ;;  %v2664_v36 = vpop.eup %2663 }
 0x614   :  { %2667 = vrcp.f32 %v1478_v49  ;;  %v2666_v44 = vpop.eup %2665 }
 0x615   :  { %2669 = vrcp.f32 %v1479_v35  ;;  %v1480_v55 = vadd.f32 1.0, %v2666_v44  ;;  %v2051_v35 = vld [vmem:[%s3768_s0 + $0xd0] sm:$0xff]  ;;  %v2052_v44 = vld [vmem:[%s3768_s0 + $0xd8] sm:$0xff] }
 0x617   :  { %2671 = vrcp.f32 %v1480_v55 }
 0x61e   :  { %v2668_v9 = vpop.eup %2667 }
 0x61f   :  { %v1489_v26 = vmul.f32 %v2668_v9, %v2664_v36  ;;  %v2670_v30 = vpop.eup %2669 }
 0x620   :  { %v1488_v6 = vmul.f32 %v2670_v30, %v3570_v32  ;;  %v1798_v32 = vld [vmem:[%s3769_s1 + $0x188] sm:$0xff] }
 0x621   :  { %v2672_v11 = vpop.eup %2671  ;;  %v2535_v15 = vpack.c.bf16 %v1802_v1, %v1798_v32 }
 0x622   :  { %v3620_v22 = vadd.f32 %v1489_v26, %v1488_v6 }
 0x624   :  { %2673 = vtanh.f32 %v3620_v22 }
 0x62e   :  { %v2674_v27 = vpop.eup %2673 }
 0x62f   :  { %v1492_v39 = vmul.f32 %v2674_v27, %v2672_v11 }
 0x631   :  { %1494 = vst [vmem:[#allocation2 + $0x28] sm:$0xff] %v1492_v39  ;;  %1633 = vmatmul.mubr.f32.vlgmr.msra.gmra.mrb[12].mxu0 %v1492_v39  ;;  %1704 = vmatmul.mubr.f32.vlgmr.msra.gmra.mrb[12].mxu1 %v1492_v39 }
 0x632   :  { %2514 = vmatpush1.bf16.msra.mxu0 %v3351_v29  ;;  %2546 = vmatpush1.bf16.msra.mxu1 %v3360_v43  ;;  %v1762_v29 = vld [vmem:[%s3769_s1 + $0x68] sm:$0xff] }
 0x633   :  { %2548 = vmatprep.subr.bf16.mxu1 %v3372_v14  ;;  %1877 = vmatprep.mubr.f32.mxu0 %v2731_v7  ;;  %v1757_v14 = vld [vmem:[%s3769_s1 + $0x40] sm:$0xff] }
 0x634   :  { %1948 = vmatprep.mubr.f32.mxu1 %v2731_v7  ;;  %v1758_v7 = vld [vmem:[%s3769_s1 + $0x48] sm:$0xff] }
 0x635   :  { %v2515_v43 = vpack.c.bf16 %v1762_v29, %v1758_v7 }
 0x636   :  { %2550 = vmatpush1.bf16.msra.mxu1 %v3380_v46  ;;  %v1761_v46 = vld [vmem:[%s3769_s1 + $0x60] sm:$0xff] }
 0x637   :  { %2552 = vmatprep.subr.bf16.mxu1 %v3392_v3  ;;  %v2517_v3 = vpack.c.bf16 %v1761_v46, %v1757_v14  ;;  %2516 = vmatprep.subr.bf16.mxu0 %v2515_v43 }
 0x639   :  { %2518 = vmatpush1.bf16.msra.mxu0 %v2517_v3 }
 0x63a   :  { %2554 = vmatpush1.bf16.msra.mxu1 %v3400_v24  ;;  %v1766_v24 = vld [vmem:[%s3769_s1 + $0x88] sm:$0xff] }
 0x63b   :  { %2556 = vmatprep.subr.bf16.mxu1 %v3412_v50  ;;  %v1770_v50 = vld [vmem:[%s3769_s1 + $0xa8] sm:$0xff] }
 0x63e   :  { %2558 = vmatpush1.bf16.msra.mxu1 %v3420_v54  ;;  %v2519_v54 = vpack.c.bf16 %v1770_v50, %v1766_v24 }
 0x63f   :  { %2560 = vmatprep.subr.bf16.mxu1 %v3432_v59  ;;  %v1765_v59 = vld [vmem:[%s3769_s1 + $0x80] sm:$0xff] }
 0x640   :  { %2520 = vmatprep.subr.bf16.mxu0 %v2519_v54 }
 0x642   :  { %2562 = vmatpush1.bf16.msra.mxu1 %v3440_v63  ;;  %v1769_v63 = vld [vmem:[%s3769_s1 + $0xa0] sm:$0xff] }
 0x643   :  { %2564 = vmatprep.subr.bf16.mxu1 %v3452_v5  ;;  %v2521_v5 = vpack.c.bf16 %v1769_v63, %v1765_v59  ;;  %v2056_v59 = vld [vmem:[%s3768_s0 + $0xe0] sm:$0xff]  ;;  %v2057_v63 = vld [vmem:[%s3768_s0 + $0xe8] sm:$0xff] }
 0x645   :  { %2522 = vmatpush1.bf16.msra.mxu0 %v2521_v5 }
 0x646   :  { %2566 = vmatpush1.bf16.msra.mxu1 %v3460_v37  ;;  %v1774_v37 = vld [vmem:[%s3769_s1 + $0xc8] sm:$0xff] }
 0x647   :  { %2568 = vmatprep.subr.bf16.mxu1 %v3472_v62  ;;  %v1778_v62 = vld [vmem:[%s3769_s1 + $0xe8] sm:$0xff] }
 0x64a   :  { %2570 = vmatpush1.bf16.msra.mxu1 %v3480_v40  ;;  %v2523_v40 = vpack.c.bf16 %v1778_v62, %v1774_v37 }
 0x64b   :  { %2572 = vmatprep.subr.bf16.mxu1 %v3492_v10  ;;  %v1773_v10 = vld [vmem:[%s3769_s1 + $0xc0] sm:$0xff] }
 0x64c   :  { %2524 = vmatprep.subr.bf16.mxu0 %v2523_v40 }
 0x64e   :  { %2574 = vmatpush1.bf16.msra.mxu1 %v3500_v21  ;;  %v1777_v21 = vld [vmem:[%s3769_s1 + $0xe0] sm:$0xff] }
 0x64f   :  { %v2525_v51 = vpack.c.bf16 %v1777_v21, %v1773_v10 }
 0x651   :  { %2526 = vmatpush1.bf16.msra.mxu0 %v2525_v51 }
 0x652   :  { %2528 = vmatprep.subr.bf16.mxu0 %v2527_v57  ;;  %v2059_v57 = vld [vmem:[%s3768_s0 + $0xf8] sm:$0xff] }
 0x655   :  { %2530 = vmatpush1.bf16.msra.mxu0 %v2529_v2 }
 0x656   :  { %2532 = vmatprep.subr.bf16.mxu0 %v2531_v25 }
 0x659   :  { %2534 = vmatpush1.bf16.msra.mxu0 %v2533_v18 }
 0x65a   :  { %2536 = vmatprep.subr.bf16.mxu0 %v2535_v15 }
 0x65d   :  { %2538 = vmatpush1.bf16.msra.mxu0 %v2537_v48 }
 0x65e   :  { %2540 = vmatprep.subr.bf16.mxu0 %v2539_v41 }
 0x661   :  { %2542 = vmatpush1.bf16.msra.mxu0 %v2541_v23 }
 0x704   :  { %v1634_v47 = vpop.f32.mrb[12].mxu0  ;;  %v1705_v17 = vpop.f32.mrb[12].mxu1 }
 0x705   :  { %v1710_v42 = vadd.f32 %v2049_v34, %v1634_v47  ;;  %v1636_v58 = vpop.f32.mrb[13].mxu0  ;;  %v1707_v13 = vpop.f32.mrb[13].mxu1  ;;  %v1712_v36 = vadd.f32 %v2051_v35, %v1705_v17 }
 0x706   :  { %v1711_v28 = vadd.f32 %v2050_v38, %v1636_v58  ;;  %v1713_v9 = vadd.f32 %v2052_v44, %v1707_v13 }
 0x707   :  { %v2053_v49 = vmul.f32 -1.442695, %v1710_v42  ;;  %v2055_v26 = vmul.f32 -1.442695, %v1712_v36 }
 0x708   :  { %v2054_v16 = vmul.f32 -1.442695, %v1711_v28 }
 0x709   :  { %2675 = vpow2.f32 %v2053_v49 }
 0x70a   :  { %2677 = vpow2.f32 %v2054_v16 }
 0x70b   :  { %2679 = vtanh.f32 %v1713_v9 }
 0x70c   :  { %2681 = vpow2.f32 %v2055_v26 }
 0x713   :  { %v2676_v30 = vpop.eup %2675 }
 0x714   :  { %v1723_v55 = vadd.f32 1.0, %v2676_v30  ;;  %v2678_v6 = vpop.eup %2677 }
 0x715   :  { %v1724_v11 = vadd.f32 1.0, %v2678_v6  ;;  %v2680_v27 = vpop.eup %2679 }
 0x716   :  { %2683 = vrcp.f32 %v1723_v55  ;;  %v2682_v39 = vpop.eup %2681 }
 0x717   :  { %2685 = vrcp.f32 %v1724_v11  ;;  %v1725_v14 = vadd.f32 1.0, %v2682_v39 }
 0x719   :  { %2687 = vrcp.f32 %v1725_v14 }
 0x720   :  { %v2684_v7 = vpop.eup %2683 }
 0x721   :  { %v1734_v29 = vmul.f32 %v2684_v7, %v2680_v27  ;;  %v2686_v43 = vpop.eup %2685 }
 0x722   :  { %v1733_v46 = vmul.f32 %v2686_v43, %v3620_v22 }
 0x723   :  { %v2688_v24 = vpop.eup %2687 }
 0x724   :  { %v1735_v3 = vadd.f32 %v1734_v29, %v1733_v46 }
 0x726   :  { %2689 = vtanh.f32 %v1735_v3 }
 0x730   :  { %v2690_v50 = vpop.eup %2689 }
 0x731   :  { %v1737_v54 = vmul.f32 %v2690_v50, %v2688_v24 }
 0x733   :  { %1739 = vst [vmem:[#allocation2 + $0x30] sm:$0xff] %v1737_v54  ;;  %1878 = vmatmul.mubr.f32.vlgmr.msra.gmra.mrb[14].mxu0 %v1737_v54  ;;  %1949 = vmatmul.mubr.f32.vlgmr.msra.gmra.mrb[14].mxu1 %v1737_v54 }
 0x806   :  { %v1879_v5 = vpop.f32.mrb[14].mxu0  ;;  %v1950_v37 = vpop.f32.mrb[14].mxu1 }
 0x807   :  { %v1955_v22 = vadd.f32 %v2056_v59, %v1879_v5  ;;  %v1881_v62 = vpop.f32.mrb[15].mxu0  ;;  %v1952_v40 = vpop.f32.mrb[15].mxu1  ;;  %v1957_v56 = vadd.f32 %v2058_v53, %v1950_v37 }
 0x808   :  { %v1956_v10 = vadd.f32 %v2057_v63, %v1881_v62  ;;  %v1958_v60 = vadd.f32 %v2059_v57, %v1952_v40 }
 0x809   :  { %v2060_v21 = vmul.f32 -1.442695, %v1955_v22  ;;  %v2062_v61 = vmul.f32 -1.442695, %v1957_v56 }
 0x80a   :  { %v2061_v51 = vmul.f32 -1.442695, %v1956_v10 }
 0x80b   :  { %2691 = vpow2.f32 %v2060_v21 }
 0x80c   :  { %2693 = vpow2.f32 %v2061_v51 }
 0x80d   :  { %2695 = vtanh.f32 %v1958_v60 }
 0x80e   :  { %2697 = vpow2.f32 %v2062_v61 }
 0x815   :  { %v2692_v2 = vpop.eup %2691 }
 0x816   :  { %v1968_v4 = vadd.f32 1.0, %v2692_v2  ;;  %v2694_v8 = vpop.eup %2693 }
 0x817   :  { %v1969_v25 = vadd.f32 1.0, %v2694_v8  ;;  %v2696_v45 = vpop.eup %2695 }
 0x818   :  { %2699 = vrcp.f32 %v1968_v4  ;;  %v2698_v52 = vpop.eup %2697 }
 0x819   :  { %2701 = vrcp.f32 %v1969_v25  ;;  %v1970_v15 = vadd.f32 1.0, %v2698_v52 }
 0x81b   :  { %2703 = vrcp.f32 %v1970_v15 }
 0x822   :  { %v2700_v18 = vpop.eup %2699 }
 0x823   :  { %v1979_v32 = vmul.f32 %v2700_v18, %v2696_v45  ;;  %v2702_v1 = vpop.eup %2701 }
 0x824   :  { %v1978_v20 = vmul.f32 %v2702_v1, %v1735_v3 }
 0x825   :  { %v2704_v48 = vpop.eup %2703 }
 0x826   :  { %v1980_v33 = vadd.f32 %v1979_v32, %v1978_v20 }
 0x828   :  { %2705 = vtanh.f32 %v1980_v33  ;;  %1986 = vst [vmem:[%s3774_s6] sm:$0xff] %v1980_v33 }
 0x832   :  { %v2706_v0 = vpop.eup %2705 }
 0x833   :  { %v1982_v31 = vmul.f32 %v2706_v0, %v2704_v48 }
 0x835   :  { %1984 = vst [vmem:[#allocation2 + $0x38] sm:$0xff] %v1982_v31  ;;  %1985 = vst [vmem:[%s3773_s5] sm:$0xff] %v1982_v31 }
 0x836   :  { %2718 = shalt.err (!%p2715_p4)
}
 0x837   :  { %s2719_s27 = scalar_lea.hbm %s3772_s4, 1024 }
 0x838   :  { %p2720_p5 = scmp.ne.s32.totalorder %s3772_s4, %s2719_s27  ;;  %p2723_p6 = scmp.lt.u32.totalorder %s2719_s27, %s3772_s4 }
 0x83a   :  { %p2725_p7 = pnand %p2723_p6, %p2720_p5 }
 0x83c   :  { %2728 = shalt.err (!%p2725_p7)
}
 0x83d   :  { %s2733_s5 = smov 128   ;;  %s2734_s7 = smov 8  }
 0x83e   :  { %1998 = dma.vmem_to_hbm [thread:$0]  %s1993_s22, 1024, %s3772_s4, [#allocation3], %s2733_s5, %s2733_s5, %s2734_s7  }
 0x83f   :  { %2729 = dma.done.wait [#allocation3], 1024  }
 0x840   :  { %2730 = vsyncadd [#allocation3], 4294966272 }
 0x841   :  { %2010 = vsyncpa [#allocation3], 1 }

// kernel: seq2seq_forward.6
= control target key start
LH: loop header
LB: loop body
LE: loop exit
PB: predicated region body
PF: predicated region fallthrough
CT: control target
= control target key end

     0   :  { %12 = vsyncpa [#allocation3], 0  ;;  %v2759_v7 = vmov 0.0   ;;  %s3794_s0 = inlined_call_operand.vmem [shape: f32[1,8,512], index: 0, kind: input, shape index: {}]   ;;  %s3795_s1 = inlined_call_operand.vmem [shape: f32[128,512], index: 1, kind: input, shape index: {}]   ;;  %s3796_s2 = inlined_call_operand.vmem [shape: f32[8,128], index: 2, kind: input, shape index: {}]   ;;  %s3797_s3 = inlined_call_operand.vmem [shape: f32[8,128], index: 3, kind: input, shape index: {}]   ;;  %s3798_s4 = inlined_call_operand.vmem [shape: f32[8,8,128], index: 4, kind: output, shape index: {0}]   ;;  %s3799_s5 = inlined_call_operand.hbm [shape: f32[8,128], index: 5, kind: output, shape index: {1}]   ;;  %s3800_s6 = inlined_call_operand.hbm [shape: f32[8,128], index: 6, kind: output, shape index: {2}]  }
   0x1   :  { %v37_v0 = vld [vmem:[%s3795_s1 + $0x8] sm:$0xff]  ;;  %v36_v2 = vld [vmem:[%s3795_s1] sm:$0xff]  ;;  %164 = vmatprep.mubr.f32.mxu0 %v2759_v7  ;;  %235 = vmatprep.mubr.f32.mxu1 %v2759_v7  ;;  %v39_v19 = vld [vmem:[%s3795_s1 + $0x18] sm:$0xff] }
   0x2   :  { %v41_v1 = vld [vmem:[%s3795_s1 + $0x28] sm:$0xff]  ;;  %v40_v4 = vld [vmem:[%s3795_s1 + $0x20] sm:$0xff]  ;;  %v43_v20 = vld [vmem:[%s3795_s1 + $0x38] sm:$0xff] }
   0x3   :  { %v2806_v3 = vpack.c.bf16 %v41_v1, %v37_v0  ;;  %v45_v5 = vld [vmem:[%s3795_s1 + $0x48] sm:$0xff]  ;;  %v2819_v8 = vpack.c.bf16 %v40_v4, %v36_v2  ;;  %v44_v10 = vld [vmem:[%s3795_s1 + $0x40] sm:$0xff]  ;;  %v2860_v22 = vpack.c.bf16 %v43_v20, %v39_v19  ;;  %v38_v23 = vld [vmem:[%s3795_s1 + $0x10] sm:$0xff] }
   0x4   :  { %v49_v6 = vld [vmem:[%s3795_s1 + $0x68] sm:$0xff]  ;;  %v48_v11 = vld [vmem:[%s3795_s1 + $0x60] sm:$0xff]  ;;  %v42_v24 = vld [vmem:[%s3795_s1 + $0x30] sm:$0xff] }
   0x5   :  { %v2821_v9 = vpack.c.bf16 %v49_v6, %v45_v5  ;;  %v53_v12 = vld [vmem:[%s3795_s1 + $0x88] sm:$0xff]  ;;  %2085 = vmatprep.subr.bf16.mxu0 %v2806_v3  ;;  %v2837_v14 = vpack.c.bf16 %v48_v11, %v44_v10  ;;  %v52_v15 = vld [vmem:[%s3795_s1 + $0x80] sm:$0xff]  ;;  %v2868_v25 = vpack.c.bf16 %v42_v24, %v38_v23  ;;  %2117 = vmatprep.subr.bf16.mxu1 %v2860_v22  ;;  %v47_v27 = vld [vmem:[%s3795_s1 + $0x58] sm:$0xff] }
   0x6   :  { %v57_v13 = vld [vmem:[%s3795_s1 + $0xa8] sm:$0xff]  ;;  %2087 = vmatpush1.bf16.msra.mxu0 %v2819_v8  ;;  %v56_v16 = vld [vmem:[%s3795_s1 + $0xa0] sm:$0xff]  ;;  %v51_v28 = vld [vmem:[%s3795_s1 + $0x78] sm:$0xff] }
   0x7   :  { %2089 = vmatprep.subr.bf16.mxu0 %v2821_v9  ;;  %v2846_v17 = vpack.c.bf16 %v57_v13, %v53_v12  ;;  %v61_v18 = vld [vmem:[%s3795_s1 + $0xc8] sm:$0xff]  ;;  %v2871_v26 = vpack.c.bf16 %v56_v16, %v52_v15  ;;  %v46_v29 = vld [vmem:[%s3795_s1 + $0x50] sm:$0xff]  ;;  %v60_v31 = vld [vmem:[%s3795_s1 + $0xc0] sm:$0xff]  ;;  %2119 = vmatpush1.bf16.msra.mxu1 %v2868_v25  ;;  %v2893_v33 = vpack.c.bf16 %v51_v28, %v47_v27 }
   0x8   :  { %v65_v21 = vld [vmem:[%s3795_s1 + $0xe8] sm:$0xff]  ;;  %v64_v32 = vld [vmem:[%s3795_s1 + $0xe0] sm:$0xff]  ;;  %v50_v34 = vld [vmem:[%s3795_s1 + $0x70] sm:$0xff] }
   0x9   :  { %v2884_v30 = vpack.c.bf16 %v65_v21, %v61_v18  ;;  %v69_v35 = vld [vmem:[%s3795_s1 + $0x108] sm:$0xff]  ;;  %v2904_v37 = vpack.c.bf16 %v50_v34, %v46_v29  ;;  %v55_v38 = vld [vmem:[%s3795_s1 + $0x98] sm:$0xff]  ;;  %2121 = vmatprep.subr.bf16.mxu1 %v2893_v33  ;;  %v54_v40 = vld [vmem:[%s3795_s1 + $0x90] sm:$0xff]  ;;  %v2920_v42 = vpack.c.bf16 %v64_v32, %v60_v31 }
   0xa   :  { %2091 = vmatpush1.bf16.msra.mxu0 %v2837_v14  ;;  %v73_v36 = vld [vmem:[%s3795_s1 + $0x128] sm:$0xff]  ;;  %v59_v39 = vld [vmem:[%s3795_s1 + $0xb8] sm:$0xff]  ;;  %v58_v41 = vld [vmem:[%s3795_s1 + $0xb0] sm:$0xff] }
   0xb   :  { %2093 = vmatprep.subr.bf16.mxu0 %v2846_v17  ;;  %v68_v43 = vld [vmem:[%s3795_s1 + $0x100] sm:$0xff]  ;;  %v2928_v45 = vpack.c.bf16 %v59_v39, %v55_v38  ;;  %v2931_v46 = vpack.c.bf16 %v73_v36, %v69_v35  ;;  %2123 = vmatpush1.bf16.msra.mxu1 %v2904_v37  ;;  %v77_v47 = vld [vmem:[%s3795_s1 + $0x148] sm:$0xff]  ;;  %v2937_v48 = vpack.c.bf16 %v58_v41, %v54_v40  ;;  %v63_v49 = vld [vmem:[%s3795_s1 + $0xd8] sm:$0xff] }
   0xc   :  { %v72_v44 = vld [vmem:[%s3795_s1 + $0x120] sm:$0xff]  ;;  %v67_v50 = vld [vmem:[%s3795_s1 + $0xf8] sm:$0xff]  ;;  %v81_v51 = vld [vmem:[%s3795_s1 + $0x168] sm:$0xff] }
   0xd   :  { %2125 = vmatprep.subr.bf16.mxu1 %v2928_v45  ;;  %v2949_v52 = vpack.c.bf16 %v67_v50, %v63_v49  ;;  %v62_v53 = vld [vmem:[%s3795_s1 + $0xd0] sm:$0xff]  ;;  %v2958_v55 = vpack.c.bf16 %v72_v44, %v68_v43  ;;  %v71_v56 = vld [vmem:[%s3795_s1 + $0x118] sm:$0xff]  ;;  %v2967_v58 = vpack.c.bf16 %v81_v51, %v77_v47  ;;  %v76_v59 = vld [vmem:[%s3795_s1 + $0x140] sm:$0xff] }
   0xe   :  { %2095 = vmatpush1.bf16.msra.mxu0 %v2871_v26  ;;  %v66_v54 = vld [vmem:[%s3795_s1 + $0xf0] sm:$0xff]  ;;  %v75_v57 = vld [vmem:[%s3795_s1 + $0x138] sm:$0xff]  ;;  %v80_v60 = vld [vmem:[%s3795_s1 + $0x160] sm:$0xff] }
   0xf   :  { %2097 = vmatprep.subr.bf16.mxu0 %v2884_v30  ;;  %2127 = vmatpush1.bf16.msra.mxu1 %v2937_v48  ;;  %v85_v61 = vld [vmem:[%s3795_s1 + $0x188] sm:$0xff]  ;;  %v2979_v62 = vpack.c.bf16 %v66_v54, %v62_v53  ;;  %v2985_v0 = vpack.c.bf16 %v75_v57, %v71_v56  ;;  %v70_v1 = vld [vmem:[%s3795_s1 + $0x110] sm:$0xff]  ;;  %v79_v4 = vld [vmem:[%s3795_s1 + $0x158] sm:$0xff]  ;;  %v3000_v6 = vpack.c.bf16 %v80_v60, %v76_v59 }
  0x10   :  { %v89_v63 = vld [vmem:[%s3795_s1 + $0x1a8] sm:$0xff]  ;;  %2129 = vmatprep.subr.bf16.mxu1 %v2949_v52  ;;  %v74_v2 = vld [vmem:[%s3795_s1 + $0x130] sm:$0xff]  ;;  %v83_v5 = vld [vmem:[%s3795_s1 + $0x178] sm:$0xff] }
  0x11   :  { %v84_v10 = vld [vmem:[%s3795_s1 + $0x180] sm:$0xff]  ;;  %v3006_v11 = vpack.c.bf16 %v89_v63, %v85_v61  ;;  %v93_v13 = vld [vmem:[%s3795_s1 + $0x1c8] sm:$0xff]  ;;  %v3018_v16 = vpack.c.bf16 %v74_v2, %v70_v1  ;;  %v3021_v18 = vpack.c.bf16 %v83_v5, %v79_v4  ;;  %v78_v19 = vld [vmem:[%s3795_s1 + $0x150] sm:$0xff] }
  0x12   :  { %2099 = vmatpush1.bf16.msra.mxu0 %v2920_v42  ;;  %v88_v12 = vld [vmem:[%s3795_s1 + $0x1a0] sm:$0xff]  ;;  %v97_v15 = vld [vmem:[%s3795_s1 + $0x1e8] sm:$0xff]  ;;  %v82_v20 = vld [vmem:[%s3795_s1 + $0x170] sm:$0xff] }
  0x13   :  { %2101 = vmatprep.subr.bf16.mxu0 %v2931_v46  ;;  %2131 = vmatpush1.bf16.msra.mxu1 %v2979_v62 }
  0x14   :  { %2133 = vmatprep.subr.bf16.mxu1 %v2985_v0 }
  0x16   :  { %2103 = vmatpush1.bf16.msra.mxu0 %v2958_v55 }
  0x17   :  { %2105 = vmatprep.subr.bf16.mxu0 %v2967_v58 }
  0x18   :  { %13 = vsyncpa [#allocation5], 0  ;;  %v87_v21 = vld [vmem:[%s3795_s1 + $0x198] sm:$0xff]  ;;  %v3036_v24 = vpack.c.bf16 %v88_v12, %v84_v10  ;;  %v3039_v27 = vpack.c.bf16 %v97_v15, %v93_v13  ;;  %v92_v28 = vld [vmem:[%s3795_s1 + $0x1c0] sm:$0xff]  ;;  %2135 = vmatpush1.bf16.msra.mxu1 %v3018_v16  ;;  %v3048_v31 = vpack.c.bf16 %v82_v20, %v78_v19  ;;  %s2760_s10 = smov [#allocation2]   ;;  %s2761_s12 = smov [#allocation4]  }
  0x19   :  { %v91_v23 = vld [vmem:[%s3795_s1 + $0x1b8] sm:$0xff]  ;;  %v96_v29 = vld [vmem:[%s3795_s1 + $0x1e0] sm:$0xff]  ;;  %2137 = vmatprep.subr.bf16.mxu1 %v3021_v18  ;;  %v86_v34 = vld [vmem:[%s3795_s1 + $0x190] sm:$0xff]  ;;  %s2029_s11 = sshll.u32 %s2760_s10, 4  ;;  %s2039_s13 = sshll.u32 %s2761_s12, 4  ;;  %s2030_s11 = int_to_ptr.vmem [resolvable:$true] %s2029_s11  ;;  %s2040_s13 = int_to_ptr.vmem [resolvable:$true] %s2039_s13 }
  0x1a   :  { %2107 = vmatpush1.bf16.msra.mxu0 %v3000_v6  ;;  %v3051_v32 = vpack.c.bf16 %v91_v23, %v87_v21  ;;  %v90_v35 = vld [vmem:[%s3795_s1 + $0x1b0] sm:$0xff]  ;;  %v95_v36 = vld [vmem:[%s3795_s1 + $0x1d8] sm:$0xff]  ;;  %v3066_v39 = vpack.c.bf16 %v96_v29, %v92_v28  ;;  %v26_v47 = vld [vmem:[%s3796_s2] sm:$0xff]  ;;  %s2711_s14 = scalar_lea.vmem %s2030_s11, 128  ;;  %p2716_p1 = scmp.lt.s32.totalorder %s2030_s11, %s2030_s11 }
  0x1b   :  { %2109 = vmatprep.subr.bf16.mxu0 %v3006_v11  ;;  %v99_v38 = vld [vmem:[%s3795_s1 + $0x1f8] sm:$0xff]  ;;  %v3070_v40 = vpack.c.bf16 %v90_v35, %v86_v34  ;;  %v94_v43 = vld [vmem:[%s3795_s1 + $0x1d0] sm:$0xff]  ;;  %v3129_v50 = vld [vmem:[%s3794_s0] sm:$0xff]  ;;  %p2712_p0 = scmp.ne.s32.totalorder %s2030_s11, %s2711_s14  ;;  %p2717_p2 = scmp.lt.s32.totalorder %s2711_s14, %s2711_s14 }
  0x1c   :  { %2139 = vmatpush1.bf16.msra.mxu1 %v3048_v31  ;;  %v3073_v41 = vpack.c.bf16 %v99_v38, %v95_v36  ;;  %v98_v44 = vld [vmem:[%s3795_s1 + $0x1f0] sm:$0xff]  ;;  %v3134_v51 = vld [vmem:[%s3794_s0 + $0x8] sm:$0xff]  ;;  %v3147_v4 = vld [vmem:[%s3794_s0 + $0x18] sm:$0xff] }
  0x1d   :  { %2141 = vmatprep.subr.bf16.mxu1 %v3051_v32  ;;  %v3086_v49 = vpack.c.bf16 %v98_v44, %v94_v43  ;;  %v3141_v61 = vld [vmem:[%s3794_s0 + $0x10] sm:$0xff]  ;;  %v28_v23 = vld [vmem:[%s3797_s3] sm:$0xff]  ;;  %p2718_p3 = por %p2717_p2, %p2716_p1 }
  0x1e   :  { %2111 = vmatpush1.bf16.msra.mxu0 %v3036_v24 }
  0x1f   :  { %2113 = vmatprep.subr.bf16.mxu0 %v3039_v27  ;;  %p2719_p4 = pnand %p2718_p3, %p2712_p0 }
  0x20   :  { %2143 = vmatpush1.bf16.msra.mxu1 %v3070_v40 }
  0x21   :  { %2145 = vmatprep.subr.bf16.mxu1 %v3073_v41 }
  0x22   :  { %2115 = vmatpush1.bf16.msra.mxu0 %v3066_v39 }
  0x23   :  { %2149 = vmatprep.subr.bf16.mxu0 %v2806_v3 }
  0x24   :  { %2147 = vmatpush1.bf16.msra.mxu1 %v3086_v49 }
  0x25   :  { %165 = vmatmul.mubr.f32.vlgmr.msra.gmra.mrb[0].mxu0 %v26_v47  ;;  %2181 = vmatprep.subr.bf16.mxu1 %v2860_v22 }
  0x26   :  { %2151 = vmatpush1.bf16.msra.mxu0 %v2819_v8  ;;  %412 = vmatprep.mubr.f32.mxu0 %v2759_v7 }
  0x27   :  { %2153 = vmatprep.subr.bf16.mxu0 %v2821_v9  ;;  %236 = vmatmul.mubr.f32.vlgmr.msra.gmra.mrb[0].mxu1 %v26_v47 }
  0x28   :  { %2183 = vmatpush1.bf16.msra.mxu1 %v2868_v25  ;;  %483 = vmatprep.mubr.f32.mxu1 %v2759_v7 }
  0x29   :  { %2185 = vmatprep.subr.bf16.mxu1 %v2893_v33 }
  0x2a   :  { %2155 = vmatpush1.bf16.msra.mxu0 %v2837_v14 }
  0x2b   :  { %2157 = vmatprep.subr.bf16.mxu0 %v2846_v17 }
  0x2c   :  { %2187 = vmatpush1.bf16.msra.mxu1 %v2904_v37 }
  0x2d   :  { %2189 = vmatprep.subr.bf16.mxu1 %v2928_v45 }
  0x2e   :  { %2159 = vmatpush1.bf16.msra.mxu0 %v2871_v26 }
  0x2f   :  { %2161 = vmatprep.subr.bf16.mxu0 %v2884_v30 }
  0x30   :  { %2191 = vmatpush1.bf16.msra.mxu1 %v2937_v48 }
  0x31   :  { %2193 = vmatprep.subr.bf16.mxu1 %v2949_v52 }
  0x32   :  { %2163 = vmatpush1.bf16.msra.mxu0 %v2920_v42 }
  0x33   :  { %2165 = vmatprep.subr.bf16.mxu0 %v2931_v46 }
  0x34   :  { %2195 = vmatpush1.bf16.msra.mxu1 %v2979_v62 }
  0x35   :  { %2197 = vmatprep.subr.bf16.mxu1 %v2985_v0 }
  0x36   :  { %2167 = vmatpush1.bf16.msra.mxu0 %v2958_v55 }
  0x37   :  { %2169 = vmatprep.subr.bf16.mxu0 %v2967_v58 }
  0x38   :  { %2199 = vmatpush1.bf16.msra.mxu1 %v3018_v16 }
  0x39   :  { %2201 = vmatprep.subr.bf16.mxu1 %v3021_v18 }
  0x3a   :  { %2171 = vmatpush1.bf16.msra.mxu0 %v3000_v6 }
  0x3b   :  { %2173 = vmatprep.subr.bf16.mxu0 %v3006_v11 }
  0x3c   :  { %2203 = vmatpush1.bf16.msra.mxu1 %v3048_v31 }
  0x3d   :  { %2205 = vmatprep.subr.bf16.mxu1 %v3051_v32 }
  0x3e   :  { %2175 = vmatpush1.bf16.msra.mxu0 %v3036_v24 }
  0x3f   :  { %2177 = vmatprep.subr.bf16.mxu0 %v3039_v27 }
  0x40   :  { %2207 = vmatpush1.bf16.msra.mxu1 %v3070_v40 }
  0x41   :  { %2209 = vmatprep.subr.bf16.mxu1 %v3073_v41 }
  0x42   :  { %2179 = vmatpush1.bf16.msra.mxu0 %v3066_v39 }
  0x43   :  { %2213 = vmatprep.subr.bf16.mxu0 %v2806_v3 }
  0x44   :  { %2211 = vmatpush1.bf16.msra.mxu1 %v3086_v49 }
  0x45   :  { %2245 = vmatprep.subr.bf16.mxu1 %v2860_v22 }
  0xf8   :  { %v166_v53 = vpop.f32.mrb[0].mxu0 }
  0xf9   :  { %v242_v54 = vadd.f32 %v166_v53, %v3129_v50  ;;  %v168_v56 = vpop.f32.mrb[1].mxu0 }
  0xfa   :  { %v243_v57 = vadd.f32 %v168_v56, %v3134_v51  ;;  %v237_v63 = vpop.f32.mrb[0].mxu1 }
  0xfb   :  { %v2053_v59 = vmul.f32 -1.442695, %v242_v54  ;;  %v239_v1 = vpop.f32.mrb[1].mxu1  ;;  %v244_v2 = vadd.f32 %v237_v63, %v3141_v61 }
  0xfc   :  { %v2054_v60 = vmul.f32 -1.442695, %v243_v57  ;;  %v245_v10 = vadd.f32 %v239_v1, %v3147_v4 }
  0xfd   :  { %2599 = vpow2.f32 %v2053_v59  ;;  %v2055_v5 = vmul.f32 -1.442695, %v244_v2 }
  0xfe   :  { %2601 = vpow2.f32 %v2054_v60 }
  0xff   :  { %2603 = vpow2.f32 %v2055_v5 }
 0x100   :  { %2605 = vtanh.f32 %v245_v10  ;;  %v810_v10 = vld [vmem:[%s3795_s1 + $0xe0] sm:$0xff] }
 0x107   :  { %v2600_v12 = vpop.eup %2599 }
 0x108   :  { %v2602_v13 = vpop.eup %2601  ;;  %v255_v15 = vadd.f32 1.0, %v2600_v12 }
 0x109   :  { %v256_v19 = vadd.f32 1.0, %v2602_v13  ;;  %v2604_v20 = vpop.eup %2603  ;;  %v815_v13 = vld [vmem:[%s3795_s1 + $0x108] sm:$0xff] }
 0x10a   :  { %2607 = vrcp.f32 %v255_v15  ;;  %v2606_v21 = vpop.eup %2605  ;;  %v257_v29 = vadd.f32 1.0, %v2604_v20  ;;  %v819_v15 = vld [vmem:[%s3795_s1 + $0x128] sm:$0xff]  ;;  %v814_v20 = vld [vmem:[%s3795_s1 + $0x100] sm:$0xff] }
 0x10b   :  { %2609 = vrcp.f32 %v256_v19  ;;  %v3282_v19 = vpack.c.bf16 %v819_v15, %v815_v13  ;;  %v1038_v15 = vld [vmem:[%s3795_s1 + $0x38] sm:$0xff] }
 0x10c   :  { %2611 = vrcp.f32 %v257_v29  ;;  %v827_v29 = vld [vmem:[%s3795_s1 + $0x168] sm:$0xff] }
 0x114   :  { %v2608_v28 = vpop.eup %2607 }
 0x115   :  { %v2610_v34 = vpop.eup %2609  ;;  %v266_v35 = vmul.f32 %v2608_v28, %v2606_v21  ;;  %v818_v21 = vld [vmem:[%s3795_s1 + $0x120] sm:$0xff]  ;;  %v823_v28 = vld [vmem:[%s3795_s1 + $0x148] sm:$0xff] }
 0x116   :  { %v265_v36 = vmul.f32 %v2610_v34, %v28_v23  ;;  %v2612_v43 = vpop.eup %2611  ;;  %v3290_v23 = vpack.c.bf16 %v818_v21, %v814_v20  ;;  %v3300_v34 = vpack.c.bf16 %v827_v29, %v823_v28  ;;  %v1031_v20 = vld [vmem:[%s3795_s1] sm:$0xff] }
 0x117   :  { %v1035_v21 = vld [vmem:[%s3795_s1 + $0x20] sm:$0xff] }
 0x118   :  { %v3153_v38 = vadd.f32 %v266_v35, %v265_v36  ;;  %v822_v35 = vld [vmem:[%s3795_s1 + $0x140] sm:$0xff]  ;;  %v3383_v29 = vpack.c.bf16 %v1035_v21, %v1031_v20  ;;  %v1090_v20 = vld [vmem:[%s3795_s1 + $0x1d8] sm:$0xff] }
 0x119   :  { %v826_v36 = vld [vmem:[%s3795_s1 + $0x160] sm:$0xff]  ;;  %v1094_v21 = vld [vmem:[%s3795_s1 + $0x1f8] sm:$0xff] }
 0x11a   :  { %2613 = vtanh.f32 %v3153_v38 }
 0x124   :  { %v2614_v44 = vpop.eup %2613 }
 0x125   :  { %v269_v47 = vmul.f32 %v2614_v44, %v2612_v43  ;;  %v831_v43 = vld [vmem:[%s3795_s1 + $0x188] sm:$0xff] }
 0x126   :  { %v835_v44 = vld [vmem:[%s3795_s1 + $0x1a8] sm:$0xff] }
 0x127   :  { %275 = vst [vmem:[%s3798_s4] sm:$0xff] %v269_v47  ;;  %413 = vmatmul.mubr.f32.vlgmr.msra.gmra.mrb[2].mxu0 %v269_v47  ;;  %484 = vmatmul.mubr.f32.vlgmr.msra.gmra.mrb[2].mxu1 %v269_v47  ;;  %v3318_v47 = vpack.c.bf16 %v835_v44, %v831_v43  ;;  %v1042_v44 = vld [vmem:[%s3795_s1 + $0x58] sm:$0xff] }
 0x128   :  { %2215 = vmatpush1.bf16.msra.mxu0 %v2819_v8  ;;  %2247 = vmatpush1.bf16.msra.mxu1 %v2868_v25 }
 0x129   :  { %2217 = vmatprep.subr.bf16.mxu0 %v2821_v9  ;;  %2249 = vmatprep.subr.bf16.mxu1 %v2893_v33 }
 0x12a   :  { %661 = vmatprep.mubr.f32.mxu0 %v2759_v7  ;;  %732 = vmatprep.mubr.f32.mxu1 %v2759_v7 }
 0x12c   :  { %2219 = vmatpush1.bf16.msra.mxu0 %v2837_v14  ;;  %2251 = vmatpush1.bf16.msra.mxu1 %v2904_v37 }
 0x12d   :  { %2221 = vmatprep.subr.bf16.mxu0 %v2846_v17  ;;  %2253 = vmatprep.subr.bf16.mxu1 %v2928_v45 }
 0x130   :  { %2223 = vmatpush1.bf16.msra.mxu0 %v2871_v26  ;;  %2255 = vmatpush1.bf16.msra.mxu1 %v2937_v48 }
 0x131   :  { %2225 = vmatprep.subr.bf16.mxu0 %v2884_v30  ;;  %2257 = vmatprep.subr.bf16.mxu1 %v2949_v52 }
 0x134   :  { %2227 = vmatpush1.bf16.msra.mxu0 %v2920_v42  ;;  %2259 = vmatpush1.bf16.msra.mxu1 %v2979_v62 }
 0x135   :  { %2229 = vmatprep.subr.bf16.mxu0 %v2931_v46  ;;  %2261 = vmatprep.subr.bf16.mxu1 %v2985_v0 }
 0x138   :  { %2231 = vmatpush1.bf16.msra.mxu0 %v2958_v55  ;;  %2263 = vmatpush1.bf16.msra.mxu1 %v3018_v16 }
 0x139   :  { %2233 = vmatprep.subr.bf16.mxu0 %v2967_v58  ;;  %2265 = vmatprep.subr.bf16.mxu1 %v3021_v18 }
 0x13c   :  { %2235 = vmatpush1.bf16.msra.mxu0 %v3000_v6  ;;  %2267 = vmatpush1.bf16.msra.mxu1 %v3048_v31 }
 0x13d   :  { %2237 = vmatprep.subr.bf16.mxu0 %v3006_v11  ;;  %2269 = vmatprep.subr.bf16.mxu1 %v3051_v32 }
 0x140   :  { %2239 = vmatpush1.bf16.msra.mxu0 %v3036_v24  ;;  %2271 = vmatpush1.bf16.msra.mxu1 %v3070_v40 }
 0x141   :  { %2241 = vmatprep.subr.bf16.mxu0 %v3039_v27  ;;  %2273 = vmatprep.subr.bf16.mxu1 %v3073_v41 }
 0x144   :  { %2243 = vmatpush1.bf16.msra.mxu0 %v3066_v39  ;;  %2275 = vmatpush1.bf16.msra.mxu1 %v3086_v49 }
 0x145   :  { %2277 = vmatprep.subr.bf16.mxu0 %v2806_v3  ;;  %2309 = vmatprep.subr.bf16.mxu1 %v2860_v22 }
 0x1fa   :  { %v414_v9 = vpop.f32.mrb[2].mxu0  ;;  %v485_v14 = vpop.f32.mrb[2].mxu1 }
 0x1fb   :  { %v490_v17 = vadd.f32 %v414_v9, %v3129_v50  ;;  %v416_v26 = vpop.f32.mrb[3].mxu0  ;;  %v487_v30 = vpop.f32.mrb[3].mxu1  ;;  %v492_v58 = vadd.f32 %v485_v14, %v3141_v61  ;;  %v830_v9 = vld [vmem:[%s3795_s1 + $0x180] sm:$0xff] }
 0x1fc   :  { %v491_v42 = vadd.f32 %v416_v26, %v3134_v51  ;;  %v493_v6 = vadd.f32 %v487_v30, %v3147_v4  ;;  %v834_v14 = vld [vmem:[%s3795_s1 + $0x1a0] sm:$0xff]  ;;  %v839_v26 = vld [vmem:[%s3795_s1 + $0x1c8] sm:$0xff] }
 0x1fd   :  { %v2056_v46 = vmul.f32 -1.442695, %v490_v17  ;;  %v2058_v11 = vmul.f32 -1.442695, %v492_v58  ;;  %v3326_v17 = vpack.c.bf16 %v834_v14, %v830_v9  ;;  %v843_v30 = vld [vmem:[%s3795_s1 + $0x1e8] sm:$0xff]  ;;  %v1046_v9 = vld [vmem:[%s3795_s1 + $0x78] sm:$0xff] }
 0x1fe   :  { %v2057_v55 = vmul.f32 -1.442695, %v491_v42  ;;  %v3336_v42 = vpack.c.bf16 %v843_v30, %v839_v26  ;;  %v3404_v14 = vpack.c.bf16 %v1046_v9, %v1042_v44  ;;  %v1041_v26 = vld [vmem:[%s3795_s1 + $0x50] sm:$0xff] }
 0x1ff   :  { %2615 = vpow2.f32 %v2056_v46  ;;  %v838_v46 = vld [vmem:[%s3795_s1 + $0x1c0] sm:$0xff]  ;;  %v1045_v30 = vld [vmem:[%s3795_s1 + $0x70] sm:$0xff] }
 0x200   :  { %2617 = vpow2.f32 %v2057_v55  ;;  %v842_v55 = vld [vmem:[%s3795_s1 + $0x1e0] sm:$0xff]  ;;  %v1093_v44 = vld [vmem:[%s3795_s1 + $0x1f0] sm:$0xff] }
 0x201   :  { %2619 = vtanh.f32 %v493_v6  ;;  %v3344_v58 = vpack.c.bf16 %v842_v55, %v838_v46  ;;  %v3412_v46 = vpack.c.bf16 %v1045_v30, %v1041_v26  ;;  %v1050_v55 = vld [vmem:[%s3795_s1 + $0x98] sm:$0xff] }
 0x202   :  { %2621 = vpow2.f32 %v2058_v11 }
 0x209   :  { %v2616_v3 = vpop.eup %2615 }
 0x20a   :  { %v503_v24 = vadd.f32 1.0, %v2616_v3  ;;  %v2618_v22 = vpop.eup %2617 }
 0x20b   :  { %v504_v27 = vadd.f32 1.0, %v2618_v22  ;;  %v2620_v39 = vpop.eup %2619 }
 0x20c   :  { %2623 = vrcp.f32 %v503_v24  ;;  %v2622_v53 = vpop.eup %2621 }
 0x20d   :  { %2625 = vrcp.f32 %v504_v27  ;;  %v505_v59 = vadd.f32 1.0, %v2622_v53 }
 0x20f   :  { %2627 = vrcp.f32 %v505_v59 }
 0x216   :  { %v2624_v54 = vpop.eup %2623 }
 0x217   :  { %v514_v56 = vmul.f32 %v2624_v54, %v2620_v39  ;;  %v2626_v57 = vpop.eup %2625 }
 0x218   :  { %v513_v60 = vmul.f32 %v2626_v57, %v3153_v38  ;;  %v3308_v38 = vpack.c.bf16 %v826_v36, %v822_v35  ;;  %v1033_v35 = vld [vmem:[%s3795_s1 + $0x10] sm:$0xff] }
 0x219   :  { %v2628_v1 = vpop.eup %2627  ;;  %v1037_v36 = vld [vmem:[%s3795_s1 + $0x30] sm:$0xff] }
 0x21a   :  { %v3198_v63 = vadd.f32 %v514_v56, %v513_v60  ;;  %v3392_v43 = vpack.c.bf16 %v1037_v36, %v1033_v35  ;;  %v3524_v35 = vpack.c.bf16 %v1094_v21, %v1090_v20  ;;  %v1089_v36 = vld [vmem:[%s3795_s1 + $0x1d0] sm:$0xff]  ;;  %v3592_v20 = vld [vmem:[%s3794_s0 + $0x8] sm:$0xff] }
 0x21b   :  { %v3532_v9 = vpack.c.bf16 %v1093_v44, %v1089_v36 }
 0x21c   :  { %2629 = vtanh.f32 %v3198_v63 }
 0x226   :  { %v2630_v2 = vpop.eup %2629 }
 0x227   :  { %v517_v5 = vmul.f32 %v2630_v2, %v2628_v1 }
 0x229   :  { %2059 = vst [vmem:[%s3798_s4 + $0x8] sm:$0xff] %v517_v5  ;;  %662 = vmatmul.mubr.f32.vlgmr.msra.gmra.mrb[4].mxu0 %v517_v5  ;;  %733 = vmatmul.mubr.f32.vlgmr.msra.gmra.mrb[4].mxu1 %v517_v5 }
 0x22a   :  { %2279 = vmatpush1.bf16.msra.mxu0 %v2819_v8  ;;  %2311 = vmatpush1.bf16.msra.mxu1 %v2868_v25  ;;  %v791_v8 = vld [vmem:[%s3795_s1 + $0x48] sm:$0xff] }
 0x22b   :  { %2313 = vmatprep.subr.bf16.mxu1 %v2893_v33  ;;  %910 = vmatprep.mubr.f32.mxu0 %v2759_v7  ;;  %v795_v25 = vld [vmem:[%s3795_s1 + $0x68] sm:$0xff] }
 0x22c   :  { %981 = vmatprep.mubr.f32.mxu1 %v2759_v7  ;;  %v3228_v33 = vpack.c.bf16 %v795_v25, %v791_v8 }
 0x22e   :  { %2315 = vmatpush1.bf16.msra.mxu1 %v2904_v37  ;;  %v790_v37 = vld [vmem:[%s3795_s1 + $0x40] sm:$0xff]  ;;  %2281 = vmatprep.subr.bf16.mxu0 %v3228_v33 }
 0x22f   :  { %2317 = vmatprep.subr.bf16.mxu1 %v2928_v45  ;;  %v794_v45 = vld [vmem:[%s3795_s1 + $0x60] sm:$0xff] }
 0x232   :  { %2319 = vmatpush1.bf16.msra.mxu1 %v2937_v48  ;;  %v3236_v48 = vpack.c.bf16 %v794_v45, %v790_v37 }
 0x233   :  { %2321 = vmatprep.subr.bf16.mxu1 %v2949_v52  ;;  %v799_v52 = vld [vmem:[%s3795_s1 + $0x88] sm:$0xff] }
 0x234   :  { %2283 = vmatpush1.bf16.msra.mxu0 %v3236_v48 }
 0x236   :  { %2323 = vmatpush1.bf16.msra.mxu1 %v2979_v62  ;;  %v803_v62 = vld [vmem:[%s3795_s1 + $0xa8] sm:$0xff] }
 0x237   :  { %2325 = vmatprep.subr.bf16.mxu1 %v2985_v0  ;;  %v3246_v0 = vpack.c.bf16 %v803_v62, %v799_v52 }
 0x239   :  { %2285 = vmatprep.subr.bf16.mxu0 %v3246_v0 }
 0x23a   :  { %2327 = vmatpush1.bf16.msra.mxu1 %v3018_v16  ;;  %v798_v16 = vld [vmem:[%s3795_s1 + $0x80] sm:$0xff] }
 0x23b   :  { %2329 = vmatprep.subr.bf16.mxu1 %v3021_v18  ;;  %v802_v18 = vld [vmem:[%s3795_s1 + $0xa0] sm:$0xff] }
 0x23e   :  { %2331 = vmatpush1.bf16.msra.mxu1 %v3048_v31  ;;  %v3254_v31 = vpack.c.bf16 %v802_v18, %v798_v16 }
 0x23f   :  { %2333 = vmatprep.subr.bf16.mxu1 %v3051_v32  ;;  %v807_v32 = vld [vmem:[%s3795_s1 + $0xc8] sm:$0xff] }
 0x240   :  { %2287 = vmatpush1.bf16.msra.mxu0 %v3254_v31 }
 0x242   :  { %2335 = vmatpush1.bf16.msra.mxu1 %v3070_v40  ;;  %v811_v40 = vld [vmem:[%s3795_s1 + $0xe8] sm:$0xff] }
 0x243   :  { %2337 = vmatprep.subr.bf16.mxu1 %v3073_v41  ;;  %v3264_v41 = vpack.c.bf16 %v811_v40, %v807_v32 }
 0x245   :  { %2289 = vmatprep.subr.bf16.mxu0 %v3264_v41 }
 0x246   :  { %2339 = vmatpush1.bf16.msra.mxu1 %v3086_v49  ;;  %v806_v49 = vld [vmem:[%s3795_s1 + $0xc0] sm:$0xff] }
 0x247   :  { %v3272_v12 = vpack.c.bf16 %v810_v10, %v806_v49  ;;  %v1036_v49 = vld [vmem:[%s3795_s1 + $0x28] sm:$0xff]  ;;  %v1034_v10 = vld [vmem:[%s3795_s1 + $0x18] sm:$0xff] }
 0x248   :  { %v3381_v28 = vpack.c.bf16 %v1038_v15, %v1034_v10  ;;  %v1085_v10 = vld [vmem:[%s3795_s1 + $0x1b0] sm:$0xff] }
 0x249   :  { %2291 = vmatpush1.bf16.msra.mxu0 %v3272_v12 }
 0x24a   :  { %2293 = vmatprep.subr.bf16.mxu0 %v3282_v19  ;;  %2373 = vmatprep.subr.bf16.mxu1 %v3381_v28 }
 0x24d   :  { %2295 = vmatpush1.bf16.msra.mxu0 %v3290_v23 }
 0x24e   :  { %2297 = vmatprep.subr.bf16.mxu0 %v3300_v34 }
 0x251   :  { %2299 = vmatpush1.bf16.msra.mxu0 %v3308_v38 }
 0x252   :  { %2301 = vmatprep.subr.bf16.mxu0 %v3318_v47 }
 0x255   :  { %2303 = vmatpush1.bf16.msra.mxu0 %v3326_v17 }
 0x256   :  { %2305 = vmatprep.subr.bf16.mxu0 %v3336_v42 }
 0x259   :  { %2307 = vmatpush1.bf16.msra.mxu0 %v3344_v58 }
 0x2fc   :  { %v663_v6 = vpop.f32.mrb[4].mxu0  ;;  %v734_v11 = vpop.f32.mrb[4].mxu1 }
 0x2fd   :  { %v739_v3 = vadd.f32 %v663_v6, %v3129_v50  ;;  %v665_v24 = vpop.f32.mrb[5].mxu0  ;;  %v736_v22 = vpop.f32.mrb[5].mxu1  ;;  %v741_v54 = vadd.f32 %v734_v11, %v3141_v61  ;;  %v1054_v6 = vld [vmem:[%s3795_s1 + $0xb8] sm:$0xff] }
 0x2fe   :  { %v740_v27 = vadd.f32 %v665_v24, %v3134_v51  ;;  %v742_v56 = vadd.f32 %v736_v22, %v3147_v4  ;;  %v3424_v11 = vpack.c.bf16 %v1054_v6, %v1050_v55  ;;  %v1053_v24 = vld [vmem:[%s3795_s1 + $0xb0] sm:$0xff] }
 0x2ff   :  { %v2060_v39 = vmul.f32 -1.442695, %v739_v3  ;;  %v2062_v57 = vmul.f32 -1.442695, %v741_v54  ;;  %v1049_v3 = vld [vmem:[%s3795_s1 + $0x90] sm:$0xff] }
 0x300   :  { %v2061_v53 = vmul.f32 -1.442695, %v740_v27  ;;  %v3432_v22 = vpack.c.bf16 %v1053_v24, %v1049_v3  ;;  %v1058_v27 = vld [vmem:[%s3795_s1 + $0xd8] sm:$0xff]  ;;  %v1057_v54 = vld [vmem:[%s3795_s1 + $0xd0] sm:$0xff] }
 0x301   :  { %2631 = vpow2.f32 %v2060_v39  ;;  %v1062_v39 = vld [vmem:[%s3795_s1 + $0xf8] sm:$0xff] }
 0x302   :  { %2633 = vpow2.f32 %v2061_v53  ;;  %v3444_v53 = vpack.c.bf16 %v1062_v39, %v1058_v27 }
 0x303   :  { %2635 = vtanh.f32 %v742_v56  ;;  %v1061_v56 = vld [vmem:[%s3795_s1 + $0xf0] sm:$0xff] }
 0x304   :  { %2637 = vpow2.f32 %v2062_v57  ;;  %v3452_v57 = vpack.c.bf16 %v1061_v56, %v1057_v54 }
 0x30b   :  { %v2632_v59 = vpop.eup %2631 }
 0x30c   :  { %v752_v60 = vadd.f32 1.0, %v2632_v59  ;;  %v2634_v1 = vpop.eup %2633  ;;  %v1066_v59 = vld [vmem:[%s3795_s1 + $0x118] sm:$0xff] }
 0x30d   :  { %v753_v2 = vadd.f32 1.0, %v2634_v1  ;;  %v2636_v5 = vpop.eup %2635 }
 0x30e   :  { %2639 = vrcp.f32 %v752_v60  ;;  %v2638_v8 = vpop.eup %2637  ;;  %v1070_v60 = vld [vmem:[%s3795_s1 + $0x138] sm:$0xff] }
 0x30f   :  { %2641 = vrcp.f32 %v753_v2  ;;  %v754_v52 = vadd.f32 1.0, %v2638_v8  ;;  %v3464_v1 = vpack.c.bf16 %v1070_v60, %v1066_v59  ;;  %v1065_v2 = vld [vmem:[%s3795_s1 + $0x110] sm:$0xff] }
 0x311   :  { %2643 = vrcp.f32 %v754_v52  ;;  %v1073_v52 = vld [vmem:[%s3795_s1 + $0x150] sm:$0xff] }
 0x318   :  { %v2640_v25 = vpop.eup %2639 }
 0x319   :  { %v763_v37 = vmul.f32 %v2640_v25, %v2636_v5  ;;  %v2642_v45 = vpop.eup %2641  ;;  %v1069_v5 = vld [vmem:[%s3795_s1 + $0x130] sm:$0xff]  ;;  %v1074_v25 = vld [vmem:[%s3795_s1 + $0x158] sm:$0xff] }
 0x31a   :  { %v762_v62 = vmul.f32 %v2642_v45, %v3198_v63  ;;  %v1032_v63 = vld [vmem:[%s3795_s1 + $0x8] sm:$0xff]  ;;  %v3472_v8 = vpack.c.bf16 %v1069_v5, %v1065_v2 }
 0x31b   :  { %v2644_v18 = vpop.eup %2643  ;;  %v3370_v13 = vpack.c.bf16 %v1036_v49, %v1032_v63  ;;  %v1081_v49 = vld [vmem:[%s3795_s1 + $0x190] sm:$0xff] }
 0x31c   :  { %v3353_v16 = vadd.f32 %v763_v37, %v762_v62  ;;  %v1078_v37 = vld [vmem:[%s3795_s1 + $0x178] sm:$0xff]  ;;  %v1077_v62 = vld [vmem:[%s3795_s1 + $0x170] sm:$0xff]  ;;  %v3512_v15 = vpack.c.bf16 %v1085_v10, %v1081_v49 }
 0x31d   :  { %2341 = vmatprep.subr.bf16.mxu0 %v3370_v13  ;;  %v3484_v45 = vpack.c.bf16 %v1078_v37, %v1074_v25 }
 0x31e   :  { %2645 = vtanh.f32 %v3353_v16 }
 0x328   :  { %v2646_v32 = vpop.eup %2645 }
 0x329   :  { %v766_v40 = vmul.f32 %v2646_v32, %v2644_v18  ;;  %v3492_v18 = vpack.c.bf16 %v1077_v62, %v1073_v52  ;;  %v1082_v32 = vld [vmem:[%s3795_s1 + $0x198] sm:$0xff] }
 0x32b   :  { %2063 = vst [vmem:[%s3798_s4 + $0x10] sm:$0xff] %v766_v40  ;;  %911 = vmatmul.mubr.f32.vlgmr.msra.gmra.mrb[6].mxu0 %v766_v40  ;;  %982 = vmatmul.mubr.f32.vlgmr.msra.gmra.mrb[6].mxu1 %v766_v40  ;;  %v1086_v40 = vld [vmem:[%s3795_s1 + $0x1b8] sm:$0xff] }
 0x32c   :  { %1159 = vmatprep.mubr.f32.mxu0 %v2759_v7  ;;  %1230 = vmatprep.mubr.f32.mxu1 %v2759_v7  ;;  %v3504_v63 = vpack.c.bf16 %v1086_v40, %v1082_v32 }
 0x32d   :  { %2343 = vmatpush1.bf16.msra.mxu0 %v3383_v29  ;;  %2375 = vmatpush1.bf16.msra.mxu1 %v3392_v43 }
 0x32e   :  { %2345 = vmatprep.subr.bf16.mxu0 %v3228_v33  ;;  %2377 = vmatprep.subr.bf16.mxu1 %v3404_v14 }
 0x331   :  { %2347 = vmatpush1.bf16.msra.mxu0 %v3236_v48  ;;  %2379 = vmatpush1.bf16.msra.mxu1 %v3412_v46 }
 0x332   :  { %2349 = vmatprep.subr.bf16.mxu0 %v3246_v0  ;;  %2381 = vmatprep.subr.bf16.mxu1 %v3424_v11 }
 0x335   :  { %2351 = vmatpush1.bf16.msra.mxu0 %v3254_v31  ;;  %2383 = vmatpush1.bf16.msra.mxu1 %v3432_v22 }
 0x336   :  { %2353 = vmatprep.subr.bf16.mxu0 %v3264_v41  ;;  %2385 = vmatprep.subr.bf16.mxu1 %v3444_v53 }
 0x339   :  { %2355 = vmatpush1.bf16.msra.mxu0 %v3272_v12  ;;  %2387 = vmatpush1.bf16.msra.mxu1 %v3452_v57 }
 0x33a   :  { %2357 = vmatprep.subr.bf16.mxu0 %v3282_v19  ;;  %2389 = vmatprep.subr.bf16.mxu1 %v3464_v1 }
 0x33d   :  { %2359 = vmatpush1.bf16.msra.mxu0 %v3290_v23  ;;  %2391 = vmatpush1.bf16.msra.mxu1 %v3472_v8 }
 0x33e   :  { %2361 = vmatprep.subr.bf16.mxu0 %v3300_v34  ;;  %2393 = vmatprep.subr.bf16.mxu1 %v3484_v45 }
 0x341   :  { %2363 = vmatpush1.bf16.msra.mxu0 %v3308_v38  ;;  %2395 = vmatpush1.bf16.msra.mxu1 %v3492_v18 }
 0x342   :  { %2365 = vmatprep.subr.bf16.mxu0 %v3318_v47  ;;  %2397 = vmatprep.subr.bf16.mxu1 %v3504_v63 }
 0x345   :  { %2367 = vmatpush1.bf16.msra.mxu0 %v3326_v17  ;;  %2399 = vmatpush1.bf16.msra.mxu1 %v3512_v15 }
 0x346   :  { %2369 = vmatprep.subr.bf16.mxu0 %v3336_v42  ;;  %2401 = vmatprep.subr.bf16.mxu1 %v3524_v35 }
 0x349   :  { %2371 = vmatpush1.bf16.msra.mxu0 %v3344_v58  ;;  %2403 = vmatpush1.bf16.msra.mxu1 %v3532_v9 }
 0x34a   :  { %2405 = vmatprep.subr.bf16.mxu0 %v3370_v13  ;;  %2437 = vmatprep.subr.bf16.mxu1 %v3381_v28 }
 0x3fe   :  { %v912_v26 = vpop.f32.mrb[6].mxu0  ;;  %v983_v30 = vpop.f32.mrb[6].mxu1 }
 0x3ff   :  { %v988_v55 = vadd.f32 %v912_v26, %v3129_v50  ;;  %v914_v6 = vpop.f32.mrb[7].mxu0  ;;  %v985_v3 = vpop.f32.mrb[7].mxu1  ;;  %v990_v54 = vadd.f32 %v983_v30, %v3141_v61 }
 0x400   :  { %v989_v24 = vadd.f32 %v914_v6, %v3134_v51  ;;  %v991_v56 = vadd.f32 %v985_v3, %v3147_v4 }
 0x401   :  { %v2064_v27 = vmul.f32 -1.442695, %v988_v55  ;;  %v2066_v59 = vmul.f32 -1.442695, %v990_v54 }
 0x402   :  { %v2065_v39 = vmul.f32 -1.442695, %v989_v24  ;;  %v3599_v24 = vld [vmem:[%s3794_s0 + $0x10] sm:$0xff] }
 0x403   :  { %2647 = vpow2.f32 %v2064_v27 }
 0x404   :  { %2649 = vpow2.f32 %v2065_v39  ;;  %v3605_v39 = vld [vmem:[%s3794_s0 + $0x18] sm:$0xff] }
 0x405   :  { %2651 = vtanh.f32 %v991_v56 }
 0x406   :  { %2653 = vpow2.f32 %v2066_v59 }
 0x40d   :  { %v2648_v60 = vpop.eup %2647 }
 0x40e   :  { %v1001_v2 = vadd.f32 1.0, %v2648_v60  ;;  %v2650_v5 = vpop.eup %2649 }
 0x40f   :  { %v1002_v50 = vadd.f32 1.0, %v2650_v5  ;;  %v2652_v25 = vpop.eup %2651 }
 0x410   :  { %2655 = vrcp.f32 %v1001_v2  ;;  %v2654_v37 = vpop.eup %2653 }
 0x411   :  { %2657 = vrcp.f32 %v1002_v50  ;;  %v1003_v32 = vadd.f32 1.0, %v2654_v37 }
 0x413   :  { %2659 = vrcp.f32 %v1003_v32 }
 0x41a   :  { %v2656_v51 = vpop.eup %2655 }
 0x41b   :  { %v1012_v52 = vmul.f32 %v2656_v51, %v2652_v25  ;;  %v2658_v62 = vpop.eup %2657 }
 0x41c   :  { %v1011_v40 = vmul.f32 %v2658_v62, %v3353_v16  ;;  %v3587_v16 = vld [vmem:[%s3794_s0] sm:$0xff] }
 0x41d   :  { %v2660_v4 = vpop.eup %2659 }
 0x41e   :  { %v3544_v61 = vadd.f32 %v1012_v52, %v1011_v40 }
 0x420   :  { %2661 = vtanh.f32 %v3544_v61 }
 0x42a   :  { %v2662_v49 = vpop.eup %2661 }
 0x42b   :  { %v1015_v10 = vmul.f32 %v2662_v49, %v2660_v4 }
 0x42d   :  { %2067 = vst [vmem:[%s3798_s4 + $0x18] sm:$0xff] %v1015_v10  ;;  %1160 = vmatmul.mubr.f32.vlgmr.msra.gmra.mrb[8].mxu0 %v1015_v10  ;;  %1231 = vmatmul.mubr.f32.vlgmr.msra.gmra.mrb[8].mxu1 %v1015_v10 }
 0x42e   :  { %2407 = vmatpush1.bf16.msra.mxu0 %v3383_v29  ;;  %2439 = vmatpush1.bf16.msra.mxu1 %v3392_v43 }
 0x42f   :  { %2409 = vmatprep.subr.bf16.mxu0 %v3228_v33  ;;  %2441 = vmatprep.subr.bf16.mxu1 %v3404_v14 }
 0x430   :  { %1408 = vmatprep.mubr.f32.mxu0 %v2759_v7  ;;  %1479 = vmatprep.mubr.f32.mxu1 %v2759_v7 }
 0x432   :  { %2411 = vmatpush1.bf16.msra.mxu0 %v3236_v48  ;;  %2443 = vmatpush1.bf16.msra.mxu1 %v3412_v46 }
 0x433   :  { %2413 = vmatprep.subr.bf16.mxu0 %v3246_v0  ;;  %2445 = vmatprep.subr.bf16.mxu1 %v3424_v11 }
 0x436   :  { %2415 = vmatpush1.bf16.msra.mxu0 %v3254_v31  ;;  %2447 = vmatpush1.bf16.msra.mxu1 %v3432_v22 }
 0x437   :  { %2417 = vmatprep.subr.bf16.mxu0 %v3264_v41  ;;  %2449 = vmatprep.subr.bf16.mxu1 %v3444_v53 }
 0x43a   :  { %2419 = vmatpush1.bf16.msra.mxu0 %v3272_v12  ;;  %2451 = vmatpush1.bf16.msra.mxu1 %v3452_v57 }
 0x43b   :  { %2421 = vmatprep.subr.bf16.mxu0 %v3282_v19  ;;  %2453 = vmatprep.subr.bf16.mxu1 %v3464_v1 }
 0x43e   :  { %2423 = vmatpush1.bf16.msra.mxu0 %v3290_v23  ;;  %2455 = vmatpush1.bf16.msra.mxu1 %v3472_v8 }
 0x43f   :  { %2425 = vmatprep.subr.bf16.mxu0 %v3300_v34  ;;  %2457 = vmatprep.subr.bf16.mxu1 %v3484_v45 }
 0x442   :  { %2427 = vmatpush1.bf16.msra.mxu0 %v3308_v38  ;;  %2459 = vmatpush1.bf16.msra.mxu1 %v3492_v18 }
 0x443   :  { %2429 = vmatprep.subr.bf16.mxu0 %v3318_v47  ;;  %2461 = vmatprep.subr.bf16.mxu1 %v3504_v63 }
 0x446   :  { %2431 = vmatpush1.bf16.msra.mxu0 %v3326_v17  ;;  %2463 = vmatpush1.bf16.msra.mxu1 %v3512_v15 }
 0x447   :  { %2433 = vmatprep.subr.bf16.mxu0 %v3336_v42  ;;  %2465 = vmatprep.subr.bf16.mxu1 %v3524_v35 }
 0x44a   :  { %2435 = vmatpush1.bf16.msra.mxu0 %v3344_v58  ;;  %2467 = vmatpush1.bf16.msra.mxu1 %v3532_v9 }
 0x44b   :  { %2469 = vmatprep.subr.bf16.mxu0 %v3370_v13  ;;  %2501 = vmatprep.subr.bf16.mxu1 %v3381_v28 }
 0x500   :  { %v1161_v21 = vpop.f32.mrb[8].mxu0  ;;  %v1232_v36 = vpop.f32.mrb[8].mxu1 }
 0x501   :  { %v1237_v44 = vadd.f32 %v1161_v21, %v3587_v16  ;;  %v1163_v26 = vpop.f32.mrb[9].mxu0  ;;  %v1234_v30 = vpop.f32.mrb[9].mxu1  ;;  %v1239_v27 = vadd.f32 %v1232_v36, %v3599_v24 }
 0x502   :  { %v1238_v55 = vadd.f32 %v1163_v26, %v3592_v20  ;;  %v1240_v54 = vadd.f32 %v1234_v30, %v3605_v39 }
 0x503   :  { %v2068_v6 = vmul.f32 -1.442695, %v1237_v44  ;;  %v2070_v56 = vmul.f32 -1.442695, %v1239_v27 }
 0x504   :  { %v2069_v3 = vmul.f32 -1.442695, %v1238_v55 }
 0x505   :  { %2663 = vpow2.f32 %v2068_v6 }
 0x506   :  { %2665 = vpow2.f32 %v2069_v3 }
 0x507   :  { %2667 = vtanh.f32 %v1240_v54 }
 0x508   :  { %2669 = vpow2.f32 %v2070_v56  ;;  %v1811_v56 = vld [vmem:[%s3795_s1 + $0x108] sm:$0xff] }
 0x50f   :  { %v2664_v59 = vpop.eup %2663 }
 0x510   :  { %v1250_v60 = vadd.f32 1.0, %v2664_v59  ;;  %v2666_v2 = vpop.eup %2665  ;;  %v1815_v59 = vld [vmem:[%s3795_s1 + $0x128] sm:$0xff] }
 0x511   :  { %v1251_v5 = vadd.f32 1.0, %v2666_v2  ;;  %v2668_v50 = vpop.eup %2667  ;;  %v1810_v2 = vld [vmem:[%s3795_s1 + $0x100] sm:$0xff] }
 0x512   :  { %2671 = vrcp.f32 %v1250_v60  ;;  %v2670_v25 = vpop.eup %2669  ;;  %v2548_v60 = vpack.c.bf16 %v1815_v59, %v1811_v56 }
 0x513   :  { %2673 = vrcp.f32 %v1251_v5  ;;  %v1252_v62 = vadd.f32 1.0, %v2670_v25  ;;  %v1814_v5 = vld [vmem:[%s3795_s1 + $0x120] sm:$0xff]  ;;  %v1819_v25 = vld [vmem:[%s3795_s1 + $0x148] sm:$0xff] }
 0x515   :  { %2675 = vrcp.f32 %v1252_v62  ;;  %v1822_v62 = vld [vmem:[%s3795_s1 + $0x160] sm:$0xff] }
 0x51c   :  { %v2672_v37 = vpop.eup %2671 }
 0x51d   :  { %v1261_v51 = vmul.f32 %v2672_v37, %v2668_v50  ;;  %v2674_v52 = vpop.eup %2673  ;;  %v2550_v50 = vpack.c.bf16 %v1814_v5, %v1810_v2  ;;  %v1823_v37 = vld [vmem:[%s3795_s1 + $0x168] sm:$0xff] }
 0x51e   :  { %v1260_v32 = vmul.f32 %v2674_v52, %v3544_v61  ;;  %v1818_v52 = vld [vmem:[%s3795_s1 + $0x140] sm:$0xff] }
 0x51f   :  { %v2676_v4 = vpop.eup %2675 }
 0x520   :  { %v3609_v40 = vadd.f32 %v1261_v51, %v1260_v32  ;;  %v2552_v51 = vpack.c.bf16 %v1823_v37, %v1819_v25  ;;  %v2554_v32 = vpack.c.bf16 %v1822_v62, %v1818_v52 }
 0x522   :  { %2677 = vtanh.f32 %v3609_v40 }
 0x52c   :  { %v2678_v49 = vpop.eup %2677 }
 0x52d   :  { %v1264_v10 = vmul.f32 %v2678_v49, %v2676_v4  ;;  %v1831_v4 = vld [vmem:[%s3795_s1 + $0x1a8] sm:$0xff] }
 0x52f   :  { %2071 = vst [vmem:[%s3798_s4 + $0x20] sm:$0xff] %v1264_v10  ;;  %1409 = vmatmul.mubr.f32.vlgmr.msra.gmra.mrb[10].mxu0 %v1264_v10  ;;  %1480 = vmatmul.mubr.f32.vlgmr.msra.gmra.mrb[10].mxu1 %v1264_v10  ;;  %v1826_v10 = vld [vmem:[%s3795_s1 + $0x180] sm:$0xff] }
 0x530   :  { %2471 = vmatpush1.bf16.msra.mxu0 %v3383_v29  ;;  %2503 = vmatpush1.bf16.msra.mxu1 %v3392_v43 }
 0x531   :  { %2473 = vmatprep.subr.bf16.mxu0 %v3228_v33  ;;  %2505 = vmatprep.subr.bf16.mxu1 %v3404_v14 }
 0x532   :  { %1657 = vmatprep.mubr.f32.mxu0 %v2759_v7  ;;  %1728 = vmatprep.mubr.f32.mxu1 %v2759_v7 }
 0x534   :  { %2475 = vmatpush1.bf16.msra.mxu0 %v3236_v48  ;;  %2507 = vmatpush1.bf16.msra.mxu1 %v3412_v46 }
 0x535   :  { %2477 = vmatprep.subr.bf16.mxu0 %v3246_v0  ;;  %2509 = vmatprep.subr.bf16.mxu1 %v3424_v11 }
 0x538   :  { %2479 = vmatpush1.bf16.msra.mxu0 %v3254_v31  ;;  %2511 = vmatpush1.bf16.msra.mxu1 %v3432_v22 }
 0x539   :  { %2481 = vmatprep.subr.bf16.mxu0 %v3264_v41  ;;  %2513 = vmatprep.subr.bf16.mxu1 %v3444_v53 }
 0x53c   :  { %2483 = vmatpush1.bf16.msra.mxu0 %v3272_v12  ;;  %2515 = vmatpush1.bf16.msra.mxu1 %v3452_v57 }
 0x53d   :  { %2485 = vmatprep.subr.bf16.mxu0 %v3282_v19  ;;  %2517 = vmatprep.subr.bf16.mxu1 %v3464_v1 }
 0x540   :  { %2487 = vmatpush1.bf16.msra.mxu0 %v3290_v23  ;;  %2519 = vmatpush1.bf16.msra.mxu1 %v3472_v8 }
 0x541   :  { %2489 = vmatprep.subr.bf16.mxu0 %v3300_v34  ;;  %2521 = vmatprep.subr.bf16.mxu1 %v3484_v45 }
 0x544   :  { %2491 = vmatpush1.bf16.msra.mxu0 %v3308_v38  ;;  %2523 = vmatpush1.bf16.msra.mxu1 %v3492_v18 }
 0x545   :  { %2493 = vmatprep.subr.bf16.mxu0 %v3318_v47  ;;  %2525 = vmatprep.subr.bf16.mxu1 %v3504_v63 }
 0x548   :  { %2495 = vmatpush1.bf16.msra.mxu0 %v3326_v17  ;;  %2527 = vmatpush1.bf16.msra.mxu1 %v3512_v15 }
 0x549   :  { %2497 = vmatprep.subr.bf16.mxu0 %v3336_v42  ;;  %2529 = vmatprep.subr.bf16.mxu1 %v3524_v35 }
 0x54c   :  { %2499 = vmatpush1.bf16.msra.mxu0 %v3344_v58  ;;  %2531 = vmatpush1.bf16.msra.mxu1 %v3532_v9 }
 0x54d   :  { %2533 = vmatprep.subr.bf16.mxu0 %v3370_v13  ;;  %2565 = vmatprep.subr.bf16.mxu1 %v3381_v28 }
 0x602   :  { %v1410_v33 = vpop.f32.mrb[10].mxu0  ;;  %v1481_v48 = vpop.f32.mrb[10].mxu1 }
 0x603   :  { %v1486_v0 = vadd.f32 %v1410_v33, %v3587_v16  ;;  %v1412_v31 = vpop.f32.mrb[11].mxu0  ;;  %v1483_v41 = vpop.f32.mrb[11].mxu1  ;;  %v1488_v34 = vadd.f32 %v1481_v48, %v3599_v24  ;;  %v1830_v33 = vld [vmem:[%s3795_s1 + $0x1a0] sm:$0xff] }
 0x604   :  { %v1487_v12 = vadd.f32 %v1412_v31, %v3592_v20  ;;  %v1489_v38 = vadd.f32 %v1483_v41, %v3605_v39  ;;  %v2558_v48 = vpack.c.bf16 %v1830_v33, %v1826_v10  ;;  %v1839_v31 = vld [vmem:[%s3795_s1 + $0x1e8] sm:$0xff] }
 0x605   :  { %v2072_v19 = vmul.f32 -1.442695, %v1486_v0  ;;  %v2074_v47 = vmul.f32 -1.442695, %v1488_v34  ;;  %v1835_v0 = vld [vmem:[%s3795_s1 + $0x1c8] sm:$0xff] }
 0x606   :  { %v2073_v23 = vmul.f32 -1.442695, %v1487_v12  ;;  %v2560_v41 = vpack.c.bf16 %v1839_v31, %v1835_v0  ;;  %v1834_v12 = vld [vmem:[%s3795_s1 + $0x1c0] sm:$0xff] }
 0x607   :  { %2679 = vpow2.f32 %v2072_v19  ;;  %v1838_v19 = vld [vmem:[%s3795_s1 + $0x1e0] sm:$0xff] }
 0x608   :  { %2681 = vpow2.f32 %v2073_v23  ;;  %v2562_v23 = vpack.c.bf16 %v1838_v19, %v1834_v12 }
 0x609   :  { %2683 = vtanh.f32 %v1489_v38 }
 0x60a   :  { %2685 = vpow2.f32 %v2074_v47 }
 0x611   :  { %v2680_v17 = vpop.eup %2679 }
 0x612   :  { %v1499_v42 = vadd.f32 1.0, %v2680_v17  ;;  %v2682_v58 = vpop.eup %2681 }
 0x613   :  { %v1500_v13 = vadd.f32 1.0, %v2682_v58  ;;  %v2684_v28 = vpop.eup %2683 }
 0x614   :  { %2687 = vrcp.f32 %v1499_v42  ;;  %v2686_v61 = vpop.eup %2685 }
 0x615   :  { %2689 = vrcp.f32 %v1500_v13  ;;  %v1501_v26 = vadd.f32 1.0, %v2686_v61 }
 0x617   :  { %2691 = vrcp.f32 %v1501_v26 }
 0x61e   :  { %v2688_v21 = vpop.eup %2687 }
 0x61f   :  { %v1510_v36 = vmul.f32 %v2688_v21, %v2684_v28  ;;  %v2690_v44 = vpop.eup %2689 }
 0x620   :  { %v1509_v30 = vmul.f32 %v2690_v44, %v3609_v40  ;;  %v1827_v40 = vld [vmem:[%s3795_s1 + $0x188] sm:$0xff] }
 0x621   :  { %v2692_v6 = vpop.eup %2691  ;;  %v2556_v49 = vpack.c.bf16 %v1831_v4, %v1827_v40 }
 0x622   :  { %v3654_v55 = vadd.f32 %v1510_v36, %v1509_v30 }
 0x624   :  { %2693 = vtanh.f32 %v3654_v55 }
 0x62e   :  { %v2694_v3 = vpop.eup %2693 }
 0x62f   :  { %v1513_v27 = vmul.f32 %v2694_v3, %v2692_v6 }
 0x631   :  { %2075 = vst [vmem:[%s3798_s4 + $0x28] sm:$0xff] %v1513_v27  ;;  %1658 = vmatmul.mubr.f32.vlgmr.msra.gmra.mrb[12].mxu0 %v1513_v27  ;;  %1729 = vmatmul.mubr.f32.vlgmr.msra.gmra.mrb[12].mxu1 %v1513_v27 }
 0x632   :  { %2535 = vmatpush1.bf16.msra.mxu0 %v3383_v29  ;;  %2567 = vmatpush1.bf16.msra.mxu1 %v3392_v43  ;;  %v1791_v29 = vld [vmem:[%s3795_s1 + $0x68] sm:$0xff] }
 0x633   :  { %2569 = vmatprep.subr.bf16.mxu1 %v3404_v14  ;;  %1906 = vmatprep.mubr.f32.mxu0 %v2759_v7  ;;  %v1786_v14 = vld [vmem:[%s3795_s1 + $0x40] sm:$0xff] }
 0x634   :  { %1977 = vmatprep.mubr.f32.mxu1 %v2759_v7  ;;  %v1787_v7 = vld [vmem:[%s3795_s1 + $0x48] sm:$0xff] }
 0x635   :  { %v2536_v43 = vpack.c.bf16 %v1791_v29, %v1787_v7 }
 0x636   :  { %2571 = vmatpush1.bf16.msra.mxu1 %v3412_v46  ;;  %v1790_v46 = vld [vmem:[%s3795_s1 + $0x60] sm:$0xff] }
 0x637   :  { %2573 = vmatprep.subr.bf16.mxu1 %v3424_v11  ;;  %v2538_v11 = vpack.c.bf16 %v1790_v46, %v1786_v14  ;;  %2537 = vmatprep.subr.bf16.mxu0 %v2536_v43 }
 0x639   :  { %2539 = vmatpush1.bf16.msra.mxu0 %v2538_v11 }
 0x63a   :  { %2575 = vmatpush1.bf16.msra.mxu1 %v3432_v22  ;;  %v1795_v22 = vld [vmem:[%s3795_s1 + $0x88] sm:$0xff] }
 0x63b   :  { %2577 = vmatprep.subr.bf16.mxu1 %v3444_v53  ;;  %v1799_v53 = vld [vmem:[%s3795_s1 + $0xa8] sm:$0xff] }
 0x63e   :  { %2579 = vmatpush1.bf16.msra.mxu1 %v3452_v57  ;;  %v2540_v57 = vpack.c.bf16 %v1799_v53, %v1795_v22 }
 0x63f   :  { %2581 = vmatprep.subr.bf16.mxu1 %v3464_v1  ;;  %v1794_v1 = vld [vmem:[%s3795_s1 + $0x80] sm:$0xff] }
 0x640   :  { %2541 = vmatprep.subr.bf16.mxu0 %v2540_v57 }
 0x642   :  { %2583 = vmatpush1.bf16.msra.mxu1 %v3472_v8  ;;  %v1798_v8 = vld [vmem:[%s3795_s1 + $0xa0] sm:$0xff] }
 0x643   :  { %2585 = vmatprep.subr.bf16.mxu1 %v3484_v45  ;;  %v2542_v45 = vpack.c.bf16 %v1798_v8, %v1794_v1 }
 0x645   :  { %2543 = vmatpush1.bf16.msra.mxu0 %v2542_v45 }
 0x646   :  { %2587 = vmatpush1.bf16.msra.mxu1 %v3492_v18  ;;  %v1803_v18 = vld [vmem:[%s3795_s1 + $0xc8] sm:$0xff] }
 0x647   :  { %2589 = vmatprep.subr.bf16.mxu1 %v3504_v63  ;;  %v1807_v63 = vld [vmem:[%s3795_s1 + $0xe8] sm:$0xff] }
 0x64a   :  { %2591 = vmatpush1.bf16.msra.mxu1 %v3512_v15  ;;  %v2544_v15 = vpack.c.bf16 %v1807_v63, %v1803_v18 }
 0x64b   :  { %2593 = vmatprep.subr.bf16.mxu1 %v3524_v35  ;;  %v1802_v35 = vld [vmem:[%s3795_s1 + $0xc0] sm:$0xff] }
 0x64c   :  { %2545 = vmatprep.subr.bf16.mxu0 %v2544_v15 }
 0x64e   :  { %2595 = vmatpush1.bf16.msra.mxu1 %v3532_v9  ;;  %v1806_v9 = vld [vmem:[%s3795_s1 + $0xe0] sm:$0xff] }
 0x64f   :  { %v2546_v54 = vpack.c.bf16 %v1806_v9, %v1802_v35 }
 0x651   :  { %2547 = vmatpush1.bf16.msra.mxu0 %v2546_v54 }
 0x652   :  { %2549 = vmatprep.subr.bf16.mxu0 %v2548_v60 }
 0x655   :  { %2551 = vmatpush1.bf16.msra.mxu0 %v2550_v50 }
 0x656   :  { %2553 = vmatprep.subr.bf16.mxu0 %v2552_v51 }
 0x659   :  { %2555 = vmatpush1.bf16.msra.mxu0 %v2554_v32 }
 0x65a   :  { %2557 = vmatprep.subr.bf16.mxu0 %v2556_v49 }
 0x65d   :  { %2559 = vmatpush1.bf16.msra.mxu0 %v2558_v48 }
 0x65e   :  { %2561 = vmatprep.subr.bf16.mxu0 %v2560_v41 }
 0x661   :  { %2563 = vmatpush1.bf16.msra.mxu0 %v2562_v23 }
 0x704   :  { %v1659_v34 = vpop.f32.mrb[12].mxu0  ;;  %v1730_v38 = vpop.f32.mrb[12].mxu1 }
 0x705   :  { %v1735_v47 = vadd.f32 %v1659_v34, %v3587_v16  ;;  %v1661_v17 = vpop.f32.mrb[13].mxu0  ;;  %v1732_v42 = vpop.f32.mrb[13].mxu1  ;;  %v1737_v61 = vadd.f32 %v1730_v38, %v3599_v24 }
 0x706   :  { %v1736_v58 = vadd.f32 %v1661_v17, %v3592_v20  ;;  %v1738_v21 = vadd.f32 %v1732_v42, %v3605_v39 }
 0x707   :  { %v2076_v13 = vmul.f32 -1.442695, %v1735_v47  ;;  %v2078_v36 = vmul.f32 -1.442695, %v1737_v61 }
 0x708   :  { %v2077_v28 = vmul.f32 -1.442695, %v1736_v58 }
 0x709   :  { %2695 = vpow2.f32 %v2076_v13 }
 0x70a   :  { %2697 = vpow2.f32 %v2077_v28 }
 0x70b   :  { %2699 = vtanh.f32 %v1738_v21 }
 0x70c   :  { %2701 = vpow2.f32 %v2078_v36 }
 0x713   :  { %v2696_v44 = vpop.eup %2695 }
 0x714   :  { %v1748_v26 = vadd.f32 1.0, %v2696_v44  ;;  %v2698_v30 = vpop.eup %2697 }
 0x715   :  { %v1749_v16 = vadd.f32 1.0, %v2698_v30  ;;  %v2700_v6 = vpop.eup %2699 }
 0x716   :  { %2703 = vrcp.f32 %v1748_v26  ;;  %v2702_v3 = vpop.eup %2701 }
 0x717   :  { %2705 = vrcp.f32 %v1749_v16  ;;  %v1750_v29 = vadd.f32 1.0, %v2702_v3 }
 0x719   :  { %2707 = vrcp.f32 %v1750_v29 }
 0x720   :  { %v2704_v20 = vpop.eup %2703 }
 0x721   :  { %v1759_v27 = vmul.f32 %v2704_v20, %v2700_v6  ;;  %v2706_v7 = vpop.eup %2705 }
 0x722   :  { %v1758_v43 = vmul.f32 %v2706_v7, %v3654_v55 }
 0x723   :  { %v2708_v39 = vpop.eup %2707 }
 0x724   :  { %v1760_v24 = vadd.f32 %v1759_v27, %v1758_v43 }
 0x726   :  { %2709 = vtanh.f32 %v1760_v24  ;;  %1771 = vst [vmem:[#allocation4] sm:$0xff] %v1760_v24 }
 0x730   :  { %v2710_v14 = vpop.eup %2709 }
 0x731   :  { %v1762_v46 = vmul.f32 %v2710_v14, %v2708_v39 }
 0x733   :  { %2079 = vst [vmem:[%s3798_s4 + $0x30] sm:$0xff] %v1762_v46  ;;  %1770 = vst [vmem:[#allocation2] sm:$0xff] %v1762_v46  ;;  %1907 = vmatmul.mubr.f32.vlgmr.msra.gmra.mrb[14].mxu0 %v1762_v46  ;;  %1978 = vmatmul.mubr.f32.vlgmr.msra.gmra.mrb[14].mxu1 %v1762_v46 }
 0x734   :  { %2722 = shalt.err (!%p2719_p4)
}
 0x735   :  { %s2723_s4 = scalar_lea.hbm %s3799_s5, 128 }
 0x736   :  { %p2724_p5 = scmp.ne.s32.totalorder %s3799_s5, %s2723_s4  ;;  %p2727_p6 = scmp.lt.u32.totalorder %s2723_s4, %s3799_s5 }
 0x738   :  { %p2729_p7 = pnand %p2727_p6, %p2724_p5 }
 0x73a   :  { %2732 = shalt.err (!%p2729_p7)
}
 0x73b   :  { %2032 = dma.vmem_to_hbm [thread:$0]  %s2030_s11, 128, %s3799_s5, [#allocation3]  }
 0x73c   :  { %s2733_s22 = scalar_lea.vmem %s2040_s13, 128  ;;  %p2738_p9 = scmp.lt.s32.totalorder %s2040_s13, %s2040_s13 }
 0x73d   :  { %p2734_p8 = scmp.ne.s32.totalorder %s2040_s13, %s2733_s22  ;;  %p2739_p10 = scmp.lt.s32.totalorder %s2733_s22, %s2733_s22 }
 0x73f   :  { %p2740_p11 = por %p2739_p10, %p2738_p9 }
 0x741   :  { %p2741_p12 = pnand %p2740_p11, %p2734_p8 }
 0x743   :  { %2744 = shalt.err (!%p2741_p12)
}
 0x744   :  { %s2745_s25 = scalar_lea.hbm %s3800_s6, 128 }
 0x745   :  { %p2746_p13 = scmp.ne.s32.totalorder %s3800_s6, %s2745_s25  ;;  %p2749_p0 = scmp.lt.u32.totalorder %s2745_s25, %s3800_s6 }
 0x747   :  { %p2751_p1 = pnand %p2749_p0, %p2746_p13 }
 0x749   :  { %2754 = shalt.err (!%p2751_p1)
}
 0x74a   :  { %2042 = dma.vmem_to_hbm [thread:$0]  %s2040_s13, 128, %s3800_s6, [#allocation5]  }
 0x806   :  { %v1908_v55 = vpop.f32.mrb[14].mxu0  ;;  %v1979_v11 = vpop.f32.mrb[14].mxu1 }
 0x807   :  { %v1910_v22 = vpop.f32.mrb[15].mxu0  ;;  %v1981_v53 = vpop.f32.mrb[15].mxu1 }
 0x808   :  { %2755 = dma.done.wait [#allocation3], 128  }
 0x809   :  { %2756 = vsyncadd [#allocation3], 4294967168 }
 0x80a   :  { %2757 = dma.done.wait [#allocation5], 128  }
 0x80b   :  { %2758 = vsyncadd [#allocation5], 4294967168 }
 0x80c   :  { %2051 = vsyncpa [#allocation3], 1 }
 0x80d   :  { %2052 = vsyncpa [#allocation5], 1 }

// kernel: seq2seq_forward.4
= control target key start
LH: loop header
LB: loop body
LE: loop exit
PB: predicated region body
PF: predicated region fallthrough
CT: control target
= control target key end

     0   :  { %v2698_v3 = vmov 0.0   ;;  %s3749_s1 = inlined_call_operand.vmem [shape: f32[128,512], index: 1, kind: input, shape index: {}]   ;;  %s3750_s2 = inlined_call_operand.vmem [shape: f32[8,128], index: 2, kind: input, shape index: {}, may-alias: {2,3}]   ;;  %s3751_s0 = inlined_call_operand.vmem [shape: f32[8,8,512], index: 0, kind: input, shape index: {}]   ;;  %s3752_s3 = inlined_call_operand.vmem [shape: f32[8,128], index: 3, kind: input, shape index: {}, may-alias: {2,3}]   ;;  %s3753_s4 = inlined_call_operand.vmem [shape: f32[8,8,128], index: 4, kind: output, shape index: {0}]   ;;  %s3754_s6 = inlined_call_operand.vmem [shape: f32[8,128], index: 6, kind: output, shape index: {2}]   ;;  %s3755_s5 = inlined_call_operand.vmem [shape: f32[8,128], index: 5, kind: output, shape index: {1}]  }
   0x1   :  { %v35_v0 = vld [vmem:[%s3749_s1 + $0x8] sm:$0xff]  ;;  %v34_v2 = vld [vmem:[%s3749_s1] sm:$0xff]  ;;  %162 = vmatprep.mubr.f32.mxu0 %v2698_v3  ;;  %233 = vmatprep.mubr.f32.mxu1 %v2698_v3  ;;  %v37_v19 = vld [vmem:[%s3749_s1 + $0x18] sm:$0xff] }
   0x2   :  { %v39_v1 = vld [vmem:[%s3749_s1 + $0x28] sm:$0xff]  ;;  %v38_v5 = vld [vmem:[%s3749_s1 + $0x20] sm:$0xff]  ;;  %v41_v20 = vld [vmem:[%s3749_s1 + $0x38] sm:$0xff] }
   0x3   :  { %v2745_v4 = vpack.c.bf16 %v39_v1, %v35_v0  ;;  %v43_v6 = vld [vmem:[%s3749_s1 + $0x48] sm:$0xff]  ;;  %v2756_v8 = vpack.c.bf16 %v38_v5, %v34_v2  ;;  %v42_v10 = vld [vmem:[%s3749_s1 + $0x40] sm:$0xff]  ;;  %v2797_v22 = vpack.c.bf16 %v41_v20, %v37_v19  ;;  %v36_v23 = vld [vmem:[%s3749_s1 + $0x10] sm:$0xff] }
   0x4   :  { %v47_v7 = vld [vmem:[%s3749_s1 + $0x68] sm:$0xff]  ;;  %v46_v11 = vld [vmem:[%s3749_s1 + $0x60] sm:$0xff]  ;;  %v40_v24 = vld [vmem:[%s3749_s1 + $0x30] sm:$0xff] }
   0x5   :  { %v2758_v9 = vpack.c.bf16 %v47_v7, %v43_v6  ;;  %v51_v12 = vld [vmem:[%s3749_s1 + $0x88] sm:$0xff]  ;;  %2058 = vmatprep.subr.bf16.mxu0 %v2745_v4  ;;  %v2774_v14 = vpack.c.bf16 %v46_v11, %v42_v10  ;;  %v50_v15 = vld [vmem:[%s3749_s1 + $0x80] sm:$0xff]  ;;  %v2805_v25 = vpack.c.bf16 %v40_v24, %v36_v23  ;;  %2090 = vmatprep.subr.bf16.mxu1 %v2797_v22  ;;  %v45_v27 = vld [vmem:[%s3749_s1 + $0x58] sm:$0xff] }
   0x6   :  { %v55_v13 = vld [vmem:[%s3749_s1 + $0xa8] sm:$0xff]  ;;  %2060 = vmatpush1.bf16.msra.mxu0 %v2756_v8  ;;  %v54_v16 = vld [vmem:[%s3749_s1 + $0xa0] sm:$0xff]  ;;  %v49_v28 = vld [vmem:[%s3749_s1 + $0x78] sm:$0xff] }
   0x7   :  { %2062 = vmatprep.subr.bf16.mxu0 %v2758_v9  ;;  %v2783_v17 = vpack.c.bf16 %v55_v13, %v51_v12  ;;  %v59_v18 = vld [vmem:[%s3749_s1 + $0xc8] sm:$0xff]  ;;  %v2808_v26 = vpack.c.bf16 %v54_v16, %v50_v15  ;;  %v44_v29 = vld [vmem:[%s3749_s1 + $0x50] sm:$0xff]  ;;  %v58_v31 = vld [vmem:[%s3749_s1 + $0xc0] sm:$0xff]  ;;  %2092 = vmatpush1.bf16.msra.mxu1 %v2805_v25  ;;  %v2830_v33 = vpack.c.bf16 %v49_v28, %v45_v27 }
   0x8   :  { %v63_v21 = vld [vmem:[%s3749_s1 + $0xe8] sm:$0xff]  ;;  %v62_v32 = vld [vmem:[%s3749_s1 + $0xe0] sm:$0xff]  ;;  %v48_v34 = vld [vmem:[%s3749_s1 + $0x70] sm:$0xff] }
   0x9   :  { %v2821_v30 = vpack.c.bf16 %v63_v21, %v59_v18  ;;  %v67_v35 = vld [vmem:[%s3749_s1 + $0x108] sm:$0xff]  ;;  %v2841_v37 = vpack.c.bf16 %v48_v34, %v44_v29  ;;  %v53_v38 = vld [vmem:[%s3749_s1 + $0x98] sm:$0xff]  ;;  %2094 = vmatprep.subr.bf16.mxu1 %v2830_v33  ;;  %v52_v40 = vld [vmem:[%s3749_s1 + $0x90] sm:$0xff]  ;;  %v2857_v42 = vpack.c.bf16 %v62_v32, %v58_v31 }
   0xa   :  { %2064 = vmatpush1.bf16.msra.mxu0 %v2774_v14  ;;  %v71_v36 = vld [vmem:[%s3749_s1 + $0x128] sm:$0xff]  ;;  %v57_v39 = vld [vmem:[%s3749_s1 + $0xb8] sm:$0xff]  ;;  %v56_v41 = vld [vmem:[%s3749_s1 + $0xb0] sm:$0xff] }
   0xb   :  { %2066 = vmatprep.subr.bf16.mxu0 %v2783_v17  ;;  %v66_v43 = vld [vmem:[%s3749_s1 + $0x100] sm:$0xff]  ;;  %v2865_v45 = vpack.c.bf16 %v57_v39, %v53_v38  ;;  %v2868_v46 = vpack.c.bf16 %v71_v36, %v67_v35  ;;  %2096 = vmatpush1.bf16.msra.mxu1 %v2841_v37  ;;  %v75_v47 = vld [vmem:[%s3749_s1 + $0x148] sm:$0xff]  ;;  %v2874_v48 = vpack.c.bf16 %v56_v41, %v52_v40  ;;  %v61_v49 = vld [vmem:[%s3749_s1 + $0xd8] sm:$0xff] }
   0xc   :  { %v70_v44 = vld [vmem:[%s3749_s1 + $0x120] sm:$0xff]  ;;  %v65_v50 = vld [vmem:[%s3749_s1 + $0xf8] sm:$0xff]  ;;  %v79_v51 = vld [vmem:[%s3749_s1 + $0x168] sm:$0xff] }
   0xd   :  { %2098 = vmatprep.subr.bf16.mxu1 %v2865_v45  ;;  %v2886_v52 = vpack.c.bf16 %v65_v50, %v61_v49  ;;  %v60_v53 = vld [vmem:[%s3749_s1 + $0xd0] sm:$0xff]  ;;  %v2895_v55 = vpack.c.bf16 %v70_v44, %v66_v43  ;;  %v69_v56 = vld [vmem:[%s3749_s1 + $0x118] sm:$0xff]  ;;  %v2904_v58 = vpack.c.bf16 %v79_v51, %v75_v47  ;;  %v74_v59 = vld [vmem:[%s3749_s1 + $0x140] sm:$0xff] }
   0xe   :  { %2068 = vmatpush1.bf16.msra.mxu0 %v2808_v26  ;;  %v64_v54 = vld [vmem:[%s3749_s1 + $0xf0] sm:$0xff]  ;;  %v73_v57 = vld [vmem:[%s3749_s1 + $0x138] sm:$0xff]  ;;  %v78_v60 = vld [vmem:[%s3749_s1 + $0x160] sm:$0xff] }
   0xf   :  { %2070 = vmatprep.subr.bf16.mxu0 %v2821_v30  ;;  %2100 = vmatpush1.bf16.msra.mxu1 %v2874_v48  ;;  %v83_v61 = vld [vmem:[%s3749_s1 + $0x188] sm:$0xff]  ;;  %v2916_v62 = vpack.c.bf16 %v64_v54, %v60_v53  ;;  %v2922_v0 = vpack.c.bf16 %v73_v57, %v69_v56  ;;  %v68_v1 = vld [vmem:[%s3749_s1 + $0x110] sm:$0xff]  ;;  %v77_v5 = vld [vmem:[%s3749_s1 + $0x158] sm:$0xff]  ;;  %v2937_v7 = vpack.c.bf16 %v78_v60, %v74_v59 }
  0x10   :  { %v87_v63 = vld [vmem:[%s3749_s1 + $0x1a8] sm:$0xff]  ;;  %2102 = vmatprep.subr.bf16.mxu1 %v2886_v52  ;;  %v72_v2 = vld [vmem:[%s3749_s1 + $0x130] sm:$0xff]  ;;  %v81_v6 = vld [vmem:[%s3749_s1 + $0x178] sm:$0xff] }
  0x11   :  { %v2940_v10 = vpack.c.bf16 %v87_v63, %v83_v61  ;;  %v82_v11 = vld [vmem:[%s3749_s1 + $0x180] sm:$0xff]  ;;  %v91_v13 = vld [vmem:[%s3749_s1 + $0x1c8] sm:$0xff]  ;;  %v2952_v15 = vpack.c.bf16 %v72_v2, %v68_v1  ;;  %v2958_v18 = vpack.c.bf16 %v81_v6, %v77_v5  ;;  %v76_v19 = vld [vmem:[%s3749_s1 + $0x150] sm:$0xff] }
  0x12   :  { %2072 = vmatpush1.bf16.msra.mxu0 %v2857_v42  ;;  %v86_v12 = vld [vmem:[%s3749_s1 + $0x1a0] sm:$0xff]  ;;  %v95_v16 = vld [vmem:[%s3749_s1 + $0x1e8] sm:$0xff]  ;;  %v80_v20 = vld [vmem:[%s3749_s1 + $0x170] sm:$0xff] }
  0x13   :  { %2074 = vmatprep.subr.bf16.mxu0 %v2868_v46  ;;  %2104 = vmatpush1.bf16.msra.mxu1 %v2916_v62  ;;  %v85_v21 = vld [vmem:[%s3749_s1 + $0x198] sm:$0xff]  ;;  %v2973_v24 = vpack.c.bf16 %v86_v12, %v82_v11  ;;  %v2976_v27 = vpack.c.bf16 %v95_v16, %v91_v13  ;;  %v90_v28 = vld [vmem:[%s3749_s1 + $0x1c0] sm:$0xff]  ;;  %v2985_v31 = vpack.c.bf16 %v80_v20, %v76_v19  ;;  %v84_v34 = vld [vmem:[%s3749_s1 + $0x190] sm:$0xff] }
  0x14   :  { %2106 = vmatprep.subr.bf16.mxu1 %v2922_v0  ;;  %v89_v23 = vld [vmem:[%s3749_s1 + $0x1b8] sm:$0xff]  ;;  %v94_v29 = vld [vmem:[%s3749_s1 + $0x1e0] sm:$0xff]  ;;  %v88_v35 = vld [vmem:[%s3749_s1 + $0x1b0] sm:$0xff] }
  0x15   :  { %v2988_v32 = vpack.c.bf16 %v89_v23, %v85_v21  ;;  %v93_v36 = vld [vmem:[%s3749_s1 + $0x1d8] sm:$0xff]  ;;  %v3003_v39 = vpack.c.bf16 %v94_v29, %v90_v28  ;;  %v3007_v40 = vpack.c.bf16 %v88_v35, %v84_v34  ;;  %v92_v43 = vld [vmem:[%s3749_s1 + $0x1d0] sm:$0xff]  ;;  %v24_v47 = vld [vmem:[%s3750_s2] sm:$0xff] }
  0x16   :  { %2076 = vmatpush1.bf16.msra.mxu0 %v2895_v55  ;;  %v97_v38 = vld [vmem:[%s3749_s1 + $0x1f8] sm:$0xff]  ;;  %v96_v44 = vld [vmem:[%s3749_s1 + $0x1f0] sm:$0xff]  ;;  %v30_v50 = vld [vmem:[%s3751_s0] sm:$0xff] }
  0x17   :  { %2078 = vmatprep.subr.bf16.mxu0 %v2904_v58  ;;  %2108 = vmatpush1.bf16.msra.mxu1 %v2952_v15  ;;  %v3010_v41 = vpack.c.bf16 %v97_v38, %v93_v36  ;;  %v3023_v49 = vpack.c.bf16 %v96_v44, %v92_v43  ;;  %v31_v51 = vld [vmem:[%s3751_s0 + $0x8] sm:$0xff]  ;;  %v32_v61 = vld [vmem:[%s3751_s0 + $0x10] sm:$0xff]  ;;  %v33_v5 = vld [vmem:[%s3751_s0 + $0x18] sm:$0xff] }
  0x18   :  { %2110 = vmatprep.subr.bf16.mxu1 %v2958_v18  ;;  %v26_v23 = vld [vmem:[%s3752_s3] sm:$0xff] }
  0x1a   :  { %2080 = vmatpush1.bf16.msra.mxu0 %v2937_v7 }
  0x1b   :  { %2082 = vmatprep.subr.bf16.mxu0 %v2940_v10  ;;  %2112 = vmatpush1.bf16.msra.mxu1 %v2985_v31 }
  0x1c   :  { %2114 = vmatprep.subr.bf16.mxu1 %v2988_v32 }
  0x1e   :  { %2084 = vmatpush1.bf16.msra.mxu0 %v2973_v24 }
  0x1f   :  { %2086 = vmatprep.subr.bf16.mxu0 %v2976_v27  ;;  %2116 = vmatpush1.bf16.msra.mxu1 %v3007_v40 }
  0x20   :  { %2118 = vmatprep.subr.bf16.mxu1 %v3010_v41 }
  0x22   :  { %2088 = vmatpush1.bf16.msra.mxu0 %v3003_v39 }
  0x23   :  { %2122 = vmatprep.subr.bf16.mxu0 %v2745_v4  ;;  %2120 = vmatpush1.bf16.msra.mxu1 %v3023_v49 }
  0x24   :  { %2154 = vmatprep.subr.bf16.mxu1 %v2797_v22 }
  0x25   :  { %163 = vmatmul.mubr.f32.vlgmr.msra.gmra.mrb[0].mxu0 %v24_v47 }
  0x26   :  { %2124 = vmatpush1.bf16.msra.mxu0 %v2756_v8  ;;  %406 = vmatprep.mubr.f32.mxu0 %v2698_v3 }
  0x27   :  { %2126 = vmatprep.subr.bf16.mxu0 %v2758_v9  ;;  %234 = vmatmul.mubr.f32.vlgmr.msra.gmra.mrb[0].mxu1 %v24_v47 }
  0x28   :  { %2156 = vmatpush1.bf16.msra.mxu1 %v2805_v25  ;;  %477 = vmatprep.mubr.f32.mxu1 %v2698_v3 }
  0x29   :  { %2158 = vmatprep.subr.bf16.mxu1 %v2830_v33 }
  0x2a   :  { %2128 = vmatpush1.bf16.msra.mxu0 %v2774_v14 }
  0x2b   :  { %2130 = vmatprep.subr.bf16.mxu0 %v2783_v17 }
  0x2c   :  { %2160 = vmatpush1.bf16.msra.mxu1 %v2841_v37 }
  0x2d   :  { %2162 = vmatprep.subr.bf16.mxu1 %v2865_v45 }
  0x2e   :  { %2132 = vmatpush1.bf16.msra.mxu0 %v2808_v26 }
  0x2f   :  { %2134 = vmatprep.subr.bf16.mxu0 %v2821_v30 }
  0x30   :  { %2164 = vmatpush1.bf16.msra.mxu1 %v2874_v48 }
  0x31   :  { %2166 = vmatprep.subr.bf16.mxu1 %v2886_v52 }
  0x32   :  { %2136 = vmatpush1.bf16.msra.mxu0 %v2857_v42 }
  0x33   :  { %2138 = vmatprep.subr.bf16.mxu0 %v2868_v46 }
  0x34   :  { %2168 = vmatpush1.bf16.msra.mxu1 %v2916_v62 }
  0x35   :  { %2170 = vmatprep.subr.bf16.mxu1 %v2922_v0 }
  0x36   :  { %2140 = vmatpush1.bf16.msra.mxu0 %v2895_v55 }
  0x37   :  { %2142 = vmatprep.subr.bf16.mxu0 %v2904_v58 }
  0x38   :  { %2172 = vmatpush1.bf16.msra.mxu1 %v2952_v15 }
  0x39   :  { %2174 = vmatprep.subr.bf16.mxu1 %v2958_v18 }
  0x3a   :  { %2144 = vmatpush1.bf16.msra.mxu0 %v2937_v7 }
  0x3b   :  { %2146 = vmatprep.subr.bf16.mxu0 %v2940_v10 }
  0x3c   :  { %2176 = vmatpush1.bf16.msra.mxu1 %v2985_v31 }
  0x3d   :  { %2178 = vmatprep.subr.bf16.mxu1 %v2988_v32 }
  0x3e   :  { %2148 = vmatpush1.bf16.msra.mxu0 %v2973_v24 }
  0x3f   :  { %2150 = vmatprep.subr.bf16.mxu0 %v2976_v27 }
  0x40   :  { %2180 = vmatpush1.bf16.msra.mxu1 %v3007_v40 }
  0x41   :  { %2182 = vmatprep.subr.bf16.mxu1 %v3010_v41 }
  0x42   :  { %2152 = vmatpush1.bf16.msra.mxu0 %v3003_v39 }
  0x43   :  { %2186 = vmatprep.subr.bf16.mxu0 %v2745_v4 }
  0x44   :  { %2184 = vmatpush1.bf16.msra.mxu1 %v3023_v49 }
  0x45   :  { %2218 = vmatprep.subr.bf16.mxu1 %v2797_v22 }
  0xf8   :  { %v164_v53 = vpop.f32.mrb[0].mxu0 }
  0xf9   :  { %v240_v54 = vadd.f32 %v164_v53, %v30_v50  ;;  %v166_v56 = vpop.f32.mrb[1].mxu0 }
  0xfa   :  { %v241_v57 = vadd.f32 %v166_v56, %v31_v51  ;;  %v235_v63 = vpop.f32.mrb[0].mxu1 }
  0xfb   :  { %v1998_v59 = vmul.f32 -1.442695, %v240_v54  ;;  %v237_v1 = vpop.f32.mrb[1].mxu1  ;;  %v242_v2 = vadd.f32 %v235_v63, %v32_v61 }
  0xfc   :  { %v1999_v60 = vmul.f32 -1.442695, %v241_v57  ;;  %v243_v11 = vadd.f32 %v237_v1, %v33_v5 }
  0xfd   :  { %2570 = vpow2.f32 %v1998_v59  ;;  %v2000_v6 = vmul.f32 -1.442695, %v242_v2 }
  0xfe   :  { %2572 = vpow2.f32 %v1999_v60 }
  0xff   :  { %2574 = vpow2.f32 %v2000_v6  ;;  %v793_v6 = vld [vmem:[%s3749_s1 + $0xc8] sm:$0xff] }
 0x100   :  { %2576 = vtanh.f32 %v243_v11  ;;  %v797_v11 = vld [vmem:[%s3749_s1 + $0xe8] sm:$0xff] }
 0x107   :  { %v2571_v12 = vpop.eup %2570 }
 0x108   :  { %v2573_v13 = vpop.eup %2572  ;;  %v253_v16 = vadd.f32 1.0, %v2571_v12  ;;  %v3205_v12 = vpack.c.bf16 %v797_v11, %v793_v6 }
 0x109   :  { %v254_v19 = vadd.f32 1.0, %v2573_v13  ;;  %v2575_v20 = vpop.eup %2574  ;;  %v792_v13 = vld [vmem:[%s3749_s1 + $0xc0] sm:$0xff] }
 0x10a   :  { %2578 = vrcp.f32 %v253_v16  ;;  %v2577_v21 = vpop.eup %2576  ;;  %v255_v29 = vadd.f32 1.0, %v2575_v20  ;;  %v796_v16 = vld [vmem:[%s3749_s1 + $0xe0] sm:$0xff]  ;;  %v801_v20 = vld [vmem:[%s3749_s1 + $0x108] sm:$0xff] }
 0x10b   :  { %2580 = vrcp.f32 %v254_v19  ;;  %v3213_v19 = vpack.c.bf16 %v796_v16, %v792_v13  ;;  %v1018_v16 = vld [vmem:[%s3749_s1 + $0x28] sm:$0xff] }
 0x10c   :  { %2582 = vrcp.f32 %v255_v29  ;;  %v804_v29 = vld [vmem:[%s3749_s1 + $0x120] sm:$0xff] }
 0x114   :  { %v2579_v28 = vpop.eup %2578 }
 0x115   :  { %v2581_v34 = vpop.eup %2580  ;;  %v264_v35 = vmul.f32 %v2579_v28, %v2577_v21  ;;  %v805_v21 = vld [vmem:[%s3749_s1 + $0x128] sm:$0xff]  ;;  %v800_v28 = vld [vmem:[%s3749_s1 + $0x100] sm:$0xff] }
 0x116   :  { %v263_v36 = vmul.f32 %v2581_v34, %v26_v23  ;;  %v2583_v43 = vpop.eup %2582  ;;  %v3223_v23 = vpack.c.bf16 %v805_v21, %v801_v20  ;;  %v3231_v34 = vpack.c.bf16 %v804_v29, %v800_v28  ;;  %v1016_v20 = vld [vmem:[%s3749_s1 + $0x18] sm:$0xff]  ;;  %v1015_v29 = vld [vmem:[%s3749_s1 + $0x10] sm:$0xff] }
 0x117   :  { %v1020_v28 = vld [vmem:[%s3749_s1 + $0x38] sm:$0xff] }
 0x118   :  { %v3078_v38 = vadd.f32 %v264_v35, %v263_v36  ;;  %v809_v35 = vld [vmem:[%s3749_s1 + $0x148] sm:$0xff] }
 0x119   :  { %v813_v36 = vld [vmem:[%s3749_s1 + $0x168] sm:$0xff] }
 0x11a   :  { %2584 = vtanh.f32 %v3078_v38 }
 0x124   :  { %v2585_v44 = vpop.eup %2584 }
 0x125   :  { %v267_v47 = vmul.f32 %v2585_v44, %v2583_v43  ;;  %v808_v43 = vld [vmem:[%s3749_s1 + $0x140] sm:$0xff] }
 0x126   :  { %v812_v44 = vld [vmem:[%s3749_s1 + $0x160] sm:$0xff] }
 0x127   :  { %268 = vst [vmem:[%s3753_s4] sm:$0xff] %v267_v47  ;;  %407 = vmatmul.mubr.f32.vlgmr.msra.gmra.mrb[2].mxu0 %v267_v47  ;;  %478 = vmatmul.mubr.f32.vlgmr.msra.gmra.mrb[2].mxu1 %v267_v47  ;;  %v3249_v47 = vpack.c.bf16 %v812_v44, %v808_v43  ;;  %v1024_v44 = vld [vmem:[%s3749_s1 + $0x58] sm:$0xff] }
 0x128   :  { %2188 = vmatpush1.bf16.msra.mxu0 %v2756_v8  ;;  %2220 = vmatpush1.bf16.msra.mxu1 %v2805_v25  ;;  %v2001_v8 = vld [vmem:[%s3751_s0 + $0x20] sm:$0xff] }
 0x129   :  { %2190 = vmatprep.subr.bf16.mxu0 %v2758_v9  ;;  %2222 = vmatprep.subr.bf16.mxu1 %v2830_v33  ;;  %v2002_v9 = vld [vmem:[%s3751_s0 + $0x28] sm:$0xff] }
 0x12a   :  { %651 = vmatprep.mubr.f32.mxu0 %v2698_v3  ;;  %722 = vmatprep.mubr.f32.mxu1 %v2698_v3 }
 0x12c   :  { %2192 = vmatpush1.bf16.msra.mxu0 %v2774_v14  ;;  %2224 = vmatpush1.bf16.msra.mxu1 %v2841_v37 }
 0x12d   :  { %2194 = vmatprep.subr.bf16.mxu0 %v2783_v17  ;;  %2226 = vmatprep.subr.bf16.mxu1 %v2865_v45 }
 0x130   :  { %2196 = vmatpush1.bf16.msra.mxu0 %v2808_v26  ;;  %2228 = vmatpush1.bf16.msra.mxu1 %v2874_v48 }
 0x131   :  { %2198 = vmatprep.subr.bf16.mxu0 %v2821_v30  ;;  %2230 = vmatprep.subr.bf16.mxu1 %v2886_v52 }
 0x134   :  { %2200 = vmatpush1.bf16.msra.mxu0 %v2857_v42  ;;  %2232 = vmatpush1.bf16.msra.mxu1 %v2916_v62 }
 0x135   :  { %2202 = vmatprep.subr.bf16.mxu0 %v2868_v46  ;;  %2234 = vmatprep.subr.bf16.mxu1 %v2922_v0 }
 0x138   :  { %2204 = vmatpush1.bf16.msra.mxu0 %v2895_v55  ;;  %2236 = vmatpush1.bf16.msra.mxu1 %v2952_v15 }
 0x139   :  { %2206 = vmatprep.subr.bf16.mxu0 %v2904_v58  ;;  %2238 = vmatprep.subr.bf16.mxu1 %v2958_v18 }
 0x13c   :  { %2208 = vmatpush1.bf16.msra.mxu0 %v2937_v7  ;;  %2240 = vmatpush1.bf16.msra.mxu1 %v2985_v31  ;;  %v2004_v7 = vld [vmem:[%s3751_s0 + $0x38] sm:$0xff] }
 0x13d   :  { %2210 = vmatprep.subr.bf16.mxu0 %v2940_v10  ;;  %2242 = vmatprep.subr.bf16.mxu1 %v2988_v32 }
 0x140   :  { %2212 = vmatpush1.bf16.msra.mxu0 %v2973_v24  ;;  %2244 = vmatpush1.bf16.msra.mxu1 %v3007_v40 }
 0x141   :  { %2214 = vmatprep.subr.bf16.mxu0 %v2976_v27  ;;  %2246 = vmatprep.subr.bf16.mxu1 %v3010_v41 }
 0x144   :  { %2216 = vmatpush1.bf16.msra.mxu0 %v3003_v39  ;;  %2248 = vmatpush1.bf16.msra.mxu1 %v3023_v49 }
 0x145   :  { %2250 = vmatprep.subr.bf16.mxu0 %v2745_v4  ;;  %2282 = vmatprep.subr.bf16.mxu1 %v2797_v22  ;;  %v2003_v4 = vld [vmem:[%s3751_s0 + $0x30] sm:$0xff] }
 0x1fa   :  { %v408_v14 = vpop.f32.mrb[2].mxu0  ;;  %v479_v17 = vpop.f32.mrb[2].mxu1 }
 0x1fb   :  { %v484_v26 = vadd.f32 %v2001_v8, %v408_v14  ;;  %v410_v30 = vpop.f32.mrb[3].mxu0  ;;  %v481_v42 = vpop.f32.mrb[3].mxu1  ;;  %v486_v22 = vadd.f32 %v2003_v4, %v479_v17  ;;  %v817_v8 = vld [vmem:[%s3749_s1 + $0x188] sm:$0xff]  ;;  %v816_v17 = vld [vmem:[%s3749_s1 + $0x180] sm:$0xff] }
 0x1fc   :  { %v485_v46 = vadd.f32 %v2002_v9, %v410_v30  ;;  %v487_v10 = vadd.f32 %v2004_v7, %v481_v42  ;;  %v821_v9 = vld [vmem:[%s3749_s1 + $0x1a8] sm:$0xff]  ;;  %v828_v4 = vld [vmem:[%s3749_s1 + $0x1e0] sm:$0xff] }
 0x1fd   :  { %v2005_v55 = vmul.f32 -1.442695, %v484_v26  ;;  %v2007_v24 = vmul.f32 -1.442695, %v486_v22  ;;  %v3259_v14 = vpack.c.bf16 %v821_v9, %v817_v8  ;;  %v820_v26 = vld [vmem:[%s3749_s1 + $0x1a0] sm:$0xff]  ;;  %v825_v42 = vld [vmem:[%s3749_s1 + $0x1c8] sm:$0xff] }
 0x1fe   :  { %v2006_v58 = vmul.f32 -1.442695, %v485_v46  ;;  %v3267_v30 = vpack.c.bf16 %v820_v26, %v816_v17  ;;  %v829_v46 = vld [vmem:[%s3749_s1 + $0x1e8] sm:$0xff]  ;;  %v2009_v7 = vld [vmem:[%s3751_s0 + $0x40] sm:$0xff]  ;;  %v1028_v8 = vld [vmem:[%s3749_s1 + $0x78] sm:$0xff] }
 0x1ff   :  { %2586 = vpow2.f32 %v2005_v55  ;;  %v3277_v55 = vpack.c.bf16 %v829_v46, %v825_v42  ;;  %v3345_v9 = vpack.c.bf16 %v1028_v8, %v1024_v44  ;;  %v1023_v17 = vld [vmem:[%s3749_s1 + $0x50] sm:$0xff]  ;;  %v1032_v46 = vld [vmem:[%s3749_s1 + $0x98] sm:$0xff] }
 0x200   :  { %2588 = vpow2.f32 %v2006_v58  ;;  %v824_v58 = vld [vmem:[%s3749_s1 + $0x1c0] sm:$0xff]  ;;  %v1027_v26 = vld [vmem:[%s3749_s1 + $0x70] sm:$0xff] }
 0x201   :  { %2590 = vtanh.f32 %v487_v10  ;;  %v3285_v22 = vpack.c.bf16 %v828_v4, %v824_v58  ;;  %v2010_v10 = vld [vmem:[%s3751_s0 + $0x48] sm:$0xff]  ;;  %v3353_v42 = vpack.c.bf16 %v1027_v26, %v1023_v17  ;;  %v1036_v58 = vld [vmem:[%s3749_s1 + $0xb8] sm:$0xff] }
 0x202   :  { %2592 = vpow2.f32 %v2007_v24  ;;  %v3365_v4 = vpack.c.bf16 %v1036_v58, %v1032_v46 }
 0x209   :  { %v2587_v27 = vpop.eup %2586 }
 0x20a   :  { %v497_v39 = vadd.f32 1.0, %v2587_v27  ;;  %v2589_v50 = vpop.eup %2588 }
 0x20b   :  { %v498_v51 = vadd.f32 1.0, %v2589_v50  ;;  %v2591_v53 = vpop.eup %2590 }
 0x20c   :  { %2594 = vrcp.f32 %v497_v39  ;;  %v2593_v54 = vpop.eup %2592 }
 0x20d   :  { %2596 = vrcp.f32 %v498_v51  ;;  %v499_v60 = vadd.f32 1.0, %v2593_v54 }
 0x20f   :  { %2598 = vrcp.f32 %v499_v60  ;;  %v2012_v60 = vld [vmem:[%s3751_s0 + $0x58] sm:$0xff] }
 0x216   :  { %v2595_v56 = vpop.eup %2594 }
 0x217   :  { %v508_v57 = vmul.f32 %v2595_v56, %v2591_v53  ;;  %v2597_v59 = vpop.eup %2596 }
 0x218   :  { %v507_v61 = vmul.f32 %v2597_v59, %v3078_v38  ;;  %v3241_v38 = vpack.c.bf16 %v813_v36, %v809_v35  ;;  %v1019_v35 = vld [vmem:[%s3749_s1 + $0x30] sm:$0xff]  ;;  %v3330_v36 = vpack.c.bf16 %v1020_v28, %v1016_v20 }
 0x219   :  { %v2599_v1 = vpop.eup %2598  ;;  %v3332_v43 = vpack.c.bf16 %v1019_v35, %v1015_v29  ;;  %v1075_v20 = vld [vmem:[%s3749_s1 + $0x1f0] sm:$0xff]  ;;  %v2017_v29 = vld [vmem:[%s3751_s0 + $0x60] sm:$0xff]  ;;  %v2018_v35 = vld [vmem:[%s3751_s0 + $0x68] sm:$0xff] }
 0x21a   :  { %v3131_v63 = vadd.f32 %v508_v57, %v507_v61  ;;  %v2011_v57 = vld [vmem:[%s3751_s0 + $0x50] sm:$0xff] }
 0x21c   :  { %2600 = vtanh.f32 %v3131_v63 }
 0x226   :  { %v2601_v2 = vpop.eup %2600 }
 0x227   :  { %v511_v5 = vmul.f32 %v2601_v2, %v2599_v1 }
 0x229   :  { %2008 = vst [vmem:[%s3753_s4 + $0x8] sm:$0xff] %v511_v5  ;;  %652 = vmatmul.mubr.f32.vlgmr.msra.gmra.mrb[4].mxu0 %v511_v5  ;;  %723 = vmatmul.mubr.f32.vlgmr.msra.gmra.mrb[4].mxu1 %v511_v5 }
 0x22a   :  { %2284 = vmatpush1.bf16.msra.mxu1 %v2805_v25  ;;  %896 = vmatprep.mubr.f32.mxu0 %v2698_v3  ;;  %v768_v25 = vld [vmem:[%s3749_s1] sm:$0xff] }
 0x22b   :  { %2286 = vmatprep.subr.bf16.mxu1 %v2830_v33  ;;  %967 = vmatprep.mubr.f32.mxu1 %v2698_v3  ;;  %v772_v33 = vld [vmem:[%s3749_s1 + $0x20] sm:$0xff] }
 0x22e   :  { %2288 = vmatpush1.bf16.msra.mxu1 %v2841_v37  ;;  %v3160_v37 = vpack.c.bf16 %v772_v33, %v768_v25 }
 0x22f   :  { %2290 = vmatprep.subr.bf16.mxu1 %v2865_v45  ;;  %v777_v45 = vld [vmem:[%s3749_s1 + $0x48] sm:$0xff] }
 0x230   :  { %2252 = vmatpush1.bf16.msra.mxu0 %v3160_v37 }
 0x232   :  { %2292 = vmatpush1.bf16.msra.mxu1 %v2874_v48  ;;  %v781_v48 = vld [vmem:[%s3749_s1 + $0x68] sm:$0xff] }
 0x233   :  { %2294 = vmatprep.subr.bf16.mxu1 %v2886_v52  ;;  %v3169_v52 = vpack.c.bf16 %v781_v48, %v777_v45 }
 0x235   :  { %2254 = vmatprep.subr.bf16.mxu0 %v3169_v52 }
 0x236   :  { %2296 = vmatpush1.bf16.msra.mxu1 %v2916_v62  ;;  %v776_v62 = vld [vmem:[%s3749_s1 + $0x40] sm:$0xff] }
 0x237   :  { %2298 = vmatprep.subr.bf16.mxu1 %v2922_v0  ;;  %v780_v0 = vld [vmem:[%s3749_s1 + $0x60] sm:$0xff] }
 0x23a   :  { %2300 = vmatpush1.bf16.msra.mxu1 %v2952_v15  ;;  %v3177_v15 = vpack.c.bf16 %v780_v0, %v776_v62 }
 0x23b   :  { %2302 = vmatprep.subr.bf16.mxu1 %v2958_v18  ;;  %v785_v18 = vld [vmem:[%s3749_s1 + $0x88] sm:$0xff] }
 0x23c   :  { %2256 = vmatpush1.bf16.msra.mxu0 %v3177_v15 }
 0x23e   :  { %2304 = vmatpush1.bf16.msra.mxu1 %v2985_v31  ;;  %v789_v31 = vld [vmem:[%s3749_s1 + $0xa8] sm:$0xff] }
 0x23f   :  { %2306 = vmatprep.subr.bf16.mxu1 %v2988_v32  ;;  %v3187_v32 = vpack.c.bf16 %v789_v31, %v785_v18 }
 0x241   :  { %2258 = vmatprep.subr.bf16.mxu0 %v3187_v32 }
 0x242   :  { %2308 = vmatpush1.bf16.msra.mxu1 %v3007_v40  ;;  %v784_v40 = vld [vmem:[%s3749_s1 + $0x80] sm:$0xff] }
 0x243   :  { %2310 = vmatprep.subr.bf16.mxu1 %v3010_v41  ;;  %v788_v41 = vld [vmem:[%s3749_s1 + $0xa0] sm:$0xff] }
 0x246   :  { %2312 = vmatpush1.bf16.msra.mxu1 %v3023_v49  ;;  %v3195_v49 = vpack.c.bf16 %v788_v41, %v784_v40 }
 0x247   :  { %2346 = vmatprep.subr.bf16.mxu1 %v3330_v36 }
 0x248   :  { %2260 = vmatpush1.bf16.msra.mxu0 %v3195_v49 }
 0x249   :  { %2262 = vmatprep.subr.bf16.mxu0 %v3205_v12 }
 0x24c   :  { %2264 = vmatpush1.bf16.msra.mxu0 %v3213_v19 }
 0x24d   :  { %2266 = vmatprep.subr.bf16.mxu0 %v3223_v23 }
 0x250   :  { %2268 = vmatpush1.bf16.msra.mxu0 %v3231_v34 }
 0x251   :  { %2270 = vmatprep.subr.bf16.mxu0 %v3241_v38 }
 0x254   :  { %2272 = vmatpush1.bf16.msra.mxu0 %v3249_v47 }
 0x255   :  { %2274 = vmatprep.subr.bf16.mxu0 %v3259_v14 }
 0x258   :  { %2276 = vmatpush1.bf16.msra.mxu0 %v3267_v30 }
 0x259   :  { %2278 = vmatprep.subr.bf16.mxu0 %v3277_v55 }
 0x25c   :  { %2280 = vmatpush1.bf16.msra.mxu0 %v3285_v22 }
 0x2fc   :  { %v653_v24 = vpop.f32.mrb[4].mxu0  ;;  %v724_v27 = vpop.f32.mrb[4].mxu1 }
 0x2fd   :  { %v729_v39 = vadd.f32 %v2009_v7, %v653_v24  ;;  %v655_v50 = vpop.f32.mrb[5].mxu0  ;;  %v726_v51 = vpop.f32.mrb[5].mxu1  ;;  %v731_v59 = vadd.f32 %v2011_v57, %v724_v27  ;;  %v1031_v7 = vld [vmem:[%s3749_s1 + $0x90] sm:$0xff]  ;;  %v1040_v27 = vld [vmem:[%s3749_s1 + $0xd8] sm:$0xff] }
 0x2fe   :  { %v730_v53 = vadd.f32 %v2010_v10, %v655_v50  ;;  %v732_v61 = vadd.f32 %v2012_v60, %v726_v51  ;;  %v1035_v10 = vld [vmem:[%s3749_s1 + $0xb0] sm:$0xff]  ;;  %v1052_v57 = vld [vmem:[%s3749_s1 + $0x138] sm:$0xff] }
 0x2ff   :  { %v2013_v54 = vmul.f32 -1.442695, %v729_v39  ;;  %v2015_v1 = vmul.f32 -1.442695, %v731_v59  ;;  %v3373_v24 = vpack.c.bf16 %v1035_v10, %v1031_v7  ;;  %v1044_v39 = vld [vmem:[%s3749_s1 + $0xf8] sm:$0xff]  ;;  %v1039_v51 = vld [vmem:[%s3749_s1 + $0xd0] sm:$0xff] }
 0x300   :  { %v2014_v56 = vmul.f32 -1.442695, %v730_v53  ;;  %v3385_v50 = vpack.c.bf16 %v1044_v39, %v1040_v27  ;;  %v1043_v53 = vld [vmem:[%s3749_s1 + $0xf0] sm:$0xff] }
 0x301   :  { %2602 = vpow2.f32 %v2013_v54  ;;  %v3393_v54 = vpack.c.bf16 %v1043_v53, %v1039_v51  ;;  %v1047_v60 = vld [vmem:[%s3749_s1 + $0x110] sm:$0xff]  ;;  %v2020_v51 = vld [vmem:[%s3751_s0 + $0x78] sm:$0xff] }
 0x302   :  { %2604 = vpow2.f32 %v2014_v56  ;;  %v1048_v56 = vld [vmem:[%s3749_s1 + $0x118] sm:$0xff]  ;;  %v2019_v27 = vld [vmem:[%s3751_s0 + $0x70] sm:$0xff] }
 0x303   :  { %2606 = vtanh.f32 %v732_v61  ;;  %v3405_v59 = vpack.c.bf16 %v1052_v57, %v1048_v56  ;;  %v1051_v61 = vld [vmem:[%s3749_s1 + $0x130] sm:$0xff] }
 0x304   :  { %2608 = vpow2.f32 %v2015_v1  ;;  %v3413_v1 = vpack.c.bf16 %v1051_v61, %v1047_v60 }
 0x30b   :  { %v2603_v2 = vpop.eup %2602 }
 0x30c   :  { %v742_v5 = vadd.f32 1.0, %v2603_v2  ;;  %v2605_v25 = vpop.eup %2604  ;;  %v1056_v2 = vld [vmem:[%s3749_s1 + $0x158] sm:$0xff] }
 0x30d   :  { %v743_v33 = vadd.f32 1.0, %v2605_v25  ;;  %v2607_v45 = vpop.eup %2606 }
 0x30e   :  { %2610 = vrcp.f32 %v742_v5  ;;  %v2609_v48 = vpop.eup %2608  ;;  %v1060_v5 = vld [vmem:[%s3749_s1 + $0x178] sm:$0xff] }
 0x30f   :  { %2612 = vrcp.f32 %v743_v33  ;;  %v744_v31 = vadd.f32 1.0, %v2609_v48  ;;  %v3425_v25 = vpack.c.bf16 %v1060_v5, %v1056_v2  ;;  %v1055_v33 = vld [vmem:[%s3749_s1 + $0x150] sm:$0xff] }
 0x311   :  { %2614 = vrcp.f32 %v744_v31  ;;  %v1063_v31 = vld [vmem:[%s3749_s1 + $0x190] sm:$0xff] }
 0x318   :  { %v2611_v62 = vpop.eup %2610 }
 0x319   :  { %v753_v0 = vmul.f32 %v2611_v62, %v2607_v45  ;;  %v2613_v18 = vpop.eup %2612  ;;  %v1059_v45 = vld [vmem:[%s3749_s1 + $0x170] sm:$0xff]  ;;  %v1064_v62 = vld [vmem:[%s3749_s1 + $0x198] sm:$0xff] }
 0x31a   :  { %v752_v40 = vmul.f32 %v2613_v18, %v3131_v63  ;;  %v1014_v63 = vld [vmem:[%s3749_s1 + $0x8] sm:$0xff]  ;;  %v3433_v48 = vpack.c.bf16 %v1059_v45, %v1055_v33 }
 0x31b   :  { %v2615_v6 = vpop.eup %2614  ;;  %v3319_v21 = vpack.c.bf16 %v1018_v16, %v1014_v63  ;;  %v1071_v16 = vld [vmem:[%s3749_s1 + $0x1d0] sm:$0xff] }
 0x31c   :  { %v3302_v41 = vadd.f32 %v753_v0, %v752_v40  ;;  %v1068_v0 = vld [vmem:[%s3749_s1 + $0x1b8] sm:$0xff]  ;;  %v1067_v40 = vld [vmem:[%s3749_s1 + $0x1b0] sm:$0xff]  ;;  %v3473_v28 = vpack.c.bf16 %v1075_v20, %v1071_v16 }
 0x31d   :  { %2314 = vmatprep.subr.bf16.mxu0 %v3319_v21  ;;  %v3445_v18 = vpack.c.bf16 %v1068_v0, %v1064_v62 }
 0x31e   :  { %2616 = vtanh.f32 %v3302_v41 }
 0x328   :  { %v2617_v11 = vpop.eup %2616 }
 0x329   :  { %v756_v13 = vmul.f32 %v2617_v11, %v2615_v6  ;;  %v3453_v6 = vpack.c.bf16 %v1067_v40, %v1063_v31  ;;  %v1072_v11 = vld [vmem:[%s3749_s1 + $0x1d8] sm:$0xff] }
 0x32b   :  { %2016 = vst [vmem:[%s3753_s4 + $0x10] sm:$0xff] %v756_v13  ;;  %897 = vmatmul.mubr.f32.vlgmr.msra.gmra.mrb[6].mxu0 %v756_v13  ;;  %968 = vmatmul.mubr.f32.vlgmr.msra.gmra.mrb[6].mxu1 %v756_v13  ;;  %v1076_v13 = vld [vmem:[%s3749_s1 + $0x1f8] sm:$0xff] }
 0x32c   :  { %1141 = vmatprep.mubr.f32.mxu0 %v2698_v3  ;;  %1212 = vmatprep.mubr.f32.mxu1 %v2698_v3  ;;  %v3465_v63 = vpack.c.bf16 %v1076_v13, %v1072_v11 }
 0x32d   :  { %2316 = vmatpush1.bf16.msra.mxu0 %v3160_v37  ;;  %2348 = vmatpush1.bf16.msra.mxu1 %v3332_v43 }
 0x32e   :  { %2318 = vmatprep.subr.bf16.mxu0 %v3169_v52  ;;  %2350 = vmatprep.subr.bf16.mxu1 %v3345_v9 }
 0x331   :  { %2320 = vmatpush1.bf16.msra.mxu0 %v3177_v15  ;;  %2352 = vmatpush1.bf16.msra.mxu1 %v3353_v42 }
 0x332   :  { %2322 = vmatprep.subr.bf16.mxu0 %v3187_v32  ;;  %2354 = vmatprep.subr.bf16.mxu1 %v3365_v4 }
 0x335   :  { %2324 = vmatpush1.bf16.msra.mxu0 %v3195_v49  ;;  %2356 = vmatpush1.bf16.msra.mxu1 %v3373_v24 }
 0x336   :  { %2326 = vmatprep.subr.bf16.mxu0 %v3205_v12  ;;  %2358 = vmatprep.subr.bf16.mxu1 %v3385_v50 }
 0x339   :  { %2328 = vmatpush1.bf16.msra.mxu0 %v3213_v19  ;;  %2360 = vmatpush1.bf16.msra.mxu1 %v3393_v54 }
 0x33a   :  { %2330 = vmatprep.subr.bf16.mxu0 %v3223_v23  ;;  %2362 = vmatprep.subr.bf16.mxu1 %v3405_v59 }
 0x33d   :  { %2332 = vmatpush1.bf16.msra.mxu0 %v3231_v34  ;;  %2364 = vmatpush1.bf16.msra.mxu1 %v3413_v1 }
 0x33e   :  { %2334 = vmatprep.subr.bf16.mxu0 %v3241_v38  ;;  %2366 = vmatprep.subr.bf16.mxu1 %v3425_v25 }
 0x341   :  { %2336 = vmatpush1.bf16.msra.mxu0 %v3249_v47  ;;  %2368 = vmatpush1.bf16.msra.mxu1 %v3433_v48 }
 0x342   :  { %2338 = vmatprep.subr.bf16.mxu0 %v3259_v14  ;;  %2370 = vmatprep.subr.bf16.mxu1 %v3445_v18 }
 0x345   :  { %2340 = vmatpush1.bf16.msra.mxu0 %v3267_v30  ;;  %2372 = vmatpush1.bf16.msra.mxu1 %v3453_v6 }
 0x346   :  { %2342 = vmatprep.subr.bf16.mxu0 %v3277_v55  ;;  %2374 = vmatprep.subr.bf16.mxu1 %v3465_v63 }
 0x349   :  { %2344 = vmatpush1.bf16.msra.mxu0 %v3285_v22  ;;  %2376 = vmatpush1.bf16.msra.mxu1 %v3473_v28 }
 0x34a   :  { %2378 = vmatprep.subr.bf16.mxu0 %v3319_v21  ;;  %2410 = vmatprep.subr.bf16.mxu1 %v3330_v36 }
 0x3fe   :  { %v898_v44 = vpop.f32.mrb[6].mxu0  ;;  %v969_v8 = vpop.f32.mrb[6].mxu1 }
 0x3ff   :  { %v974_v17 = vadd.f32 %v2017_v29, %v898_v44  ;;  %v900_v26 = vpop.f32.mrb[7].mxu0  ;;  %v971_v46 = vpop.f32.mrb[7].mxu1  ;;  %v976_v39 = vadd.f32 %v2019_v27, %v969_v8  ;;  %v2026_v29 = vld [vmem:[%s3751_s0 + $0x88] sm:$0xff] }
 0x400   :  { %v975_v58 = vadd.f32 %v2018_v35, %v900_v26  ;;  %v977_v53 = vadd.f32 %v2020_v51, %v971_v46 }
 0x401   :  { %v2021_v7 = vmul.f32 -1.442695, %v974_v17  ;;  %v2023_v56 = vmul.f32 -1.442695, %v976_v39  ;;  %v2028_v39 = vld [vmem:[%s3751_s0 + $0x98] sm:$0xff] }
 0x402   :  { %v2022_v10 = vmul.f32 -1.442695, %v975_v58 }
 0x403   :  { %2618 = vpow2.f32 %v2021_v7 }
 0x404   :  { %2620 = vpow2.f32 %v2022_v10  ;;  %v2027_v10 = vld [vmem:[%s3751_s0 + $0x90] sm:$0xff] }
 0x405   :  { %2622 = vtanh.f32 %v977_v53 }
 0x406   :  { %2624 = vpow2.f32 %v2023_v56 }
 0x40d   :  { %v2619_v57 = vpop.eup %2618 }
 0x40e   :  { %v987_v60 = vadd.f32 1.0, %v2619_v57  ;;  %v2621_v61 = vpop.eup %2620 }
 0x40f   :  { %v988_v2 = vadd.f32 1.0, %v2621_v61  ;;  %v2623_v5 = vpop.eup %2622 }
 0x410   :  { %2626 = vrcp.f32 %v987_v60  ;;  %v2625_v33 = vpop.eup %2624 }
 0x411   :  { %2628 = vrcp.f32 %v988_v2  ;;  %v989_v31 = vadd.f32 1.0, %v2625_v33 }
 0x413   :  { %2630 = vrcp.f32 %v989_v31 }
 0x41a   :  { %v2627_v45 = vpop.eup %2626 }
 0x41b   :  { %v998_v62 = vmul.f32 %v2627_v45, %v2623_v5  ;;  %v2629_v0 = vpop.eup %2628 }
 0x41c   :  { %v997_v40 = vmul.f32 %v2629_v0, %v3302_v41  ;;  %v2025_v41 = vld [vmem:[%s3751_s0 + $0x80] sm:$0xff] }
 0x41d   :  { %v2631_v13 = vpop.eup %2630 }
 0x41e   :  { %v3493_v11 = vadd.f32 %v998_v62, %v997_v40 }
 0x420   :  { %2632 = vtanh.f32 %v3493_v11 }
 0x42a   :  { %v2633_v16 = vpop.eup %2632 }
 0x42b   :  { %v1001_v20 = vmul.f32 %v2633_v16, %v2631_v13 }
 0x42d   :  { %2024 = vst [vmem:[%s3753_s4 + $0x18] sm:$0xff] %v1001_v20  ;;  %1142 = vmatmul.mubr.f32.vlgmr.msra.gmra.mrb[8].mxu0 %v1001_v20  ;;  %1213 = vmatmul.mubr.f32.vlgmr.msra.gmra.mrb[8].mxu1 %v1001_v20 }
 0x42e   :  { %2380 = vmatpush1.bf16.msra.mxu0 %v3160_v37  ;;  %2412 = vmatpush1.bf16.msra.mxu1 %v3332_v43 }
 0x42f   :  { %2382 = vmatprep.subr.bf16.mxu0 %v3169_v52  ;;  %2414 = vmatprep.subr.bf16.mxu1 %v3345_v9 }
 0x430   :  { %1386 = vmatprep.mubr.f32.mxu0 %v2698_v3  ;;  %1457 = vmatprep.mubr.f32.mxu1 %v2698_v3 }
 0x432   :  { %2384 = vmatpush1.bf16.msra.mxu0 %v3177_v15  ;;  %2416 = vmatpush1.bf16.msra.mxu1 %v3353_v42 }
 0x433   :  { %2386 = vmatprep.subr.bf16.mxu0 %v3187_v32  ;;  %2418 = vmatprep.subr.bf16.mxu1 %v3365_v4 }
 0x436   :  { %2388 = vmatpush1.bf16.msra.mxu0 %v3195_v49  ;;  %2420 = vmatpush1.bf16.msra.mxu1 %v3373_v24 }
 0x437   :  { %2390 = vmatprep.subr.bf16.mxu0 %v3205_v12  ;;  %2422 = vmatprep.subr.bf16.mxu1 %v3385_v50 }
 0x43a   :  { %2392 = vmatpush1.bf16.msra.mxu0 %v3213_v19  ;;  %2424 = vmatpush1.bf16.msra.mxu1 %v3393_v54 }
 0x43b   :  { %2394 = vmatprep.subr.bf16.mxu0 %v3223_v23  ;;  %2426 = vmatprep.subr.bf16.mxu1 %v3405_v59 }
 0x43e   :  { %2396 = vmatpush1.bf16.msra.mxu0 %v3231_v34  ;;  %2428 = vmatpush1.bf16.msra.mxu1 %v3413_v1 }
 0x43f   :  { %2398 = vmatprep.subr.bf16.mxu0 %v3241_v38  ;;  %2430 = vmatprep.subr.bf16.mxu1 %v3425_v25 }
 0x442   :  { %2400 = vmatpush1.bf16.msra.mxu0 %v3249_v47  ;;  %2432 = vmatpush1.bf16.msra.mxu1 %v3433_v48 }
 0x443   :  { %2402 = vmatprep.subr.bf16.mxu0 %v3259_v14  ;;  %2434 = vmatprep.subr.bf16.mxu1 %v3445_v18 }
 0x446   :  { %2404 = vmatpush1.bf16.msra.mxu0 %v3267_v30  ;;  %2436 = vmatpush1.bf16.msra.mxu1 %v3453_v6 }
 0x447   :  { %2406 = vmatprep.subr.bf16.mxu0 %v3277_v55  ;;  %2438 = vmatprep.subr.bf16.mxu1 %v3465_v63 }
 0x44a   :  { %2408 = vmatpush1.bf16.msra.mxu0 %v3285_v22  ;;  %2440 = vmatpush1.bf16.msra.mxu1 %v3473_v28 }
 0x44b   :  { %2442 = vmatprep.subr.bf16.mxu0 %v3319_v21  ;;  %2474 = vmatprep.subr.bf16.mxu1 %v3330_v36 }
 0x500   :  { %v1143_v35 = vpop.f32.mrb[8].mxu0  ;;  %v1214_v44 = vpop.f32.mrb[8].mxu1 }
 0x501   :  { %v1219_v8 = vadd.f32 %v2025_v41, %v1143_v35  ;;  %v1145_v17 = vpop.f32.mrb[9].mxu0  ;;  %v1216_v26 = vpop.f32.mrb[9].mxu1  ;;  %v1221_v27 = vadd.f32 %v2027_v10, %v1214_v44 }
 0x502   :  { %v1220_v46 = vadd.f32 %v2026_v29, %v1145_v17  ;;  %v1222_v51 = vadd.f32 %v2028_v39, %v1216_v26  ;;  %v1777_v39 = vld [vmem:[%s3749_s1 + $0xe8] sm:$0xff] }
 0x503   :  { %v2029_v58 = vmul.f32 -1.442695, %v1219_v8  ;;  %v2031_v53 = vmul.f32 -1.442695, %v1221_v27 }
 0x504   :  { %v2030_v7 = vmul.f32 -1.442695, %v1220_v46 }
 0x505   :  { %2634 = vpow2.f32 %v2029_v58 }
 0x506   :  { %2636 = vpow2.f32 %v2030_v7 }
 0x507   :  { %2638 = vtanh.f32 %v1222_v51 }
 0x508   :  { %2640 = vpow2.f32 %v2031_v53  ;;  %v1772_v53 = vld [vmem:[%s3749_s1 + $0xc0] sm:$0xff] }
 0x50f   :  { %v2635_v56 = vpop.eup %2634 }
 0x510   :  { %v1232_v57 = vadd.f32 1.0, %v2635_v56  ;;  %v2637_v60 = vpop.eup %2636  ;;  %v1776_v56 = vld [vmem:[%s3749_s1 + $0xe0] sm:$0xff] }
 0x511   :  { %v1233_v61 = vadd.f32 1.0, %v2637_v60  ;;  %v2639_v2 = vpop.eup %2638  ;;  %v1781_v60 = vld [vmem:[%s3749_s1 + $0x108] sm:$0xff] }
 0x512   :  { %2642 = vrcp.f32 %v1232_v57  ;;  %v2641_v5 = vpop.eup %2640  ;;  %v2519_v57 = vpack.c.bf16 %v1776_v56, %v1772_v53 }
 0x513   :  { %2644 = vrcp.f32 %v1233_v61  ;;  %v1234_v0 = vadd.f32 1.0, %v2641_v5  ;;  %v1785_v61 = vld [vmem:[%s3749_s1 + $0x128] sm:$0xff]  ;;  %v1780_v5 = vld [vmem:[%s3749_s1 + $0x100] sm:$0xff] }
 0x515   :  { %2646 = vrcp.f32 %v1234_v0  ;;  %v1793_v0 = vld [vmem:[%s3749_s1 + $0x168] sm:$0xff] }
 0x51c   :  { %v2643_v33 = vpop.eup %2642 }
 0x51d   :  { %v1243_v45 = vmul.f32 %v2643_v33, %v2639_v2  ;;  %v2645_v62 = vpop.eup %2644  ;;  %v2521_v2 = vpack.c.bf16 %v1785_v61, %v1781_v60  ;;  %v1784_v33 = vld [vmem:[%s3749_s1 + $0x120] sm:$0xff]  ;;  %v2051_v60 = vld [vmem:[%s3751_s0 + $0xf0] sm:$0xff] }
 0x51e   :  { %v1242_v31 = vmul.f32 %v2645_v62, %v3493_v11  ;;  %v1789_v62 = vld [vmem:[%s3749_s1 + $0x148] sm:$0xff] }
 0x51f   :  { %v2647_v13 = vpop.eup %2646 }
 0x520   :  { %v3546_v40 = vadd.f32 %v1243_v45, %v1242_v31  ;;  %v2523_v45 = vpack.c.bf16 %v1784_v33, %v1780_v5  ;;  %v2525_v31 = vpack.c.bf16 %v1793_v0, %v1789_v62 }
 0x522   :  { %2648 = vtanh.f32 %v3546_v40 }
 0x52c   :  { %v2649_v16 = vpop.eup %2648 }
 0x52d   :  { %v1246_v20 = vmul.f32 %v2649_v16, %v2647_v13  ;;  %v1792_v13 = vld [vmem:[%s3749_s1 + $0x160] sm:$0xff] }
 0x52f   :  { %2032 = vst [vmem:[%s3753_s4 + $0x20] sm:$0xff] %v1246_v20  ;;  %1387 = vmatmul.mubr.f32.vlgmr.msra.gmra.mrb[10].mxu0 %v1246_v20  ;;  %1458 = vmatmul.mubr.f32.vlgmr.msra.gmra.mrb[10].mxu1 %v1246_v20  ;;  %v1797_v20 = vld [vmem:[%s3749_s1 + $0x188] sm:$0xff] }
 0x530   :  { %2444 = vmatpush1.bf16.msra.mxu0 %v3160_v37  ;;  %2476 = vmatpush1.bf16.msra.mxu1 %v3332_v43  ;;  %v2033_v37 = vld [vmem:[%s3751_s0 + $0xa0] sm:$0xff] }
 0x531   :  { %2446 = vmatprep.subr.bf16.mxu0 %v3169_v52  ;;  %2478 = vmatprep.subr.bf16.mxu1 %v3345_v9  ;;  %v2034_v52 = vld [vmem:[%s3751_s0 + $0xa8] sm:$0xff] }
 0x532   :  { %1631 = vmatprep.mubr.f32.mxu0 %v2698_v3  ;;  %1702 = vmatprep.mubr.f32.mxu1 %v2698_v3 }
 0x534   :  { %2448 = vmatpush1.bf16.msra.mxu0 %v3177_v15  ;;  %2480 = vmatpush1.bf16.msra.mxu1 %v3353_v42 }
 0x535   :  { %2450 = vmatprep.subr.bf16.mxu0 %v3187_v32  ;;  %2482 = vmatprep.subr.bf16.mxu1 %v3365_v4 }
 0x538   :  { %2452 = vmatpush1.bf16.msra.mxu0 %v3195_v49  ;;  %2484 = vmatpush1.bf16.msra.mxu1 %v3373_v24 }
 0x539   :  { %2454 = vmatprep.subr.bf16.mxu0 %v3205_v12  ;;  %2486 = vmatprep.subr.bf16.mxu1 %v3385_v50 }
 0x53c   :  { %2456 = vmatpush1.bf16.msra.mxu0 %v3213_v19  ;;  %2488 = vmatpush1.bf16.msra.mxu1 %v3393_v54 }
 0x53d   :  { %2458 = vmatprep.subr.bf16.mxu0 %v3223_v23  ;;  %2490 = vmatprep.subr.bf16.mxu1 %v3405_v59 }
 0x540   :  { %2460 = vmatpush1.bf16.msra.mxu0 %v3231_v34  ;;  %2492 = vmatpush1.bf16.msra.mxu1 %v3413_v1 }
 0x541   :  { %2462 = vmatprep.subr.bf16.mxu0 %v3241_v38  ;;  %2494 = vmatprep.subr.bf16.mxu1 %v3425_v25 }
 0x544   :  { %2464 = vmatpush1.bf16.msra.mxu0 %v3249_v47  ;;  %2496 = vmatpush1.bf16.msra.mxu1 %v3433_v48  ;;  %v2035_v47 = vld [vmem:[%s3751_s0 + $0xb0] sm:$0xff] }
 0x545   :  { %2466 = vmatprep.subr.bf16.mxu0 %v3259_v14  ;;  %2498 = vmatprep.subr.bf16.mxu1 %v3445_v18 }
 0x548   :  { %2468 = vmatpush1.bf16.msra.mxu0 %v3267_v30  ;;  %2500 = vmatpush1.bf16.msra.mxu1 %v3453_v6  ;;  %v2036_v30 = vld [vmem:[%s3751_s0 + $0xb8] sm:$0xff] }
 0x549   :  { %2470 = vmatprep.subr.bf16.mxu0 %v3277_v55  ;;  %2502 = vmatprep.subr.bf16.mxu1 %v3465_v63 }
 0x54c   :  { %2472 = vmatpush1.bf16.msra.mxu0 %v3285_v22  ;;  %2504 = vmatpush1.bf16.msra.mxu1 %v3473_v28 }
 0x54d   :  { %2506 = vmatprep.subr.bf16.mxu0 %v3319_v21  ;;  %2538 = vmatprep.subr.bf16.mxu1 %v3330_v36 }
 0x602   :  { %v1388_v15 = vpop.f32.mrb[10].mxu0  ;;  %v1459_v32 = vpop.f32.mrb[10].mxu1 }
 0x603   :  { %v1464_v49 = vadd.f32 %v2033_v37, %v1388_v15  ;;  %v1390_v12 = vpop.f32.mrb[11].mxu0  ;;  %v1461_v19 = vpop.f32.mrb[11].mxu1  ;;  %v1466_v14 = vadd.f32 %v2035_v47, %v1459_v32  ;;  %v1801_v37 = vld [vmem:[%s3749_s1 + $0x1a8] sm:$0xff]  ;;  %v1796_v15 = vld [vmem:[%s3749_s1 + $0x180] sm:$0xff] }
 0x604   :  { %v1465_v23 = vadd.f32 %v2034_v52, %v1390_v12  ;;  %v1467_v55 = vadd.f32 %v2036_v30, %v1461_v19  ;;  %v2529_v52 = vpack.c.bf16 %v1801_v37, %v1797_v20  ;;  %v1800_v32 = vld [vmem:[%s3749_s1 + $0x1a0] sm:$0xff]  ;;  %v1805_v12 = vld [vmem:[%s3749_s1 + $0x1c8] sm:$0xff] }
 0x605   :  { %v2037_v34 = vmul.f32 -1.442695, %v1464_v49  ;;  %v2039_v22 = vmul.f32 -1.442695, %v1466_v14  ;;  %v2531_v49 = vpack.c.bf16 %v1800_v32, %v1796_v15  ;;  %v1809_v19 = vld [vmem:[%s3749_s1 + $0x1e8] sm:$0xff]  ;;  %v2041_v14 = vld [vmem:[%s3751_s0 + $0xc0] sm:$0xff] }
 0x606   :  { %v2038_v38 = vmul.f32 -1.442695, %v1465_v23  ;;  %v2533_v23 = vpack.c.bf16 %v1809_v19, %v1805_v12  ;;  %v2042_v30 = vld [vmem:[%s3751_s0 + $0xc8] sm:$0xff] }
 0x607   :  { %2650 = vpow2.f32 %v2037_v34  ;;  %v1804_v34 = vld [vmem:[%s3749_s1 + $0x1c0] sm:$0xff] }
 0x608   :  { %2652 = vpow2.f32 %v2038_v38  ;;  %v1808_v38 = vld [vmem:[%s3749_s1 + $0x1e0] sm:$0xff] }
 0x609   :  { %2654 = vtanh.f32 %v1467_v55  ;;  %v2535_v47 = vpack.c.bf16 %v1808_v38, %v1804_v34 }
 0x60a   :  { %2656 = vpow2.f32 %v2039_v22 }
 0x611   :  { %v2651_v21 = vpop.eup %2650 }
 0x612   :  { %v1477_v36 = vadd.f32 1.0, %v2651_v21  ;;  %v2653_v11 = vpop.eup %2652 }
 0x613   :  { %v1478_v41 = vadd.f32 1.0, %v2653_v11  ;;  %v2655_v29 = vpop.eup %2654 }
 0x614   :  { %2658 = vrcp.f32 %v1477_v36  ;;  %v2657_v35 = vpop.eup %2656 }
 0x615   :  { %2660 = vrcp.f32 %v1478_v41  ;;  %v1479_v26 = vadd.f32 1.0, %v2657_v35 }
 0x617   :  { %2662 = vrcp.f32 %v1479_v26 }
 0x61e   :  { %v2659_v44 = vpop.eup %2658 }
 0x61f   :  { %v1488_v8 = vmul.f32 %v2659_v44, %v2655_v29  ;;  %v2661_v17 = vpop.eup %2660  ;;  %v2043_v44 = vld [vmem:[%s3751_s0 + $0xd0] sm:$0xff] }
 0x620   :  { %v1487_v46 = vmul.f32 %v2661_v17, %v3546_v40  ;;  %v1788_v40 = vld [vmem:[%s3749_s1 + $0x140] sm:$0xff]  ;;  %v2044_v17 = vld [vmem:[%s3751_s0 + $0xd8] sm:$0xff] }
 0x621   :  { %v2663_v7 = vpop.eup %2662  ;;  %v2527_v16 = vpack.c.bf16 %v1792_v13, %v1788_v40 }
 0x622   :  { %v3599_v58 = vadd.f32 %v1488_v8, %v1487_v46 }
 0x624   :  { %2664 = vtanh.f32 %v3599_v58 }
 0x62e   :  { %v2665_v10 = vpop.eup %2664 }
 0x62f   :  { %v1491_v27 = vmul.f32 %v2665_v10, %v2663_v7 }
 0x631   :  { %2040 = vst [vmem:[%s3753_s4 + $0x28] sm:$0xff] %v1491_v27  ;;  %1632 = vmatmul.mubr.f32.vlgmr.msra.gmra.mrb[12].mxu0 %v1491_v27  ;;  %1703 = vmatmul.mubr.f32.vlgmr.msra.gmra.mrb[12].mxu1 %v1491_v27 }
 0x632   :  { %2540 = vmatpush1.bf16.msra.mxu1 %v3332_v43  ;;  %1876 = vmatprep.mubr.f32.mxu0 %v2698_v3  ;;  %v1752_v43 = vld [vmem:[%s3749_s1 + $0x20] sm:$0xff] }
 0x633   :  { %2542 = vmatprep.subr.bf16.mxu1 %v3345_v9  ;;  %1947 = vmatprep.mubr.f32.mxu1 %v2698_v3  ;;  %v1748_v3 = vld [vmem:[%s3749_s1] sm:$0xff] }
 0x634   :  { %v2507_v9 = vpack.c.bf16 %v1752_v43, %v1748_v3 }
 0x636   :  { %2544 = vmatpush1.bf16.msra.mxu1 %v3353_v42  ;;  %2508 = vmatpush1.bf16.msra.mxu0 %v2507_v9  ;;  %v1757_v42 = vld [vmem:[%s3749_s1 + $0x48] sm:$0xff] }
 0x637   :  { %2546 = vmatprep.subr.bf16.mxu1 %v3365_v4  ;;  %v1761_v4 = vld [vmem:[%s3749_s1 + $0x68] sm:$0xff] }
 0x63a   :  { %2548 = vmatpush1.bf16.msra.mxu1 %v3373_v24  ;;  %v2509_v24 = vpack.c.bf16 %v1761_v4, %v1757_v42 }
 0x63b   :  { %2550 = vmatprep.subr.bf16.mxu1 %v3385_v50  ;;  %v1756_v50 = vld [vmem:[%s3749_s1 + $0x40] sm:$0xff] }
 0x63c   :  { %2510 = vmatprep.subr.bf16.mxu0 %v2509_v24 }
 0x63e   :  { %2552 = vmatpush1.bf16.msra.mxu1 %v3393_v54  ;;  %v1760_v54 = vld [vmem:[%s3749_s1 + $0x60] sm:$0xff] }
 0x63f   :  { %2554 = vmatprep.subr.bf16.mxu1 %v3405_v59  ;;  %v2511_v59 = vpack.c.bf16 %v1760_v54, %v1756_v50 }
 0x641   :  { %2512 = vmatpush1.bf16.msra.mxu0 %v2511_v59 }
 0x642   :  { %2556 = vmatpush1.bf16.msra.mxu1 %v3413_v1  ;;  %v1765_v1 = vld [vmem:[%s3749_s1 + $0x88] sm:$0xff] }
 0x643   :  { %2558 = vmatprep.subr.bf16.mxu1 %v3425_v25  ;;  %v1769_v25 = vld [vmem:[%s3749_s1 + $0xa8] sm:$0xff] }
 0x646   :  { %2560 = vmatpush1.bf16.msra.mxu1 %v3433_v48  ;;  %v2513_v48 = vpack.c.bf16 %v1769_v25, %v1765_v1 }
 0x647   :  { %2562 = vmatprep.subr.bf16.mxu1 %v3445_v18  ;;  %v1764_v18 = vld [vmem:[%s3749_s1 + $0x80] sm:$0xff] }
 0x648   :  { %2514 = vmatprep.subr.bf16.mxu0 %v2513_v48 }
 0x64a   :  { %2564 = vmatpush1.bf16.msra.mxu1 %v3453_v6  ;;  %v1768_v6 = vld [vmem:[%s3749_s1 + $0xa0] sm:$0xff] }
 0x64b   :  { %2566 = vmatprep.subr.bf16.mxu1 %v3465_v63  ;;  %v2515_v63 = vpack.c.bf16 %v1768_v6, %v1764_v18  ;;  %v2049_v18 = vld [vmem:[%s3751_s0 + $0xe0] sm:$0xff] }
 0x64d   :  { %2516 = vmatpush1.bf16.msra.mxu0 %v2515_v63 }
 0x64e   :  { %2568 = vmatpush1.bf16.msra.mxu1 %v3473_v28  ;;  %v1773_v28 = vld [vmem:[%s3749_s1 + $0xc8] sm:$0xff] }
 0x64f   :  { %v2517_v51 = vpack.c.bf16 %v1777_v39, %v1773_v28 }
 0x651   :  { %2518 = vmatprep.subr.bf16.mxu0 %v2517_v51 }
 0x652   :  { %2520 = vmatpush1.bf16.msra.mxu0 %v2519_v57 }
 0x653   :  { %2522 = vmatprep.subr.bf16.mxu0 %v2521_v2  ;;  %v2052_v2 = vld [vmem:[%s3751_s0 + $0xf8] sm:$0xff] }
 0x656   :  { %2524 = vmatpush1.bf16.msra.mxu0 %v2523_v45 }
 0x657   :  { %2526 = vmatprep.subr.bf16.mxu0 %v2525_v31 }
 0x65a   :  { %2528 = vmatpush1.bf16.msra.mxu0 %v2527_v16 }
 0x65b   :  { %2530 = vmatprep.subr.bf16.mxu0 %v2529_v52 }
 0x65e   :  { %2532 = vmatpush1.bf16.msra.mxu0 %v2531_v49 }
 0x65f   :  { %2534 = vmatprep.subr.bf16.mxu0 %v2533_v23 }
 0x662   :  { %2536 = vmatpush1.bf16.msra.mxu0 %v2535_v47 }
 0x704   :  { %v1633_v55 = vpop.f32.mrb[12].mxu0  ;;  %v1704_v22 = vpop.f32.mrb[12].mxu1 }
 0x705   :  { %v1709_v21 = vadd.f32 %v2041_v14, %v1633_v55  ;;  %v1635_v36 = vpop.f32.mrb[13].mxu0  ;;  %v1706_v11 = vpop.f32.mrb[13].mxu1  ;;  %v1711_v8 = vadd.f32 %v2043_v44, %v1704_v22 }
 0x706   :  { %v1710_v41 = vadd.f32 %v2042_v30, %v1635_v36  ;;  %v1712_v26 = vadd.f32 %v2044_v17, %v1706_v11 }
 0x707   :  { %v2045_v29 = vmul.f32 -1.442695, %v1709_v21  ;;  %v2047_v46 = vmul.f32 -1.442695, %v1711_v8 }
 0x708   :  { %v2046_v35 = vmul.f32 -1.442695, %v1710_v41 }
 0x709   :  { %2666 = vpow2.f32 %v2045_v29 }
 0x70a   :  { %2668 = vpow2.f32 %v2046_v35 }
 0x70b   :  { %2670 = vtanh.f32 %v1712_v26 }
 0x70c   :  { %2672 = vpow2.f32 %v2047_v46 }
 0x713   :  { %v2667_v7 = vpop.eup %2666 }
 0x714   :  { %v1722_v10 = vadd.f32 1.0, %v2667_v7  ;;  %v2669_v27 = vpop.eup %2668 }
 0x715   :  { %v1723_v3 = vadd.f32 1.0, %v2669_v27  ;;  %v2671_v43 = vpop.eup %2670 }
 0x716   :  { %2674 = vrcp.f32 %v1722_v10  ;;  %v2673_v9 = vpop.eup %2672 }
 0x717   :  { %2676 = vrcp.f32 %v1723_v3  ;;  %v1724_v50 = vadd.f32 1.0, %v2673_v9 }
 0x719   :  { %2678 = vrcp.f32 %v1724_v50 }
 0x720   :  { %v2675_v42 = vpop.eup %2674 }
 0x721   :  { %v1733_v4 = vmul.f32 %v2675_v42, %v2671_v43  ;;  %v2677_v24 = vpop.eup %2676 }
 0x722   :  { %v1732_v54 = vmul.f32 %v2677_v24, %v3599_v58  ;;  %v2050_v58 = vld [vmem:[%s3751_s0 + $0xe8] sm:$0xff] }
 0x723   :  { %v2679_v1 = vpop.eup %2678 }
 0x724   :  { %v1734_v59 = vadd.f32 %v1733_v4, %v1732_v54 }
 0x726   :  { %2680 = vtanh.f32 %v1734_v59 }
 0x730   :  { %v2681_v25 = vpop.eup %2680 }
 0x731   :  { %v1736_v48 = vmul.f32 %v2681_v25, %v2679_v1 }
 0x733   :  { %2048 = vst [vmem:[%s3753_s4 + $0x30] sm:$0xff] %v1736_v48  ;;  %1877 = vmatmul.mubr.f32.vlgmr.msra.gmra.mrb[14].mxu0 %v1736_v48  ;;  %1948 = vmatmul.mubr.f32.vlgmr.msra.gmra.mrb[14].mxu1 %v1736_v48 }
 0x806   :  { %v1878_v6 = vpop.f32.mrb[14].mxu0  ;;  %v1949_v63 = vpop.f32.mrb[14].mxu1 }
 0x807   :  { %v1954_v28 = vadd.f32 %v2049_v18, %v1878_v6  ;;  %v1880_v39 = vpop.f32.mrb[15].mxu0  ;;  %v1951_v51 = vpop.f32.mrb[15].mxu1  ;;  %v1956_v61 = vadd.f32 %v2051_v60, %v1949_v63 }
 0x808   :  { %v1955_v53 = vadd.f32 %v2050_v58, %v1880_v39  ;;  %v1957_v5 = vadd.f32 %v2052_v2, %v1951_v51 }
 0x809   :  { %v2053_v56 = vmul.f32 -1.442695, %v1954_v28  ;;  %v2055_v33 = vmul.f32 -1.442695, %v1956_v61 }
 0x80a   :  { %v2054_v57 = vmul.f32 -1.442695, %v1955_v53 }
 0x80b   :  { %2682 = vpow2.f32 %v2053_v56 }
 0x80c   :  { %2684 = vpow2.f32 %v2054_v57 }
 0x80d   :  { %2686 = vtanh.f32 %v1957_v5 }
 0x80e   :  { %2688 = vpow2.f32 %v2055_v33 }
 0x815   :  { %v2683_v45 = vpop.eup %2682 }
 0x816   :  { %v1967_v62 = vadd.f32 1.0, %v2683_v45  ;;  %v2685_v0 = vpop.eup %2684 }
 0x817   :  { %v1968_v31 = vadd.f32 1.0, %v2685_v0  ;;  %v2687_v40 = vpop.eup %2686 }
 0x818   :  { %2690 = vrcp.f32 %v1967_v62  ;;  %v2689_v13 = vpop.eup %2688 }
 0x819   :  { %2692 = vrcp.f32 %v1968_v31  ;;  %v1969_v52 = vadd.f32 1.0, %v2689_v13 }
 0x81b   :  { %2694 = vrcp.f32 %v1969_v52 }
 0x822   :  { %v2691_v16 = vpop.eup %2690 }
 0x823   :  { %v1978_v20 = vmul.f32 %v2691_v16, %v2687_v40  ;;  %v2693_v37 = vpop.eup %2692 }
 0x824   :  { %v1977_v15 = vmul.f32 %v2693_v37, %v1734_v59 }
 0x825   :  { %v2695_v49 = vpop.eup %2694 }
 0x826   :  { %v1979_v32 = vadd.f32 %v1978_v20, %v1977_v15 }
 0x828   :  { %2696 = vtanh.f32 %v1979_v32  ;;  %1985 = vst [vmem:[%s3754_s6] sm:$0xff] %v1979_v32 }
 0x832   :  { %v2697_v12 = vpop.eup %2696 }
 0x833   :  { %v1981_v19 = vmul.f32 %v2697_v12, %v2695_v49 }
 0x835   :  { %2056 = vst [vmem:[%s3753_s4 + $0x38] sm:$0xff] %v1981_v19  ;;  %1984 = vst [vmem:[%s3755_s5] sm:$0xff] %v1981_v19 }

// kernel: seq2seq_forward.7
= control target key start
LH: loop header
LB: loop body
LE: loop exit
PB: predicated region body
PF: predicated region fallthrough
CT: control target
= control target key end

     0   :  { %12 = vsyncpa [#allocation3], 0  ;;  %v2794_v7 = vmov 0.0   ;;  %s3845_s0 = inlined_call_operand.vmem [shape: f32[8,8,512], index: 0, kind: input, shape index: {}]   ;;  %s3846_s1 = inlined_call_operand.vmem [shape: f32[128,512], index: 1, kind: input, shape index: {}]   ;;  %s3847_s2 = inlined_call_operand.vmem [shape: f32[8,128], index: 2, kind: input, shape index: {}]   ;;  %s3848_s3 = inlined_call_operand.vmem [shape: f32[8,128], index: 3, kind: input, shape index: {}]   ;;  %s3849_s4 = inlined_call_operand.vmem [shape: f32[8,8,128], index: 4, kind: output, shape index: {0}]   ;;  %s3850_s5 = inlined_call_operand.hbm [shape: f32[8,128], index: 5, kind: output, shape index: {1}]   ;;  %s3851_s6 = inlined_call_operand.hbm [shape: f32[8,128], index: 6, kind: output, shape index: {2}]  }
   0x1   :  { %v37_v0 = vld [vmem:[%s3846_s1 + $0x8] sm:$0xff]  ;;  %v36_v2 = vld [vmem:[%s3846_s1] sm:$0xff]  ;;  %164 = vmatprep.mubr.f32.mxu0 %v2794_v7  ;;  %235 = vmatprep.mubr.f32.mxu1 %v2794_v7  ;;  %v39_v19 = vld [vmem:[%s3846_s1 + $0x18] sm:$0xff] }
   0x2   :  { %v41_v1 = vld [vmem:[%s3846_s1 + $0x28] sm:$0xff]  ;;  %v40_v4 = vld [vmem:[%s3846_s1 + $0x20] sm:$0xff]  ;;  %v43_v20 = vld [vmem:[%s3846_s1 + $0x38] sm:$0xff] }
   0x3   :  { %v2841_v3 = vpack.c.bf16 %v41_v1, %v37_v0  ;;  %v45_v5 = vld [vmem:[%s3846_s1 + $0x48] sm:$0xff]  ;;  %v2854_v8 = vpack.c.bf16 %v40_v4, %v36_v2  ;;  %v44_v10 = vld [vmem:[%s3846_s1 + $0x40] sm:$0xff]  ;;  %v2895_v22 = vpack.c.bf16 %v43_v20, %v39_v19  ;;  %v38_v23 = vld [vmem:[%s3846_s1 + $0x10] sm:$0xff] }
   0x4   :  { %v49_v6 = vld [vmem:[%s3846_s1 + $0x68] sm:$0xff]  ;;  %v48_v11 = vld [vmem:[%s3846_s1 + $0x60] sm:$0xff]  ;;  %v42_v24 = vld [vmem:[%s3846_s1 + $0x30] sm:$0xff] }
   0x5   :  { %v2856_v9 = vpack.c.bf16 %v49_v6, %v45_v5  ;;  %v53_v12 = vld [vmem:[%s3846_s1 + $0x88] sm:$0xff]  ;;  %2120 = vmatprep.subr.bf16.mxu0 %v2841_v3  ;;  %v2872_v14 = vpack.c.bf16 %v48_v11, %v44_v10  ;;  %v52_v15 = vld [vmem:[%s3846_s1 + $0x80] sm:$0xff]  ;;  %v2903_v25 = vpack.c.bf16 %v42_v24, %v38_v23  ;;  %2152 = vmatprep.subr.bf16.mxu1 %v2895_v22  ;;  %v47_v27 = vld [vmem:[%s3846_s1 + $0x58] sm:$0xff] }
   0x6   :  { %v57_v13 = vld [vmem:[%s3846_s1 + $0xa8] sm:$0xff]  ;;  %2122 = vmatpush1.bf16.msra.mxu0 %v2854_v8  ;;  %v56_v16 = vld [vmem:[%s3846_s1 + $0xa0] sm:$0xff]  ;;  %v51_v28 = vld [vmem:[%s3846_s1 + $0x78] sm:$0xff] }
   0x7   :  { %2124 = vmatprep.subr.bf16.mxu0 %v2856_v9  ;;  %v2881_v17 = vpack.c.bf16 %v57_v13, %v53_v12  ;;  %v61_v18 = vld [vmem:[%s3846_s1 + $0xc8] sm:$0xff]  ;;  %v2906_v26 = vpack.c.bf16 %v56_v16, %v52_v15  ;;  %v46_v29 = vld [vmem:[%s3846_s1 + $0x50] sm:$0xff]  ;;  %v60_v31 = vld [vmem:[%s3846_s1 + $0xc0] sm:$0xff]  ;;  %2154 = vmatpush1.bf16.msra.mxu1 %v2903_v25  ;;  %v2928_v33 = vpack.c.bf16 %v51_v28, %v47_v27 }
   0x8   :  { %v65_v21 = vld [vmem:[%s3846_s1 + $0xe8] sm:$0xff]  ;;  %v64_v32 = vld [vmem:[%s3846_s1 + $0xe0] sm:$0xff]  ;;  %v50_v34 = vld [vmem:[%s3846_s1 + $0x70] sm:$0xff] }
   0x9   :  { %v2919_v30 = vpack.c.bf16 %v65_v21, %v61_v18  ;;  %v69_v35 = vld [vmem:[%s3846_s1 + $0x108] sm:$0xff]  ;;  %v2939_v37 = vpack.c.bf16 %v50_v34, %v46_v29  ;;  %v55_v38 = vld [vmem:[%s3846_s1 + $0x98] sm:$0xff]  ;;  %2156 = vmatprep.subr.bf16.mxu1 %v2928_v33  ;;  %v54_v40 = vld [vmem:[%s3846_s1 + $0x90] sm:$0xff]  ;;  %v2955_v42 = vpack.c.bf16 %v64_v32, %v60_v31 }
   0xa   :  { %2126 = vmatpush1.bf16.msra.mxu0 %v2872_v14  ;;  %v73_v36 = vld [vmem:[%s3846_s1 + $0x128] sm:$0xff]  ;;  %v59_v39 = vld [vmem:[%s3846_s1 + $0xb8] sm:$0xff]  ;;  %v58_v41 = vld [vmem:[%s3846_s1 + $0xb0] sm:$0xff] }
   0xb   :  { %2128 = vmatprep.subr.bf16.mxu0 %v2881_v17  ;;  %v68_v43 = vld [vmem:[%s3846_s1 + $0x100] sm:$0xff]  ;;  %v2963_v45 = vpack.c.bf16 %v59_v39, %v55_v38  ;;  %v2966_v46 = vpack.c.bf16 %v73_v36, %v69_v35  ;;  %2158 = vmatpush1.bf16.msra.mxu1 %v2939_v37  ;;  %v77_v47 = vld [vmem:[%s3846_s1 + $0x148] sm:$0xff]  ;;  %v2972_v48 = vpack.c.bf16 %v58_v41, %v54_v40  ;;  %v63_v49 = vld [vmem:[%s3846_s1 + $0xd8] sm:$0xff] }
   0xc   :  { %v72_v44 = vld [vmem:[%s3846_s1 + $0x120] sm:$0xff]  ;;  %v67_v50 = vld [vmem:[%s3846_s1 + $0xf8] sm:$0xff]  ;;  %v81_v51 = vld [vmem:[%s3846_s1 + $0x168] sm:$0xff] }
   0xd   :  { %2160 = vmatprep.subr.bf16.mxu1 %v2963_v45  ;;  %v2984_v52 = vpack.c.bf16 %v67_v50, %v63_v49  ;;  %v62_v53 = vld [vmem:[%s3846_s1 + $0xd0] sm:$0xff]  ;;  %v2993_v55 = vpack.c.bf16 %v72_v44, %v68_v43  ;;  %v71_v56 = vld [vmem:[%s3846_s1 + $0x118] sm:$0xff]  ;;  %v3002_v58 = vpack.c.bf16 %v81_v51, %v77_v47  ;;  %v76_v59 = vld [vmem:[%s3846_s1 + $0x140] sm:$0xff] }
   0xe   :  { %2130 = vmatpush1.bf16.msra.mxu0 %v2906_v26  ;;  %v66_v54 = vld [vmem:[%s3846_s1 + $0xf0] sm:$0xff]  ;;  %v75_v57 = vld [vmem:[%s3846_s1 + $0x138] sm:$0xff]  ;;  %v80_v60 = vld [vmem:[%s3846_s1 + $0x160] sm:$0xff] }
   0xf   :  { %2132 = vmatprep.subr.bf16.mxu0 %v2919_v30  ;;  %2162 = vmatpush1.bf16.msra.mxu1 %v2972_v48  ;;  %v85_v61 = vld [vmem:[%s3846_s1 + $0x188] sm:$0xff]  ;;  %v3014_v62 = vpack.c.bf16 %v66_v54, %v62_v53  ;;  %v3020_v0 = vpack.c.bf16 %v75_v57, %v71_v56  ;;  %v70_v1 = vld [vmem:[%s3846_s1 + $0x110] sm:$0xff]  ;;  %v79_v4 = vld [vmem:[%s3846_s1 + $0x158] sm:$0xff]  ;;  %v3035_v6 = vpack.c.bf16 %v80_v60, %v76_v59 }
  0x10   :  { %v89_v63 = vld [vmem:[%s3846_s1 + $0x1a8] sm:$0xff]  ;;  %2164 = vmatprep.subr.bf16.mxu1 %v2984_v52  ;;  %v74_v2 = vld [vmem:[%s3846_s1 + $0x130] sm:$0xff]  ;;  %v83_v5 = vld [vmem:[%s3846_s1 + $0x178] sm:$0xff] }
  0x11   :  { %v84_v10 = vld [vmem:[%s3846_s1 + $0x180] sm:$0xff]  ;;  %v3041_v11 = vpack.c.bf16 %v89_v63, %v85_v61  ;;  %v93_v13 = vld [vmem:[%s3846_s1 + $0x1c8] sm:$0xff]  ;;  %v3053_v16 = vpack.c.bf16 %v74_v2, %v70_v1  ;;  %v3056_v18 = vpack.c.bf16 %v83_v5, %v79_v4  ;;  %v78_v19 = vld [vmem:[%s3846_s1 + $0x150] sm:$0xff] }
  0x12   :  { %2134 = vmatpush1.bf16.msra.mxu0 %v2955_v42  ;;  %v88_v12 = vld [vmem:[%s3846_s1 + $0x1a0] sm:$0xff]  ;;  %v97_v15 = vld [vmem:[%s3846_s1 + $0x1e8] sm:$0xff]  ;;  %v82_v20 = vld [vmem:[%s3846_s1 + $0x170] sm:$0xff] }
  0x13   :  { %2136 = vmatprep.subr.bf16.mxu0 %v2966_v46  ;;  %2166 = vmatpush1.bf16.msra.mxu1 %v3014_v62 }
  0x14   :  { %2168 = vmatprep.subr.bf16.mxu1 %v3020_v0 }
  0x16   :  { %2138 = vmatpush1.bf16.msra.mxu0 %v2993_v55 }
  0x17   :  { %2140 = vmatprep.subr.bf16.mxu0 %v3002_v58 }
  0x18   :  { %13 = vsyncpa [#allocation5], 0  ;;  %v87_v21 = vld [vmem:[%s3846_s1 + $0x198] sm:$0xff]  ;;  %v3071_v24 = vpack.c.bf16 %v88_v12, %v84_v10  ;;  %v3074_v27 = vpack.c.bf16 %v97_v15, %v93_v13  ;;  %v92_v28 = vld [vmem:[%s3846_s1 + $0x1c0] sm:$0xff]  ;;  %2170 = vmatpush1.bf16.msra.mxu1 %v3053_v16  ;;  %v3083_v31 = vpack.c.bf16 %v82_v20, %v78_v19  ;;  %s2795_s25 = smov [#allocation2]   ;;  %s2796_s27 = smov [#allocation4]  }
  0x19   :  { %v91_v23 = vld [vmem:[%s3846_s1 + $0x1b8] sm:$0xff]  ;;  %v96_v29 = vld [vmem:[%s3846_s1 + $0x1e0] sm:$0xff]  ;;  %2172 = vmatprep.subr.bf16.mxu1 %v3056_v18  ;;  %v86_v34 = vld [vmem:[%s3846_s1 + $0x190] sm:$0xff]  ;;  %s2036_s26 = sshll.u32 %s2795_s25, 4  ;;  %s2046_s28 = sshll.u32 %s2796_s27, 4  ;;  %s2037_s26 = int_to_ptr.vmem [resolvable:$true] %s2036_s26  ;;  %s2047_s28 = int_to_ptr.vmem [resolvable:$true] %s2046_s28 }
  0x1a   :  { %2142 = vmatpush1.bf16.msra.mxu0 %v3035_v6  ;;  %v3086_v32 = vpack.c.bf16 %v91_v23, %v87_v21  ;;  %v90_v35 = vld [vmem:[%s3846_s1 + $0x1b0] sm:$0xff]  ;;  %v95_v36 = vld [vmem:[%s3846_s1 + $0x1d8] sm:$0xff]  ;;  %v3101_v39 = vpack.c.bf16 %v96_v29, %v92_v28  ;;  %v26_v47 = vld [vmem:[%s3847_s2] sm:$0xff]  ;;  %s2746_s29 = scalar_lea.vmem %s2037_s26, 128  ;;  %p2751_p1 = scmp.lt.s32.totalorder %s2037_s26, %s2037_s26 }
  0x1b   :  { %2144 = vmatprep.subr.bf16.mxu0 %v3041_v11  ;;  %v99_v38 = vld [vmem:[%s3846_s1 + $0x1f8] sm:$0xff]  ;;  %v3105_v40 = vpack.c.bf16 %v90_v35, %v86_v34  ;;  %v94_v43 = vld [vmem:[%s3846_s1 + $0x1d0] sm:$0xff]  ;;  %v32_v50 = vld [vmem:[%s3845_s0] sm:$0xff]  ;;  %p2747_p0 = scmp.ne.s32.totalorder %s2037_s26, %s2746_s29  ;;  %p2752_p2 = scmp.lt.s32.totalorder %s2746_s29, %s2746_s29 }
  0x1c   :  { %2174 = vmatpush1.bf16.msra.mxu1 %v3083_v31  ;;  %v3108_v41 = vpack.c.bf16 %v99_v38, %v95_v36  ;;  %v98_v44 = vld [vmem:[%s3846_s1 + $0x1f0] sm:$0xff]  ;;  %v33_v51 = vld [vmem:[%s3845_s0 + $0x8] sm:$0xff]  ;;  %v35_v4 = vld [vmem:[%s3845_s0 + $0x18] sm:$0xff] }
  0x1d   :  { %2176 = vmatprep.subr.bf16.mxu1 %v3086_v32  ;;  %v3121_v49 = vpack.c.bf16 %v98_v44, %v94_v43  ;;  %v34_v61 = vld [vmem:[%s3845_s0 + $0x10] sm:$0xff]  ;;  %v28_v23 = vld [vmem:[%s3848_s3] sm:$0xff]  ;;  %p2753_p3 = por %p2752_p2, %p2751_p1 }
  0x1e   :  { %2146 = vmatpush1.bf16.msra.mxu0 %v3071_v24 }
  0x1f   :  { %2148 = vmatprep.subr.bf16.mxu0 %v3074_v27  ;;  %p2754_p4 = pnand %p2753_p3, %p2747_p0 }
  0x20   :  { %2178 = vmatpush1.bf16.msra.mxu1 %v3105_v40 }
  0x21   :  { %2180 = vmatprep.subr.bf16.mxu1 %v3108_v41 }
  0x22   :  { %2150 = vmatpush1.bf16.msra.mxu0 %v3101_v39 }
  0x23   :  { %2184 = vmatprep.subr.bf16.mxu0 %v2841_v3 }
  0x24   :  { %2182 = vmatpush1.bf16.msra.mxu1 %v3121_v49 }
  0x25   :  { %165 = vmatmul.mubr.f32.vlgmr.msra.gmra.mrb[0].mxu0 %v26_v47  ;;  %2216 = vmatprep.subr.bf16.mxu1 %v2895_v22 }
  0x26   :  { %2186 = vmatpush1.bf16.msra.mxu0 %v2854_v8  ;;  %413 = vmatprep.mubr.f32.mxu0 %v2794_v7 }
  0x27   :  { %2188 = vmatprep.subr.bf16.mxu0 %v2856_v9  ;;  %236 = vmatmul.mubr.f32.vlgmr.msra.gmra.mrb[0].mxu1 %v26_v47 }
  0x28   :  { %2218 = vmatpush1.bf16.msra.mxu1 %v2903_v25  ;;  %484 = vmatprep.mubr.f32.mxu1 %v2794_v7 }
  0x29   :  { %2220 = vmatprep.subr.bf16.mxu1 %v2928_v33 }
  0x2a   :  { %2190 = vmatpush1.bf16.msra.mxu0 %v2872_v14 }
  0x2b   :  { %2192 = vmatprep.subr.bf16.mxu0 %v2881_v17 }
  0x2c   :  { %2222 = vmatpush1.bf16.msra.mxu1 %v2939_v37 }
  0x2d   :  { %2224 = vmatprep.subr.bf16.mxu1 %v2963_v45 }
  0x2e   :  { %2194 = vmatpush1.bf16.msra.mxu0 %v2906_v26 }
  0x2f   :  { %2196 = vmatprep.subr.bf16.mxu0 %v2919_v30 }
  0x30   :  { %2226 = vmatpush1.bf16.msra.mxu1 %v2972_v48 }
  0x31   :  { %2228 = vmatprep.subr.bf16.mxu1 %v2984_v52 }
  0x32   :  { %2198 = vmatpush1.bf16.msra.mxu0 %v2955_v42 }
  0x33   :  { %2200 = vmatprep.subr.bf16.mxu0 %v2966_v46 }
  0x34   :  { %2230 = vmatpush1.bf16.msra.mxu1 %v3014_v62 }
  0x35   :  { %2232 = vmatprep.subr.bf16.mxu1 %v3020_v0 }
  0x36   :  { %2202 = vmatpush1.bf16.msra.mxu0 %v2993_v55 }
  0x37   :  { %2204 = vmatprep.subr.bf16.mxu0 %v3002_v58 }
  0x38   :  { %2234 = vmatpush1.bf16.msra.mxu1 %v3053_v16 }
  0x39   :  { %2236 = vmatprep.subr.bf16.mxu1 %v3056_v18 }
  0x3a   :  { %2206 = vmatpush1.bf16.msra.mxu0 %v3035_v6 }
  0x3b   :  { %2208 = vmatprep.subr.bf16.mxu0 %v3041_v11 }
  0x3c   :  { %2238 = vmatpush1.bf16.msra.mxu1 %v3083_v31 }
  0x3d   :  { %2240 = vmatprep.subr.bf16.mxu1 %v3086_v32 }
  0x3e   :  { %2210 = vmatpush1.bf16.msra.mxu0 %v3071_v24 }
  0x3f   :  { %2212 = vmatprep.subr.bf16.mxu0 %v3074_v27 }
  0x40   :  { %2242 = vmatpush1.bf16.msra.mxu1 %v3105_v40 }
  0x41   :  { %2244 = vmatprep.subr.bf16.mxu1 %v3108_v41 }
  0x42   :  { %2214 = vmatpush1.bf16.msra.mxu0 %v3101_v39 }
  0x43   :  { %2248 = vmatprep.subr.bf16.mxu0 %v2841_v3 }
  0x44   :  { %2246 = vmatpush1.bf16.msra.mxu1 %v3121_v49 }
  0x45   :  { %2280 = vmatprep.subr.bf16.mxu1 %v2895_v22 }
  0xf8   :  { %v166_v53 = vpop.f32.mrb[0].mxu0 }
  0xf9   :  { %v242_v54 = vadd.f32 %v166_v53, %v32_v50  ;;  %v168_v56 = vpop.f32.mrb[1].mxu0 }
  0xfa   :  { %v243_v57 = vadd.f32 %v168_v56, %v33_v51  ;;  %v237_v63 = vpop.f32.mrb[0].mxu1 }
  0xfb   :  { %v2060_v59 = vmul.f32 -1.442695, %v242_v54  ;;  %v239_v1 = vpop.f32.mrb[1].mxu1  ;;  %v244_v2 = vadd.f32 %v237_v63, %v34_v61 }
  0xfc   :  { %v2061_v60 = vmul.f32 -1.442695, %v243_v57  ;;  %v245_v10 = vadd.f32 %v239_v1, %v35_v4 }
  0xfd   :  { %2634 = vpow2.f32 %v2060_v59  ;;  %v2062_v5 = vmul.f32 -1.442695, %v244_v2 }
  0xfe   :  { %2636 = vpow2.f32 %v2061_v60 }
  0xff   :  { %2638 = vpow2.f32 %v2062_v5 }
 0x100   :  { %2640 = vtanh.f32 %v245_v10  ;;  %v813_v10 = vld [vmem:[%s3846_s1 + $0xe0] sm:$0xff] }
 0x107   :  { %v2635_v12 = vpop.eup %2634 }
 0x108   :  { %v2637_v13 = vpop.eup %2636  ;;  %v255_v15 = vadd.f32 1.0, %v2635_v12 }
 0x109   :  { %v256_v19 = vadd.f32 1.0, %v2637_v13  ;;  %v2639_v20 = vpop.eup %2638  ;;  %v818_v13 = vld [vmem:[%s3846_s1 + $0x108] sm:$0xff] }
 0x10a   :  { %2642 = vrcp.f32 %v255_v15  ;;  %v2641_v21 = vpop.eup %2640  ;;  %v257_v29 = vadd.f32 1.0, %v2639_v20  ;;  %v822_v15 = vld [vmem:[%s3846_s1 + $0x128] sm:$0xff]  ;;  %v817_v20 = vld [vmem:[%s3846_s1 + $0x100] sm:$0xff] }
 0x10b   :  { %2644 = vrcp.f32 %v256_v19  ;;  %v3313_v19 = vpack.c.bf16 %v822_v15, %v818_v13  ;;  %v1042_v15 = vld [vmem:[%s3846_s1 + $0x38] sm:$0xff] }
 0x10c   :  { %2646 = vrcp.f32 %v257_v29  ;;  %v830_v29 = vld [vmem:[%s3846_s1 + $0x168] sm:$0xff] }
 0x114   :  { %v2643_v28 = vpop.eup %2642 }
 0x115   :  { %v2645_v34 = vpop.eup %2644  ;;  %v266_v35 = vmul.f32 %v2643_v28, %v2641_v21  ;;  %v821_v21 = vld [vmem:[%s3846_s1 + $0x120] sm:$0xff]  ;;  %v826_v28 = vld [vmem:[%s3846_s1 + $0x148] sm:$0xff] }
 0x116   :  { %v265_v36 = vmul.f32 %v2645_v34, %v28_v23  ;;  %v2647_v43 = vpop.eup %2646  ;;  %v3321_v23 = vpack.c.bf16 %v821_v21, %v817_v20  ;;  %v3331_v34 = vpack.c.bf16 %v830_v29, %v826_v28  ;;  %v1035_v20 = vld [vmem:[%s3846_s1] sm:$0xff] }
 0x117   :  { %v1039_v21 = vld [vmem:[%s3846_s1 + $0x20] sm:$0xff] }
 0x118   :  { %v3176_v38 = vadd.f32 %v266_v35, %v265_v36  ;;  %v825_v35 = vld [vmem:[%s3846_s1 + $0x140] sm:$0xff]  ;;  %v3422_v29 = vpack.c.bf16 %v1039_v21, %v1035_v20  ;;  %v1097_v20 = vld [vmem:[%s3846_s1 + $0x1f0] sm:$0xff] }
 0x119   :  { %v829_v36 = vld [vmem:[%s3846_s1 + $0x160] sm:$0xff] }
 0x11a   :  { %2648 = vtanh.f32 %v3176_v38 }
 0x124   :  { %v2649_v44 = vpop.eup %2648 }
 0x125   :  { %v269_v47 = vmul.f32 %v2649_v44, %v2647_v43  ;;  %v834_v43 = vld [vmem:[%s3846_s1 + $0x188] sm:$0xff] }
 0x126   :  { %v838_v44 = vld [vmem:[%s3846_s1 + $0x1a8] sm:$0xff] }
 0x127   :  { %275 = vst [vmem:[%s3849_s4] sm:$0xff] %v269_v47  ;;  %414 = vmatmul.mubr.f32.vlgmr.msra.gmra.mrb[2].mxu0 %v269_v47  ;;  %485 = vmatmul.mubr.f32.vlgmr.msra.gmra.mrb[2].mxu1 %v269_v47  ;;  %v3349_v47 = vpack.c.bf16 %v838_v44, %v834_v43  ;;  %v1046_v44 = vld [vmem:[%s3846_s1 + $0x58] sm:$0xff] }
 0x128   :  { %2250 = vmatpush1.bf16.msra.mxu0 %v2854_v8  ;;  %2282 = vmatpush1.bf16.msra.mxu1 %v2903_v25 }
 0x129   :  { %2252 = vmatprep.subr.bf16.mxu0 %v2856_v9  ;;  %2284 = vmatprep.subr.bf16.mxu1 %v2928_v33  ;;  %v2063_v9 = vld [vmem:[%s3845_s0 + $0x20] sm:$0xff] }
 0x12a   :  { %663 = vmatprep.mubr.f32.mxu0 %v2794_v7  ;;  %734 = vmatprep.mubr.f32.mxu1 %v2794_v7 }
 0x12c   :  { %2254 = vmatpush1.bf16.msra.mxu0 %v2872_v14  ;;  %2286 = vmatpush1.bf16.msra.mxu1 %v2939_v37  ;;  %v2064_v14 = vld [vmem:[%s3845_s0 + $0x28] sm:$0xff] }
 0x12d   :  { %2256 = vmatprep.subr.bf16.mxu0 %v2881_v17  ;;  %2288 = vmatprep.subr.bf16.mxu1 %v2963_v45 }
 0x130   :  { %2258 = vmatpush1.bf16.msra.mxu0 %v2906_v26  ;;  %2290 = vmatpush1.bf16.msra.mxu1 %v2972_v48 }
 0x131   :  { %2260 = vmatprep.subr.bf16.mxu0 %v2919_v30  ;;  %2292 = vmatprep.subr.bf16.mxu1 %v2984_v52 }
 0x134   :  { %2262 = vmatpush1.bf16.msra.mxu0 %v2955_v42  ;;  %2294 = vmatpush1.bf16.msra.mxu1 %v3014_v62 }
 0x135   :  { %2264 = vmatprep.subr.bf16.mxu0 %v2966_v46  ;;  %2296 = vmatprep.subr.bf16.mxu1 %v3020_v0 }
 0x138   :  { %2266 = vmatpush1.bf16.msra.mxu0 %v2993_v55  ;;  %2298 = vmatpush1.bf16.msra.mxu1 %v3053_v16 }
 0x139   :  { %2268 = vmatprep.subr.bf16.mxu0 %v3002_v58  ;;  %2300 = vmatprep.subr.bf16.mxu1 %v3056_v18 }
 0x13c   :  { %2270 = vmatpush1.bf16.msra.mxu0 %v3035_v6  ;;  %2302 = vmatpush1.bf16.msra.mxu1 %v3083_v31 }
 0x13d   :  { %2272 = vmatprep.subr.bf16.mxu0 %v3041_v11  ;;  %2304 = vmatprep.subr.bf16.mxu1 %v3086_v32  ;;  %v2066_v11 = vld [vmem:[%s3845_s0 + $0x38] sm:$0xff] }
 0x140   :  { %2274 = vmatpush1.bf16.msra.mxu0 %v3071_v24  ;;  %2306 = vmatpush1.bf16.msra.mxu1 %v3105_v40 }
 0x141   :  { %2276 = vmatprep.subr.bf16.mxu0 %v3074_v27  ;;  %2308 = vmatprep.subr.bf16.mxu1 %v3108_v41 }
 0x144   :  { %2278 = vmatpush1.bf16.msra.mxu0 %v3101_v39  ;;  %2310 = vmatpush1.bf16.msra.mxu1 %v3121_v49 }
 0x145   :  { %2312 = vmatprep.subr.bf16.mxu0 %v2841_v3  ;;  %2344 = vmatprep.subr.bf16.mxu1 %v2895_v22  ;;  %v2065_v3 = vld [vmem:[%s3845_s0 + $0x30] sm:$0xff] }
 0x1fa   :  { %v415_v17 = vpop.f32.mrb[2].mxu0  ;;  %v486_v26 = vpop.f32.mrb[2].mxu1 }
 0x1fb   :  { %v491_v30 = vadd.f32 %v2063_v9, %v415_v17  ;;  %v417_v42 = vpop.f32.mrb[3].mxu0  ;;  %v488_v46 = vpop.f32.mrb[3].mxu1  ;;  %v493_v22 = vadd.f32 %v2065_v3, %v486_v26  ;;  %v833_v9 = vld [vmem:[%s3846_s1 + $0x180] sm:$0xff]  ;;  %v842_v26 = vld [vmem:[%s3846_s1 + $0x1c8] sm:$0xff] }
 0x1fc   :  { %v492_v55 = vadd.f32 %v2064_v14, %v417_v42  ;;  %v494_v24 = vadd.f32 %v2066_v11, %v488_v46  ;;  %v837_v14 = vld [vmem:[%s3846_s1 + $0x1a0] sm:$0xff]  ;;  %v2072_v3 = vld [vmem:[%s3845_s0 + $0x48] sm:$0xff] }
 0x1fd   :  { %v2067_v58 = vmul.f32 -1.442695, %v491_v30  ;;  %v2069_v27 = vmul.f32 -1.442695, %v493_v22  ;;  %v3357_v17 = vpack.c.bf16 %v837_v14, %v833_v9  ;;  %v846_v30 = vld [vmem:[%s3846_s1 + $0x1e8] sm:$0xff]  ;;  %v841_v46 = vld [vmem:[%s3846_s1 + $0x1c0] sm:$0xff] }
 0x1fe   :  { %v2068_v6 = vmul.f32 -1.442695, %v492_v55  ;;  %v3367_v42 = vpack.c.bf16 %v846_v30, %v842_v26  ;;  %v845_v55 = vld [vmem:[%s3846_s1 + $0x1e0] sm:$0xff]  ;;  %v1050_v9 = vld [vmem:[%s3846_s1 + $0x78] sm:$0xff]  ;;  %v1045_v26 = vld [vmem:[%s3846_s1 + $0x50] sm:$0xff] }
 0x1ff   :  { %2650 = vpow2.f32 %v2067_v58  ;;  %v3375_v58 = vpack.c.bf16 %v845_v55, %v841_v46  ;;  %v3443_v14 = vpack.c.bf16 %v1050_v9, %v1046_v44  ;;  %v1049_v30 = vld [vmem:[%s3846_s1 + $0x70] sm:$0xff]  ;;  %v1054_v55 = vld [vmem:[%s3846_s1 + $0x98] sm:$0xff] }
 0x200   :  { %2652 = vpow2.f32 %v2068_v6  ;;  %v2071_v6 = vld [vmem:[%s3845_s0 + $0x40] sm:$0xff]  ;;  %v3451_v46 = vpack.c.bf16 %v1049_v30, %v1045_v26 }
 0x201   :  { %2654 = vtanh.f32 %v494_v24 }
 0x202   :  { %2656 = vpow2.f32 %v2069_v27 }
 0x209   :  { %v2651_v39 = vpop.eup %2650 }
 0x20a   :  { %v504_v50 = vadd.f32 1.0, %v2651_v39  ;;  %v2653_v51 = vpop.eup %2652 }
 0x20b   :  { %v505_v53 = vadd.f32 1.0, %v2653_v51  ;;  %v2655_v54 = vpop.eup %2654 }
 0x20c   :  { %2658 = vrcp.f32 %v504_v50  ;;  %v2657_v56 = vpop.eup %2656 }
 0x20d   :  { %2660 = vrcp.f32 %v505_v53  ;;  %v506_v61 = vadd.f32 1.0, %v2657_v56 }
 0x20f   :  { %2662 = vrcp.f32 %v506_v61 }
 0x216   :  { %v2659_v57 = vpop.eup %2658 }
 0x217   :  { %v515_v59 = vmul.f32 %v2659_v57, %v2655_v54  ;;  %v2661_v60 = vpop.eup %2660  ;;  %v2073_v54 = vld [vmem:[%s3845_s0 + $0x50] sm:$0xff]  ;;  %v2074_v57 = vld [vmem:[%s3845_s0 + $0x58] sm:$0xff] }
 0x218   :  { %v514_v63 = vmul.f32 %v2661_v60, %v3176_v38  ;;  %v3339_v38 = vpack.c.bf16 %v829_v36, %v825_v35  ;;  %v1037_v35 = vld [vmem:[%s3846_s1 + $0x10] sm:$0xff] }
 0x219   :  { %v2663_v2 = vpop.eup %2662  ;;  %v1041_v36 = vld [vmem:[%s3846_s1 + $0x30] sm:$0xff] }
 0x21a   :  { %v3229_v1 = vadd.f32 %v515_v59, %v514_v63  ;;  %v3431_v43 = vpack.c.bf16 %v1041_v36, %v1037_v35  ;;  %v2079_v35 = vld [vmem:[%s3845_s0 + $0x60] sm:$0xff]  ;;  %v2080_v36 = vld [vmem:[%s3845_s0 + $0x68] sm:$0xff] }
 0x21c   :  { %2664 = vtanh.f32 %v3229_v1 }
 0x226   :  { %v2665_v4 = vpop.eup %2664 }
 0x227   :  { %v518_v5 = vmul.f32 %v2665_v4, %v2663_v2 }
 0x229   :  { %2070 = vst [vmem:[%s3849_s4 + $0x8] sm:$0xff] %v518_v5  ;;  %664 = vmatmul.mubr.f32.vlgmr.msra.gmra.mrb[4].mxu0 %v518_v5  ;;  %735 = vmatmul.mubr.f32.vlgmr.msra.gmra.mrb[4].mxu1 %v518_v5 }
 0x22a   :  { %2314 = vmatpush1.bf16.msra.mxu0 %v2854_v8  ;;  %2346 = vmatpush1.bf16.msra.mxu1 %v2903_v25  ;;  %v794_v8 = vld [vmem:[%s3846_s1 + $0x48] sm:$0xff] }
 0x22b   :  { %2348 = vmatprep.subr.bf16.mxu1 %v2928_v33  ;;  %913 = vmatprep.mubr.f32.mxu0 %v2794_v7  ;;  %v798_v25 = vld [vmem:[%s3846_s1 + $0x68] sm:$0xff] }
 0x22c   :  { %984 = vmatprep.mubr.f32.mxu1 %v2794_v7  ;;  %v3259_v33 = vpack.c.bf16 %v798_v25, %v794_v8 }
 0x22e   :  { %2350 = vmatpush1.bf16.msra.mxu1 %v2939_v37  ;;  %v793_v37 = vld [vmem:[%s3846_s1 + $0x40] sm:$0xff]  ;;  %2316 = vmatprep.subr.bf16.mxu0 %v3259_v33 }
 0x22f   :  { %2352 = vmatprep.subr.bf16.mxu1 %v2963_v45  ;;  %v797_v45 = vld [vmem:[%s3846_s1 + $0x60] sm:$0xff] }
 0x232   :  { %2354 = vmatpush1.bf16.msra.mxu1 %v2972_v48  ;;  %v3267_v48 = vpack.c.bf16 %v797_v45, %v793_v37 }
 0x233   :  { %2356 = vmatprep.subr.bf16.mxu1 %v2984_v52  ;;  %v802_v52 = vld [vmem:[%s3846_s1 + $0x88] sm:$0xff] }
 0x234   :  { %2318 = vmatpush1.bf16.msra.mxu0 %v3267_v48 }
 0x236   :  { %2358 = vmatpush1.bf16.msra.mxu1 %v3014_v62  ;;  %v806_v62 = vld [vmem:[%s3846_s1 + $0xa8] sm:$0xff] }
 0x237   :  { %2360 = vmatprep.subr.bf16.mxu1 %v3020_v0  ;;  %v3277_v0 = vpack.c.bf16 %v806_v62, %v802_v52 }
 0x239   :  { %2320 = vmatprep.subr.bf16.mxu0 %v3277_v0 }
 0x23a   :  { %2362 = vmatpush1.bf16.msra.mxu1 %v3053_v16  ;;  %v801_v16 = vld [vmem:[%s3846_s1 + $0x80] sm:$0xff] }
 0x23b   :  { %2364 = vmatprep.subr.bf16.mxu1 %v3056_v18  ;;  %v805_v18 = vld [vmem:[%s3846_s1 + $0xa0] sm:$0xff] }
 0x23e   :  { %2366 = vmatpush1.bf16.msra.mxu1 %v3083_v31  ;;  %v3285_v31 = vpack.c.bf16 %v805_v18, %v801_v16 }
 0x23f   :  { %2368 = vmatprep.subr.bf16.mxu1 %v3086_v32  ;;  %v810_v32 = vld [vmem:[%s3846_s1 + $0xc8] sm:$0xff] }
 0x240   :  { %2322 = vmatpush1.bf16.msra.mxu0 %v3285_v31 }
 0x242   :  { %2370 = vmatpush1.bf16.msra.mxu1 %v3105_v40  ;;  %v814_v40 = vld [vmem:[%s3846_s1 + $0xe8] sm:$0xff] }
 0x243   :  { %2372 = vmatprep.subr.bf16.mxu1 %v3108_v41  ;;  %v3295_v41 = vpack.c.bf16 %v814_v40, %v810_v32 }
 0x245   :  { %2324 = vmatprep.subr.bf16.mxu0 %v3295_v41 }
 0x246   :  { %2374 = vmatpush1.bf16.msra.mxu1 %v3121_v49  ;;  %v809_v49 = vld [vmem:[%s3846_s1 + $0xc0] sm:$0xff] }
 0x247   :  { %v3303_v12 = vpack.c.bf16 %v813_v10, %v809_v49  ;;  %v1040_v49 = vld [vmem:[%s3846_s1 + $0x28] sm:$0xff]  ;;  %v1038_v10 = vld [vmem:[%s3846_s1 + $0x18] sm:$0xff] }
 0x248   :  { %v3420_v28 = vpack.c.bf16 %v1042_v15, %v1038_v10  ;;  %v1093_v15 = vld [vmem:[%s3846_s1 + $0x1d0] sm:$0xff] }
 0x249   :  { %2326 = vmatpush1.bf16.msra.mxu0 %v3303_v12  ;;  %v3571_v21 = vpack.c.bf16 %v1097_v20, %v1093_v15 }
 0x24a   :  { %2328 = vmatprep.subr.bf16.mxu0 %v3313_v19  ;;  %2408 = vmatprep.subr.bf16.mxu1 %v3420_v28 }
 0x24d   :  { %2330 = vmatpush1.bf16.msra.mxu0 %v3321_v23 }
 0x24e   :  { %2332 = vmatprep.subr.bf16.mxu0 %v3331_v34 }
 0x251   :  { %2334 = vmatpush1.bf16.msra.mxu0 %v3339_v38 }
 0x252   :  { %2336 = vmatprep.subr.bf16.mxu0 %v3349_v47 }
 0x255   :  { %2338 = vmatpush1.bf16.msra.mxu0 %v3357_v17 }
 0x256   :  { %2340 = vmatprep.subr.bf16.mxu0 %v3367_v42 }
 0x259   :  { %2342 = vmatpush1.bf16.msra.mxu0 %v3375_v58 }
 0x2fc   :  { %v665_v22 = vpop.f32.mrb[4].mxu0  ;;  %v736_v11 = vpop.f32.mrb[4].mxu1 }
 0x2fd   :  { %v741_v24 = vadd.f32 %v2071_v6, %v665_v22  ;;  %v667_v27 = vpop.f32.mrb[5].mxu0  ;;  %v738_v39 = vpop.f32.mrb[5].mxu1  ;;  %v743_v56 = vadd.f32 %v2073_v54, %v736_v11  ;;  %v1058_v6 = vld [vmem:[%s3846_s1 + $0xb8] sm:$0xff]  ;;  %v1053_v22 = vld [vmem:[%s3846_s1 + $0x90] sm:$0xff] }
 0x2fe   :  { %v742_v50 = vadd.f32 %v2072_v3, %v667_v27  ;;  %v744_v59 = vadd.f32 %v2074_v57, %v738_v39  ;;  %v3463_v3 = vpack.c.bf16 %v1058_v6, %v1054_v55  ;;  %v1057_v11 = vld [vmem:[%s3846_s1 + $0xb0] sm:$0xff]  ;;  %v1062_v27 = vld [vmem:[%s3846_s1 + $0xd8] sm:$0xff] }
 0x2ff   :  { %v2075_v51 = vmul.f32 -1.442695, %v741_v24  ;;  %v2077_v60 = vmul.f32 -1.442695, %v743_v56  ;;  %v3471_v24 = vpack.c.bf16 %v1057_v11, %v1053_v22  ;;  %v1066_v39 = vld [vmem:[%s3846_s1 + $0xf8] sm:$0xff] }
 0x300   :  { %v2076_v53 = vmul.f32 -1.442695, %v742_v50  ;;  %v3483_v50 = vpack.c.bf16 %v1066_v39, %v1062_v27  ;;  %v1070_v56 = vld [vmem:[%s3846_s1 + $0x118] sm:$0xff]  ;;  %v2081_v27 = vld [vmem:[%s3845_s0 + $0x70] sm:$0xff] }
 0x301   :  { %2666 = vpow2.f32 %v2075_v51  ;;  %v1061_v51 = vld [vmem:[%s3846_s1 + $0xd0] sm:$0xff]  ;;  %v1074_v57 = vld [vmem:[%s3846_s1 + $0x138] sm:$0xff] }
 0x302   :  { %2668 = vpow2.f32 %v2076_v53  ;;  %v1065_v53 = vld [vmem:[%s3846_s1 + $0xf0] sm:$0xff] }
 0x303   :  { %2670 = vtanh.f32 %v744_v59  ;;  %v3491_v54 = vpack.c.bf16 %v1065_v53, %v1061_v51  ;;  %v3503_v59 = vpack.c.bf16 %v1074_v57, %v1070_v56  ;;  %v2082_v51 = vld [vmem:[%s3845_s0 + $0x78] sm:$0xff] }
 0x304   :  { %2672 = vpow2.f32 %v2077_v60  ;;  %v1069_v60 = vld [vmem:[%s3846_s1 + $0x110] sm:$0xff] }
 0x30b   :  { %v2667_v61 = vpop.eup %2666 }
 0x30c   :  { %v754_v63 = vadd.f32 1.0, %v2667_v61  ;;  %v2669_v2 = vpop.eup %2668  ;;  %v1073_v61 = vld [vmem:[%s3846_s1 + $0x130] sm:$0xff] }
 0x30d   :  { %v755_v4 = vadd.f32 1.0, %v2669_v2  ;;  %v2671_v5 = vpop.eup %2670  ;;  %v1078_v2 = vld [vmem:[%s3846_s1 + $0x158] sm:$0xff] }
 0x30e   :  { %2674 = vrcp.f32 %v754_v63  ;;  %v2673_v8 = vpop.eup %2672  ;;  %v3511_v63 = vpack.c.bf16 %v1073_v61, %v1069_v60 }
 0x30f   :  { %2676 = vrcp.f32 %v755_v4  ;;  %v756_v52 = vadd.f32 1.0, %v2673_v8  ;;  %v1082_v4 = vld [vmem:[%s3846_s1 + $0x178] sm:$0xff]  ;;  %v1077_v8 = vld [vmem:[%s3846_s1 + $0x150] sm:$0xff] }
 0x311   :  { %2678 = vrcp.f32 %v756_v52  ;;  %v1090_v52 = vld [vmem:[%s3846_s1 + $0x1b8] sm:$0xff] }
 0x318   :  { %v2675_v25 = vpop.eup %2674 }
 0x319   :  { %v765_v37 = vmul.f32 %v2675_v25, %v2671_v5  ;;  %v2677_v45 = vpop.eup %2676  ;;  %v3523_v5 = vpack.c.bf16 %v1082_v4, %v1078_v2  ;;  %v1081_v25 = vld [vmem:[%s3846_s1 + $0x170] sm:$0xff] }
 0x31a   :  { %v764_v62 = vmul.f32 %v2677_v45, %v3229_v1  ;;  %v1036_v1 = vld [vmem:[%s3846_s1 + $0x8] sm:$0xff]  ;;  %v1086_v45 = vld [vmem:[%s3846_s1 + $0x198] sm:$0xff] }
 0x31b   :  { %v2679_v18 = vpop.eup %2678  ;;  %v3409_v13 = vpack.c.bf16 %v1040_v49, %v1036_v1  ;;  %v1094_v1 = vld [vmem:[%s3846_s1 + $0x1d8] sm:$0xff] }
 0x31c   :  { %v3392_v16 = vadd.f32 %v765_v37, %v764_v62  ;;  %v3531_v37 = vpack.c.bf16 %v1081_v25, %v1077_v8  ;;  %v3543_v62 = vpack.c.bf16 %v1090_v52, %v1086_v45  ;;  %v1098_v49 = vld [vmem:[%s3846_s1 + $0x1f8] sm:$0xff] }
 0x31d   :  { %2376 = vmatprep.subr.bf16.mxu0 %v3409_v13  ;;  %v3563_v10 = vpack.c.bf16 %v1098_v49, %v1094_v1 }
 0x31e   :  { %2680 = vtanh.f32 %v3392_v16 }
 0x328   :  { %v2681_v32 = vpop.eup %2680 }
 0x329   :  { %v768_v40 = vmul.f32 %v2681_v32, %v2679_v18  ;;  %v1085_v18 = vld [vmem:[%s3846_s1 + $0x190] sm:$0xff] }
 0x32a   :  { %v1089_v32 = vld [vmem:[%s3846_s1 + $0x1b0] sm:$0xff] }
 0x32b   :  { %2078 = vst [vmem:[%s3849_s4 + $0x10] sm:$0xff] %v768_v40  ;;  %914 = vmatmul.mubr.f32.vlgmr.msra.gmra.mrb[6].mxu0 %v768_v40  ;;  %985 = vmatmul.mubr.f32.vlgmr.msra.gmra.mrb[6].mxu1 %v768_v40  ;;  %v3551_v40 = vpack.c.bf16 %v1089_v32, %v1085_v18 }
 0x32c   :  { %1163 = vmatprep.mubr.f32.mxu0 %v2794_v7  ;;  %1234 = vmatprep.mubr.f32.mxu1 %v2794_v7 }
 0x32d   :  { %2378 = vmatpush1.bf16.msra.mxu0 %v3422_v29  ;;  %2410 = vmatpush1.bf16.msra.mxu1 %v3431_v43 }
 0x32e   :  { %2380 = vmatprep.subr.bf16.mxu0 %v3259_v33  ;;  %2412 = vmatprep.subr.bf16.mxu1 %v3443_v14 }
 0x331   :  { %2382 = vmatpush1.bf16.msra.mxu0 %v3267_v48  ;;  %2414 = vmatpush1.bf16.msra.mxu1 %v3451_v46 }
 0x332   :  { %2384 = vmatprep.subr.bf16.mxu0 %v3277_v0  ;;  %2416 = vmatprep.subr.bf16.mxu1 %v3463_v3 }
 0x335   :  { %2386 = vmatpush1.bf16.msra.mxu0 %v3285_v31  ;;  %2418 = vmatpush1.bf16.msra.mxu1 %v3471_v24 }
 0x336   :  { %2388 = vmatprep.subr.bf16.mxu0 %v3295_v41  ;;  %2420 = vmatprep.subr.bf16.mxu1 %v3483_v50 }
 0x339   :  { %2390 = vmatpush1.bf16.msra.mxu0 %v3303_v12  ;;  %2422 = vmatpush1.bf16.msra.mxu1 %v3491_v54 }
 0x33a   :  { %2392 = vmatprep.subr.bf16.mxu0 %v3313_v19  ;;  %2424 = vmatprep.subr.bf16.mxu1 %v3503_v59 }
 0x33d   :  { %2394 = vmatpush1.bf16.msra.mxu0 %v3321_v23  ;;  %2426 = vmatpush1.bf16.msra.mxu1 %v3511_v63 }
 0x33e   :  { %2396 = vmatprep.subr.bf16.mxu0 %v3331_v34  ;;  %2428 = vmatprep.subr.bf16.mxu1 %v3523_v5 }
 0x341   :  { %2398 = vmatpush1.bf16.msra.mxu0 %v3339_v38  ;;  %2430 = vmatpush1.bf16.msra.mxu1 %v3531_v37 }
 0x342   :  { %2400 = vmatprep.subr.bf16.mxu0 %v3349_v47  ;;  %2432 = vmatprep.subr.bf16.mxu1 %v3543_v62 }
 0x345   :  { %2402 = vmatpush1.bf16.msra.mxu0 %v3357_v17  ;;  %2434 = vmatpush1.bf16.msra.mxu1 %v3551_v40 }
 0x346   :  { %2404 = vmatprep.subr.bf16.mxu0 %v3367_v42  ;;  %2436 = vmatprep.subr.bf16.mxu1 %v3563_v10 }
 0x349   :  { %2406 = vmatpush1.bf16.msra.mxu0 %v3375_v58  ;;  %2438 = vmatpush1.bf16.msra.mxu1 %v3571_v21 }
 0x34a   :  { %2440 = vmatprep.subr.bf16.mxu0 %v3409_v13  ;;  %2472 = vmatprep.subr.bf16.mxu1 %v3420_v28 }
 0x3fe   :  { %v915_v44 = vpop.f32.mrb[6].mxu0  ;;  %v986_v9 = vpop.f32.mrb[6].mxu1 }
 0x3ff   :  { %v991_v26 = vadd.f32 %v2079_v35, %v915_v44  ;;  %v917_v30 = vpop.f32.mrb[7].mxu0  ;;  %v988_v55 = vpop.f32.mrb[7].mxu1  ;;  %v993_v39 = vadd.f32 %v2081_v27, %v986_v9  ;;  %v2088_v35 = vld [vmem:[%s3845_s0 + $0x88] sm:$0xff] }
 0x400   :  { %v992_v6 = vadd.f32 %v2080_v36, %v917_v30  ;;  %v994_v53 = vadd.f32 %v2082_v51, %v988_v55 }
 0x401   :  { %v2083_v22 = vmul.f32 -1.442695, %v991_v26  ;;  %v2085_v56 = vmul.f32 -1.442695, %v993_v39  ;;  %v2090_v39 = vld [vmem:[%s3845_s0 + $0x98] sm:$0xff] }
 0x402   :  { %v2084_v11 = vmul.f32 -1.442695, %v992_v6 }
 0x403   :  { %2682 = vpow2.f32 %v2083_v22 }
 0x404   :  { %2684 = vpow2.f32 %v2084_v11  ;;  %v2089_v11 = vld [vmem:[%s3845_s0 + $0x90] sm:$0xff] }
 0x405   :  { %2686 = vtanh.f32 %v994_v53 }
 0x406   :  { %2688 = vpow2.f32 %v2085_v56 }
 0x40d   :  { %v2683_v57 = vpop.eup %2682 }
 0x40e   :  { %v1004_v60 = vadd.f32 1.0, %v2683_v57  ;;  %v2685_v61 = vpop.eup %2684 }
 0x40f   :  { %v1005_v2 = vadd.f32 1.0, %v2685_v61  ;;  %v2687_v4 = vpop.eup %2686 }
 0x410   :  { %2690 = vrcp.f32 %v1004_v60  ;;  %v2689_v8 = vpop.eup %2688 }
 0x411   :  { %2692 = vrcp.f32 %v1005_v2  ;;  %v1006_v18 = vadd.f32 1.0, %v2689_v8 }
 0x413   :  { %2694 = vrcp.f32 %v1006_v18 }
 0x41a   :  { %v2691_v25 = vpop.eup %2690 }
 0x41b   :  { %v1015_v45 = vmul.f32 %v2691_v25, %v2687_v4  ;;  %v2693_v52 = vpop.eup %2692 }
 0x41c   :  { %v1014_v32 = vmul.f32 %v2693_v52, %v3392_v16  ;;  %v2087_v16 = vld [vmem:[%s3845_s0 + $0x80] sm:$0xff] }
 0x41d   :  { %v2695_v49 = vpop.eup %2694 }
 0x41e   :  { %v3591_v1 = vadd.f32 %v1015_v45, %v1014_v32 }
 0x420   :  { %2696 = vtanh.f32 %v3591_v1 }
 0x42a   :  { %v2697_v15 = vpop.eup %2696 }
 0x42b   :  { %v1018_v20 = vmul.f32 %v2697_v15, %v2695_v49 }
 0x42d   :  { %2086 = vst [vmem:[%s3849_s4 + $0x18] sm:$0xff] %v1018_v20  ;;  %1164 = vmatmul.mubr.f32.vlgmr.msra.gmra.mrb[8].mxu0 %v1018_v20  ;;  %1235 = vmatmul.mubr.f32.vlgmr.msra.gmra.mrb[8].mxu1 %v1018_v20 }
 0x42e   :  { %2442 = vmatpush1.bf16.msra.mxu0 %v3422_v29  ;;  %2474 = vmatpush1.bf16.msra.mxu1 %v3431_v43 }
 0x42f   :  { %2444 = vmatprep.subr.bf16.mxu0 %v3259_v33  ;;  %2476 = vmatprep.subr.bf16.mxu1 %v3443_v14 }
 0x430   :  { %1413 = vmatprep.mubr.f32.mxu0 %v2794_v7  ;;  %1484 = vmatprep.mubr.f32.mxu1 %v2794_v7 }
 0x432   :  { %2446 = vmatpush1.bf16.msra.mxu0 %v3267_v48  ;;  %2478 = vmatpush1.bf16.msra.mxu1 %v3451_v46 }
 0x433   :  { %2448 = vmatprep.subr.bf16.mxu0 %v3277_v0  ;;  %2480 = vmatprep.subr.bf16.mxu1 %v3463_v3 }
 0x436   :  { %2450 = vmatpush1.bf16.msra.mxu0 %v3285_v31  ;;  %2482 = vmatpush1.bf16.msra.mxu1 %v3471_v24 }
 0x437   :  { %2452 = vmatprep.subr.bf16.mxu0 %v3295_v41  ;;  %2484 = vmatprep.subr.bf16.mxu1 %v3483_v50 }
 0x43a   :  { %2454 = vmatpush1.bf16.msra.mxu0 %v3303_v12  ;;  %2486 = vmatpush1.bf16.msra.mxu1 %v3491_v54 }
 0x43b   :  { %2456 = vmatprep.subr.bf16.mxu0 %v3313_v19  ;;  %2488 = vmatprep.subr.bf16.mxu1 %v3503_v59 }
 0x43e   :  { %2458 = vmatpush1.bf16.msra.mxu0 %v3321_v23  ;;  %2490 = vmatpush1.bf16.msra.mxu1 %v3511_v63 }
 0x43f   :  { %2460 = vmatprep.subr.bf16.mxu0 %v3331_v34  ;;  %2492 = vmatprep.subr.bf16.mxu1 %v3523_v5 }
 0x442   :  { %2462 = vmatpush1.bf16.msra.mxu0 %v3339_v38  ;;  %2494 = vmatpush1.bf16.msra.mxu1 %v3531_v37 }
 0x443   :  { %2464 = vmatprep.subr.bf16.mxu0 %v3349_v47  ;;  %2496 = vmatprep.subr.bf16.mxu1 %v3543_v62 }
 0x446   :  { %2466 = vmatpush1.bf16.msra.mxu0 %v3357_v17  ;;  %2498 = vmatpush1.bf16.msra.mxu1 %v3551_v40 }
 0x447   :  { %2468 = vmatprep.subr.bf16.mxu0 %v3367_v42  ;;  %2500 = vmatprep.subr.bf16.mxu1 %v3563_v10 }
 0x44a   :  { %2470 = vmatpush1.bf16.msra.mxu0 %v3375_v58  ;;  %2502 = vmatpush1.bf16.msra.mxu1 %v3571_v21 }
 0x44b   :  { %2504 = vmatprep.subr.bf16.mxu0 %v3409_v13  ;;  %2536 = vmatprep.subr.bf16.mxu1 %v3420_v28 }
 0x500   :  { %v1165_v36 = vpop.f32.mrb[8].mxu0  ;;  %v1236_v44 = vpop.f32.mrb[8].mxu1 }
 0x501   :  { %v1241_v9 = vadd.f32 %v2087_v16, %v1165_v36  ;;  %v1167_v26 = vpop.f32.mrb[9].mxu0  ;;  %v1238_v30 = vpop.f32.mrb[9].mxu1  ;;  %v1243_v27 = vadd.f32 %v2089_v11, %v1236_v44 }
 0x502   :  { %v1242_v55 = vadd.f32 %v2088_v35, %v1167_v26  ;;  %v1244_v51 = vadd.f32 %v2090_v39, %v1238_v30 }
 0x503   :  { %v2091_v6 = vmul.f32 -1.442695, %v1241_v9  ;;  %v2093_v53 = vmul.f32 -1.442695, %v1243_v27 }
 0x504   :  { %v2092_v22 = vmul.f32 -1.442695, %v1242_v55 }
 0x505   :  { %2698 = vpow2.f32 %v2091_v6 }
 0x506   :  { %2700 = vpow2.f32 %v2092_v22 }
 0x507   :  { %2702 = vtanh.f32 %v1244_v51 }
 0x508   :  { %2704 = vpow2.f32 %v2093_v53  ;;  %v1818_v53 = vld [vmem:[%s3846_s1 + $0x108] sm:$0xff] }
 0x50f   :  { %v2699_v56 = vpop.eup %2698 }
 0x510   :  { %v1254_v57 = vadd.f32 1.0, %v2699_v56  ;;  %v2701_v60 = vpop.eup %2700  ;;  %v1822_v56 = vld [vmem:[%s3846_s1 + $0x128] sm:$0xff] }
 0x511   :  { %v1255_v61 = vadd.f32 1.0, %v2701_v60  ;;  %v2703_v2 = vpop.eup %2702  ;;  %v1817_v60 = vld [vmem:[%s3846_s1 + $0x100] sm:$0xff] }
 0x512   :  { %2706 = vrcp.f32 %v1254_v57  ;;  %v2705_v4 = vpop.eup %2704  ;;  %v2583_v57 = vpack.c.bf16 %v1822_v56, %v1818_v53 }
 0x513   :  { %2708 = vrcp.f32 %v1255_v61  ;;  %v1256_v52 = vadd.f32 1.0, %v2705_v4  ;;  %v1821_v61 = vld [vmem:[%s3846_s1 + $0x120] sm:$0xff]  ;;  %v1826_v4 = vld [vmem:[%s3846_s1 + $0x148] sm:$0xff] }
 0x515   :  { %2710 = vrcp.f32 %v1256_v52  ;;  %v1829_v52 = vld [vmem:[%s3846_s1 + $0x160] sm:$0xff] }
 0x51c   :  { %v2707_v8 = vpop.eup %2706 }
 0x51d   :  { %v1265_v25 = vmul.f32 %v2707_v8, %v2703_v2  ;;  %v2709_v45 = vpop.eup %2708  ;;  %v2585_v2 = vpack.c.bf16 %v1821_v61, %v1817_v60  ;;  %v1830_v8 = vld [vmem:[%s3846_s1 + $0x168] sm:$0xff] }
 0x51e   :  { %v1264_v18 = vmul.f32 %v2709_v45, %v3591_v1  ;;  %v1825_v45 = vld [vmem:[%s3846_s1 + $0x140] sm:$0xff] }
 0x51f   :  { %v2711_v49 = vpop.eup %2710 }
 0x520   :  { %v3644_v32 = vadd.f32 %v1265_v25, %v1264_v18  ;;  %v2587_v25 = vpack.c.bf16 %v1830_v8, %v1826_v4  ;;  %v2589_v18 = vpack.c.bf16 %v1829_v52, %v1825_v45 }
 0x522   :  { %2712 = vtanh.f32 %v3644_v32 }
 0x52c   :  { %v2713_v15 = vpop.eup %2712 }
 0x52d   :  { %v1268_v20 = vmul.f32 %v2713_v15, %v2711_v49  ;;  %v1838_v49 = vld [vmem:[%s3846_s1 + $0x1a8] sm:$0xff] }
 0x52f   :  { %2094 = vst [vmem:[%s3849_s4 + $0x20] sm:$0xff] %v1268_v20  ;;  %1414 = vmatmul.mubr.f32.vlgmr.msra.gmra.mrb[10].mxu0 %v1268_v20  ;;  %1485 = vmatmul.mubr.f32.vlgmr.msra.gmra.mrb[10].mxu1 %v1268_v20  ;;  %v1833_v20 = vld [vmem:[%s3846_s1 + $0x180] sm:$0xff] }
 0x530   :  { %2506 = vmatpush1.bf16.msra.mxu0 %v3422_v29  ;;  %2538 = vmatpush1.bf16.msra.mxu1 %v3431_v43 }
 0x531   :  { %2508 = vmatprep.subr.bf16.mxu0 %v3259_v33  ;;  %2540 = vmatprep.subr.bf16.mxu1 %v3443_v14  ;;  %v2095_v33 = vld [vmem:[%s3845_s0 + $0xa0] sm:$0xff] }
 0x532   :  { %1663 = vmatprep.mubr.f32.mxu0 %v2794_v7  ;;  %1734 = vmatprep.mubr.f32.mxu1 %v2794_v7 }
 0x534   :  { %2510 = vmatpush1.bf16.msra.mxu0 %v3267_v48  ;;  %2542 = vmatpush1.bf16.msra.mxu1 %v3451_v46  ;;  %v2096_v48 = vld [vmem:[%s3845_s0 + $0xa8] sm:$0xff] }
 0x535   :  { %2512 = vmatprep.subr.bf16.mxu0 %v3277_v0  ;;  %2544 = vmatprep.subr.bf16.mxu1 %v3463_v3 }
 0x538   :  { %2514 = vmatpush1.bf16.msra.mxu0 %v3285_v31  ;;  %2546 = vmatpush1.bf16.msra.mxu1 %v3471_v24 }
 0x539   :  { %2516 = vmatprep.subr.bf16.mxu0 %v3295_v41  ;;  %2548 = vmatprep.subr.bf16.mxu1 %v3483_v50 }
 0x53c   :  { %2518 = vmatpush1.bf16.msra.mxu0 %v3303_v12  ;;  %2550 = vmatpush1.bf16.msra.mxu1 %v3491_v54 }
 0x53d   :  { %2520 = vmatprep.subr.bf16.mxu0 %v3313_v19  ;;  %2552 = vmatprep.subr.bf16.mxu1 %v3503_v59 }
 0x540   :  { %2522 = vmatpush1.bf16.msra.mxu0 %v3321_v23  ;;  %2554 = vmatpush1.bf16.msra.mxu1 %v3511_v63 }
 0x541   :  { %2524 = vmatprep.subr.bf16.mxu0 %v3331_v34  ;;  %2556 = vmatprep.subr.bf16.mxu1 %v3523_v5 }
 0x544   :  { %2526 = vmatpush1.bf16.msra.mxu0 %v3339_v38  ;;  %2558 = vmatpush1.bf16.msra.mxu1 %v3531_v37 }
 0x545   :  { %2528 = vmatprep.subr.bf16.mxu0 %v3349_v47  ;;  %2560 = vmatprep.subr.bf16.mxu1 %v3543_v62  ;;  %v2097_v47 = vld [vmem:[%s3845_s0 + $0xb0] sm:$0xff] }
 0x548   :  { %2530 = vmatpush1.bf16.msra.mxu0 %v3357_v17  ;;  %2562 = vmatpush1.bf16.msra.mxu1 %v3551_v40 }
 0x549   :  { %2532 = vmatprep.subr.bf16.mxu0 %v3367_v42  ;;  %2564 = vmatprep.subr.bf16.mxu1 %v3563_v10  ;;  %v2098_v42 = vld [vmem:[%s3845_s0 + $0xb8] sm:$0xff] }
 0x54c   :  { %2534 = vmatpush1.bf16.msra.mxu0 %v3375_v58  ;;  %2566 = vmatpush1.bf16.msra.mxu1 %v3571_v21 }
 0x54d   :  { %2568 = vmatprep.subr.bf16.mxu0 %v3409_v13  ;;  %2600 = vmatprep.subr.bf16.mxu1 %v3420_v28 }
 0x602   :  { %v1415_v0 = vpop.f32.mrb[10].mxu0  ;;  %v1486_v31 = vpop.f32.mrb[10].mxu1 }
 0x603   :  { %v1491_v41 = vadd.f32 %v2095_v33, %v1415_v0  ;;  %v1417_v12 = vpop.f32.mrb[11].mxu0  ;;  %v1488_v19 = vpop.f32.mrb[11].mxu1  ;;  %v1493_v17 = vadd.f32 %v2097_v47, %v1486_v31  ;;  %v1837_v33 = vld [vmem:[%s3846_s1 + $0x1a0] sm:$0xff]  ;;  %v1842_v0 = vld [vmem:[%s3846_s1 + $0x1c8] sm:$0xff] }
 0x604   :  { %v1492_v23 = vadd.f32 %v2096_v48, %v1417_v12  ;;  %v1494_v58 = vadd.f32 %v2098_v42, %v1488_v19  ;;  %v2593_v48 = vpack.c.bf16 %v1837_v33, %v1833_v20  ;;  %v1846_v31 = vld [vmem:[%s3846_s1 + $0x1e8] sm:$0xff]  ;;  %v1841_v12 = vld [vmem:[%s3846_s1 + $0x1c0] sm:$0xff] }
 0x605   :  { %v2099_v34 = vmul.f32 -1.442695, %v1491_v41  ;;  %v2101_v13 = vmul.f32 -1.442695, %v1493_v17  ;;  %v2595_v41 = vpack.c.bf16 %v1846_v31, %v1842_v0  ;;  %v1845_v19 = vld [vmem:[%s3846_s1 + $0x1e0] sm:$0xff] }
 0x606   :  { %v2100_v38 = vmul.f32 -1.442695, %v1492_v23  ;;  %v2597_v23 = vpack.c.bf16 %v1845_v19, %v1841_v12 }
 0x607   :  { %2714 = vpow2.f32 %v2099_v34  ;;  %v2103_v34 = vld [vmem:[%s3845_s0 + $0xc0] sm:$0xff] }
 0x608   :  { %2716 = vpow2.f32 %v2100_v38  ;;  %v2104_v38 = vld [vmem:[%s3845_s0 + $0xc8] sm:$0xff] }
 0x609   :  { %2718 = vtanh.f32 %v1494_v58 }
 0x60a   :  { %2720 = vpow2.f32 %v2101_v13 }
 0x611   :  { %v2715_v28 = vpop.eup %2714 }
 0x612   :  { %v1504_v1 = vadd.f32 1.0, %v2715_v28  ;;  %v2717_v16 = vpop.eup %2716 }
 0x613   :  { %v1505_v35 = vadd.f32 1.0, %v2717_v16  ;;  %v2719_v36 = vpop.eup %2718 }
 0x614   :  { %2722 = vrcp.f32 %v1504_v1  ;;  %v2721_v44 = vpop.eup %2720 }
 0x615   :  { %2724 = vrcp.f32 %v1505_v35  ;;  %v1506_v55 = vadd.f32 1.0, %v2721_v44  ;;  %v2105_v35 = vld [vmem:[%s3845_s0 + $0xd0] sm:$0xff]  ;;  %v2106_v44 = vld [vmem:[%s3845_s0 + $0xd8] sm:$0xff] }
 0x617   :  { %2726 = vrcp.f32 %v1506_v55 }
 0x61e   :  { %v2723_v9 = vpop.eup %2722 }
 0x61f   :  { %v1515_v26 = vmul.f32 %v2723_v9, %v2719_v36  ;;  %v2725_v30 = vpop.eup %2724 }
 0x620   :  { %v1514_v6 = vmul.f32 %v2725_v30, %v3644_v32  ;;  %v1834_v32 = vld [vmem:[%s3846_s1 + $0x188] sm:$0xff] }
 0x621   :  { %v2727_v11 = vpop.eup %2726  ;;  %v2591_v15 = vpack.c.bf16 %v1838_v49, %v1834_v32 }
 0x622   :  { %v3697_v22 = vadd.f32 %v1515_v26, %v1514_v6 }
 0x624   :  { %2728 = vtanh.f32 %v3697_v22 }
 0x62e   :  { %v2729_v27 = vpop.eup %2728 }
 0x62f   :  { %v1518_v39 = vmul.f32 %v2729_v27, %v2727_v11 }
 0x631   :  { %2102 = vst [vmem:[%s3849_s4 + $0x28] sm:$0xff] %v1518_v39  ;;  %1664 = vmatmul.mubr.f32.vlgmr.msra.gmra.mrb[12].mxu0 %v1518_v39  ;;  %1735 = vmatmul.mubr.f32.vlgmr.msra.gmra.mrb[12].mxu1 %v1518_v39 }
 0x632   :  { %2570 = vmatpush1.bf16.msra.mxu0 %v3422_v29  ;;  %2602 = vmatpush1.bf16.msra.mxu1 %v3431_v43  ;;  %v1798_v29 = vld [vmem:[%s3846_s1 + $0x68] sm:$0xff] }
 0x633   :  { %2604 = vmatprep.subr.bf16.mxu1 %v3443_v14  ;;  %1913 = vmatprep.mubr.f32.mxu0 %v2794_v7  ;;  %v1793_v14 = vld [vmem:[%s3846_s1 + $0x40] sm:$0xff] }
 0x634   :  { %1984 = vmatprep.mubr.f32.mxu1 %v2794_v7  ;;  %v1794_v7 = vld [vmem:[%s3846_s1 + $0x48] sm:$0xff] }
 0x635   :  { %v2571_v43 = vpack.c.bf16 %v1798_v29, %v1794_v7 }
 0x636   :  { %2606 = vmatpush1.bf16.msra.mxu1 %v3451_v46  ;;  %v1797_v46 = vld [vmem:[%s3846_s1 + $0x60] sm:$0xff] }
 0x637   :  { %2608 = vmatprep.subr.bf16.mxu1 %v3463_v3  ;;  %v2573_v3 = vpack.c.bf16 %v1797_v46, %v1793_v14  ;;  %2572 = vmatprep.subr.bf16.mxu0 %v2571_v43 }
 0x639   :  { %2574 = vmatpush1.bf16.msra.mxu0 %v2573_v3 }
 0x63a   :  { %2610 = vmatpush1.bf16.msra.mxu1 %v3471_v24  ;;  %v1802_v24 = vld [vmem:[%s3846_s1 + $0x88] sm:$0xff] }
 0x63b   :  { %2612 = vmatprep.subr.bf16.mxu1 %v3483_v50  ;;  %v1806_v50 = vld [vmem:[%s3846_s1 + $0xa8] sm:$0xff] }
 0x63e   :  { %2614 = vmatpush1.bf16.msra.mxu1 %v3491_v54  ;;  %v2575_v54 = vpack.c.bf16 %v1806_v50, %v1802_v24 }
 0x63f   :  { %2616 = vmatprep.subr.bf16.mxu1 %v3503_v59  ;;  %v1801_v59 = vld [vmem:[%s3846_s1 + $0x80] sm:$0xff] }
 0x640   :  { %2576 = vmatprep.subr.bf16.mxu0 %v2575_v54 }
 0x642   :  { %2618 = vmatpush1.bf16.msra.mxu1 %v3511_v63  ;;  %v1805_v63 = vld [vmem:[%s3846_s1 + $0xa0] sm:$0xff] }
 0x643   :  { %2620 = vmatprep.subr.bf16.mxu1 %v3523_v5  ;;  %v2577_v5 = vpack.c.bf16 %v1805_v63, %v1801_v59 }
 0x645   :  { %2578 = vmatpush1.bf16.msra.mxu0 %v2577_v5 }
 0x646   :  { %2622 = vmatpush1.bf16.msra.mxu1 %v3531_v37  ;;  %v1810_v37 = vld [vmem:[%s3846_s1 + $0xc8] sm:$0xff] }
 0x647   :  { %2624 = vmatprep.subr.bf16.mxu1 %v3543_v62  ;;  %v1814_v62 = vld [vmem:[%s3846_s1 + $0xe8] sm:$0xff] }
 0x64a   :  { %2626 = vmatpush1.bf16.msra.mxu1 %v3551_v40  ;;  %v2579_v40 = vpack.c.bf16 %v1814_v62, %v1810_v37 }
 0x64b   :  { %2628 = vmatprep.subr.bf16.mxu1 %v3563_v10  ;;  %v1809_v10 = vld [vmem:[%s3846_s1 + $0xc0] sm:$0xff] }
 0x64c   :  { %2580 = vmatprep.subr.bf16.mxu0 %v2579_v40 }
 0x64e   :  { %2630 = vmatpush1.bf16.msra.mxu1 %v3571_v21  ;;  %v1813_v21 = vld [vmem:[%s3846_s1 + $0xe0] sm:$0xff] }
 0x64f   :  { %v2581_v51 = vpack.c.bf16 %v1813_v21, %v1809_v10 }
 0x651   :  { %2582 = vmatpush1.bf16.msra.mxu0 %v2581_v51 }
 0x652   :  { %2584 = vmatprep.subr.bf16.mxu0 %v2583_v57 }
 0x655   :  { %2586 = vmatpush1.bf16.msra.mxu0 %v2585_v2 }
 0x656   :  { %2588 = vmatprep.subr.bf16.mxu0 %v2587_v25 }
 0x659   :  { %2590 = vmatpush1.bf16.msra.mxu0 %v2589_v18 }
 0x65a   :  { %2592 = vmatprep.subr.bf16.mxu0 %v2591_v15 }
 0x65d   :  { %2594 = vmatpush1.bf16.msra.mxu0 %v2593_v48 }
 0x65e   :  { %2596 = vmatprep.subr.bf16.mxu0 %v2595_v41 }
 0x661   :  { %2598 = vmatpush1.bf16.msra.mxu0 %v2597_v23 }
 0x704   :  { %v1665_v47 = vpop.f32.mrb[12].mxu0  ;;  %v1736_v17 = vpop.f32.mrb[12].mxu1 }
 0x705   :  { %v1741_v42 = vadd.f32 %v2103_v34, %v1665_v47  ;;  %v1667_v58 = vpop.f32.mrb[13].mxu0  ;;  %v1738_v13 = vpop.f32.mrb[13].mxu1  ;;  %v1743_v36 = vadd.f32 %v2105_v35, %v1736_v17 }
 0x706   :  { %v1742_v28 = vadd.f32 %v2104_v38, %v1667_v58  ;;  %v1744_v9 = vadd.f32 %v2106_v44, %v1738_v13 }
 0x707   :  { %v2107_v1 = vmul.f32 -1.442695, %v1741_v42  ;;  %v2109_v26 = vmul.f32 -1.442695, %v1743_v36 }
 0x708   :  { %v2108_v16 = vmul.f32 -1.442695, %v1742_v28 }
 0x709   :  { %2730 = vpow2.f32 %v2107_v1 }
 0x70a   :  { %2732 = vpow2.f32 %v2108_v16 }
 0x70b   :  { %2734 = vtanh.f32 %v1744_v9 }
 0x70c   :  { %2736 = vpow2.f32 %v2109_v26 }
 0x713   :  { %v2731_v30 = vpop.eup %2730 }
 0x714   :  { %v1754_v55 = vadd.f32 1.0, %v2731_v30  ;;  %v2733_v6 = vpop.eup %2732 }
 0x715   :  { %v1755_v11 = vadd.f32 1.0, %v2733_v6  ;;  %v2735_v27 = vpop.eup %2734 }
 0x716   :  { %2738 = vrcp.f32 %v1754_v55  ;;  %v2737_v39 = vpop.eup %2736 }
 0x717   :  { %2740 = vrcp.f32 %v1755_v11  ;;  %v1756_v14 = vadd.f32 1.0, %v2737_v39 }
 0x719   :  { %2742 = vrcp.f32 %v1756_v14 }
 0x720   :  { %v2739_v7 = vpop.eup %2738 }
 0x721   :  { %v1765_v29 = vmul.f32 %v2739_v7, %v2735_v27  ;;  %v2741_v43 = vpop.eup %2740 }
 0x722   :  { %v1764_v46 = vmul.f32 %v2741_v43, %v3697_v22 }
 0x723   :  { %v2743_v24 = vpop.eup %2742 }
 0x724   :  { %v1766_v3 = vadd.f32 %v1765_v29, %v1764_v46 }
 0x726   :  { %2744 = vtanh.f32 %v1766_v3  ;;  %1777 = vst [vmem:[#allocation4] sm:$0xff] %v1766_v3 }
 0x730   :  { %v2745_v50 = vpop.eup %2744 }
 0x731   :  { %v1768_v54 = vmul.f32 %v2745_v50, %v2743_v24 }
 0x733   :  { %2110 = vst [vmem:[%s3849_s4 + $0x30] sm:$0xff] %v1768_v54  ;;  %1776 = vst [vmem:[#allocation2] sm:$0xff] %v1768_v54  ;;  %1914 = vmatmul.mubr.f32.vlgmr.msra.gmra.mrb[14].mxu0 %v1768_v54  ;;  %1985 = vmatmul.mubr.f32.vlgmr.msra.gmra.mrb[14].mxu1 %v1768_v54 }
 0x734   :  { %2757 = shalt.err (!%p2754_p4)
}
 0x735   :  { %s2758_s4 = scalar_lea.hbm %s3850_s5, 128 }
 0x736   :  { %p2759_p5 = scmp.ne.s32.totalorder %s3850_s5, %s2758_s4  ;;  %p2762_p6 = scmp.lt.u32.totalorder %s2758_s4, %s3850_s5 }
 0x738   :  { %p2764_p7 = pnand %p2762_p6, %p2759_p5 }
 0x73a   :  { %2767 = shalt.err (!%p2764_p7)
}
 0x73b   :  { %2039 = dma.vmem_to_hbm [thread:$0]  %s2037_s26, 128, %s3850_s5, [#allocation3]  }
 0x73c   :  { %s2768_s13 = scalar_lea.vmem %s2047_s28, 128  ;;  %p2773_p9 = scmp.lt.s32.totalorder %s2047_s28, %s2047_s28 }
 0x73d   :  { %p2769_p8 = scmp.ne.s32.totalorder %s2047_s28, %s2768_s13  ;;  %p2774_p10 = scmp.lt.s32.totalorder %s2768_s13, %s2768_s13 }
 0x73f   :  { %p2775_p11 = por %p2774_p10, %p2773_p9 }
 0x741   :  { %p2776_p12 = pnand %p2775_p11, %p2769_p8 }
 0x743   :  { %2779 = shalt.err (!%p2776_p12)
}
 0x744   :  { %s2780_s16 = scalar_lea.hbm %s3851_s6, 128 }
 0x745   :  { %p2781_p13 = scmp.ne.s32.totalorder %s3851_s6, %s2780_s16  ;;  %p2784_p0 = scmp.lt.u32.totalorder %s2780_s16, %s3851_s6 }
 0x747   :  { %p2786_p1 = pnand %p2784_p0, %p2781_p13 }
 0x749   :  { %2789 = shalt.err (!%p2786_p1)
}
 0x74a   :  { %2049 = dma.vmem_to_hbm [thread:$0]  %s2047_s28, 128, %s3851_s6, [#allocation5]  }
 0x806   :  { %v1915_v22 = vpop.f32.mrb[14].mxu0  ;;  %v1986_v59 = vpop.f32.mrb[14].mxu1 }
 0x807   :  { %v1917_v63 = vpop.f32.mrb[15].mxu0  ;;  %v1988_v5 = vpop.f32.mrb[15].mxu1 }
 0x808   :  { %2790 = dma.done.wait [#allocation3], 128  }
 0x809   :  { %2791 = vsyncadd [#allocation3], 4294967168 }
 0x80a   :  { %2792 = dma.done.wait [#allocation5], 128  }
 0x80b   :  { %2793 = vsyncadd [#allocation5], 4294967168 }
 0x80c   :  { %2058 = vsyncpa [#allocation3], 1 }
 0x80d   :  { %2059 = vsyncpa [#allocation5], 1 }

</bundles_post_ra>
